<compile_context>
chip_gen: v7x
topology: tpu7x:2x2x1
jax: 0.10.0
libtpu: 0.0.40
codegen_flags: <defaults>
</compile_context>

<pallas_src>
import functools

import numpy as np

import jax
import jax.numpy as jnp
from jax import lax
from jax.experimental import pallas as pl
from jax.experimental.pallas import tpu as pltpu


# ----------------------------------------------------------------------------
# Fused kernel: conv1 -> InstanceNorm -> ReLU -> conv2 -> InstanceNorm ->
#               + residual -> ReLU, on a sublane-packed, lane-dense (R, N) slab.
# ----------------------------------------------------------------------------
def _basic_block_kernel(x_ref, w1_ref, w2_ref, mask_ref, o_ref, col_ref, *,
                        D, H, W, eps):
    """One grid step = BB batch elements packed on sublanes.

    x_ref:    (R, N)      packed input, row r = b_local*C + c, lane-dense voxels
    w1_ref:   (R, 27*R)   block-diagonal (over batch slot) conv1 weight
    w2_ref:   (R, 27*R)   block-diagonal conv2 weight
    mask_ref: (27, R, N)  pre-broadcast {0,1} in-bounds masks per tap
    o_ref:    (R, N)
    col_ref:  (27*R, N)   f32 VMEM scratch: im2col patch matrix
    """
    N = D * H * W
    HW = H * W
    R = x_ref.shape[0]

    taps = [(oz, oy, ox)
            for oz in (-1, 0, 1) for oy in (-1, 0, 1) for ox in (-1, 0, 1)]

    def conv3(src, w_ref):
        # Stack 27 masked, lane-rolled copies of src into the im2col scratch,
        # then contract the whole (tap, batch-local channel) axis in a single
        # MXU matmul with the block-diagonal weight.
        for k, (oz, oy, ox) in enumerate(taps):
            off = oz * HW + oy * W + ox                      # neighbor offset
            if off == 0:                                     # center tap
                col_ref[k * R:(k + 1) * R, :] = src
            else:
                rolled = pltpu.roll(src, shift=(-off) % N, axis=1)   # XLU roll
                col_ref[k * R:(k + 1) * R, :] = rolled * mask_ref[k]
        return jnp.dot(w_ref[...], col_ref[...],
                       preferred_element_type=jnp.float32,
                       precision=lax.Precision.HIGHEST)

    def inst_norm(v):
        # Per (batch, channel) row statistics over all voxels: lane reductions.
        mean = jnp.mean(v, axis=1, keepdims=True)
        c = v - mean
        var = jnp.mean(c * c, axis=1, keepdims=True)
        return c * lax.rsqrt(var + eps)

    x = x_ref[...].astype(jnp.float32)
    h = jnp.maximum(inst_norm(conv3(x, w1_ref)), 0.0)       # conv1 -> IN -> relu
    h = inst_norm(conv3(h, w2_ref)) + x                     # conv2 -> IN -> +res
    o_ref[...] = jnp.maximum(h, 0.0).astype(o_ref.dtype)    # relu, lane-dense


# ----------------------------------------------------------------------------
# Host-side packing helpers
# ----------------------------------------------------------------------------
def _make_tap_masks(D, H, W):
    """(27, D*H*W) {0,1}: which voxels have an in-bounds neighbor for each tap."""
    z, y, x = np.meshgrid(np.arange(D), np.arange(H), np.arange(W), indexing="ij")
    z, y, x = z.ravel(), y.ravel(), x.ravel()
    rows = []
    for oz in (-1, 0, 1):
        for oy in (-1, 0, 1):
            for ox in (-1, 0, 1):
                valid = ((z + oz >= 0) & (z + oz < D) &
                         (y + oy >= 0) & (y + oy < H) &
                         (x + ox >= 0) & (x + ox < W))
                rows.append(valid.astype(np.float32))
    return np.stack(rows, axis=0)


def _block_diag_weight(w, bb):
    """[27, Cin, Cout] Minkowski weight -> (bb*Cout, 27*bb*Cin) block-diagonal
    matrix matching the im2col row order col = k*(bb*Cin) + b*Cin + c."""
    K, cin, cout = w.shape
    wt = jnp.transpose(w, (2, 0, 1))                         # (Cout, 27, Cin)
    eye = jnp.eye(bb, dtype=w.dtype)
    blk = jnp.einsum("pkc,ab->apkbc", wt, eye)               # (bb,Cout,27,bb,Cin)
    return blk.reshape(bb * cout, K * bb * cin)


def basic_block_forward(x_ncdhw, w1, w2, *, eps=1e-5):
    """x: [B, C, D, H, W]; w1, w2: [27, Cin, Cout] (Minkowski layout). Returns NCDHW."""
    B, C, D, H, W = x_ncdhw.shape
    P = w1.shape[-1]
    assert w1.shape == (27, C, P) and w2.shape == (27, P, P)
    assert C == P, "downsample=None requires inplanes == planes"
    N = D * H * W

    # Batch elements per grid step: fill the 8 sublanes of an f32 vreg.
    bb = max(1, 8 // C)
    while B % bb:
        bb -= 1
    grid = B // bb
    R = bb * C

    x_flat = x_ncdhw.reshape(B * C, N)                       # free reshape
    w1_blk = _block_diag_weight(w1, bb)                      # (R, 27*R)
    w2_blk = _block_diag_weight(w2, bb)                      # (R, 27*R)
    masks = jnp.asarray(_make_tap_masks(D, H, W))            # (27, N)
    masks_b = jnp.broadcast_to(masks[:, None, :], (27, R, N))  # pre-broadcast

    out = pl.pallas_call(
        functools.partial(_basic_block_kernel, D=D, H=H, W=W, eps=eps),
        out_shape=jax.ShapeDtypeStruct((B * P, N), x_ncdhw.dtype),
        grid=(grid,),
        in_specs=[
            pl.BlockSpec((R, N), lambda i: (i, 0)),
            pl.BlockSpec((R, 27 * R), lambda i: (0, 0)),
            pl.BlockSpec((R, 27 * R), lambda i: (0, 0)),
            pl.BlockSpec((27, R, N), lambda i: (0, 0, 0)),
        ],
        out_specs=pl.BlockSpec((R, N), lambda i: (i, 0)),
        scratch_shapes=[pltpu.VMEM((27 * R, N), jnp.float32)],
        compiler_params=pltpu.CompilerParams(
            dimension_semantics=("parallel",)),               # 2 steps -> 2 TCs on v7x
    )(x_flat, w1_blk, w2_blk, masks_b)
    return out.reshape(B, P, D, H, W)


# ----------------------------------------------------------------------------
# Pure-JAX reference (dense-grid analog of the PyTorch module) for validation.
# ----------------------------------------------------------------------------
def _reference_forward(x, w1, w2, eps=1e-5):
    def conv(v, w):
        cin, cout = w.shape[1], w.shape[2]
        kern = w.reshape(3, 3, 3, cin, cout)                 # taps ordered (dz,dy,dx)
        return lax.conv_general_dilated(
            v, kern, window_strides=(1, 1, 1),
            padding=((1, 1), (1, 1), (1, 1)),
            dimension_numbers=("NCDHW", "DHWIO", "NCDHW"),
            precision=lax.Precision.HIGHEST)

    def inorm(v):
        m = jnp.mean(v, axis=(2, 3, 4), keepdims=True)
        c = v - m
        var = jnp.mean(c * c, axis=(2, 3, 4), keepdims=True)
        return c * lax.rsqrt(var + eps)

    h = jax.nn.relu(inorm(conv(x, w1)))
    h = inorm(conv(h, w2)) + x
    return jax.nn.relu(h)


if __name__ == "__main__":
    key = jax.random.PRNGKey(0)
    k_x, k_w1, k_w2 = jax.random.split(key, 3)

    # B=4 so that with bb=2 batch elements packed per step (full 8 sublanes)
    # the grid still has 2 "parallel" iterations for the two v7x TensorCores.
    B, C, D, H, W = 4, 4, 8, 8, 8        # inplanes == planes (downsample=None)
    P = C
    x = jax.random.normal(k_x, (B, C, D, H, W), jnp.float32)
    # Minkowski conv weight layout: [kernel_volume=27, in_channels, out_channels]
    w1 = 0.1 * jax.random.normal(k_w1, (27, C, P), jnp.float32)
    w2 = 0.1 * jax.random.normal(k_w2, (27, P, P), jnp.float32)

    out = jax.jit(basic_block_forward)(x, w1, w2)
    jax.block_until_ready(out)
    assert out.shape == (B, P, D, H, W)

    ref = _reference_forward(x, w1, w2)
    max_err = float(jnp.max(jnp.abs(out - ref)))
    assert max_err < 2e-3, f"mismatch vs pure-JAX reference: max abs err = {max_err}"
    print("KERNEL_OK")
</pallas_src>

<mosaic_0001>
module attributes {stable_mosaic.version = 11 : i64} {
  func.func @_basic_block_kernel(%arg0: i32, %arg1: memref<8x512xf32, #tpu.memory_space<vmem>>, %arg2: memref<8x216xf32, #tpu.memory_space<vmem>>, %arg3: memref<8x216xf32, #tpu.memory_space<vmem>>, %arg4: memref<27x8x512xf32, #tpu.memory_space<vmem>>, %arg5: memref<8x512xf32, #tpu.memory_space<vmem>>, %arg6: memref<216x512xf32, #tpu.memory_space<vmem>>) attributes {dimension_semantics = [#tpu.dimension_semantics<parallel>], iteration_bounds = array<i64: 2>, scalar_prefetch = 0 : i64, scratch_operands = 1 : i64, tpu.core_type = #tpu.core_type<tc>, window_params = [{transform_indices = @transform_0, window_bounds = array<i64: 8, 512>}, {pipeline_mode = #tpu.pipeline_mode<synchronous>, transform_indices = @transform_1, window_bounds = array<i64: 8, 216>}, {pipeline_mode = #tpu.pipeline_mode<synchronous>, transform_indices = @transform_2, window_bounds = array<i64: 8, 216>}, {pipeline_mode = #tpu.pipeline_mode<synchronous>, transform_indices = @transform_3, window_bounds = array<i64: 27, 8, 512>}, {transform_indices = @transform_4, window_bounds = array<i64: 8, 512>}]} {
    %c0 = arith.constant 0 : index
    %c0_0 = arith.constant 0 : index
    %0 = vector.load %arg1[%c0, %c0_0] : memref<8x512xf32, #tpu.memory_space<vmem>>, vector<8x512xf32>
    %c73_i32 = arith.constant 73 : i32
    %1 = tpu.dynamic_rotate %0 by %c73_i32 dim 1 : vector<8x512xf32>, i32 -> vector<8x512xf32>
    %c0_1 = arith.constant 0 : index
    %c0_2 = arith.constant 0 : index
    %c0_3 = arith.constant 0 : index
    %2 = vector.load %arg4[%c0_1, %c0_2, %c0_3] : memref<27x8x512xf32, #tpu.memory_space<vmem>>, vector<1x8x512xf32>
    %3 = vector.shape_cast %2 : vector<1x8x512xf32> to vector<8x512xf32>
    %4 = arith.mulf %1, %3 : vector<8x512xf32>
    %c0_4 = arith.constant 0 : index
    %c0_5 = arith.constant 0 : index
    %5 = vector.load %arg6[%c0_4, %c0_5] : memref<216x512xf32, #tpu.memory_space<vmem>>, vector<8x512xf32>
    tpu.vector_store %arg6[%c0_4, %c0_5], %4 {strides = array<i32>} : memref<216x512xf32, #tpu.memory_space<vmem>>, vector<8x512xf32>,
    %c72_i32 = arith.constant 72 : i32
    %6 = tpu.dynamic_rotate %0 by %c72_i32 dim 1 : vector<8x512xf32>, i32 -> vector<8x512xf32>
    %c1 = arith.constant 1 : index
    %c0_6 = arith.constant 0 : index
    %c0_7 = arith.constant 0 : index
    %7 = vector.load %arg4[%c1, %c0_6, %c0_7] : memref<27x8x512xf32, #tpu.memory_space<vmem>>, vector<1x8x512xf32>
    %8 = vector.shape_cast %7 : vector<1x8x512xf32> to vector<8x512xf32>
    %9 = arith.mulf %6, %8 : vector<8x512xf32>
    %c8 = arith.constant 8 : index
    %c0_8 = arith.constant 0 : index
    %10 = vector.load %arg6[%c8, %c0_8] : memref<216x512xf32, #tpu.memory_space<vmem>>, vector<8x512xf32>
    tpu.vector_store %arg6[%c8, %c0_8], %9 {strides = array<i32>} : memref<216x512xf32, #tpu.memory_space<vmem>>, vector<8x512xf32>,
    %c71_i32 = arith.constant 71 : i32
    %11 = tpu.dynamic_rotate %0 by %c71_i32 dim 1 : vector<8x512xf32>, i32 -> vector<8x512xf32>
    %c2 = arith.constant 2 : index
    %c0_9 = arith.constant 0 : index
    %c0_10 = arith.constant 0 : index
    %12 = vector.load %arg4[%c2, %c0_9, %c0_10] : memref<27x8x512xf32, #tpu.memory_space<vmem>>, vector<1x8x512xf32>
    %13 = vector.shape_cast %12 : vector<1x8x512xf32> to vector<8x512xf32>
    %14 = arith.mulf %11, %13 : vector<8x512xf32>
    %c16 = arith.constant 16 : index
    %c0_11 = arith.constant 0 : index
    %15 = vector.load %arg6[%c16, %c0_11] : memref<216x512xf32, #tpu.memory_space<vmem>>, vector<8x512xf32>
    tpu.vector_store %arg6[%c16, %c0_11], %14 {strides = array<i32>} : memref<216x512xf32, #tpu.memory_space<vmem>>, vector<8x512xf32>,
    %c65_i32 = arith.constant 65 : i32
    %16 = tpu.dynamic_rotate %0 by %c65_i32 dim 1 : vector<8x512xf32>, i32 -> vector<8x512xf32>
    %c3 = arith.constant 3 : index
    %c0_12 = arith.constant 0 : index
    %c0_13 = arith.constant 0 : index
    %17 = vector.load %arg4[%c3, %c0_12, %c0_13] : memref<27x8x512xf32, #tpu.memory_space<vmem>>, vector<1x8x512xf32>
    %18 = vector.shape_cast %17 : vector<1x8x512xf32> to vector<8x512xf32>
    %19 = arith.mulf %16, %18 : vector<8x512xf32>
    %c24 = arith.constant 24 : index
    %c0_14 = arith.constant 0 : index
    %20 = vector.load %arg6[%c24, %c0_14] : memref<216x512xf32, #tpu.memory_space<vmem>>, vector<8x512xf32>
    tpu.vector_store %arg6[%c24, %c0_14], %19 {strides = array<i32>} : memref<216x512xf32, #tpu.memory_space<vmem>>, vector<8x512xf32>,
    %c64_i32 = arith.constant 64 : i32
    %21 = tpu.dynamic_rotate %0 by %c64_i32 dim 1 : vector<8x512xf32>, i32 -> vector<8x512xf32>
    %c4 = arith.constant 4 : index
    %c0_15 = arith.constant 0 : index
    %c0_16 = arith.constant 0 : index
    %22 = vector.load %arg4[%c4, %c0_15, %c0_16] : memref<27x8x512xf32, #tpu.memory_space<vmem>>, vector<1x8x512xf32>
    %23 = vector.shape_cast %22 : vector<1x8x512xf32> to vector<8x512xf32>
    %24 = arith.mulf %21, %23 : vector<8x512xf32>
    %c32 = arith.constant 32 : index
    %c0_17 = arith.constant 0 : index
    %25 = vector.load %arg6[%c32, %c0_17] : memref<216x512xf32, #tpu.memory_space<vmem>>, vector<8x512xf32>
    tpu.vector_store %arg6[%c32, %c0_17], %24 {strides = array<i32>} : memref<216x512xf32, #tpu.memory_space<vmem>>, vector<8x512xf32>,
    %c63_i32 = arith.constant 63 : i32
    %26 = tpu.dynamic_rotate %0 by %c63_i32 dim 1 : vector<8x512xf32>, i32 -> vector<8x512xf32>
    %c5 = arith.constant 5 : index
    %c0_18 = arith.constant 0 : index
    %c0_19 = arith.constant 0 : index
    %27 = vector.load %arg4[%c5, %c0_18, %c0_19] : memref<27x8x512xf32, #tpu.memory_space<vmem>>, vector<1x8x512xf32>
    %28 = vector.shape_cast %27 : vector<1x8x512xf32> to vector<8x512xf32>
    %29 = arith.mulf %26, %28 : vector<8x512xf32>
    %c40 = arith.constant 40 : index
    %c0_20 = arith.constant 0 : index
    %30 = vector.load %arg6[%c40, %c0_20] : memref<216x512xf32, #tpu.memory_space<vmem>>, vector<8x512xf32>
    tpu.vector_store %arg6[%c40, %c0_20], %29 {strides = array<i32>} : memref<216x512xf32, #tpu.memory_space<vmem>>, vector<8x512xf32>,
    %c57_i32 = arith.constant 57 : i32
    %31 = tpu.dynamic_rotate %0 by %c57_i32 dim 1 : vector<8x512xf32>, i32 -> vector<8x512xf32>
    %c6 = arith.constant 6 : index
    %c0_21 = arith.constant 0 : index
    %c0_22 = arith.constant 0 : index
    %32 = vector.load %arg4[%c6, %c0_21, %c0_22] : memref<27x8x512xf32, #tpu.memory_space<vmem>>, vector<1x8x512xf32>
    %33 = vector.shape_cast %32 : vector<1x8x512xf32> to vector<8x512xf32>
    %34 = arith.mulf %31, %33 : vector<8x512xf32>
    %c48 = arith.constant 48 : index
    %c0_23 = arith.constant 0 : index
    %35 = vector.load %arg6[%c48, %c0_23] : memref<216x512xf32, #tpu.memory_space<vmem>>, vector<8x512xf32>
    tpu.vector_store %arg6[%c48, %c0_23], %34 {strides = array<i32>} : memref<216x512xf32, #tpu.memory_space<vmem>>, vector<8x512xf32>,
    %c56_i32 = arith.constant 56 : i32
    %36 = tpu.dynamic_rotate %0 by %c56_i32 dim 1 : vector<8x512xf32>, i32 -> vector<8x512xf32>
    %c7 = arith.constant 7 : index
    %c0_24 = arith.constant 0 : index
    %c0_25 = arith.constant 0 : index
    %37 = vector.load %arg4[%c7, %c0_24, %c0_25] : memref<27x8x512xf32, #tpu.memory_space<vmem>>, vector<1x8x512xf32>
    %38 = vector.shape_cast %37 : vector<1x8x512xf32> to vector<8x512xf32>
    %39 = arith.mulf %36, %38 : vector<8x512xf32>
    %c56 = arith.constant 56 : index
    %c0_26 = arith.constant 0 : index
    %40 = vector.load %arg6[%c56, %c0_26] : memref<216x512xf32, #tpu.memory_space<vmem>>, vector<8x512xf32>
    tpu.vector_store %arg6[%c56, %c0_26], %39 {strides = array<i32>} : memref<216x512xf32, #tpu.memory_space<vmem>>, vector<8x512xf32>,
    %c55_i32 = arith.constant 55 : i32
    %41 = tpu.dynamic_rotate %0 by %c55_i32 dim 1 : vector<8x512xf32>, i32 -> vector<8x512xf32>
    %c8_27 = arith.constant 8 : index
    %c0_28 = arith.constant 0 : index
    %c0_29 = arith.constant 0 : index
    %42 = vector.load %arg4[%c8_27, %c0_28, %c0_29] : memref<27x8x512xf32, #tpu.memory_space<vmem>>, vector<1x8x512xf32>
    %43 = vector.shape_cast %42 : vector<1x8x512xf32> to vector<8x512xf32>
    %44 = arith.mulf %41, %43 : vector<8x512xf32>
    %c64 = arith.constant 64 : index
    %c0_30 = arith.constant 0 : index
    %45 = vector.load %arg6[%c64, %c0_30] : memref<216x512xf32, #tpu.memory_space<vmem>>, vector<8x512xf32>
    tpu.vector_store %arg6[%c64, %c0_30], %44 {strides = array<i32>} : memref<216x512xf32, #tpu.memory_space<vmem>>, vector<8x512xf32>,
    %c9_i32 = arith.constant 9 : i32
    %46 = tpu.dynamic_rotate %0 by %c9_i32 dim 1 : vector<8x512xf32>, i32 -> vector<8x512xf32>
    %c9 = arith.constant 9 : index
    %c0_31 = arith.constant 0 : index
    %c0_32 = arith.constant 0 : index
    %47 = vector.load %arg4[%c9, %c0_31, %c0_32] : memref<27x8x512xf32, #tpu.memory_space<vmem>>, vector<1x8x512xf32>
    %48 = vector.shape_cast %47 : vector<1x8x512xf32> to vector<8x512xf32>
    %49 = arith.mulf %46, %48 : vector<8x512xf32>
    %c72 = arith.constant 72 : index
    %c0_33 = arith.constant 0 : index
    %50 = vector.load %arg6[%c72, %c0_33] : memref<216x512xf32, #tpu.memory_space<vmem>>, vector<8x512xf32>
    tpu.vector_store %arg6[%c72, %c0_33], %49 {strides = array<i32>} : memref<216x512xf32, #tpu.memory_space<vmem>>, vector<8x512xf32>,
    %c8_i32 = arith.constant 8 : i32
    %51 = tpu.dynamic_rotate %0 by %c8_i32 dim 1 : vector<8x512xf32>, i32 -> vector<8x512xf32>
    %c10 = arith.constant 10 : index
    %c0_34 = arith.constant 0 : index
    %c0_35 = arith.constant 0 : index
    %52 = vector.load %arg4[%c10, %c0_34, %c0_35] : memref<27x8x512xf32, #tpu.memory_space<vmem>>, vector<1x8x512xf32>
    %53 = vector.shape_cast %52 : vector<1x8x512xf32> to vector<8x512xf32>
    %54 = arith.mulf %51, %53 : vector<8x512xf32>
    %c80 = arith.constant 80 : index
    %c0_36 = arith.constant 0 : index
    %55 = vector.load %arg6[%c80, %c0_36] : memref<216x512xf32, #tpu.memory_space<vmem>>, vector<8x512xf32>
    tpu.vector_store %arg6[%c80, %c0_36], %54 {strides = array<i32>} : memref<216x512xf32, #tpu.memory_space<vmem>>, vector<8x512xf32>,
    %c7_i32 = arith.constant 7 : i32
    %56 = tpu.dynamic_rotate %0 by %c7_i32 dim 1 : vector<8x512xf32>, i32 -> vector<8x512xf32>
    %c11 = arith.constant 11 : index
    %c0_37 = arith.constant 0 : index
    %c0_38 = arith.constant 0 : index
    %57 = vector.load %arg4[%c11, %c0_37, %c0_38] : memref<27x8x512xf32, #tpu.memory_space<vmem>>, vector<1x8x512xf32>
    %58 = vector.shape_cast %57 : vector<1x8x512xf32> to vector<8x512xf32>
    %59 = arith.mulf %56, %58 : vector<8x512xf32>
    %c88 = arith.constant 88 : index
    %c0_39 = arith.constant 0 : index
    %60 = vector.load %arg6[%c88, %c0_39] : memref<216x512xf32, #tpu.memory_space<vmem>>, vector<8x512xf32>
    tpu.vector_store %arg6[%c88, %c0_39], %59 {strides = array<i32>} : memref<216x512xf32, #tpu.memory_space<vmem>>, vector<8x512xf32>,
    %c1_i32 = arith.constant 1 : i32
    %61 = tpu.dynamic_rotate %0 by %c1_i32 dim 1 : vector<8x512xf32>, i32 -> vector<8x512xf32>
    %c12 = arith.constant 12 : index
    %c0_40 = arith.constant 0 : index
    %c0_41 = arith.constant 0 : index
    %62 = vector.load %arg4[%c12, %c0_40, %c0_41] : memref<27x8x512xf32, #tpu.memory_space<vmem>>, vector<1x8x512xf32>
    %63 = vector.shape_cast %62 : vector<1x8x512xf32> to vector<8x512xf32>
    %64 = arith.mulf %61, %63 : vector<8x512xf32>
    %c96 = arith.constant 96 : index
    %c0_42 = arith.constant 0 : index
    %65 = vector.load %arg6[%c96, %c0_42] : memref<216x512xf32, #tpu.memory_space<vmem>>, vector<8x512xf32>
    tpu.vector_store %arg6[%c96, %c0_42], %64 {strides = array<i32>} : memref<216x512xf32, #tpu.memory_space<vmem>>, vector<8x512xf32>,
    %c104 = arith.constant 104 : index
    %c0_43 = arith.constant 0 : index
    %66 = vector.load %arg6[%c104, %c0_43] : memref<216x512xf32, #tpu.memory_space<vmem>>, vector<8x512xf32>
    tpu.vector_store %arg6[%c104, %c0_43], %0 {strides = array<i32>} : memref<216x512xf32, #tpu.memory_space<vmem>>, vector<8x512xf32>,
    %c511_i32 = arith.constant 511 : i32
    %67 = tpu.dynamic_rotate %0 by %c511_i32 dim 1 : vector<8x512xf32>, i32 -> vector<8x512xf32>
    %c14 = arith.constant 14 : index
    %c0_44 = arith.constant 0 : index
    %c0_45 = arith.constant 0 : index
    %68 = vector.load %arg4[%c14, %c0_44, %c0_45] : memref<27x8x512xf32, #tpu.memory_space<vmem>>, vector<1x8x512xf32>
    %69 = vector.shape_cast %68 : vector<1x8x512xf32> to vector<8x512xf32>
    %70 = arith.mulf %67, %69 : vector<8x512xf32>
    %c112 = arith.constant 112 : index
    %c0_46 = arith.constant 0 : index
    %71 = vector.load %arg6[%c112, %c0_46] : memref<216x512xf32, #tpu.memory_space<vmem>>, vector<8x512xf32>
    tpu.vector_store %arg6[%c112, %c0_46], %70 {strides = array<i32>} : memref<216x512xf32, #tpu.memory_space<vmem>>, vector<8x512xf32>,
    %c505_i32 = arith.constant 505 : i32
    %72 = tpu.dynamic_rotate %0 by %c505_i32 dim 1 : vector<8x512xf32>, i32 -> vector<8x512xf32>
    %c15 = arith.constant 15 : index
    %c0_47 = arith.constant 0 : index
    %c0_48 = arith.constant 0 : index
    %73 = vector.load %arg4[%c15, %c0_47, %c0_48] : memref<27x8x512xf32, #tpu.memory_space<vmem>>, vector<1x8x512xf32>
    %74 = vector.shape_cast %73 : vector<1x8x512xf32> to vector<8x512xf32>
    %75 = arith.mulf %72, %74 : vector<8x512xf32>
    %c120 = arith.constant 120 : index
    %c0_49 = arith.constant 0 : index
    %76 = vector.load %arg6[%c120, %c0_49] : memref<216x512xf32, #tpu.memory_space<vmem>>, vector<8x512xf32>
    tpu.vector_store %arg6[%c120, %c0_49], %75 {strides = array<i32>} : memref<216x512xf32, #tpu.memory_space<vmem>>, vector<8x512xf32>,
    %c504_i32 = arith.constant 504 : i32
    %77 = tpu.dynamic_rotate %0 by %c504_i32 dim 1 : vector<8x512xf32>, i32 -> vector<8x512xf32>
    %c16_50 = arith.constant 16 : index
    %c0_51 = arith.constant 0 : index
    %c0_52 = arith.constant 0 : index
    %78 = vector.load %arg4[%c16_50, %c0_51, %c0_52] : memref<27x8x512xf32, #tpu.memory_space<vmem>>, vector<1x8x512xf32>
    %79 = vector.shape_cast %78 : vector<1x8x512xf32> to vector<8x512xf32>
    %80 = arith.mulf %77, %79 : vector<8x512xf32>
    %c128 = arith.constant 128 : index
    %c0_53 = arith.constant 0 : index
    %81 = vector.load %arg6[%c128, %c0_53] : memref<216x512xf32, #tpu.memory_space<vmem>>, vector<8x512xf32>
    tpu.vector_store %arg6[%c128, %c0_53], %80 {strides = array<i32>} : memref<216x512xf32, #tpu.memory_space<vmem>>, vector<8x512xf32>,
    %c503_i32 = arith.constant 503 : i32
    %82 = tpu.dynamic_rotate %0 by %c503_i32 dim 1 : vector<8x512xf32>, i32 -> vector<8x512xf32>
    %c17 = arith.constant 17 : index
    %c0_54 = arith.constant 0 : index
    %c0_55 = arith.constant 0 : index
    %83 = vector.load %arg4[%c17, %c0_54, %c0_55] : memref<27x8x512xf32, #tpu.memory_space<vmem>>, vector<1x8x512xf32>
    %84 = vector.shape_cast %83 : vector<1x8x512xf32> to vector<8x512xf32>
    %85 = arith.mulf %82, %84 : vector<8x512xf32>
    %c136 = arith.constant 136 : index
    %c0_56 = arith.constant 0 : index
    %86 = vector.load %arg6[%c136, %c0_56] : memref<216x512xf32, #tpu.memory_space<vmem>>, vector<8x512xf32>
    tpu.vector_store %arg6[%c136, %c0_56], %85 {strides = array<i32>} : memref<216x512xf32, #tpu.memory_space<vmem>>, vector<8x512xf32>,
    %c457_i32 = arith.constant 457 : i32
    %87 = tpu.dynamic_rotate %0 by %c457_i32 dim 1 : vector<8x512xf32>, i32 -> vector<8x512xf32>
    %c18 = arith.constant 18 : index
    %c0_57 = arith.constant 0 : index
    %c0_58 = arith.constant 0 : index
    %88 = vector.load %arg4[%c18, %c0_57, %c0_58] : memref<27x8x512xf32, #tpu.memory_space<vmem>>, vector<1x8x512xf32>
    %89 = vector.shape_cast %88 : vector<1x8x512xf32> to vector<8x512xf32>
    %90 = arith.mulf %87, %89 : vector<8x512xf32>
    %c144 = arith.constant 144 : index
    %c0_59 = arith.constant 0 : index
    %91 = vector.load %arg6[%c144, %c0_59] : memref<216x512xf32, #tpu.memory_space<vmem>>, vector<8x512xf32>
    tpu.vector_store %arg6[%c144, %c0_59], %90 {strides = array<i32>} : memref<216x512xf32, #tpu.memory_space<vmem>>, vector<8x512xf32>,
    %c456_i32 = arith.constant 456 : i32
    %92 = tpu.dynamic_rotate %0 by %c456_i32 dim 1 : vector<8x512xf32>, i32 -> vector<8x512xf32>
    %c19 = arith.constant 19 : index
    %c0_60 = arith.constant 0 : index
    %c0_61 = arith.constant 0 : index
    %93 = vector.load %arg4[%c19, %c0_60, %c0_61] : memref<27x8x512xf32, #tpu.memory_space<vmem>>, vector<1x8x512xf32>
    %94 = vector.shape_cast %93 : vector<1x8x512xf32> to vector<8x512xf32>
    %95 = arith.mulf %92, %94 : vector<8x512xf32>
    %c152 = arith.constant 152 : index
    %c0_62 = arith.constant 0 : index
    %96 = vector.load %arg6[%c152, %c0_62] : memref<216x512xf32, #tpu.memory_space<vmem>>, vector<8x512xf32>
    tpu.vector_store %arg6[%c152, %c0_62], %95 {strides = array<i32>} : memref<216x512xf32, #tpu.memory_space<vmem>>, vector<8x512xf32>,
    %c455_i32 = arith.constant 455 : i32
    %97 = tpu.dynamic_rotate %0 by %c455_i32 dim 1 : vector<8x512xf32>, i32 -> vector<8x512xf32>
    %c20 = arith.constant 20 : index
    %c0_63 = arith.constant 0 : index
    %c0_64 = arith.constant 0 : index
    %98 = vector.load %arg4[%c20, %c0_63, %c0_64] : memref<27x8x512xf32, #tpu.memory_space<vmem>>, vector<1x8x512xf32>
    %99 = vector.shape_cast %98 : vector<1x8x512xf32> to vector<8x512xf32>
    %100 = arith.mulf %97, %99 : vector<8x512xf32>
    %c160 = arith.constant 160 : index
    %c0_65 = arith.constant 0 : index
    %101 = vector.load %arg6[%c160, %c0_65] : memref<216x512xf32, #tpu.memory_space<vmem>>, vector<8x512xf32>
    tpu.vector_store %arg6[%c160, %c0_65], %100 {strides = array<i32>} : memref<216x512xf32, #tpu.memory_space<vmem>>, vector<8x512xf32>,
    %c449_i32 = arith.constant 449 : i32
    %102 = tpu.dynamic_rotate %0 by %c449_i32 dim 1 : vector<8x512xf32>, i32 -> vector<8x512xf32>
    %c21 = arith.constant 21 : index
    %c0_66 = arith.constant 0 : index
    %c0_67 = arith.constant 0 : index
    %103 = vector.load %arg4[%c21, %c0_66, %c0_67] : memref<27x8x512xf32, #tpu.memory_space<vmem>>, vector<1x8x512xf32>
    %104 = vector.shape_cast %103 : vector<1x8x512xf32> to vector<8x512xf32>
    %105 = arith.mulf %102, %104 : vector<8x512xf32>
    %c168 = arith.constant 168 : index
    %c0_68 = arith.constant 0 : index
    %106 = vector.load %arg6[%c168, %c0_68] : memref<216x512xf32, #tpu.memory_space<vmem>>, vector<8x512xf32>
    tpu.vector_store %arg6[%c168, %c0_68], %105 {strides = array<i32>} : memref<216x512xf32, #tpu.memory_space<vmem>>, vector<8x512xf32>,
    %c448_i32 = arith.constant 448 : i32
    %107 = tpu.dynamic_rotate %0 by %c448_i32 dim 1 : vector<8x512xf32>, i32 -> vector<8x512xf32>
    %c22 = arith.constant 22 : index
    %c0_69 = arith.constant 0 : index
    %c0_70 = arith.constant 0 : index
    %108 = vector.load %arg4[%c22, %c0_69, %c0_70] : memref<27x8x512xf32, #tpu.memory_space<vmem>>, vector<1x8x512xf32>
    %109 = vector.shape_cast %108 : vector<1x8x512xf32> to vector<8x512xf32>
    %110 = arith.mulf %107, %109 : vector<8x512xf32>
    %c176 = arith.constant 176 : index
    %c0_71 = arith.constant 0 : index
    %111 = vector.load %arg6[%c176, %c0_71] : memref<216x512xf32, #tpu.memory_space<vmem>>, vector<8x512xf32>
    tpu.vector_store %arg6[%c176, %c0_71], %110 {strides = array<i32>} : memref<216x512xf32, #tpu.memory_space<vmem>>, vector<8x512xf32>,
    %c447_i32 = arith.constant 447 : i32
    %112 = tpu.dynamic_rotate %0 by %c447_i32 dim 1 : vector<8x512xf32>, i32 -> vector<8x512xf32>
    %c23 = arith.constant 23 : index
    %c0_72 = arith.constant 0 : index
    %c0_73 = arith.constant 0 : index
    %113 = vector.load %arg4[%c23, %c0_72, %c0_73] : memref<27x8x512xf32, #tpu.memory_space<vmem>>, vector<1x8x512xf32>
    %114 = vector.shape_cast %113 : vector<1x8x512xf32> to vector<8x512xf32>
    %115 = arith.mulf %112, %114 : vector<8x512xf32>
    %c184 = arith.constant 184 : index
    %c0_74 = arith.constant 0 : index
    %116 = vector.load %arg6[%c184, %c0_74] : memref<216x512xf32, #tpu.memory_space<vmem>>, vector<8x512xf32>
    tpu.vector_store %arg6[%c184, %c0_74], %115 {strides = array<i32>} : memref<216x512xf32, #tpu.memory_space<vmem>>, vector<8x512xf32>,
    %c441_i32 = arith.constant 441 : i32
    %117 = tpu.dynamic_rotate %0 by %c441_i32 dim 1 : vector<8x512xf32>, i32 -> vector<8x512xf32>
    %c24_75 = arith.constant 24 : index
    %c0_76 = arith.constant 0 : index
    %c0_77 = arith.constant 0 : index
    %118 = vector.load %arg4[%c24_75, %c0_76, %c0_77] : memref<27x8x512xf32, #tpu.memory_space<vmem>>, vector<1x8x512xf32>
    %119 = vector.shape_cast %118 : vector<1x8x512xf32> to vector<8x512xf32>
    %120 = arith.mulf %117, %119 : vector<8x512xf32>
    %c192 = arith.constant 192 : index
    %c0_78 = arith.constant 0 : index
    %121 = vector.load %arg6[%c192, %c0_78] : memref<216x512xf32, #tpu.memory_space<vmem>>, vector<8x512xf32>
    tpu.vector_store %arg6[%c192, %c0_78], %120 {strides = array<i32>} : memref<216x512xf32, #tpu.memory_space<vmem>>, vector<8x512xf32>,
    %c440_i32 = arith.constant 440 : i32
    %122 = tpu.dynamic_rotate %0 by %c440_i32 dim 1 : vector<8x512xf32>, i32 -> vector<8x512xf32>
    %c25 = arith.constant 25 : index
    %c0_79 = arith.constant 0 : index
    %c0_80 = arith.constant 0 : index
    %123 = vector.load %arg4[%c25, %c0_79, %c0_80] : memref<27x8x512xf32, #tpu.memory_space<vmem>>, vector<1x8x512xf32>
    %124 = vector.shape_cast %123 : vector<1x8x512xf32> to vector<8x512xf32>
    %125 = arith.mulf %122, %124 : vector<8x512xf32>
    %c200 = arith.constant 200 : index
    %c0_81 = arith.constant 0 : index
    %126 = vector.load %arg6[%c200, %c0_81] : memref<216x512xf32, #tpu.memory_space<vmem>>, vector<8x512xf32>
    tpu.vector_store %arg6[%c200, %c0_81], %125 {strides = array<i32>} : memref<216x512xf32, #tpu.memory_space<vmem>>, vector<8x512xf32>,
    %c439_i32 = arith.constant 439 : i32
    %127 = tpu.dynamic_rotate %0 by %c439_i32 dim 1 : vector<8x512xf32>, i32 -> vector<8x512xf32>
    %c26 = arith.constant 26 : index
    %c0_82 = arith.constant 0 : index
    %c0_83 = arith.constant 0 : index
    %128 = vector.load %arg4[%c26, %c0_82, %c0_83] : memref<27x8x512xf32, #tpu.memory_space<vmem>>, vector<1x8x512xf32>
    %129 = vector.shape_cast %128 : vector<1x8x512xf32> to vector<8x512xf32>
    %130 = arith.mulf %127, %129 : vector<8x512xf32>
    %c208 = arith.constant 208 : index
    %c0_84 = arith.constant 0 : index
    %131 = vector.load %arg6[%c208, %c0_84] : memref<216x512xf32, #tpu.memory_space<vmem>>, vector<8x512xf32>
    tpu.vector_store %arg6[%c208, %c0_84], %130 {strides = array<i32>} : memref<216x512xf32, #tpu.memory_space<vmem>>, vector<8x512xf32>,
    %c0_85 = arith.constant 0 : index
    %c0_86 = arith.constant 0 : index
    %132 = vector.load %arg2[%c0_85, %c0_86] : memref<8x216xf32, #tpu.memory_space<vmem>>, vector<8x216xf32>
    %c0_87 = arith.constant 0 : index
    %c0_88 = arith.constant 0 : index
    %133 = vector.load %arg6[%c0_87, %c0_88] : memref<216x512xf32, #tpu.memory_space<vmem>>, vector<216x512xf32>
    %cst = arith.constant dense<0.000000e+00> : vector<8x512xf32>
    %134 = tpu.matmul %132, %133, %cst {dimension_numbers = #tpu.dot_dimension_numbers<[1], [0], [0], [1], [0, 0, 1, 1], [], []>, precision = #tpu.contract_precision<fp32>} : vector<8x216xf32>, vector<216x512xf32>, vector<8x512xf32> -> vector<8x512xf32>
    %cst_89 = arith.constant dense<0.000000e+00> : vector<8xf32>
    %135 = vector.multi_reduction <add>, %134, %cst_89 [1] : vector<8x512xf32> to vector<8xf32>
    %136 = vector.shape_cast %135 : vector<8xf32> to vector<8x1xf32>
    %cst_90 = arith.constant 5.120000e+02 : f32
    %137 = vector.broadcast %cst_90 : f32 to vector<8x1xf32>
    %138 = arith.divf %136, %137 : vector<8x1xf32>
    %139 = vector.broadcast %138 : vector<8x1xf32> to vector<8x512xf32>
    %140 = arith.subf %134, %139 : vector<8x512xf32>
    %141 = arith.mulf %140, %140 : vector<8x512xf32>
    %cst_91 = arith.constant dense<0.000000e+00> : vector<8xf32>
    %142 = vector.multi_reduction <add>, %141, %cst_91 [1] : vector<8x512xf32> to vector<8xf32>
    %143 = vector.shape_cast %142 : vector<8xf32> to vector<8x1xf32>
    %cst_92 = arith.constant 5.120000e+02 : f32
    %144 = vector.broadcast %cst_92 : f32 to vector<8x1xf32>
    %145 = arith.divf %143, %144 : vector<8x1xf32>
    %cst_93 = arith.constant 9.99999974E-6 : f32
    %146 = vector.broadcast %cst_93 : f32 to vector<8x1xf32>
    %147 = arith.addf %145, %146 : vector<8x1xf32>
    %148 = math.rsqrt %147 : vector<8x1xf32>
    %149 = vector.broadcast %148 : vector<8x1xf32> to vector<8x512xf32>
    %150 = arith.mulf %140, %149 : vector<8x512xf32>
    %cst_94 = arith.constant 0.000000e+00 : f32
    %151 = vector.broadcast %cst_94 : f32 to vector<8x512xf32>
    %152 = arith.maximumf %150, %151 : vector<8x512xf32>
    %c73_i32_95 = arith.constant 73 : i32
    %153 = tpu.dynamic_rotate %152 by %c73_i32_95 dim 1 : vector<8x512xf32>, i32 -> vector<8x512xf32>
    %c0_96 = arith.constant 0 : index
    %c0_97 = arith.constant 0 : index
    %c0_98 = arith.constant 0 : index
    %154 = vector.load %arg4[%c0_96, %c0_97, %c0_98] : memref<27x8x512xf32, #tpu.memory_space<vmem>>, vector<1x8x512xf32>
    %155 = vector.shape_cast %154 : vector<1x8x512xf32> to vector<8x512xf32>
    %156 = arith.mulf %153, %155 : vector<8x512xf32>
    %c0_99 = arith.constant 0 : index
    %c0_100 = arith.constant 0 : index
    %157 = vector.load %arg6[%c0_99, %c0_100] : memref<216x512xf32, #tpu.memory_space<vmem>>, vector<8x512xf32>
    tpu.vector_store %arg6[%c0_99, %c0_100], %156 {strides = array<i32>} : memref<216x512xf32, #tpu.memory_space<vmem>>, vector<8x512xf32>,
    %c72_i32_101 = arith.constant 72 : i32
    %158 = tpu.dynamic_rotate %152 by %c72_i32_101 dim 1 : vector<8x512xf32>, i32 -> vector<8x512xf32>
    %c1_102 = arith.constant 1 : index
    %c0_103 = arith.constant 0 : index
    %c0_104 = arith.constant 0 : index
    %159 = vector.load %arg4[%c1_102, %c0_103, %c0_104] : memref<27x8x512xf32, #tpu.memory_space<vmem>>, vector<1x8x512xf32>
    %160 = vector.shape_cast %159 : vector<1x8x512xf32> to vector<8x512xf32>
    %161 = arith.mulf %158, %160 : vector<8x512xf32>
    %c8_105 = arith.constant 8 : index
    %c0_106 = arith.constant 0 : index
    %162 = vector.load %arg6[%c8_105, %c0_106] : memref<216x512xf32, #tpu.memory_space<vmem>>, vector<8x512xf32>
    tpu.vector_store %arg6[%c8_105, %c0_106], %161 {strides = array<i32>} : memref<216x512xf32, #tpu.memory_space<vmem>>, vector<8x512xf32>,
    %c71_i32_107 = arith.constant 71 : i32
    %163 = tpu.dynamic_rotate %152 by %c71_i32_107 dim 1 : vector<8x512xf32>, i32 -> vector<8x512xf32>
    %c2_108 = arith.constant 2 : index
    %c0_109 = arith.constant 0 : index
    %c0_110 = arith.constant 0 : index
    %164 = vector.load %arg4[%c2_108, %c0_109, %c0_110] : memref<27x8x512xf32, #tpu.memory_space<vmem>>, vector<1x8x512xf32>
    %165 = vector.shape_cast %164 : vector<1x8x512xf32> to vector<8x512xf32>
    %166 = arith.mulf %163, %165 : vector<8x512xf32>
    %c16_111 = arith.constant 16 : index
    %c0_112 = arith.constant 0 : index
    %167 = vector.load %arg6[%c16_111, %c0_112] : memref<216x512xf32, #tpu.memory_space<vmem>>, vector<8x512xf32>
    tpu.vector_store %arg6[%c16_111, %c0_112], %166 {strides = array<i32>} : memref<216x512xf32, #tpu.memory_space<vmem>>, vector<8x512xf32>,
    %c65_i32_113 = arith.constant 65 : i32
    %168 = tpu.dynamic_rotate %152 by %c65_i32_113 dim 1 : vector<8x512xf32>, i32 -> vector<8x512xf32>
    %c3_114 = arith.constant 3 : index
    %c0_115 = arith.constant 0 : index
    %c0_116 = arith.constant 0 : index
    %169 = vector.load %arg4[%c3_114, %c0_115, %c0_116] : memref<27x8x512xf32, #tpu.memory_space<vmem>>, vector<1x8x512xf32>
    %170 = vector.shape_cast %169 : vector<1x8x512xf32> to vector<8x512xf32>
    %171 = arith.mulf %168, %170 : vector<8x512xf32>
    %c24_117 = arith.constant 24 : index
    %c0_118 = arith.constant 0 : index
    %172 = vector.load %arg6[%c24_117, %c0_118] : memref<216x512xf32, #tpu.memory_space<vmem>>, vector<8x512xf32>
    tpu.vector_store %arg6[%c24_117, %c0_118], %171 {strides = array<i32>} : memref<216x512xf32, #tpu.memory_space<vmem>>, vector<8x512xf32>,
    %c64_i32_119 = arith.constant 64 : i32
    %173 = tpu.dynamic_rotate %152 by %c64_i32_119 dim 1 : vector<8x512xf32>, i32 -> vector<8x512xf32>
    %c4_120 = arith.constant 4 : index
    %c0_121 = arith.constant 0 : index
    %c0_122 = arith.constant 0 : index
    %174 = vector.load %arg4[%c4_120, %c0_121, %c0_122] : memref<27x8x512xf32, #tpu.memory_space<vmem>>, vector<1x8x512xf32>
    %175 = vector.shape_cast %174 : vector<1x8x512xf32> to vector<8x512xf32>
    %176 = arith.mulf %173, %175 : vector<8x512xf32>
    %c32_123 = arith.constant 32 : index
    %c0_124 = arith.constant 0 : index
    %177 = vector.load %arg6[%c32_123, %c0_124] : memref<216x512xf32, #tpu.memory_space<vmem>>, vector<8x512xf32>
    tpu.vector_store %arg6[%c32_123, %c0_124], %176 {strides = array<i32>} : memref<216x512xf32, #tpu.memory_space<vmem>>, vector<8x512xf32>,
    %c63_i32_125 = arith.constant 63 : i32
    %178 = tpu.dynamic_rotate %152 by %c63_i32_125 dim 1 : vector<8x512xf32>, i32 -> vector<8x512xf32>
    %c5_126 = arith.constant 5 : index
    %c0_127 = arith.constant 0 : index
    %c0_128 = arith.constant 0 : index
    %179 = vector.load %arg4[%c5_126, %c0_127, %c0_128] : memref<27x8x512xf32, #tpu.memory_space<vmem>>, vector<1x8x512xf32>
    %180 = vector.shape_cast %179 : vector<1x8x512xf32> to vector<8x512xf32>
    %181 = arith.mulf %178, %180 : vector<8x512xf32>
    %c40_129 = arith.constant 40 : index
    %c0_130 = arith.constant 0 : index
    %182 = vector.load %arg6[%c40_129, %c0_130] : memref<216x512xf32, #tpu.memory_space<vmem>>, vector<8x512xf32>
    tpu.vector_store %arg6[%c40_129, %c0_130], %181 {strides = array<i32>} : memref<216x512xf32, #tpu.memory_space<vmem>>, vector<8x512xf32>,
    %c57_i32_131 = arith.constant 57 : i32
    %183 = tpu.dynamic_rotate %152 by %c57_i32_131 dim 1 : vector<8x512xf32>, i32 -> vector<8x512xf32>
    %c6_132 = arith.constant 6 : index
    %c0_133 = arith.constant 0 : index
    %c0_134 = arith.constant 0 : index
    %184 = vector.load %arg4[%c6_132, %c0_133, %c0_134] : memref<27x8x512xf32, #tpu.memory_space<vmem>>, vector<1x8x512xf32>
    %185 = vector.shape_cast %184 : vector<1x8x512xf32> to vector<8x512xf32>
    %186 = arith.mulf %183, %185 : vector<8x512xf32>
    %c48_135 = arith.constant 48 : index
    %c0_136 = arith.constant 0 : index
    %187 = vector.load %arg6[%c48_135, %c0_136] : memref<216x512xf32, #tpu.memory_space<vmem>>, vector<8x512xf32>
    tpu.vector_store %arg6[%c48_135, %c0_136], %186 {strides = array<i32>} : memref<216x512xf32, #tpu.memory_space<vmem>>, vector<8x512xf32>,
    %c56_i32_137 = arith.constant 56 : i32
    %188 = tpu.dynamic_rotate %152 by %c56_i32_137 dim 1 : vector<8x512xf32>, i32 -> vector<8x512xf32>
    %c7_138 = arith.constant 7 : index
    %c0_139 = arith.constant 0 : index
    %c0_140 = arith.constant 0 : index
    %189 = vector.load %arg4[%c7_138, %c0_139, %c0_140] : memref<27x8x512xf32, #tpu.memory_space<vmem>>, vector<1x8x512xf32>
    %190 = vector.shape_cast %189 : vector<1x8x512xf32> to vector<8x512xf32>
    %191 = arith.mulf %188, %190 : vector<8x512xf32>
    %c56_141 = arith.constant 56 : index
    %c0_142 = arith.constant 0 : index
    %192 = vector.load %arg6[%c56_141, %c0_142] : memref<216x512xf32, #tpu.memory_space<vmem>>, vector<8x512xf32>
    tpu.vector_store %arg6[%c56_141, %c0_142], %191 {strides = array<i32>} : memref<216x512xf32, #tpu.memory_space<vmem>>, vector<8x512xf32>,
    %c55_i32_143 = arith.constant 55 : i32
    %193 = tpu.dynamic_rotate %152 by %c55_i32_143 dim 1 : vector<8x512xf32>, i32 -> vector<8x512xf32>
    %c8_144 = arith.constant 8 : index
    %c0_145 = arith.constant 0 : index
    %c0_146 = arith.constant 0 : index
    %194 = vector.load %arg4[%c8_144, %c0_145, %c0_146] : memref<27x8x512xf32, #tpu.memory_space<vmem>>, vector<1x8x512xf32>
    %195 = vector.shape_cast %194 : vector<1x8x512xf32> to vector<8x512xf32>
    %196 = arith.mulf %193, %195 : vector<8x512xf32>
    %c64_147 = arith.constant 64 : index
    %c0_148 = arith.constant 0 : index
    %197 = vector.load %arg6[%c64_147, %c0_148] : memref<216x512xf32, #tpu.memory_space<vmem>>, vector<8x512xf32>
    tpu.vector_store %arg6[%c64_147, %c0_148], %196 {strides = array<i32>} : memref<216x512xf32, #tpu.memory_space<vmem>>, vector<8x512xf32>,
    %c9_i32_149 = arith.constant 9 : i32
    %198 = tpu.dynamic_rotate %152 by %c9_i32_149 dim 1 : vector<8x512xf32>, i32 -> vector<8x512xf32>
    %c9_150 = arith.constant 9 : index
    %c0_151 = arith.constant 0 : index
    %c0_152 = arith.constant 0 : index
    %199 = vector.load %arg4[%c9_150, %c0_151, %c0_152] : memref<27x8x512xf32, #tpu.memory_space<vmem>>, vector<1x8x512xf32>
    %200 = vector.shape_cast %199 : vector<1x8x512xf32> to vector<8x512xf32>
    %201 = arith.mulf %198, %200 : vector<8x512xf32>
    %c72_153 = arith.constant 72 : index
    %c0_154 = arith.constant 0 : index
    %202 = vector.load %arg6[%c72_153, %c0_154] : memref<216x512xf32, #tpu.memory_space<vmem>>, vector<8x512xf32>
    tpu.vector_store %arg6[%c72_153, %c0_154], %201 {strides = array<i32>} : memref<216x512xf32, #tpu.memory_space<vmem>>, vector<8x512xf32>,
    %c8_i32_155 = arith.constant 8 : i32
    %203 = tpu.dynamic_rotate %152 by %c8_i32_155 dim 1 : vector<8x512xf32>, i32 -> vector<8x512xf32>
    %c10_156 = arith.constant 10 : index
    %c0_157 = arith.constant 0 : index
    %c0_158 = arith.constant 0 : index
    %204 = vector.load %arg4[%c10_156, %c0_157, %c0_158] : memref<27x8x512xf32, #tpu.memory_space<vmem>>, vector<1x8x512xf32>
    %205 = vector.shape_cast %204 : vector<1x8x512xf32> to vector<8x512xf32>
    %206 = arith.mulf %203, %205 : vector<8x512xf32>
    %c80_159 = arith.constant 80 : index
    %c0_160 = arith.constant 0 : index
    %207 = vector.load %arg6[%c80_159, %c0_160] : memref<216x512xf32, #tpu.memory_space<vmem>>, vector<8x512xf32>
    tpu.vector_store %arg6[%c80_159, %c0_160], %206 {strides = array<i32>} : memref<216x512xf32, #tpu.memory_space<vmem>>, vector<8x512xf32>,
    %c7_i32_161 = arith.constant 7 : i32
    %208 = tpu.dynamic_rotate %152 by %c7_i32_161 dim 1 : vector<8x512xf32>, i32 -> vector<8x512xf32>
    %c11_162 = arith.constant 11 : index
    %c0_163 = arith.constant 0 : index
    %c0_164 = arith.constant 0 : index
    %209 = vector.load %arg4[%c11_162, %c0_163, %c0_164] : memref<27x8x512xf32, #tpu.memory_space<vmem>>, vector<1x8x512xf32>
    %210 = vector.shape_cast %209 : vector<1x8x512xf32> to vector<8x512xf32>
    %211 = arith.mulf %208, %210 : vector<8x512xf32>
    %c88_165 = arith.constant 88 : index
    %c0_166 = arith.constant 0 : index
    %212 = vector.load %arg6[%c88_165, %c0_166] : memref<216x512xf32, #tpu.memory_space<vmem>>, vector<8x512xf32>
    tpu.vector_store %arg6[%c88_165, %c0_166], %211 {strides = array<i32>} : memref<216x512xf32, #tpu.memory_space<vmem>>, vector<8x512xf32>,
    %c1_i32_167 = arith.constant 1 : i32
    %213 = tpu.dynamic_rotate %152 by %c1_i32_167 dim 1 : vector<8x512xf32>, i32 -> vector<8x512xf32>
    %c12_168 = arith.constant 12 : index
    %c0_169 = arith.constant 0 : index
    %c0_170 = arith.constant 0 : index
    %214 = vector.load %arg4[%c12_168, %c0_169, %c0_170] : memref<27x8x512xf32, #tpu.memory_space<vmem>>, vector<1x8x512xf32>
    %215 = vector.shape_cast %214 : vector<1x8x512xf32> to vector<8x512xf32>
    %216 = arith.mulf %213, %215 : vector<8x512xf32>
    %c96_171 = arith.constant 96 : index
    %c0_172 = arith.constant 0 : index
    %217 = vector.load %arg6[%c96_171, %c0_172] : memref<216x512xf32, #tpu.memory_space<vmem>>, vector<8x512xf32>
    tpu.vector_store %arg6[%c96_171, %c0_172], %216 {strides = array<i32>} : memref<216x512xf32, #tpu.memory_space<vmem>>, vector<8x512xf32>,
    %c104_173 = arith.constant 104 : index
    %c0_174 = arith.constant 0 : index
    %218 = vector.load %arg6[%c104_173, %c0_174] : memref<216x512xf32, #tpu.memory_space<vmem>>, vector<8x512xf32>
    tpu.vector_store %arg6[%c104_173, %c0_174], %152 {strides = array<i32>} : memref<216x512xf32, #tpu.memory_space<vmem>>, vector<8x512xf32>,
    %c511_i32_175 = arith.constant 511 : i32
    %219 = tpu.dynamic_rotate %152 by %c511_i32_175 dim 1 : vector<8x512xf32>, i32 -> vector<8x512xf32>
    %c14_176 = arith.constant 14 : index
    %c0_177 = arith.constant 0 : index
    %c0_178 = arith.constant 0 : index
    %220 = vector.load %arg4[%c14_176, %c0_177, %c0_178] : memref<27x8x512xf32, #tpu.memory_space<vmem>>, vector<1x8x512xf32>
    %221 = vector.shape_cast %220 : vector<1x8x512xf32> to vector<8x512xf32>
    %222 = arith.mulf %219, %221 : vector<8x512xf32>
    %c112_179 = arith.constant 112 : index
    %c0_180 = arith.constant 0 : index
    %223 = vector.load %arg6[%c112_179, %c0_180] : memref<216x512xf32, #tpu.memory_space<vmem>>, vector<8x512xf32>
    tpu.vector_store %arg6[%c112_179, %c0_180], %222 {strides = array<i32>} : memref<216x512xf32, #tpu.memory_space<vmem>>, vector<8x512xf32>,
    %c505_i32_181 = arith.constant 505 : i32
    %224 = tpu.dynamic_rotate %152 by %c505_i32_181 dim 1 : vector<8x512xf32>, i32 -> vector<8x512xf32>
    %c15_182 = arith.constant 15 : index
    %c0_183 = arith.constant 0 : index
    %c0_184 = arith.constant 0 : index
    %225 = vector.load %arg4[%c15_182, %c0_183, %c0_184] : memref<27x8x512xf32, #tpu.memory_space<vmem>>, vector<1x8x512xf32>
    %226 = vector.shape_cast %225 : vector<1x8x512xf32> to vector<8x512xf32>
    %227 = arith.mulf %224, %226 : vector<8x512xf32>
    %c120_185 = arith.constant 120 : index
    %c0_186 = arith.constant 0 : index
    %228 = vector.load %arg6[%c120_185, %c0_186] : memref<216x512xf32, #tpu.memory_space<vmem>>, vector<8x512xf32>
    tpu.vector_store %arg6[%c120_185, %c0_186], %227 {strides = array<i32>} : memref<216x512xf32, #tpu.memory_space<vmem>>, vector<8x512xf32>,
    %c504_i32_187 = arith.constant 504 : i32
    %229 = tpu.dynamic_rotate %152 by %c504_i32_187 dim 1 : vector<8x512xf32>, i32 -> vector<8x512xf32>
    %c16_188 = arith.constant 16 : index
    %c0_189 = arith.constant 0 : index
    %c0_190 = arith.constant 0 : index
    %230 = vector.load %arg4[%c16_188, %c0_189, %c0_190] : memref<27x8x512xf32, #tpu.memory_space<vmem>>, vector<1x8x512xf32>
    %231 = vector.shape_cast %230 : vector<1x8x512xf32> to vector<8x512xf32>
    %232 = arith.mulf %229, %231 : vector<8x512xf32>
    %c128_191 = arith.constant 128 : index
    %c0_192 = arith.constant 0 : index
    %233 = vector.load %arg6[%c128_191, %c0_192] : memref<216x512xf32, #tpu.memory_space<vmem>>, vector<8x512xf32>
    tpu.vector_store %arg6[%c128_191, %c0_192], %232 {strides = array<i32>} : memref<216x512xf32, #tpu.memory_space<vmem>>, vector<8x512xf32>,
    %c503_i32_193 = arith.constant 503 : i32
    %234 = tpu.dynamic_rotate %152 by %c503_i32_193 dim 1 : vector<8x512xf32>, i32 -> vector<8x512xf32>
    %c17_194 = arith.constant 17 : index
    %c0_195 = arith.constant 0 : index
    %c0_196 = arith.constant 0 : index
    %235 = vector.load %arg4[%c17_194, %c0_195, %c0_196] : memref<27x8x512xf32, #tpu.memory_space<vmem>>, vector<1x8x512xf32>
    %236 = vector.shape_cast %235 : vector<1x8x512xf32> to vector<8x512xf32>
    %237 = arith.mulf %234, %236 : vector<8x512xf32>
    %c136_197 = arith.constant 136 : index
    %c0_198 = arith.constant 0 : index
    %238 = vector.load %arg6[%c136_197, %c0_198] : memref<216x512xf32, #tpu.memory_space<vmem>>, vector<8x512xf32>
    tpu.vector_store %arg6[%c136_197, %c0_198], %237 {strides = array<i32>} : memref<216x512xf32, #tpu.memory_space<vmem>>, vector<8x512xf32>,
    %c457_i32_199 = arith.constant 457 : i32
    %239 = tpu.dynamic_rotate %152 by %c457_i32_199 dim 1 : vector<8x512xf32>, i32 -> vector<8x512xf32>
    %c18_200 = arith.constant 18 : index
    %c0_201 = arith.constant 0 : index
    %c0_202 = arith.constant 0 : index
    %240 = vector.load %arg4[%c18_200, %c0_201, %c0_202] : memref<27x8x512xf32, #tpu.memory_space<vmem>>, vector<1x8x512xf32>
    %241 = vector.shape_cast %240 : vector<1x8x512xf32> to vector<8x512xf32>
    %242 = arith.mulf %239, %241 : vector<8x512xf32>
    %c144_203 = arith.constant 144 : index
    %c0_204 = arith.constant 0 : index
    %243 = vector.load %arg6[%c144_203, %c0_204] : memref<216x512xf32, #tpu.memory_space<vmem>>, vector<8x512xf32>
    tpu.vector_store %arg6[%c144_203, %c0_204], %242 {strides = array<i32>} : memref<216x512xf32, #tpu.memory_space<vmem>>, vector<8x512xf32>,
    %c456_i32_205 = arith.constant 456 : i32
    %244 = tpu.dynamic_rotate %152 by %c456_i32_205 dim 1 : vector<8x512xf32>, i32 -> vector<8x512xf32>
    %c19_206 = arith.constant 19 : index
    %c0_207 = arith.constant 0 : index
    %c0_208 = arith.constant 0 : index
    %245 = vector.load %arg4[%c19_206, %c0_207, %c0_208] : memref<27x8x512xf32, #tpu.memory_space<vmem>>, vector<1x8x512xf32>
    %246 = vector.shape_cast %245 : vector<1x8x512xf32> to vector<8x512xf32>
    %247 = arith.mulf %244, %246 : vector<8x512xf32>
    %c152_209 = arith.constant 152 : index
    %c0_210 = arith.constant 0 : index
    %248 = vector.load %arg6[%c152_209, %c0_210] : memref<216x512xf32, #tpu.memory_space<vmem>>, vector<8x512xf32>
    tpu.vector_store %arg6[%c152_209, %c0_210], %247 {strides = array<i32>} : memref<216x512xf32, #tpu.memory_space<vmem>>, vector<8x512xf32>,
    %c455_i32_211 = arith.constant 455 : i32
    %249 = tpu.dynamic_rotate %152 by %c455_i32_211 dim 1 : vector<8x512xf32>, i32 -> vector<8x512xf32>
    %c20_212 = arith.constant 20 : index
    %c0_213 = arith.constant 0 : index
    %c0_214 = arith.constant 0 : index
    %250 = vector.load %arg4[%c20_212, %c0_213, %c0_214] : memref<27x8x512xf32, #tpu.memory_space<vmem>>, vector<1x8x512xf32>
    %251 = vector.shape_cast %250 : vector<1x8x512xf32> to vector<8x512xf32>
    %252 = arith.mulf %249, %251 : vector<8x512xf32>
    %c160_215 = arith.constant 160 : index
    %c0_216 = arith.constant 0 : index
    %253 = vector.load %arg6[%c160_215, %c0_216] : memref<216x512xf32, #tpu.memory_space<vmem>>, vector<8x512xf32>
    tpu.vector_store %arg6[%c160_215, %c0_216], %252 {strides = array<i32>} : memref<216x512xf32, #tpu.memory_space<vmem>>, vector<8x512xf32>,
    %c449_i32_217 = arith.constant 449 : i32
    %254 = tpu.dynamic_rotate %152 by %c449_i32_217 dim 1 : vector<8x512xf32>, i32 -> vector<8x512xf32>
    %c21_218 = arith.constant 21 : index
    %c0_219 = arith.constant 0 : index
    %c0_220 = arith.constant 0 : index
    %255 = vector.load %arg4[%c21_218, %c0_219, %c0_220] : memref<27x8x512xf32, #tpu.memory_space<vmem>>, vector<1x8x512xf32>
    %256 = vector.shape_cast %255 : vector<1x8x512xf32> to vector<8x512xf32>
    %257 = arith.mulf %254, %256 : vector<8x512xf32>
    %c168_221 = arith.constant 168 : index
    %c0_222 = arith.constant 0 : index
    %258 = vector.load %arg6[%c168_221, %c0_222] : memref<216x512xf32, #tpu.memory_space<vmem>>, vector<8x512xf32>
    tpu.vector_store %arg6[%c168_221, %c0_222], %257 {strides = array<i32>} : memref<216x512xf32, #tpu.memory_space<vmem>>, vector<8x512xf32>,
    %c448_i32_223 = arith.constant 448 : i32
    %259 = tpu.dynamic_rotate %152 by %c448_i32_223 dim 1 : vector<8x512xf32>, i32 -> vector<8x512xf32>
    %c22_224 = arith.constant 22 : index
    %c0_225 = arith.constant 0 : index
    %c0_226 = arith.constant 0 : index
    %260 = vector.load %arg4[%c22_224, %c0_225, %c0_226] : memref<27x8x512xf32, #tpu.memory_space<vmem>>, vector<1x8x512xf32>
    %261 = vector.shape_cast %260 : vector<1x8x512xf32> to vector<8x512xf32>
    %262 = arith.mulf %259, %261 : vector<8x512xf32>
    %c176_227 = arith.constant 176 : index
    %c0_228 = arith.constant 0 : index
    %263 = vector.load %arg6[%c176_227, %c0_228] : memref<216x512xf32, #tpu.memory_space<vmem>>, vector<8x512xf32>
    tpu.vector_store %arg6[%c176_227, %c0_228], %262 {strides = array<i32>} : memref<216x512xf32, #tpu.memory_space<vmem>>, vector<8x512xf32>,
    %c447_i32_229 = arith.constant 447 : i32
    %264 = tpu.dynamic_rotate %152 by %c447_i32_229 dim 1 : vector<8x512xf32>, i32 -> vector<8x512xf32>
    %c23_230 = arith.constant 23 : index
    %c0_231 = arith.constant 0 : index
    %c0_232 = arith.constant 0 : index
    %265 = vector.load %arg4[%c23_230, %c0_231, %c0_232] : memref<27x8x512xf32, #tpu.memory_space<vmem>>, vector<1x8x512xf32>
    %266 = vector.shape_cast %265 : vector<1x8x512xf32> to vector<8x512xf32>
    %267 = arith.mulf %264, %266 : vector<8x512xf32>
    %c184_233 = arith.constant 184 : index
    %c0_234 = arith.constant 0 : index
    %268 = vector.load %arg6[%c184_233, %c0_234] : memref<216x512xf32, #tpu.memory_space<vmem>>, vector<8x512xf32>
    tpu.vector_store %arg6[%c184_233, %c0_234], %267 {strides = array<i32>} : memref<216x512xf32, #tpu.memory_space<vmem>>, vector<8x512xf32>,
    %c441_i32_235 = arith.constant 441 : i32
    %269 = tpu.dynamic_rotate %152 by %c441_i32_235 dim 1 : vector<8x512xf32>, i32 -> vector<8x512xf32>
    %c24_236 = arith.constant 24 : index
    %c0_237 = arith.constant 0 : index
    %c0_238 = arith.constant 0 : index
    %270 = vector.load %arg4[%c24_236, %c0_237, %c0_238] : memref<27x8x512xf32, #tpu.memory_space<vmem>>, vector<1x8x512xf32>
    %271 = vector.shape_cast %270 : vector<1x8x512xf32> to vector<8x512xf32>
    %272 = arith.mulf %269, %271 : vector<8x512xf32>
    %c192_239 = arith.constant 192 : index
    %c0_240 = arith.constant 0 : index
    %273 = vector.load %arg6[%c192_239, %c0_240] : memref<216x512xf32, #tpu.memory_space<vmem>>, vector<8x512xf32>
    tpu.vector_store %arg6[%c192_239, %c0_240], %272 {strides = array<i32>} : memref<216x512xf32, #tpu.memory_space<vmem>>, vector<8x512xf32>,
    %c440_i32_241 = arith.constant 440 : i32
    %274 = tpu.dynamic_rotate %152 by %c440_i32_241 dim 1 : vector<8x512xf32>, i32 -> vector<8x512xf32>
    %c25_242 = arith.constant 25 : index
    %c0_243 = arith.constant 0 : index
    %c0_244 = arith.constant 0 : index
    %275 = vector.load %arg4[%c25_242, %c0_243, %c0_244] : memref<27x8x512xf32, #tpu.memory_space<vmem>>, vector<1x8x512xf32>
    %276 = vector.shape_cast %275 : vector<1x8x512xf32> to vector<8x512xf32>
    %277 = arith.mulf %274, %276 : vector<8x512xf32>
    %c200_245 = arith.constant 200 : index
    %c0_246 = arith.constant 0 : index
    %278 = vector.load %arg6[%c200_245, %c0_246] : memref<216x512xf32, #tpu.memory_space<vmem>>, vector<8x512xf32>
    tpu.vector_store %arg6[%c200_245, %c0_246], %277 {strides = array<i32>} : memref<216x512xf32, #tpu.memory_space<vmem>>, vector<8x512xf32>,
    %c439_i32_247 = arith.constant 439 : i32
    %279 = tpu.dynamic_rotate %152 by %c439_i32_247 dim 1 : vector<8x512xf32>, i32 -> vector<8x512xf32>
    %c26_248 = arith.constant 26 : index
    %c0_249 = arith.constant 0 : index
    %c0_250 = arith.constant 0 : index
    %280 = vector.load %arg4[%c26_248, %c0_249, %c0_250] : memref<27x8x512xf32, #tpu.memory_space<vmem>>, vector<1x8x512xf32>
    %281 = vector.shape_cast %280 : vector<1x8x512xf32> to vector<8x512xf32>
    %282 = arith.mulf %279, %281 : vector<8x512xf32>
    %c208_251 = arith.constant 208 : index
    %c0_252 = arith.constant 0 : index
    %283 = vector.load %arg6[%c208_251, %c0_252] : memref<216x512xf32, #tpu.memory_space<vmem>>, vector<8x512xf32>
    tpu.vector_store %arg6[%c208_251, %c0_252], %282 {strides = array<i32>} : memref<216x512xf32, #tpu.memory_space<vmem>>, vector<8x512xf32>,
    %c0_253 = arith.constant 0 : index
    %c0_254 = arith.constant 0 : index
    %284 = vector.load %arg3[%c0_253, %c0_254] : memref<8x216xf32, #tpu.memory_space<vmem>>, vector<8x216xf32>
    %c0_255 = arith.constant 0 : index
    %c0_256 = arith.constant 0 : index
    %285 = vector.load %arg6[%c0_255, %c0_256] : memref<216x512xf32, #tpu.memory_space<vmem>>, vector<216x512xf32>
    %cst_257 = arith.constant dense<0.000000e+00> : vector<8x512xf32>
    %286 = tpu.matmul %284, %285, %cst_257 {dimension_numbers = #tpu.dot_dimension_numbers<[1], [0], [0], [1], [0, 0, 1, 1], [], []>, precision = #tpu.contract_precision<fp32>} : vector<8x216xf32>, vector<216x512xf32>, vector<8x512xf32> -> vector<8x512xf32>
    %cst_258 = arith.constant dense<0.000000e+00> : vector<8xf32>
    %287 = vector.multi_reduction <add>, %286, %cst_258 [1] : vector<8x512xf32> to vector<8xf32>
    %288 = vector.shape_cast %287 : vector<8xf32> to vector<8x1xf32>
    %cst_259 = arith.constant 5.120000e+02 : f32
    %289 = vector.broadcast %cst_259 : f32 to vector<8x1xf32>
    %290 = arith.divf %288, %289 : vector<8x1xf32>
    %291 = vector.broadcast %290 : vector<8x1xf32> to vector<8x512xf32>
    %292 = arith.subf %286, %291 : vector<8x512xf32>
    %293 = arith.mulf %292, %292 : vector<8x512xf32>
    %cst_260 = arith.constant dense<0.000000e+00> : vector<8xf32>
    %294 = vector.multi_reduction <add>, %293, %cst_260 [1] : vector<8x512xf32> to vector<8xf32>
    %295 = vector.shape_cast %294 : vector<8xf32> to vector<8x1xf32>
    %cst_261 = arith.constant 5.120000e+02 : f32
    %296 = vector.broadcast %cst_261 : f32 to vector<8x1xf32>
    %297 = arith.divf %295, %296 : vector<8x1xf32>
    %cst_262 = arith.constant 9.99999974E-6 : f32
    %298 = vector.broadcast %cst_262 : f32 to vector<8x1xf32>
    %299 = arith.addf %297, %298 : vector<8x1xf32>
    %300 = math.rsqrt %299 : vector<8x1xf32>
    %301 = vector.broadcast %300 : vector<8x1xf32> to vector<8x512xf32>
    %302 = arith.mulf %292, %301 : vector<8x512xf32>
    %303 = arith.addf %302, %0 : vector<8x512xf32>
    %cst_263 = arith.constant 0.000000e+00 : f32
    %304 = vector.broadcast %cst_263 : f32 to vector<8x512xf32>
    %305 = arith.maximumf %303, %304 : vector<8x512xf32>
    %c0_264 = arith.constant 0 : index
    %c0_265 = arith.constant 0 : index
    %306 = vector.load %arg5[%c0_264, %c0_265] : memref<8x512xf32, #tpu.memory_space<vmem>>, vector<8x512xf32>
    tpu.vector_store %arg5[%c0_264, %c0_265], %305 {strides = array<i32>} : memref<8x512xf32, #tpu.memory_space<vmem>>, vector<8x512xf32>,
    return
  }
  func.func @transform_0(%arg0: i32) -> (i32, i32) {
    %c0_i32 = arith.constant 0 : i32
    %c0_i32_0 = arith.constant 0 : i32
    return %arg0, %c0_i32 : i32, i32
  }
  func.func @transform_1(%arg0: i32) -> (i32, i32) {
    %c0_i32 = arith.constant 0 : i32
    %c0_i32_0 = arith.constant 0 : i32
    %c0_i32_1 = arith.constant 0 : i32
    return %c0_i32, %c0_i32_0 : i32, i32
  }
  func.func @transform_2(%arg0: i32) -> (i32, i32) {
    %c0_i32 = arith.constant 0 : i32
    %c0_i32_0 = arith.constant 0 : i32
    %c0_i32_1 = arith.constant 0 : i32
    return %c0_i32, %c0_i32_0 : i32, i32
  }
  func.func @transform_3(%arg0: i32) -> (i32, i32, i32) {
    %c0_i32 = arith.constant 0 : i32
    %c0_i32_0 = arith.constant 0 : i32
    %c0_i32_1 = arith.constant 0 : i32
    %c0_i32_2 = arith.constant 0 : i32
    return %c0_i32, %c0_i32_0, %c0_i32_1 : i32, i32, i32
  }
  func.func @transform_4(%arg0: i32) -> (i32, i32) {
    %c0_i32 = arith.constant 0 : i32
    %c0_i32_0 = arith.constant 0 : i32
    return %arg0, %c0_i32 : i32, i32
  }
}

</mosaic_0001>

<bundles_post_ra>
// kernel: basic_block_forward.1
= control target key start
LH: loop header
LB: loop body
LE: loop exit
PB: predicated region body
PF: predicated region fallthrough
CT: control target
= control target key end

     0   :  { %s7837_s15 = smov 0   ;;  %s12739_s0 = inlined_call_operand.vmem [shape: f32[16,512], index: 0, kind: input, shape index: {}]   ;;  %s12740_s1 = inlined_call_operand.vmem [shape: f32[8,216], index: 1, kind: input, shape index: {}]   ;;  %s12741_s2 = inlined_call_operand.vmem [shape: f32[8,216], index: 2, kind: input, shape index: {}]   ;;  %s12742_s3 = inlined_call_operand.vmem [shape: f32[27,8,512], index: 3, kind: input, shape index: {}]   ;;  %s12743_s4 = inlined_call_operand.vmem [shape: f32[16,512], index: 4, kind: output, shape index: {}]  }
   0x1 LB: > { %s6253_s16 = sadd.s32 4294967295, %s7793_s15   ;;  %p6257_p0 = scmp.ge.s32.totalorder %s7793_s15, 1  ;;  %s7793_s15 = sphi %s7837_s15, %s14_s15  }
   0x2   : > { %p162_p1 = scmp.lt.s32.totalorder %s7793_s15, 3 }
   0x4   : > { %p163_p2 = pnand %p6257_p0, %p162_p1 }
   0x6   : > { %166 = sbr.rel (%p163_p2) target bundleno = 2220 (0x8ac), region = 36 }
   0xd   : > { %p188_p3 = scmp.lt.s32.totalorder %s6253_s16, 1  ;;  %s7795_s21 = smov 72   ;;  %v210_v4 = vlaneseq  ;;  %v6263_v8 = vld [vmem:[%s12742_s3 + $0x28] sm:$0xff]  ;;  %v6330_v9 = vld [vmem:[%s12742_s3 + $0x260] sm:$0xff]  ;;  %v6333_v32 = vld [vmem:[%s12742_s3 + $0x278] sm:$0xff]  ;;  %vm876_vm10 = vcmask 719872  }
   0xe   : > { %s7796_s22 = smov 73   ;;  %s7797_s23 = smov 71   ;;  %v218_v10 = vld [vmem:[%s12742_s3 + $0x8] sm:$0xff]  ;;  %v6326_v11 = vld [vmem:[%s12742_s3 + $0x240] sm:$0xff]  ;;  %v6329_v37 = vld [vmem:[%s12742_s3 + $0x258] sm:$0xff] }
   0xf   : > { %s14955_s16 = smov (!%p188_p3, %s6253_s16), 1  ;;  %s7798_s24 = smov 65   ;;  %v7983_v5 = vand.u32 127, %v210_v4  ;;  %v6262_v23 = vld [vmem:[%s12742_s3 + $0x20] sm:$0xff]  ;;  %v6264_v39 = vld [vmem:[%s12742_s3 + $0x30] sm:$0xff]  ;;  %v6265_v42 = vld [vmem:[%s12742_s3 + $0x38] sm:$0xff] }
  0x10   : > { %s12744_s17 = sshll.u32 %s14955_s16, 5  ;;  %s7799_s25 = smov 64   ;;  %v217_v24 = vld [vmem:[%s12742_s3] sm:$0xff]  ;;  %v6331_v43 = vld [vmem:[%s12742_s3 + $0x268] sm:$0xff]  ;;  %v6332_v44 = vld [vmem:[%s12742_s3 + $0x270] sm:$0xff] }
  0x11   : > { %s7853_s20 = scalar_lea.vmem %s12739_s0, %s12744_s17  ;;  %s7800_s26 = smov 63   ;;  %13541 = vst [vmem:[#allocation3_spill] sm:$0xff] %v7983_v5  ;;  %vm237_vm0 = vcmp.lt.s32.totalorder %v7983_v5, 72  ;;  %vm212_vm1 = vcmp.lt.s32.totalorder %v7983_v5, 73  ;;  %vm263_vm2 = vcmp.lt.s32.totalorder %v7983_v5, 71  ;;  %vm289_vm3 = vcmp.lt.s32.totalorder %v7983_v5, 65 }
  0x12   : > { %v7856_v0 = vld [vmem:[%s7853_s20] sm:$0xff]  ;;  %v7863_v1 = vld [vmem:[%s7853_s20 + $0x8] sm:$0xff]  ;;  %v7870_v2 = vld [vmem:[%s7853_s20 + $0x18] sm:$0xff]  ;;  %s7801_s27 = smov 57   ;;  %s7802_s28 = smov 56   ;;  %vm315_vm4 = vcmp.lt.s32.totalorder %v7983_v5, 64 }
  0x13   : > { %229 = vrot.lane.b32.xlu1 %v7856_v0, %s7795_s21  ;;  %202 = vrot.lane.b32.xlu0 %v7856_v0, %s7796_s22  ;;  %v7877_v3 = vld [vmem:[%s7853_s20 + $0x10] sm:$0xff]  ;;  %s7803_s29 = smov 55   ;;  %s7804_s30 = smov 9   ;;  %v12752_v14 = vand.u32 4294901760, %v7863_v1  ;;  %v12751_v17 = vand.u32 4294901760, %v7870_v2  ;;  %v12750_v18 = vand.u32 4294901760, %v7856_v0 }
  0x14   : > { %s7805_s5 = smov 8   ;;  %s7806_s6 = smov 7   ;;  %v12749_v25 = vand.u32 4294901760, %v7877_v3  ;;  %v219_v51 = vld [vmem:[%s12742_s3 + $0x10] sm:$0xff]  ;;  %v220_v52 = vld [vmem:[%s12742_s3 + $0x18] sm:$0xff]  ;;  %v6327_v53 = vld [vmem:[%s12742_s3 + $0x248] sm:$0xff] }
  0x15   : > { %s7807_s7 = smov 1   ;;  %s7808_s8 = smov 127   ;;  %v8038_v35 = vsub.f32 %v7863_v1, %v12752_v14  ;;  %v8052_v40 = vsub.f32 %v7870_v2, %v12751_v17  ;;  %v8057_v41 = vsub.f32 %v7856_v0, %v12750_v18  ;;  %vm341_vm5 = vcmp.lt.s32.totalorder %v7983_v5, 63  ;;  %v6268_v18 = vld [vmem:[%s12742_s3 + $0x50] sm:$0xff]  ;;  %v6269_v17 = vld [vmem:[%s12742_s3 + $0x58] sm:$0xff] }
  0x16   : > { %s7809_s9 = smov 121   ;;  %s12747_s17 = smov 120   ;;  %v8096_v57 = vsub.f32 %v7877_v3, %v12749_v25  ;;  %vm367_vm6 = vcmp.lt.s32.totalorder %v7983_v5, 57  ;;  %vm393_vm7 = vcmp.lt.s32.totalorder %v7983_v5, 56  ;;  %vm419_vm8 = vcmp.lt.s32.totalorder %v7983_v5, 55 }
  0x17   : > { %231 = vrot.lane.b32.xlu1 %v7863_v1, %s7795_s21  ;;  %204 = vrot.lane.b32.xlu0 %v7863_v1, %s7796_s22  ;;  %13542 = vst [vmem:[#allocation4_spill] sm:$0xff] %v8038_v35  ;;  %s12745_s11 = smov 119   ;;  %13543 = vst [vmem:[#allocation5_spill] sm:$0xff] %v8052_v40  ;;  %vm445_vm9 = vcmp.lt.s32.totalorder %v7983_v5, 9  ;;  %vm471_vm11 = vcmp.lt.s32.totalorder %v7983_v5, 8  ;;  %vm12934_vm12 = vcmp.lt.s32.totalorder %v7983_v5, 7 }
  0x18   : > { %13544 = vst [vmem:[#allocation6_spill] sm:$0xff] %v8057_v41  ;;  %13549 = vst [vmem:[#allocation11_spill] sm:$0xff] %v8096_v57  ;;  %vm12917_vm13 = vcmp.lt.s32.totalorder %v7983_v5, 1  ;;  %vm553_vm14 = vcmp.lt.s32.totalorder %v7983_v5, 127  ;;  %vm579_vm15 = vcmp.lt.s32.totalorder %v7983_v5, 121  ;;  %s14218_s14 = smov 119  }
  0x1b   : > { %235 = vrot.lane.b32.xlu1 %v7870_v2, %s7795_s21  ;;  %208 = vrot.lane.b32.xlu0 %v7870_v2, %s7796_s22 }
  0x1f   : > { %233 = vrot.lane.b32.xlu1 %v7877_v3, %s7795_s21  ;;  %206 = vrot.lane.b32.xlu0 %v7877_v3, %s7796_s22 }
  0x23   : > { %257 = vrot.lane.b32.xlu1 %v7863_v1, %s7797_s23  ;;  %255 = vrot.lane.b32.xlu0 %v7856_v0, %s7797_s23 }
  0x27   : > { %283 = vrot.lane.b32.xlu1 %v7863_v1, %s7798_s24  ;;  %281 = vrot.lane.b32.xlu0 %v7856_v0, %s7798_s24 }
  0x2b   : > { %287 = vrot.lane.b32.xlu1 %v7870_v2, %s7798_s24  ;;  %261 = vrot.lane.b32.xlu0 %v7870_v2, %s7797_s23 }
  0x2f   : > { %285 = vrot.lane.b32.xlu1 %v7877_v3, %s7798_s24  ;;  %259 = vrot.lane.b32.xlu0 %v7877_v3, %s7797_s23 }
  0x33   : > { %309 = vrot.lane.b32.xlu1 %v7863_v1, %s7799_s25  ;;  %307 = vrot.lane.b32.xlu0 %v7856_v0, %s7799_s25 }
  0x37   : > { %335 = vrot.lane.b32.xlu1 %v7863_v1, %s7800_s26  ;;  %333 = vrot.lane.b32.xlu0 %v7856_v0, %s7800_s26 }
  0x3b   : > { %339 = vrot.lane.b32.xlu1 %v7870_v2, %s7800_s26  ;;  %313 = vrot.lane.b32.xlu0 %v7870_v2, %s7799_s25 }
  0x3f   : > { %337 = vrot.lane.b32.xlu1 %v7877_v3, %s7800_s26  ;;  %311 = vrot.lane.b32.xlu0 %v7877_v3, %s7799_s25 }
  0x43   : > { %361 = vrot.lane.b32.xlu1 %v7863_v1, %s7801_s27  ;;  %359 = vrot.lane.b32.xlu0 %v7856_v0, %s7801_s27 }
  0x47   : > { %387 = vrot.lane.b32.xlu1 %v7863_v1, %s7802_s28  ;;  %385 = vrot.lane.b32.xlu0 %v7856_v0, %s7802_s28 }
  0x4b   : > { %391 = vrot.lane.b32.xlu1 %v7870_v2, %s7802_s28  ;;  %365 = vrot.lane.b32.xlu0 %v7870_v2, %s7801_s27 }
  0x4f   : > { %389 = vrot.lane.b32.xlu1 %v7877_v3, %s7802_s28  ;;  %363 = vrot.lane.b32.xlu0 %v7877_v3, %s7801_s27 }
  0x53   : > { %413 = vrot.lane.b32.xlu1 %v7863_v1, %s7803_s29  ;;  %411 = vrot.lane.b32.xlu0 %v7856_v0, %s7803_s29 }
  0x57   : > { %439 = vrot.lane.b32.xlu1 %v7863_v1, %s7804_s30  ;;  %437 = vrot.lane.b32.xlu0 %v7856_v0, %s7804_s30 }
  0x5b   : > { %443 = vrot.lane.b32.xlu1 %v7870_v2, %s7804_s30  ;;  %417 = vrot.lane.b32.xlu0 %v7870_v2, %s7803_s29 }
  0x5f   : > { %441 = vrot.lane.b32.xlu1 %v7877_v3, %s7804_s30  ;;  %415 = vrot.lane.b32.xlu0 %v7877_v3, %s7803_s29 }
  0x63   : > { %465 = vrot.lane.b32.xlu1 %v7863_v1, %s7805_s5  ;;  %463 = vrot.lane.b32.xlu0 %v7856_v0, %s7805_s5 }
  0x67   : > { %491 = vrot.lane.b32.xlu1 %v7863_v1, %s7806_s6  ;;  %489 = vrot.lane.b32.xlu0 %v7856_v0, %s7806_s6 }
  0x6b   : > { %495 = vrot.lane.b32.xlu1 %v7870_v2, %s7806_s6  ;;  %469 = vrot.lane.b32.xlu0 %v7870_v2, %s7805_s5 }
  0x6f   : > { %493 = vrot.lane.b32.xlu1 %v7877_v3, %s7806_s6  ;;  %467 = vrot.lane.b32.xlu0 %v7877_v3, %s7805_s5 }
  0x73   : > { %517 = vrot.lane.b32.xlu1 %v7863_v1, %s7807_s7  ;;  %515 = vrot.lane.b32.xlu0 %v7856_v0, %s7807_s7 }
  0x77   : > { %519 = vrot.lane.b32.xlu1 %v7877_v3, %s7807_s7  ;;  %521 = vrot.lane.b32.xlu0 %v7870_v2, %s7807_s7 }
  0x7b   : > { %549 = vrot.lane.b32.xlu1 %v7877_v3, %s7808_s8  ;;  %547 = vrot.lane.b32.xlu0 %v7863_v1, %s7808_s8 }
  0x7f   : > { %575 = vrot.lane.b32.xlu1 %v7877_v3, %s7809_s9  ;;  %573 = vrot.lane.b32.xlu0 %v7863_v1, %s7809_s9 }
  0x83   : > { %571 = vrot.lane.b32.xlu1 %v7856_v0, %s7809_s9  ;;  %545 = vrot.lane.b32.xlu0 %v7856_v0, %s7808_s8 }
  0x85   : > { %v230_v6 = vpop.permute.xlu1 %229  ;;  %v203_v7 = vpop.permute.xlu0 %202 }
  0x87   : > { %577 = vrot.lane.b32.xlu1 %v7870_v2, %s7809_s9  ;;  %551 = vrot.lane.b32.xlu0 %v7870_v2, %s7808_s8 }
  0x89   : > { %v232_v12 = vpop.permute.xlu1 %231  ;;  %v205_v13 = vpop.permute.xlu0 %204 }
  0x8a   : > { %v240_v15 = vsel %vm237_vm0, %v230_v6, %v232_v12  ;;  %v215_v16 = vsel %vm212_vm1, %v203_v7, %v205_v13 }
  0x8b   : > { %v248_v19 = vmul.f32 %v6263_v8, %v240_v15  ;;  %v8010_v20 = vmul.f32 %v6330_v9, %v240_v15  ;;  %v222_v21 = vmul.f32 %v218_v10, %v215_v16  ;;  %v8012_v22 = vmul.f32 %v6326_v11, %v215_v16  ;;  %601 = vrot.lane.b32.xlu1 %v7877_v3, %s12747_s17  ;;  %v6267_v11 = vld [vmem:[%s12742_s3 + $0x48] sm:$0xff] }
  0x8c   : > { %599 = vrot.lane.b32.xlu0 %v7863_v1, %s12747_s17 }
  0x8d   : > { %v236_v26 = vpop.permute.xlu1 %235  ;;  %v209_v27 = vpop.permute.xlu0 %208  ;;  %v880_v28 = vand.u32 4294901760, %v222_v21  ;;  %v884_v29 = vand.u32 4294901760, %v248_v19  ;;  %v954_v30 = vand.u32 4294901760, %v8012_v22  ;;  %v958_v31 = vand.u32 4294901760, %v8010_v20 }
  0x8e   : > { %v241_v33 = vsel %vm237_vm0, %v236_v26, %v230_v6  ;;  %v216_v34 = vsel %vm212_vm1, %v209_v27, %v203_v7 }
  0x8f   : > { %v247_v36 = vmul.f32 %v6262_v23, %v241_v33  ;;  %v221_v38 = vmul.f32 %v217_v24, %v216_v34  ;;  %627 = vrot.lane.b32.xlu1 %v7877_v3, %s12745_s11  ;;  %v8070_v45 = vpack.c.bf16 %v884_v29, %v880_v28  ;;  %v8072_v46 = vsub.f32 %v222_v21, %v880_v28  ;;  %v6328_v24 = vld [vmem:[%s12742_s3 + $0x250] sm:$0xff] }
  0x90   : > { %625 = vrot.lane.b32.xlu0 %v7863_v1, %s12745_s11  ;;  %v8074_v47 = vsub.f32 %v248_v19, %v884_v29  ;;  %v8080_v48 = vpack.c.bf16 %v958_v31, %v954_v30  ;;  %v8082_v49 = vmul.f32 %v6333_v32, %v241_v33  ;;  %v8107_v62 = vmul.f32 %v6329_v37, %v216_v34 }
  0x91   : > { %13545 = vst [vmem:[#allocation7_spill] sm:$0xff] %v8070_v45  ;;  %13546 = vst [vmem:[#allocation8_spill] sm:$0xff] %v8072_v46  ;;  %v234_v50 = vpop.permute.xlu1 %233  ;;  %v207_v54 = vpop.permute.xlu0 %206  ;;  %v882_v55 = vand.u32 4294901760, %v221_v38  ;;  %v886_v56 = vand.u32 4294901760, %v247_v36  ;;  %6467 = vmatprep.subr.bf16.mxu0 %v8070_v45 }
  0x92   : > { %13547 = vst [vmem:[#allocation9_spill] sm:$0xff] %v8074_v47  ;;  %13548 = vst [vmem:[#allocation10_spill] sm:$0xff] %v8080_v48  ;;  %v238_v58 = vsel %vm237_vm0, %v234_v50, %v236_v26  ;;  %v239_v59 = vsel %vm237_vm0, %v232_v12, %v234_v50  ;;  %v213_v60 = vsel %vm212_vm1, %v207_v54, %v209_v27  ;;  %v6334_v12 = vld [vmem:[%s12742_s3 + $0x280] sm:$0xff] }
  0x93   : > { %v214_v61 = vsel %vm212_vm1, %v205_v13, %v207_v54  ;;  %v249_v63 = vmul.f32 %v6264_v39, %v239_v59  ;;  %v250_v4 = vmul.f32 %v6265_v42, %v238_v58  ;;  %v668_v6 = vmul.f32 %v6331_v43, %v239_v59  ;;  %623 = vrot.lane.b32.xlu1 %v7856_v0, %s12745_s11  ;;  %v6271_v39 = vld [vmem:[%s12742_s3 + $0x68] sm:$0xff]  ;;  %v6338_v42 = vld [vmem:[%s12742_s3 + $0x2a0] sm:$0xff] }
  0x94   : > { %v8111_v7 = vmul.f32 %v6332_v44, %v238_v58  ;;  %v223_v8 = vmul.f32 %v219_v51, %v214_v61  ;;  %v224_v9 = vmul.f32 %v220_v52, %v213_v60  ;;  %v655_v10 = vmul.f32 %v6327_v53, %v214_v61  ;;  %597 = vrot.lane.b32.xlu0 %v7856_v0, %s12747_s17 }
  0x95   : > { %v8121_v13 = vpop.permute.xlu1 %257  ;;  %v8123_v15 = vpack.c.bf16 %v886_v56, %v882_v55  ;;  %v8125_v16 = vsub.f32 %v221_v38, %v882_v55  ;;  %v8127_v19 = vsub.f32 %v247_v36, %v886_v56  ;;  %v256_v21 = vpop.permute.xlu0 %255  ;;  %v2038_v23 = vand.u32 4294901760, %v250_v4 }
  0x96   : > { %v266_v26 = vsel %vm263_vm2, %v256_v21, %v8121_v13  ;;  %v2034_v27 = vand.u32 4294901760, %v224_v9  ;;  %v2036_v28 = vand.u32 4294901760, %v223_v8  ;;  %v2040_v29 = vand.u32 4294901760, %v249_v63 }
  0x97   : > { %13550 = vst [vmem:[#allocation12_spill] sm:$0xff] %v8123_v15  ;;  %13551 = vst [vmem:[#allocation13_spill] sm:$0xff] %v8125_v16  ;;  %6469 = vmatpush1.bf16.msra.mxu0 %v8123_v15  ;;  %v274_v32 = vmul.f32 %v6267_v11, %v266_v26  ;;  %v680_v33 = vmul.f32 %v6334_v12, %v266_v26  ;;  %629 = vrot.lane.b32.xlu1 %v7870_v2, %s12745_s11  ;;  %v952_v36 = vand.u32 4294901760, %v655_v10  ;;  %v6266_v11 = vld [vmem:[%s12742_s3 + $0x40] sm:$0xff] }
  0x98   : > { %13552 = vst [vmem:[#allocation14_spill] sm:$0xff] %v8127_v19  ;;  %v8138_v34 = vsub.f32 %v250_v4, %v2038_v23  ;;  %603 = vrot.lane.b32.xlu0 %v7870_v2, %s12747_s17  ;;  %v8142_v37 = vpack.c.bf16 %v2038_v23, %v2034_v27  ;;  %v8144_v38 = vsub.f32 %v224_v9, %v2034_v27  ;;  %v956_v55 = vand.u32 4294901760, %v668_v6  ;;  %v6270_v9 = vld [vmem:[%s12742_s3 + $0x60] sm:$0xff] }
  0x99   : > { %v8152_v43 = vpack.c.bf16 %v2040_v29, %v2036_v28  ;;  %v8154_v44 = vsub.f32 %v223_v8, %v2036_v28  ;;  %v8156_v50 = vmul.f32 %v6328_v24, %v213_v60  ;;  %v284_v51 = vpop.permute.xlu1 %283  ;;  %v282_v52 = vpop.permute.xlu0 %281  ;;  %v8158_v53 = vsub.f32 %v249_v63, %v2040_v29 }
  0x9a   : > { %13553 = vst [vmem:[#allocation15_spill] sm:$0xff] %v8138_v34  ;;  %13554 = vst [vmem:[#allocation16_spill] sm:$0xff] %v8142_v37  ;;  %v888_v54 = vand.u32 4294901760, %v274_v32  ;;  %6779 = vmatprep.subr.bf16.mxu1 %v8142_v37  ;;  %v292_v56 = vsel %vm289_vm3, %v282_v52, %v284_v51  ;;  %v2106_v58 = vand.u32 4294901760, %v8107_v62  ;;  %v2110_v59 = vand.u32 4294901760, %v8082_v49 }
  0x9b   : > { %13555 = vst [vmem:[#allocation17_spill] sm:$0xff] %v8144_v38  ;;  %13556 = vst [vmem:[#allocation18_spill] sm:$0xff] %v8152_v43  ;;  %v962_v61 = vand.u32 4294901760, %v680_v33  ;;  %v300_v4 = vmul.f32 %v6271_v39, %v292_v56  ;;  %v693_v8 = vmul.f32 %v6338_v42, %v292_v56  ;;  %6781 = vmatpush1.bf16.msra.mxu1 %v8152_v43  ;;  %v6337_v42 = vld [vmem:[%s12742_s3 + $0x298] sm:$0xff] }
  0x9c   : > { %13557 = vst [vmem:[#allocation19_spill] sm:$0xff] %v8154_v44  ;;  %13558 = vst [vmem:[#allocation20_spill] sm:$0xff] %v8158_v53  ;;  %v8166_v60 = vsub.f32 %v274_v32, %v888_v54  ;;  %v8169_v63 = vpack.c.bf16 %v956_v55, %v952_v36  ;;  %v8177_v12 = vsub.f32 %v655_v10, %v952_v36  ;;  %v12760_v10 = vand.u32 4294901760, %v8156_v50 }
  0x9d   : > { %v8182_v23 = vsub.f32 %v8012_v22, %v954_v30  ;;  %v8187_v24 = vsub.f32 %v8010_v20, %v958_v31  ;;  %v8189_v26 = vpack.c.bf16 %v2110_v59, %v2106_v58  ;;  %v288_v27 = vpop.permute.xlu1 %287  ;;  %v262_v28 = vpop.permute.xlu0 %261  ;;  %v892_v29 = vand.u32 4294901760, %v300_v4  ;;  %v6341_v22 = vld [vmem:[%s12742_s3 + $0x2b8] sm:$0xff] }
  0x9e   : > { %13559 = vst [vmem:[#allocation21_spill] sm:$0xff] %v8166_v60  ;;  %13560 = vst [vmem:[#allocation22_spill] sm:$0xff] %v8169_v63  ;;  %v8191_v32 = vsub.f32 %v668_v6, %v956_v55  ;;  %v966_v39 = vand.u32 4294901760, %v693_v8  ;;  %v293_v30 = vsel %vm289_vm3, %v288_v27, %v282_v52  ;;  %v267_v20 = vsel %vm263_vm2, %v262_v28, %v256_v21  ;;  %v6273_v21 = vld [vmem:[%s12742_s3 + $0x78] sm:$0xff] }
  0x9f   : > { %13561 = vst [vmem:[#allocation23_spill] sm:$0xff] %v8177_v12  ;;  %13562 = vst [vmem:[#allocation24_spill] sm:$0xff] %v8182_v23  ;;  %v8202_v31 = vsub.f32 %v8107_v62, %v2106_v58  ;;  %v12759_v36 = vand.u32 4294901760, %v8111_v7  ;;  %v299_v6 = vmul.f32 %v6270_v9, %v293_v30  ;;  %v273_v55 = vmul.f32 %v6266_v11, %v267_v20  ;;  %v6272_v62 = vld [vmem:[%s12742_s3 + $0x70] sm:$0xff]  ;;  %v6339_v58 = vld [vmem:[%s12742_s3 + $0x2a8] sm:$0xff] }
  0xa0   : > { %13563 = vst [vmem:[#allocation25_spill] sm:$0xff] %v8187_v24  ;;  %13564 = vst [vmem:[#allocation26_spill] sm:$0xff] %v8189_v26  ;;  %v8210_v56 = vsub.f32 %v8082_v49, %v2110_v59  ;;  %v8212_v52 = vsub.f32 %v680_v33, %v962_v61  ;;  %v8223_v9 = vpack.c.bf16 %v892_v29, %v888_v54  ;;  %v6335_v54 = vld [vmem:[%s12742_s3 + $0x288] sm:$0xff] }
  0xa1   : > { %13565 = vst [vmem:[#allocation27_spill] sm:$0xff] %v8191_v32  ;;  %13566 = vst [vmem:[#allocation28_spill] sm:$0xff] %v8202_v31  ;;  %v8225_v11 = vsub.f32 %v300_v4, %v892_v29  ;;  %v8227_v49 = vpack.c.bf16 %v966_v39, %v962_v61  ;;  %v8230_v59 = vmul.f32 %v6341_v22, %v293_v30  ;;  %v286_v25 = vpop.permute.xlu1 %285  ;;  %v260_v4 = vpop.permute.xlu0 %259  ;;  %v890_v61 = vand.u32 4294901760, %v273_v55 }
  0xa2   : > { %13567 = vst [vmem:[#allocation29_spill] sm:$0xff] %v8210_v56  ;;  %13568 = vst [vmem:[#allocation30_spill] sm:$0xff] %v8212_v52  ;;  %v894_v29 = vand.u32 4294901760, %v299_v6  ;;  %v8245_v22 = vpack.c.bf16 %v12759_v36, %v12760_v10  ;;  %v290_v30 = vsel %vm289_vm3, %v286_v25, %v288_v27  ;;  %v291_v14 = vsel %vm289_vm3, %v284_v51, %v286_v25  ;;  %v6340_v27 = vld [vmem:[%s12742_s3 + $0x2b0] sm:$0xff] }
  0xa3   : > { %13569 = vst [vmem:[#allocation31_spill] sm:$0xff] %v8223_v9  ;;  %13570 = vst [vmem:[#allocation32_spill] sm:$0xff] %v8225_v11  ;;  %6471 = vmatprep.subr.bf16.mxu0 %v8223_v9  ;;  %v264_v33 = vsel %vm263_vm2, %v260_v4, %v262_v28  ;;  %v265_v43 = vsel %vm263_vm2, %v8121_v13, %v260_v4  ;;  %v8257_v37 = vmul.f32 %v6337_v42, %v267_v20  ;;  %v6275_v28 = vld [vmem:[%s12742_s3 + $0x88] sm:$0xff] }
  0xa4   : > { %13571 = vst [vmem:[#allocation33_spill] sm:$0xff] %v8227_v49  ;;  %13572 = vst [vmem:[#allocation34_spill] sm:$0xff] %v8245_v22  ;;  %v301_v15 = vmul.f32 %v6272_v62, %v291_v14  ;;  %v302_v36 = vmul.f32 %v6273_v21, %v290_v30  ;;  %v8259_v10 = vsub.f32 %v693_v8, %v966_v39  ;;  %v2118_v23 = vand.u32 4294901760, %v8230_v59 }
  0xa5   : > { %v694_v25 = vmul.f32 %v6339_v58, %v291_v14  ;;  %v275_v51 = vmul.f32 %v6268_v18, %v265_v43  ;;  %v276_v9 = vmul.f32 %v6269_v17, %v264_v33  ;;  %v681_v45 = vmul.f32 %v6335_v54, %v265_v43  ;;  %v8267_v52 = vpop.permute.xlu1 %309  ;;  %v308_v39 = vpop.permute.xlu0 %307  ;;  %v6336_v14 = vld [vmem:[%s12742_s3 + $0x290] sm:$0xff] }
  0xa6   : > { %13573 = vst [vmem:[#allocation35_spill] sm:$0xff] %v8259_v10  ;;  %v8269_v13 = vpack.c.bf16 %v894_v29, %v890_v61  ;;  %v8271_v20 = vsub.f32 %v273_v55, %v890_v61  ;;  %v8273_v8 = vsub.f32 %v299_v6, %v894_v29  ;;  %v2046_v42 = vand.u32 4294901760, %v302_v36  ;;  %v6342_v6 = vld [vmem:[%s12742_s3 + $0x2c0] sm:$0xff]  ;;  %v6279_v29 = vld [vmem:[%s12742_s3 + $0xa8] sm:$0xff] }
  0xa7   : > { %v318_v17 = vsel %vm315_vm4, %v308_v39, %v8267_v52  ;;  %v2042_v18 = vand.u32 4294901760, %v276_v9  ;;  %v2044_v43 = vand.u32 4294901760, %v275_v51  ;;  %v2048_v62 = vand.u32 4294901760, %v301_v15 }
  0xa8   : > { %13574 = vst [vmem:[#allocation36_spill] sm:$0xff] %v8269_v13  ;;  %13575 = vst [vmem:[#allocation37_spill] sm:$0xff] %v8271_v20  ;;  %v8281_v21 = vmul.f32 %v6340_v27, %v290_v30  ;;  %6473 = vmatpush1.bf16.msra.mxu0 %v8269_v13  ;;  %v326_v55 = vmul.f32 %v6275_v28, %v318_v17  ;;  %v8287_v58 = vsub.f32 %v302_v36, %v2046_v42  ;;  %v6346_v30 = vld [vmem:[%s12742_s3 + $0x2e0] sm:$0xff] }
  0xa9   : > { %13576 = vst [vmem:[#allocation38_spill] sm:$0xff] %v8273_v8  ;;  %v960_v54 = vand.u32 4294901760, %v681_v45  ;;  %v8289_v4 = vpack.c.bf16 %v2046_v42, %v2042_v18  ;;  %v8291_v61 = vsub.f32 %v276_v9, %v2042_v18  ;;  %v8299_v27 = vpack.c.bf16 %v2048_v62, %v2044_v43  ;;  %v336_v36 = vpop.permute.xlu1 %335  ;;  %v334_v10 = vpop.permute.xlu0 %333 }
  0xaa   : > { %13577 = vst [vmem:[#allocation39_spill] sm:$0xff] %v8287_v58  ;;  %v8301_v13 = vsub.f32 %v275_v51, %v2044_v43  ;;  %v8303_v28 = vmul.f32 %v6336_v14, %v264_v33  ;;  %v8305_v42 = vsub.f32 %v301_v15, %v2048_v62  ;;  %v896_v9 = vand.u32 4294901760, %v326_v55  ;;  %v6278_v14 = vld [vmem:[%s12742_s3 + $0xa0] sm:$0xff] }
  0xab   : > { %13578 = vst [vmem:[#allocation40_spill] sm:$0xff] %v8289_v4  ;;  %13579 = vst [vmem:[#allocation41_spill] sm:$0xff] %v8291_v61  ;;  %v964_v18 = vand.u32 4294901760, %v694_v25  ;;  %v706_v56 = vmul.f32 %v6342_v6, %v318_v17  ;;  %6783 = vmatprep.subr.bf16.mxu1 %v8289_v4  ;;  %v344_v31 = vsel %vm341_vm5, %v334_v10, %v336_v36  ;;  %v2114_v24 = vand.u32 4294901760, %v8257_v37  ;;  %v6274_v17 = vld [vmem:[%s12742_s3 + $0x80] sm:$0xff] }
  0xac   : > { %13580 = vst [vmem:[#allocation42_spill] sm:$0xff] %v8299_v27  ;;  %13581 = vst [vmem:[#allocation43_spill] sm:$0xff] %v8301_v13  ;;  %v352_v51 = vmul.f32 %v6279_v29, %v344_v31  ;;  %v719_v43 = vmul.f32 %v6346_v30, %v344_v31  ;;  %6785 = vmatpush1.bf16.msra.mxu1 %v8299_v27  ;;  %v8313_v33 = vsub.f32 %v326_v55, %v896_v9  ;;  %v6349_v27 = vld [vmem:[%s12742_s3 + $0x2f8] sm:$0xff] }
  0xad   : > { %13582 = vst [vmem:[#allocation44_spill] sm:$0xff] %v8305_v42  ;;  %v8316_v15 = vpack.c.bf16 %v964_v18, %v960_v54  ;;  %v8324_v62 = vsub.f32 %v681_v45, %v960_v54  ;;  %v13586_v31 = vand.u32 4294901760, %v8156_v50  ;;  %v13588_v55 = vand.u32 4294901760, %v8111_v7  ;;  %v340_v4 = vpop.permute.xlu1 %339  ;;  %v314_v32 = vpop.permute.xlu0 %313 }
  0xae   : > { %13583 = vst [vmem:[#allocation45_spill] sm:$0xff] %v8313_v33  ;;  %v8336_v30 = vpack.c.bf16 %v2118_v23, %v2114_v24  ;;  %v900_v45 = vand.u32 4294901760, %v352_v51  ;;  %v8341_v54 = vsub.f32 %v694_v25, %v964_v18  ;;  %v8354_v25 = vsub.f32 %v8257_v37, %v2114_v24 }
  0xaf   : > { %13584 = vst [vmem:[#allocation46_spill] sm:$0xff] %v8316_v15  ;;  %13585 = vst [vmem:[#allocation47_spill] sm:$0xff] %v8324_v62  ;;  %v8329_v6 = vsub.f32 %v8156_v50, %v13586_v31  ;;  %v8334_v29 = vsub.f32 %v8111_v7, %v13588_v55  ;;  %v974_v62 = vand.u32 4294901760, %v719_v43  ;;  %v345_v31 = vsel %vm341_vm5, %v340_v4, %v334_v10  ;;  %v6345_v7 = vld [vmem:[%s12742_s3 + $0x2d8] sm:$0xff]  ;;  %v6280_v50 = vld [vmem:[%s12742_s3 + $0xb0] sm:$0xff] }
  0xb0   : > { %13590 = vst [vmem:[#allocation50_spill] sm:$0xff] %v8336_v30  ;;  %13591 = vst [vmem:[#allocation51_spill] sm:$0xff] %v8341_v54  ;;  %v319_v55 = vsel %vm315_vm4, %v314_v32, %v308_v39  ;;  %v351_v12 = vmul.f32 %v6278_v14, %v345_v31  ;;  %v8357_v18 = vsub.f32 %v8230_v59, %v2118_v23  ;;  %v6281_v39 = vld [vmem:[%s12742_s3 + $0xb8] sm:$0xff]  ;;  %v6347_v14 = vld [vmem:[%s12742_s3 + $0x2e8] sm:$0xff] }
  0xb1   : > { %13587 = vst [vmem:[#allocation48_spill] sm:$0xff] %v8329_v6  ;;  %13589 = vst [vmem:[#allocation49_spill] sm:$0xff] %v8334_v29  ;;  %v970_v29 = vand.u32 4294901760, %v706_v56  ;;  %v325_v57 = vmul.f32 %v6274_v17, %v319_v55  ;;  %v8359_v10 = vmul.f32 %v6349_v27, %v345_v31  ;;  %v8370_v17 = vpack.c.bf16 %v900_v45, %v896_v9  ;;  %v338_v59 = vpop.permute.xlu1 %337  ;;  %v6276_v27 = vld [vmem:[%s12742_s3 + $0x90] sm:$0xff]  ;;  %v6277_v31 = vld [vmem:[%s12742_s3 + $0x98] sm:$0xff]  ;;  %v312_v6 = vpop.permute.xlu0 %311 }
  0xb2   : > { %13592 = vst [vmem:[#allocation52_spill] sm:$0xff] %v8354_v25  ;;  %13593 = vst [vmem:[#allocation53_spill] sm:$0xff] %v8357_v18  ;;  %v8372_v37 = vsub.f32 %v352_v51, %v900_v45  ;;  %v8376_v24 = vmul.f32 %v6345_v7, %v319_v55  ;;  %v6343_v9 = vld [vmem:[%s12742_s3 + $0x2c8] sm:$0xff]  ;;  %v902_v45 = vand.u32 4294901760, %v351_v12  ;;  %v13597_v18 = vand.u32 4294901760, %v8303_v28 }
  0xb3   : > { %13594 = vst [vmem:[#allocation54_spill] sm:$0xff] %v8370_v17  ;;  %v8374_v23 = vpack.c.bf16 %v974_v62, %v970_v29  ;;  %v898_v51 = vand.u32 4294901760, %v325_v57  ;;  %v13598_v7 = vand.u32 4294901760, %v8281_v21  ;;  %v342_v25 = vsel %vm341_vm5, %v338_v59, %v340_v4  ;;  %6475 = vmatprep.subr.bf16.mxu0 %v8370_v17  ;;  %v6348_v4 = vld [vmem:[%s12742_s3 + $0x2f0] sm:$0xff] }
  0xb4   : > { %13595 = vst [vmem:[#allocation55_spill] sm:$0xff] %v8372_v37  ;;  %v343_v54 = vsel %vm341_vm5, %v336_v36, %v338_v59  ;;  %v316_v40 = vsel %vm315_vm4, %v312_v6, %v314_v32  ;;  %v317_v41 = vsel %vm315_vm4, %v8267_v52, %v312_v6  ;;  %v8403_v30 = vsub.f32 %v706_v56, %v970_v29  ;;  %v6283_v32 = vld [vmem:[%s12742_s3 + $0xc8] sm:$0xff]  ;;  %v6344_v29 = vld [vmem:[%s12742_s3 + $0x2d0] sm:$0xff] }
  0xb5   : > { %13596 = vst [vmem:[#allocation56_spill] sm:$0xff] %v8374_v23  ;;  %v8391_v55 = vpack.c.bf16 %v13598_v7, %v13597_v18  ;;  %v353_v35 = vmul.f32 %v6280_v50, %v343_v54  ;;  %v354_v23 = vmul.f32 %v6281_v39, %v342_v25  ;;  %v8405_v18 = vsub.f32 %v719_v43, %v974_v62  ;;  %v360_v62 = vpop.permute.xlu0 %359 }
  0xb6   : > { %13600 = vst [vmem:[#allocation58_spill] sm:$0xff] %v8403_v30  ;;  %v720_v36 = vmul.f32 %v6347_v14, %v343_v54  ;;  %v327_v59 = vmul.f32 %v6276_v27, %v317_v41  ;;  %v328_v7 = vmul.f32 %v6277_v31, %v316_v40  ;;  %v707_v17 = vmul.f32 %v6343_v9, %v317_v41 }
  0xb7   : > { %13599 = vst [vmem:[#allocation57_spill] sm:$0xff] %v8391_v55  ;;  %13601 = vst [vmem:[#allocation59_spill] sm:$0xff] %v8405_v18  ;;  %v8413_v55 = vpop.permute.xlu1 %361  ;;  %v8415_v52 = vpack.c.bf16 %v902_v45, %v898_v51  ;;  %v8417_v56 = vsub.f32 %v325_v57, %v898_v51  ;;  %v8419_v43 = vsub.f32 %v351_v12, %v902_v45  ;;  %v2054_v6 = vand.u32 4294901760, %v354_v23  ;;  %v6350_v57 = vld [vmem:[%s12742_s3 + $0x300] sm:$0xff]  ;;  %v6287_v45 = vld [vmem:[%s12742_s3 + $0xe8] sm:$0xff] }
  0xb8   : > { %v370_v41 = vsel %vm367_vm6, %v360_v62, %v8413_v55  ;;  %v2050_v54 = vand.u32 4294901760, %v328_v7  ;;  %v2052_v50 = vand.u32 4294901760, %v327_v59  ;;  %v2056_v39 = vand.u32 4294901760, %v353_v35 }
  0xb9   : > { %13602 = vst [vmem:[#allocation60_spill] sm:$0xff] %v8415_v52  ;;  %13603 = vst [vmem:[#allocation61_spill] sm:$0xff] %v8417_v56  ;;  %v8427_v14 = vmul.f32 %v6348_v4, %v342_v25  ;;  %6477 = vmatpush1.bf16.msra.mxu0 %v8415_v52  ;;  %v378_v12 = vmul.f32 %v6283_v32, %v370_v41  ;;  %v8433_v27 = vsub.f32 %v354_v23, %v2054_v6  ;;  %v6354_v25 = vld [vmem:[%s12742_s3 + $0x320] sm:$0xff]  ;;  %v386_v18 = vpop.permute.xlu0 %385 }
  0xba   : > { %13604 = vst [vmem:[#allocation62_spill] sm:$0xff] %v8419_v43  ;;  %v968_v31 = vand.u32 4294901760, %v707_v17  ;;  %v8435_v9 = vpack.c.bf16 %v2054_v6, %v2050_v54  ;;  %v8437_v51 = vsub.f32 %v328_v7, %v2050_v54  ;;  %v8445_v4 = vpack.c.bf16 %v2056_v39, %v2052_v50 }
  0xbb   : > { %13605 = vst [vmem:[#allocation63_spill] sm:$0xff] %v8433_v27  ;;  %v8447_v52 = vsub.f32 %v327_v59, %v2052_v50  ;;  %v8449_v32 = vmul.f32 %v6344_v29, %v316_v40  ;;  %v388_v23 = vpop.permute.xlu1 %387  ;;  %v8451_v6 = vsub.f32 %v353_v35, %v2056_v39  ;;  %v904_v7 = vand.u32 4294901760, %v378_v12  ;;  %v6286_v29 = vld [vmem:[%s12742_s3 + $0xe0] sm:$0xff] }
  0xbc   : > { %13606 = vst [vmem:[#allocation64_spill] sm:$0xff] %v8435_v9  ;;  %13607 = vst [vmem:[#allocation65_spill] sm:$0xff] %v8437_v51  ;;  %v972_v54 = vand.u32 4294901760, %v720_v36  ;;  %v732_v30 = vmul.f32 %v6350_v57, %v370_v41  ;;  %6787 = vmatprep.subr.bf16.mxu1 %v8435_v9  ;;  %v396_v22 = vsel %vm393_vm7, %v386_v18, %v388_v23  ;;  %v2122_v26 = vand.u32 4294901760, %v8376_v24 }
  0xbd   : > { %13608 = vst [vmem:[#allocation66_spill] sm:$0xff] %v8445_v4  ;;  %13609 = vst [vmem:[#allocation67_spill] sm:$0xff] %v8447_v52  ;;  %v8456_v49 = vsub.f32 %v707_v17, %v968_v31  ;;  %v404_v59 = vmul.f32 %v6287_v45, %v396_v22  ;;  %v745_v50 = vmul.f32 %v6354_v25, %v396_v22  ;;  %6789 = vmatpush1.bf16.msra.mxu1 %v8445_v4  ;;  %v6282_v17 = vld [vmem:[%s12742_s3 + $0xc0] sm:$0xff]  ;;  %v6357_v45 = vld [vmem:[%s12742_s3 + $0x338] sm:$0xff]  ;;  %v366_v4 = vpop.permute.xlu0 %365 }
  0xbe   : > { %13610 = vst [vmem:[#allocation68_spill] sm:$0xff] %v8451_v6  ;;  %v8460_v40 = vsub.f32 %v378_v12, %v904_v7  ;;  %v8463_v35 = vpack.c.bf16 %v972_v54, %v968_v31  ;;  %v8471_v41 = vsub.f32 %v720_v36, %v972_v54  ;;  %v13615_v22 = vand.u32 4294901760, %v8303_v28  ;;  %v6288_v6 = vld [vmem:[%s12742_s3 + $0xf0] sm:$0xff] }
  0xbf   : > { %13611 = vst [vmem:[#allocation69_spill] sm:$0xff] %v8456_v49  ;;  %v13617_v57 = vand.u32 4294901760, %v8281_v21  ;;  %v2126_v31 = vand.u32 4294901760, %v8359_v10  ;;  %v392_v25 = vpop.permute.xlu1 %391  ;;  %v908_v36 = vand.u32 4294901760, %v404_v59  ;;  %v982_v54 = vand.u32 4294901760, %v745_v50 }
  0xc0   : > { %13612 = vst [vmem:[#allocation70_spill] sm:$0xff] %v8460_v40  ;;  %13613 = vst [vmem:[#allocation71_spill] sm:$0xff] %v8463_v35  ;;  %v8476_v39 = vsub.f32 %v8303_v28, %v13615_v22  ;;  %v397_v22 = vsel %vm393_vm7, %v392_v25, %v386_v18  ;;  %v8500_v9 = vsub.f32 %v8376_v24, %v2122_v26 }
  0xc1   : > { %13614 = vst [vmem:[#allocation72_spill] sm:$0xff] %v8471_v41  ;;  %v8481_v12 = vsub.f32 %v8281_v21, %v13617_v57  ;;  %v6353_v21 = vld [vmem:[%s12742_s3 + $0x318] sm:$0xff]  ;;  %v371_v57 = vsel %vm367_vm6, %v366_v4, %v360_v62  ;;  %v403_v41 = vmul.f32 %v6286_v29, %v397_v22  ;;  %v8503_v28 = vsub.f32 %v8359_v10, %v2126_v31  ;;  %v6355_v29 = vld [vmem:[%s12742_s3 + $0x328] sm:$0xff] }
  0xc2   : > { %13616 = vst [vmem:[#allocation73_spill] sm:$0xff] %v8476_v39  ;;  %v978_v39 = vand.u32 4294901760, %v732_v30  ;;  %v377_v49 = vmul.f32 %v6282_v17, %v371_v57  ;;  %13620 = vst [vmem:[#allocation76_spill] sm:$0xff] %v8500_v9  ;;  %v8505_v18 = vmul.f32 %v6357_v45, %v397_v22  ;;  %v6289_v62 = vld [vmem:[%s12742_s3 + $0xf8] sm:$0xff]  ;;  %v8516_v17 = vpack.c.bf16 %v908_v36, %v904_v7  ;;  %v6284_v45 = vld [vmem:[%s12742_s3 + $0xd0] sm:$0xff] }
  0xc3   : > { %13618 = vst [vmem:[#allocation74_spill] sm:$0xff] %v8481_v12  ;;  %v8496_v12 = vpack.c.bf16 %v2126_v31, %v2122_v26  ;;  %13621 = vst [vmem:[#allocation77_spill] sm:$0xff] %v8503_v28  ;;  %v8518_v26 = vsub.f32 %v404_v59, %v908_v36  ;;  %v8522_v24 = vmul.f32 %v6353_v21, %v371_v57  ;;  %v390_v31 = vpop.permute.xlu1 %389  ;;  %v6285_v22 = vld [vmem:[%s12742_s3 + $0xd8] sm:$0xff]  ;;  %v6351_v7 = vld [vmem:[%s12742_s3 + $0x308] sm:$0xff]  ;;  %v364_v28 = vpop.permute.xlu0 %363  ;;  %v910_v36 = vand.u32 4294901760, %v403_v41 }
  0xc4   : > { %13622 = vst [vmem:[#allocation78_spill] sm:$0xff] %v8516_v17  ;;  %v8520_v10 = vpack.c.bf16 %v982_v54, %v978_v39  ;;  %v906_v59 = vand.u32 4294901760, %v377_v49  ;;  %v13625_v9 = vand.u32 4294901760, %v8449_v32  ;;  %v13626_v21 = vand.u32 4294901760, %v8427_v14  ;;  %6479 = vmatprep.subr.bf16.mxu0 %v8516_v17 }
  0xc5   : > { %13619 = vst [vmem:[#allocation75_spill] sm:$0xff] %v8496_v12  ;;  %13623 = vst [vmem:[#allocation79_spill] sm:$0xff] %v8518_v26  ;;  %v395_v12 = vsel %vm393_vm7, %v388_v23, %v390_v31  ;;  %v368_v52 = vsel %vm367_vm6, %v364_v28, %v366_v4  ;;  %v369_v35 = vsel %vm367_vm6, %v8413_v55, %v364_v28  ;;  %v6291_v23 = vld [vmem:[%s12742_s3 + $0x108] sm:$0xff]  ;;  %v6358_v4 = vld [vmem:[%s12742_s3 + $0x340] sm:$0xff] }
  0xc6   : > { %13624 = vst [vmem:[#allocation80_spill] sm:$0xff] %v8520_v10  ;;  %v8537_v57 = vpack.c.bf16 %v13626_v21, %v13625_v9  ;;  %v394_v10 = vsel %vm393_vm7, %v390_v31, %v392_v25  ;;  %v405_v27 = vmul.f32 %v6288_v6, %v395_v12  ;;  %v8549_v9 = vsub.f32 %v732_v30, %v978_v39 }
  0xc7   : > { %v406_v51 = vmul.f32 %v6289_v62, %v394_v10  ;;  %v8551_v21 = vsub.f32 %v745_v50, %v982_v54  ;;  %v379_v25 = vmul.f32 %v6284_v45, %v369_v35  ;;  %v380_v15 = vmul.f32 %v6285_v22, %v368_v52  ;;  %v8559_v31 = vpop.permute.xlu1 %413  ;;  %v412_v50 = vpop.permute.xlu0 %411  ;;  %v6356_v62 = vld [vmem:[%s12742_s3 + $0x330] sm:$0xff] }
  0xc8   : > { %13627 = vst [vmem:[#allocation81_spill] sm:$0xff] %v8537_v57  ;;  %13628 = vst [vmem:[#allocation82_spill] sm:$0xff] %v8549_v9  ;;  %v746_v57 = vmul.f32 %v6355_v29, %v395_v12  ;;  %v733_v42 = vmul.f32 %v6351_v7, %v369_v35  ;;  %v8561_v55 = vpack.c.bf16 %v910_v36, %v906_v59  ;;  %v2064_v28 = vand.u32 4294901760, %v405_v27 }
  0xc9   : > { %13629 = vst [vmem:[#allocation83_spill] sm:$0xff] %v8551_v21  ;;  %v8563_v30 = vsub.f32 %v377_v49, %v906_v59  ;;  %v8565_v6 = vsub.f32 %v403_v41, %v910_v36  ;;  %v2062_v39 = vand.u32 4294901760, %v406_v51  ;;  %v422_v35 = vsel %vm419_vm8, %v412_v50, %v8559_v31  ;;  %v6352_v49 = vld [vmem:[%s12742_s3 + $0x310] sm:$0xff]  ;;  %v6295_v36 = vld [vmem:[%s12742_s3 + $0x128] sm:$0xff] }
  0xca   : > { %13630 = vst [vmem:[#allocation84_spill] sm:$0xff] %v8561_v55  ;;  %v2058_v12 = vand.u32 4294901760, %v380_v15  ;;  %v2060_v54 = vand.u32 4294901760, %v379_v25  ;;  %6481 = vmatpush1.bf16.msra.mxu0 %v8561_v55  ;;  %v430_v41 = vmul.f32 %v6291_v23, %v422_v35  ;;  %v758_v29 = vmul.f32 %v6358_v4, %v422_v35 }
  0xcb   : > { %13631 = vst [vmem:[#allocation85_spill] sm:$0xff] %v8563_v30  ;;  %13632 = vst [vmem:[#allocation86_spill] sm:$0xff] %v8565_v6  ;;  %v8577_v45 = vsub.f32 %v406_v51, %v2062_v39  ;;  %v976_v22 = vand.u32 4294901760, %v733_v42  ;;  %v440_v55 = vpop.permute.xlu1 %439  ;;  %v438_v23 = vpop.permute.xlu0 %437  ;;  %v8592_v4 = vsub.f32 %v405_v27, %v2064_v28  ;;  %v980_v35 = vand.u32 4294901760, %v746_v57 }
  0xcc   : > { %v8579_v7 = vpack.c.bf16 %v2062_v39, %v2058_v12  ;;  %v8581_v59 = vsub.f32 %v380_v15, %v2058_v12  ;;  %v8586_v17 = vpack.c.bf16 %v2064_v28, %v2060_v54  ;;  %v8588_v21 = vsub.f32 %v379_v25, %v2060_v54  ;;  %v767_v15 = vld [vmem:[%s12740_s1 + $0x8] sm:$0xff] }
  0xcd   : > { %13633 = vst [vmem:[#allocation87_spill] sm:$0xff] %v8577_v45  ;;  %v8590_v9 = vand.u32 4294901760, %v758_v29  ;;  %13639 = vst [vmem:[#allocation93_spill] sm:$0xff] %v8592_v4  ;;  %v912_v51 = vand.u32 4294901760, %v430_v41  ;;  %v8597_v39 = vmul.f32 %v6356_v62, %v394_v10  ;;  %v8599_v12 = vmul.f32 %v6352_v49, %v368_v52  ;;  %v6294_v62 = vld [vmem:[%s12742_s3 + $0x120] sm:$0xff]  ;;  %v6361_v49 = vld [vmem:[%s12742_s3 + $0x358] sm:$0xff] }
  0xce   : > { %13634 = vst [vmem:[#allocation88_spill] sm:$0xff] %v8579_v7  ;;  %13635 = vst [vmem:[#allocation89_spill] sm:$0xff] %v8581_v59  ;;  %6791 = vmatprep.subr.bf16.mxu1 %v8579_v7  ;;  %v448_v25 = vsel %vm445_vm9, %v438_v23, %v440_v55  ;;  %v8604_v54 = vsub.f32 %v733_v42, %v976_v22  ;;  %v8610_v28 = vpack.c.bf16 %v980_v35, %v976_v22  ;;  %v6290_v42 = vld [vmem:[%s12742_s3 + $0x100] sm:$0xff] }
  0xcf   : > { %13636 = vst [vmem:[#allocation90_spill] sm:$0xff] %v8586_v17  ;;  %13637 = vst [vmem:[#allocation91_spill] sm:$0xff] %v8588_v21  ;;  %v456_v21 = vmul.f32 %v6295_v36, %v448_v25  ;;  %6793 = vmatpush1.bf16.msra.mxu1 %v8586_v17  ;;  %v8607_v27 = vsub.f32 %v430_v41, %v912_v51  ;;  %v13643_v10 = vand.u32 4294901760, %v8449_v32  ;;  %v13645_v41 = vand.u32 4294901760, %v8427_v14  ;;  %v444_v17 = vpop.permute.xlu1 %443  ;;  %v418_v7 = vpop.permute.xlu0 %417 }
  0xd0   : > { %13638 = vst [vmem:[#allocation92_spill] sm:$0xff] %v8590_v9  ;;  %13640 = vst [vmem:[#allocation94_spill] sm:$0xff] %v8604_v54  ;;  %v2134_v36 = vand.u32 4294901760, %v8505_v18  ;;  %v878_v25 = vsel %vm876_vm10, %v767_v15, 0  ;;  %v13649_v4 = vand.u32 4294901760, %v8072_v46  ;;  %v8648_v15 = vsub.f32 %v746_v57, %v980_v35  ;;  %v6292_v57 = vld [vmem:[%s12742_s3 + $0x110] sm:$0xff] }
  0xd1   : > { %13641 = vst [vmem:[#allocation95_spill] sm:$0xff] %v8607_v27  ;;  %13642 = vst [vmem:[#allocation96_spill] sm:$0xff] %v8610_v28  ;;  %v8615_v52 = vsub.f32 %v8449_v32, %v13643_v10  ;;  %v8629_v22 = vsub.f32 %v8427_v14, %v13645_v41  ;;  %v2130_v32 = vand.u32 4294901760, %v8522_v24  ;;  %v8635_v10 = vsub.f32 %v758_v29, %v8590_v9  ;;  %v6296_v28 = vld [vmem:[%s12742_s3 + $0x130] sm:$0xff] }
  0xd2   : > { %v8637_v54 = vand.u32 4294901760, %v878_v25  ;;  %v8642_v45 = vsub.f32 %v8072_v46, %v13649_v4  ;;  %v449_v14 = vsel %vm445_vm9, %v444_v17, %v438_v23  ;;  %v423_v41 = vsel %vm419_vm8, %v418_v7, %v412_v50  ;;  %13650 = vst [vmem:[#allocation101_spill] sm:$0xff] %v8648_v15  ;;  %v6297_v23 = vld [vmem:[%s12742_s3 + $0x138] sm:$0xff] }
  0xd3   : > { %13644 = vst [vmem:[#allocation97_spill] sm:$0xff] %v8615_v52  ;;  %13646 = vst [vmem:[#allocation98_spill] sm:$0xff] %v8629_v22  ;;  %v916_v52 = vand.u32 4294901760, %v456_v21  ;;  %v8650_v29 = vpack.c.bf16 %v2134_v36, %v2130_v32  ;;  %v429_v22 = vmul.f32 %v6290_v42, %v423_v41  ;;  %v761_v9 = vmul.f32 %v6361_v49, %v423_v41  ;;  %v6293_v4 = vld [vmem:[%s12742_s3 + $0x118] sm:$0xff]  ;;  %v416_v49 = vpop.permute.xlu0 %415 }
  0xd4   : > { %13647 = vst [vmem:[#allocation99_spill] sm:$0xff] %v8635_v10  ;;  %13648 = vst [vmem:[#allocation100_spill] sm:$0xff] %v8637_v54  ;;  %v455_v10 = vmul.f32 %v6294_v62, %v449_v14  ;;  %v8670_v35 = vsub.f32 %v8522_v24, %v2130_v32  ;;  %v8676_v62 = vsub.f32 %v878_v25, %v8637_v54  ;;  %v6360_v24 = vld [vmem:[%s12742_s3 + $0x350] sm:$0xff] }
  0xd5   : > { %13651 = vst [vmem:[#allocation102_spill] sm:$0xff] %v8650_v29  ;;  %v8655_v59 = vpack.c.bf16 %v916_v52, %v912_v51  ;;  %v8661_v50 = vsub.f32 %v456_v21, %v916_v52  ;;  %v8673_v51 = vsub.f32 %v8505_v18, %v2134_v36  ;;  %v8678_v42 = vand.u32 4294901760, %v761_v9  ;;  %v442_v21 = vpop.permute.xlu1 %441  ;;  %v6359_v52 = vld [vmem:[%s12742_s3 + $0x348] sm:$0xff] }
  0xd6   : > { %13654 = vst [vmem:[#allocation105_spill] sm:$0xff] %v8670_v35  ;;  %13656 = vst [vmem:[#allocation107_spill] sm:$0xff] %v8676_v62  ;;  %v914_v32 = vand.u32 4294901760, %v429_v22  ;;  %v918_v18 = vand.u32 4294901760, %v455_v10  ;;  %v446_v25 = vsel %vm445_vm9, %v442_v21, %v444_v17  ;;  %v447_v14 = vsel %vm445_vm9, %v440_v55, %v442_v21  ;;  %v6299_v55 = vld [vmem:[%s12742_s3 + $0x148] sm:$0xff] }
  0xd7   : > { %13652 = vst [vmem:[#allocation103_spill] sm:$0xff] %v8655_v59  ;;  %13653 = vst [vmem:[#allocation104_spill] sm:$0xff] %v8661_v50  ;;  %6483 = vmatprep.subr.bf16.mxu0 %v8655_v59  ;;  %v420_v41 = vsel %vm419_vm8, %v416_v49, %v418_v7  ;;  %v421_v59 = vsel %vm419_vm8, %v8559_v31, %v416_v49  ;;  %v8698_v46 = vsub.f32 %v761_v9, %v8678_v42  ;;  %v464_v9 = vpop.permute.xlu0 %463 }
  0xd8   : > { %13655 = vst [vmem:[#allocation106_spill] sm:$0xff] %v8673_v51  ;;  %13657 = vst [vmem:[#allocation108_spill] sm:$0xff] %v8678_v42  ;;  %v457_v51 = vmul.f32 %v6296_v28, %v447_v14  ;;  %v458_v35 = vmul.f32 %v6297_v23, %v446_v25  ;;  %v431_v15 = vmul.f32 %v6292_v57, %v421_v59  ;;  %v12876_v42 = vand.u32 4294901760, %v8125_v16 }
  0xd9   : > { %13658 = vst [vmem:[#allocation109_spill] sm:$0xff] %v8698_v46  ;;  %v432_v36 = vmul.f32 %v6293_v4, %v420_v41  ;;  %v759_v54 = vmul.f32 %v6359_v52, %v421_v59  ;;  %v760_v29 = vmul.f32 %v6360_v24, %v420_v41  ;;  %v8700_v17 = vpack.c.bf16 %v918_v18, %v914_v32  ;;  %v8705_v7 = vpop.permute.xlu1 %465  ;;  %v6303_v41 = vld [vmem:[%s12742_s3 + $0x168] sm:$0xff] }
  0xda   : > { %v8707_v21 = vsub.f32 %v429_v22, %v914_v32  ;;  %v8709_v31 = vsub.f32 %v455_v10, %v918_v18  ;;  %v2070_v49 = vand.u32 4294901760, %v458_v35  ;;  %v2068_v28 = vand.u32 4294901760, %v431_v15 }
  0xdb   : > { %13659 = vst [vmem:[#allocation110_spill] sm:$0xff] %v8700_v17  ;;  %v8711_v23 = vand.u32 4294901760, %v759_v54  ;;  %v8713_v57 = vand.u32 4294901760, %v760_v29  ;;  %6485 = vmatpush1.bf16.msra.mxu0 %v8700_v17  ;;  %v474_v59 = vsel %vm471_vm11, %v464_v9, %v8705_v7  ;;  %v2066_v4 = vand.u32 4294901760, %v432_v36 }
  0xdc   : > { %13660 = vst [vmem:[#allocation111_spill] sm:$0xff] %v8707_v21  ;;  %13661 = vst [vmem:[#allocation112_spill] sm:$0xff] %v8709_v31  ;;  %v482_v52 = vmul.f32 %v6299_v55, %v474_v59  ;;  %v8719_v24 = vsub.f32 %v458_v35, %v2070_v49  ;;  %v2072_v22 = vand.u32 4294901760, %v457_v51  ;;  %v8721_v10 = vsub.f32 %v431_v15, %v2068_v28  ;;  %v766_v35 = vld [vmem:[%s12740_s1] sm:$0xff]  ;;  %v490_v55 = vpop.permute.xlu0 %489 }
  0xdd   : > { %13662 = vst [vmem:[#allocation113_spill] sm:$0xff] %v8711_v23  ;;  %13663 = vst [vmem:[#allocation114_spill] sm:$0xff] %v8713_v57  ;;  %v8724_v32 = vsub.f32 %v759_v54, %v8711_v23  ;;  %v8727_v18 = vsub.f32 %v760_v29, %v8713_v57  ;;  %v8729_v25 = vpack.c.bf16 %v2070_v49, %v2066_v4  ;;  %v492_v15 = vpop.permute.xlu1 %491  ;;  %v8744_v49 = vand.u32 4294901760, %v8676_v62 }
  0xde   : > { %13664 = vst [vmem:[#allocation115_spill] sm:$0xff] %v8719_v24  ;;  %13665 = vst [vmem:[#allocation116_spill] sm:$0xff] %v8721_v10  ;;  %v8731_v14 = vsub.f32 %v432_v36, %v2066_v4  ;;  %v8739_v59 = vpack.c.bf16 %v2072_v22, %v2068_v28  ;;  %v8741_v54 = vsub.f32 %v457_v51, %v2072_v22  ;;  %v920_v29 = vand.u32 4294901760, %v482_v52  ;;  %v6302_v4 = vld [vmem:[%s12742_s3 + $0x160] sm:$0xff] }
  0xdf   : > { %13666 = vst [vmem:[#allocation117_spill] sm:$0xff] %v8724_v32  ;;  %13667 = vst [vmem:[#allocation118_spill] sm:$0xff] %v8727_v18  ;;  %6795 = vmatprep.subr.bf16.mxu1 %v8729_v25  ;;  %v500_v36 = vsel %vm12934_vm12, %v490_v55, %v492_v15  ;;  %v2132_v17 = vand.u32 4294901760, %v8599_v12  ;;  %v2136_v18 = vand.u32 4294901760, %v8597_v39  ;;  %v1001_v28 = vsub.f32 %v8676_v62, %v8744_v49 }
  0xe0   : > { %13668 = vst [vmem:[#allocation119_spill] sm:$0xff] %v8729_v25  ;;  %13669 = vst [vmem:[#allocation120_spill] sm:$0xff] %v8731_v14  ;;  %v508_v46 = vmul.f32 %v6303_v41, %v500_v36  ;;  %6797 = vmatpush1.bf16.msra.mxu1 %v8739_v59  ;;  %v8753_v51 = vsub.f32 %v482_v52, %v920_v29  ;;  %v8758_v22 = vand.u32 4294901760, %v766_v35  ;;  %v6298_v25 = vld [vmem:[%s12742_s3 + $0x140] sm:$0xff]  ;;  %v13675_v41 = vand.u32 4294901760, %v8074_v47  ;;  %v470_v57 = vpop.permute.xlu0 %469 }
  0xe1   : > { %13670 = vst [vmem:[#allocation121_spill] sm:$0xff] %v8739_v59  ;;  %13671 = vst [vmem:[#allocation122_spill] sm:$0xff] %v8741_v54  ;;  %v8769_v36 = vpack.c.bf16 %v2136_v18, %v2132_v17  ;;  %v8772_v59 = vsub.f32 %v8599_v12, %v2132_v17  ;;  %v496_v32 = vpop.permute.xlu1 %495  ;;  %v1002_v54 = vand.u32 4294901760, %v1001_v28  ;;  %v12875_v17 = vand.u32 4294901760, %v8127_v19 }
  0xe2   : > { %13672 = vst [vmem:[#allocation123_spill] sm:$0xff] %v8744_v49  ;;  %13673 = vst [vmem:[#allocation124_spill] sm:$0xff] %v8753_v51  ;;  %v1030_v52 = vsub.f32 %v8074_v47, %v13675_v41  ;;  %v8775_v49 = vsub.f32 %v8597_v39, %v2136_v18  ;;  %v924_v62 = vand.u32 4294901760, %v508_v46  ;;  %v8778_v10 = vsub.f32 %v766_v35, %v8758_v22  ;;  %v6304_v35 = vld [vmem:[%s12742_s3 + $0x170] sm:$0xff] }
  0xe3   : > { %13674 = vst [vmem:[#allocation125_spill] sm:$0xff] %v8758_v22  ;;  %13676 = vst [vmem:[#allocation126_spill] sm:$0xff] %v8769_v36  ;;  %v501_v41 = vsel %vm12934_vm12, %v496_v32, %v490_v55  ;;  %v475_v47 = vsel %vm471_vm11, %v470_v57, %v464_v9  ;;  %1003 = vmatprep.mubr.f32.mxu0 %v1002_v54  ;;  %v6305_v55 = vld [vmem:[%s12742_s3 + $0x178] sm:$0xff]  ;;  %v13682_v9 = vand.u32 4294901760, %v8642_v45  ;;  %2157 = vmatprep.mubr.f32.mxu1 %v1002_v54  ;;  %v6300_v45 = vld [vmem:[%s12742_s3 + $0x150] sm:$0xff] }
  0xe4   : > { %13677 = vst [vmem:[#allocation127_spill] sm:$0xff] %v8772_v59  ;;  %13678 = vst [vmem:[#allocation128_spill] sm:$0xff] %v8775_v49  ;;  %v1031_v12 = vand.u32 4294901760, %v1030_v52  ;;  %v8786_v39 = vsub.f32 %v508_v46, %v924_v62  ;;  %v507_v18 = vmul.f32 %v6302_v4, %v501_v41  ;;  %v481_v49 = vmul.f32 %v6298_v25, %v475_v47  ;;  %v6301_v52 = vld [vmem:[%s12742_s3 + $0x158] sm:$0xff]  ;;  %v468_v41 = vpop.permute.xlu0 %467 }
  0xe5   : > { %13679 = vst [vmem:[#allocation129_spill] sm:$0xff] %v8778_v10  ;;  %v8788_v59 = vpack.c.bf16 %v924_v62, %v920_v29  ;;  %v8801_v46 = vand.u32 4294901760, %v8778_v10  ;;  %v8806_v47 = vsub.f32 %v8125_v16, %v12876_v42  ;;  %v8811_v62 = vsub.f32 %v8127_v19, %v12875_v17  ;;  %v494_v4 = vpop.permute.xlu1 %493 }
  0xe6   : > { %13680 = vst [vmem:[#allocation130_spill] sm:$0xff] %v8786_v39  ;;  %v8798_v28 = vpack.c.bf16 %v1031_v12, %v13682_v9  ;;  %v926_v25 = vand.u32 4294901760, %v507_v18  ;;  %v922_v29 = vand.u32 4294901760, %v481_v49  ;;  %v498_v54 = vsel %vm12934_vm12, %v494_v4, %v496_v32 }
  0xe7   : > { %13681 = vst [vmem:[#allocation131_spill] sm:$0xff] %v8788_v59  ;;  %13683 = vst [vmem:[#allocation132_spill] sm:$0xff] %v8801_v46  ;;  %6487 = vmatprep.subr.bf16.mxu0 %v8788_v59  ;;  %v499_v17 = vsel %vm12934_vm12, %v492_v15, %v494_v4  ;;  %v472_v42 = vsel %vm471_vm11, %v468_v41, %v470_v57  ;;  %v473_v59 = vsel %vm471_vm11, %v8705_v7, %v468_v41 }
  0xe8   : > { %v8831_v22 = vsub.f32 %v507_v18, %v926_v25  ;;  %v8833_v19 = vsub.f32 %v481_v49, %v922_v29  ;;  %v509_v12 = vmul.f32 %v6304_v35, %v499_v17  ;;  %v510_v16 = vmul.f32 %v6305_v55, %v498_v54  ;;  %v6307_v49 = vld [vmem:[%s12742_s3 + $0x188] sm:$0xff]  ;;  %v516_v17 = vpop.permute.xlu0 %515 }
  0xe9   : > { %v483_v9 = vmul.f32 %v6300_v45, %v473_v59  ;;  %v484_v32 = vmul.f32 %v6301_v52, %v472_v42  ;;  %v8836_v36 = vpack.c.bf16 %v926_v25, %v922_v29  ;;  %v1007_v15 = vsub.f32 %v8778_v10, %v8801_v46  ;;  %v518_v41 = vpop.permute.xlu1 %517 }
  0xea   : > { %13684 = vst [vmem:[#allocation133_spill] sm:$0xff] %v8831_v22  ;;  %13685 = vst [vmem:[#allocation134_spill] sm:$0xff] %v8833_v19  ;;  %v12888_v57 = vand.u32 4294901760, %v8831_v22  ;;  %v12891_v4 = vand.u32 4294901760, %v8833_v19  ;;  %v2078_v7 = vand.u32 4294901760, %v510_v16  ;;  %v2080_v18 = vand.u32 4294901760, %v509_v12 }
  0xeb   : > { %13686 = vst [vmem:[#allocation135_spill] sm:$0xff] %v8836_v36  ;;  %v2074_v35 = vand.u32 4294901760, %v484_v32  ;;  %v2076_v59 = vand.u32 4294901760, %v483_v9  ;;  %6489 = vmatpush1.bf16.msra.mxu0 %v8836_v36  ;;  %v526_v42 = vsel %vm12917_vm13, %v516_v17, %v518_v41  ;;  %v8848_v55 = vand.u32 4294901760, %v1007_v15 }
  0xec   : > { %v8853_v25 = vsub.f32 %v8831_v22, %v12888_v57  ;;  %v8858_v29 = vsub.f32 %v8833_v19, %v12891_v4  ;;  %v8860_v45 = vsub.f32 %v510_v16, %v2078_v7  ;;  %v8862_v52 = vsub.f32 %v509_v12, %v2080_v18  ;;  %v6308_v57 = vld [vmem:[%s12742_s3 + $0x190] sm:$0xff]  ;;  %v6309_v16 = vld [vmem:[%s12742_s3 + $0x198] sm:$0xff] }
  0xed   : > { %v8865_v54 = vsub.f32 %v484_v32, %v2074_v35  ;;  %v8867_v15 = vsub.f32 %v483_v9, %v2076_v59  ;;  %v534_v46 = vmul.f32 %v6307_v49, %v526_v42  ;;  %v8872_v36 = vpack.c.bf16 %v2078_v7, %v2074_v35  ;;  %v520_v4 = vpop.permute.xlu1 %519  ;;  %v6306_v32 = vld [vmem:[%s12742_s3 + $0x180] sm:$0xff]  ;;  %v522_v9 = vpop.permute.xlu0 %521 }
  0xee   : > { %13687 = vst [vmem:[#allocation136_spill] sm:$0xff] %v8860_v45  ;;  %13688 = vst [vmem:[#allocation137_spill] sm:$0xff] %v8862_v52  ;;  %v8881_v10 = vpack.c.bf16 %v2080_v18, %v2076_v59  ;;  %v1025_v49 = vand.u32 4294901760, %v8806_v47  ;;  %v1037_v42 = vand.u32 4294901760, %v8811_v62  ;;  %v525_v22 = vsel %vm12917_vm13, %v518_v41, %v520_v4 }
  0xef   : > { %13689 = vst [vmem:[#allocation138_spill] sm:$0xff] %v8865_v54  ;;  %13690 = vst [vmem:[#allocation139_spill] sm:$0xff] %v8867_v15  ;;  %v12902_v7 = vand.u32 4294901760, %v8867_v15  ;;  %v928_v35 = vand.u32 4294901760, %v534_v46  ;;  %6799 = vmatprep.subr.bf16.mxu1 %v8872_v36  ;;  %v524_v12 = vsel %vm12917_vm13, %v520_v4, %v522_v9  ;;  %v13693_v19 = vand.u32 4294901760, %v8862_v52 }
  0xf0   : > { %13691 = vst [vmem:[#allocation140_spill] sm:$0xff] %v8872_v36  ;;  %13692 = vst [vmem:[#allocation141_spill] sm:$0xff] %v8881_v10  ;;  %v535_v59 = vmul.f32 %v6308_v57, %v525_v22  ;;  %v527_v47 = vsel %vm12917_vm13, %v522_v9, %v516_v17  ;;  %v536_v62 = vmul.f32 %v6309_v16, %v524_v12  ;;  %6801 = vmatpush1.bf16.msra.mxu1 %v8881_v10 }
  0xf1   : > { %v8894_v18 = vsub.f32 %v8862_v52, %v13693_v19  ;;  %v8902_v41 = vsub.f32 %v8867_v15, %v12902_v7  ;;  %v8904_v36 = vsub.f32 %v534_v46, %v928_v35  ;;  %v533_v4 = vmul.f32 %v6306_v32, %v527_v47  ;;  %v6311_v19 = vld [vmem:[%s12742_s3 + $0x1c8] sm:$0xff]  ;;  %v8913_v17 = vpop.permute.xlu1 %549  ;;  %v548_v16 = vpop.permute.xlu0 %547 }
  0xf2   : > { %v13697_v45 = vand.u32 4294901760, %v7863_v1  ;;  %v2084_v22 = vand.u32 4294901760, %v535_v59  ;;  %v2082_v57 = vand.u32 4294901760, %v536_v62  ;;  %v8915_v12 = vpack.c.bf16 %v1037_v42, %v1025_v49  ;;  %v6315_v52 = vld [vmem:[%s12742_s3 + $0x1e8] sm:$0xff] }
  0xf3   : > { %13694 = vst [vmem:[#allocation142_spill] sm:$0xff] %v8894_v18  ;;  %13695 = vst [vmem:[#allocation143_spill] sm:$0xff] %v8902_v41  ;;  %v13699_v9 = vand.u32 4294901760, %v8166_v60  ;;  %v930_v32 = vand.u32 4294901760, %v533_v4  ;;  %v555_v1 = vsel %vm553_vm14, %v548_v16, %v8913_v17  ;;  %v13706_v15 = vand.u32 4294901760, %v7856_v0 }
  0xf4   : > { %13696 = vst [vmem:[#allocation144_spill] sm:$0xff] %v8904_v36  ;;  %v8908_v54 = vpack.c.bf16 %v13697_v45, %v928_v35  ;;  %v13700_v45 = vand.u32 4294901760, %v8225_v11  ;;  %v8928_v7 = vsub.f32 %v535_v59, %v2084_v22  ;;  %v8930_v49 = vsub.f32 %v536_v62, %v2082_v57 }
  0xf5   : > { %v1042_v46 = vsub.f32 %v8166_v60, %v13699_v9  ;;  %v564_v42 = vmul.f32 %v6311_v19, %v555_v1  ;;  %v13703_v9 = vand.u32 4294901760, %v7870_v2  ;;  %v13708_v59 = vand.u32 4294901760, %v7877_v3 }
  0xf6   : > { %13698 = vst [vmem:[#allocation145_spill] sm:$0xff] %v8908_v54  ;;  %6491 = vmatprep.subr.bf16.mxu0 %v8908_v54  ;;  %v1054_v35 = vsub.f32 %v8225_v11, %v13700_v45  ;;  %13701 = vst [vmem:[#allocation146_spill] sm:$0xff] %v8928_v7  ;;  %v8936_v54 = vsub.f32 %v533_v4, %v930_v32  ;;  %v8943_v45 = vpack.c.bf16 %v13706_v15, %v930_v32  ;;  %v574_v4 = vpop.permute.xlu0 %573  ;;  %v6314_v15 = vld [vmem:[%s12742_s3 + $0x1e0] sm:$0xff] }
  0xf7   : > { %13702 = vst [vmem:[#allocation147_spill] sm:$0xff] %v8930_v49  ;;  %v8934_v10 = vpack.c.bf16 %v13703_v9, %v2082_v57  ;;  %v8947_v47 = vpack.c.bf16 %v13708_v59, %v2084_v22  ;;  %v1043_v62 = vand.u32 4294901760, %v1042_v46  ;;  %v12913_v19 = vand.u32 4294901760, %v8928_v7  ;;  %v576_v57 = vpop.permute.xlu1 %575  ;;  %v6310_v22 = vld [vmem:[%s12742_s3 + $0x1c0] sm:$0xff] }
  0xf8   : > { %13705 = vst [vmem:[#allocation149_spill] sm:$0xff] %v8936_v54  ;;  %13707 = vst [vmem:[#allocation150_spill] sm:$0xff] %v8943_v45  ;;  %v936_v2 = vand.u32 4294901760, %v564_v42  ;;  %v1055_v1 = vand.u32 4294901760, %v1054_v35  ;;  %v13710_v9 = vand.u32 4294901760, %v8271_v20  ;;  %v12914_v0 = vand.u32 4294901760, %v8936_v54  ;;  %6493 = vmatpush1.bf16.msra.mxu0 %v8943_v45 }
  0xf9   : > { %13704 = vst [vmem:[#allocation148_spill] sm:$0xff] %v8934_v10  ;;  %13709 = vst [vmem:[#allocation151_spill] sm:$0xff] %v8947_v47  ;;  %6803 = vmatprep.subr.bf16.mxu1 %v8934_v10  ;;  %v581_v3 = vsel %vm579_vm15, %v574_v4, %v576_v57  ;;  %v8964_v46 = vsub.f32 %v8928_v7, %v12913_v19  ;;  %vm605_vm13 = vcmp.lt.s32.totalorder %v7983_v5, 120  ;;  %v12935_v10 = vand.u32 4294901760, %v8138_v34  ;;  %v6316_v45 = vld [vmem:[%s12742_s3 + $0x1f0] sm:$0xff]  ;;  %v6317_v7 = vld [vmem:[%s12742_s3 + $0x1f8] sm:$0xff] }
  0xfa   : > { %v1048_v11 = vsub.f32 %v8271_v20, %v13710_v9  ;;  %6805 = vmatpush1.bf16.msra.mxu1 %v8947_v47  ;;  %v8966_v32 = vsub.f32 %v564_v42, %v936_v2  ;;  %v590_v35 = vmul.f32 %v6315_v52, %v581_v3  ;;  %v8968_v59 = vpack.c.bf16 %v1055_v1, %v1043_v62  ;;  %v546_v47 = vpop.permute.xlu0 %545 }
  0xfb   : > { %13711 = vst [vmem:[#allocation152_spill] sm:$0xff] %v8964_v46  ;;  %v8973_v9 = vsub.f32 %v8936_v54, %v12914_v0  ;;  %v13713_v42 = vand.u32 4294901760, %v8273_v8  ;;  %v13714_v62 = vand.u32 4294901760, %v8144_v38  ;;  %v572_v0 = vpop.permute.xlu1 %571  ;;  %vm631_vm12 = vcmp.lt.s32.totalorder %v7983_v5, 119 }
  0xfc   : > { %13712 = vst [vmem:[#allocation153_spill] sm:$0xff] %v8966_v32  ;;  %v1049_v19 = vand.u32 4294901760, %v1048_v11  ;;  %v940_v3 = vand.u32 4294901760, %v590_v35  ;;  %v582_v11 = vsel %vm579_vm15, %v572_v0, %v574_v4 }
  0xfd   : > { %v1060_v52 = vsub.f32 %v8273_v8, %v13713_v42  ;;  %v2172_v1 = vsub.f32 %v8144_v38, %v13714_v62  ;;  %v556_v42 = vsel %vm553_vm14, %v546_v47, %v548_v16  ;;  %v589_v38 = vmul.f32 %v6314_v15, %v582_v11 }
  0xfe   : > { %v8995_v62 = vsub.f32 %v590_v35, %v940_v3  ;;  %v563_v20 = vmul.f32 %v6310_v22, %v556_v42  ;;  %v8997_v60 = vpack.c.bf16 %v940_v3, %v936_v2  ;;  %v2184_v16 = vsub.f32 %v8138_v34, %v12935_v10  ;;  %v552_v11 = vpop.permute.xlu0 %551 }
  0xff   : > { %v1061_v54 = vand.u32 4294901760, %v1060_v52  ;;  %v2173_v8 = vand.u32 4294901760, %v2172_v1  ;;  %v13717_v15 = vand.u32 4294901760, %v8313_v33  ;;  %v13718_v22 = vand.u32 4294901760, %v8372_v37  ;;  %v578_v3 = vpop.permute.xlu1 %577 }
 0x100   : > { %13715 = vst [vmem:[#allocation154_spill] sm:$0xff] %v8995_v62  ;;  %13716 = vst [vmem:[#allocation155_spill] sm:$0xff] %v8997_v60  ;;  %v942_v52 = vand.u32 4294901760, %v589_v38  ;;  %v938_v1 = vand.u32 4294901760, %v563_v20  ;;  %6495 = vmatprep.subr.bf16.mxu0 %v8997_v60  ;;  %v583_v10 = vsel %vm579_vm15, %v578_v3, %v572_v0 }
 0x101   : > { %v9006_v4 = vpack.c.bf16 %v1061_v54, %v1049_v19  ;;  %v1066_v2 = vsub.f32 %v8313_v33, %v13717_v15  ;;  %v1078_v35 = vsub.f32 %v8372_v37, %v13718_v22  ;;  %v6312_v54 = vld [vmem:[%s12742_s3 + $0x1d0] sm:$0xff]  ;;  %v6313_v19 = vld [vmem:[%s12742_s3 + $0x1d8] sm:$0xff]  ;;  %v580_v22 = vsel %vm579_vm15, %v576_v57, %v578_v3 }
 0x102   : > { %v554_v37 = vsel %vm553_vm14, %v8913_v17, %v552_v11  ;;  %v557_v33 = vsel %vm553_vm14, %v552_v11, %v546_v47  ;;  %v9035_v34 = vsub.f32 %v589_v38, %v942_v52  ;;  %v9037_v60 = vsub.f32 %v563_v20, %v938_v1  ;;  %v6319_v20 = vld [vmem:[%s12742_s3 + $0x208] sm:$0xff] }
 0x103   : > { %v591_v42 = vmul.f32 %v6316_v45, %v580_v22  ;;  %v592_v46 = vmul.f32 %v6317_v7, %v583_v10  ;;  %v565_v15 = vmul.f32 %v6312_v54, %v554_v37  ;;  %v566_v49 = vmul.f32 %v6313_v19, %v557_v33  ;;  %v9043_v62 = vpop.permute.xlu1 %601  ;;  %v600_v10 = vpop.permute.xlu0 %599 }
 0x104   : > { %13719 = vst [vmem:[#allocation156_spill] sm:$0xff] %v9035_v34  ;;  %13720 = vst [vmem:[#allocation157_spill] sm:$0xff] %v9037_v60  ;;  %v9039_v18 = vpack.c.bf16 %v942_v52, %v938_v1  ;;  %v2185_v57 = vand.u32 4294901760, %v2184_v16  ;;  %v12946_v0 = vand.u32 4294901760, %v9035_v34  ;;  %v12947_v3 = vand.u32 4294901760, %v9037_v60 }
 0x105   : > { %v2094_v41 = vand.u32 4294901760, %v592_v46  ;;  %v2096_v17 = vand.u32 4294901760, %v591_v42  ;;  %v2090_v47 = vand.u32 4294901760, %v566_v49  ;;  %v2092_v38 = vand.u32 4294901760, %v565_v15 }
 0x106   : > { %13721 = vst [vmem:[#allocation158_spill] sm:$0xff] %v9039_v18  ;;  %6497 = vmatpush1.bf16.msra.mxu0 %v9039_v18  ;;  %v9049_v33 = vpack.c.bf16 %v2185_v57, %v2173_v8  ;;  %v1067_v37 = vand.u32 4294901760, %v1066_v2  ;;  %v9054_v7 = vsub.f32 %v9035_v34, %v12946_v0  ;;  %v9059_v45 = vsub.f32 %v9037_v60, %v12947_v3 }
 0x107   : > { %v9061_v16 = vsub.f32 %v592_v46, %v2094_v41  ;;  %v9063_v52 = vsub.f32 %v591_v42, %v2096_v17  ;;  %v9065_v1 = vsub.f32 %v566_v49, %v2090_v47  ;;  %v9067_v54 = vsub.f32 %v565_v15, %v2092_v38  ;;  %v628_v22 = vpop.permute.xlu1 %627  ;;  %v6323_v46 = vld [vmem:[%s12742_s3 + $0x228] sm:$0xff]  ;;  %v626_v57 = vpop.permute.xlu0 %625 }
 0x108   : > { %v607_v8 = vsel %vm605_vm13, %v600_v10, %v9043_v62  ;;  %v9072_v2 = vpack.c.bf16 %v2094_v41, %v2090_v47  ;;  %v9078_v42 = vpack.c.bf16 %v2096_v17, %v2092_v38  ;;  %v1079_v49 = vand.u32 4294901760, %v1078_v35 }
 0x109   : > { %13722 = vst [vmem:[#allocation159_spill] sm:$0xff] %v9061_v16  ;;  %13723 = vst [vmem:[#allocation160_spill] sm:$0xff] %v9063_v52  ;;  %v12948_v19 = vand.u32 4294901760, %v9063_v52  ;;  %v616_v11 = vmul.f32 %v6319_v20, %v607_v8  ;;  %v12957_v15 = vand.u32 4294901760, %v9067_v54  ;;  %v13728_v0 = vand.u32 4294901760, %v8154_v44  ;;  %v6322_v8 = vld [vmem:[%s12742_s3 + $0x220] sm:$0xff] }
 0x10a   : > { %13724 = vst [vmem:[#allocation161_spill] sm:$0xff] %v9065_v1  ;;  %13725 = vst [vmem:[#allocation162_spill] sm:$0xff] %v9067_v54  ;;  %6807 = vmatprep.subr.bf16.mxu1 %v9072_v2  ;;  %v13729_v47 = vand.u32 4294901760, %v8158_v53  ;;  %v633_v38 = vsel %vm631_vm12, %v626_v57, %v628_v22  ;;  %v9097_v3 = vpack.c.bf16 %v1079_v49, %v1067_v37  ;;  %v6318_v37 = vld [vmem:[%s12742_s3 + $0x200] sm:$0xff]  ;;  %v13733_v49 = vand.u32 4294901760, %v8291_v61 }
 0x10b   : > { %13726 = vst [vmem:[#allocation163_spill] sm:$0xff] %v9072_v2  ;;  %13727 = vst [vmem:[#allocation164_spill] sm:$0xff] %v9078_v42  ;;  %v2178_v41 = vsub.f32 %v8154_v44, %v13728_v0  ;;  %v9092_v17 = vsub.f32 %v9063_v52, %v12948_v19  ;;  %v944_v35 = vand.u32 4294901760, %v616_v11  ;;  %6809 = vmatpush1.bf16.msra.mxu1 %v9078_v42  ;;  %v624_v52 = vpop.permute.xlu1 %623 }
 0x10c   : > { %v2190_v20 = vsub.f32 %v8158_v53, %v13729_v47  ;;  %v9102_v0 = vsub.f32 %v9067_v54, %v12957_v15  ;;  %v642_v47 = vmul.f32 %v6323_v46, %v633_v38  ;;  %v2196_v42 = vsub.f32 %v8291_v61, %v13733_v49 }
 0x10d   : > { %13730 = vst [vmem:[#allocation165_spill] sm:$0xff] %v9092_v17  ;;  %v2179_v19 = vand.u32 4294901760, %v2178_v41  ;;  %v9107_v18 = vsub.f32 %v616_v11, %v944_v35  ;;  %v12968_v15 = vand.u32 4294901760, %v8287_v58  ;;  %v634_v41 = vsel %vm631_vm12, %v624_v52, %v626_v57  ;;  %v6324_v57 = vld [vmem:[%s12742_s3 + $0x230] sm:$0xff] }
 0x10e   : > { %13731 = vst [vmem:[#allocation166_spill] sm:$0xff] %v9102_v0  ;;  %v2191_v2 = vand.u32 4294901760, %v2190_v20  ;;  %v948_v38 = vand.u32 4294901760, %v642_v47  ;;  %v598_v20 = vpop.permute.xlu0 %597  ;;  %v12975_v54 = vand.u32 4294901760, %v8419_v43  ;;  %v641_v34 = vmul.f32 %v6322_v8, %v634_v41 }
 0x10f   : > { %13732 = vst [vmem:[#allocation167_spill] sm:$0xff] %v9107_v18  ;;  %v608_v60 = vsel %vm605_vm13, %v598_v20, %v600_v10  ;;  %v2197_v53 = vand.u32 4294901760, %v2196_v42  ;;  %v2208_v49 = vsub.f32 %v8287_v58, %v12968_v15  ;;  %v13736_v10 = vand.u32 4294901760, %v8417_v56  ;;  %v630_v41 = vpop.permute.xlu1 %629 }
 0x110   : > { %v9119_v11 = vpack.c.bf16 %v2191_v2, %v2179_v19  ;;  %v9127_v61 = vsub.f32 %v642_v47, %v948_v38  ;;  %v615_v46 = vmul.f32 %v6318_v37, %v608_v60  ;;  %v6325_v2 = vld [vmem:[%s12742_s3 + $0x238] sm:$0xff]  ;;  %v9135_v19 = vpack.c.bf16 %v948_v38, %v944_v35  ;;  %v6320_v60 = vld [vmem:[%s12742_s3 + $0x210] sm:$0xff] }
 0x111   : > { %v1072_v42 = vsub.f32 %v8417_v56, %v13736_v10  ;;  %v950_v8 = vand.u32 4294901760, %v641_v34  ;;  %v2209_v47 = vand.u32 4294901760, %v2208_v49  ;;  %v1084_v37 = vsub.f32 %v8419_v43, %v12975_v54  ;;  %v6321_v10 = vld [vmem:[%s12742_s3 + $0x218] sm:$0xff] }
 0x112   : > { %13734 = vst [vmem:[#allocation168_spill] sm:$0xff] %v9127_v61  ;;  %13735 = vst [vmem:[#allocation169_spill] sm:$0xff] %v9135_v19  ;;  %v946_v58 = vand.u32 4294901760, %v615_v46  ;;  %v632_v35 = vsel %vm631_vm12, %v628_v22, %v630_v41  ;;  %v635_v38 = vsel %vm631_vm12, %v630_v41, %v624_v52  ;;  %v604_v56 = vpop.permute.xlu0 %603  ;;  %6499 = vmatprep.subr.bf16.mxu0 %v9135_v19 }
 0x113   : > { %v1073_v49 = vand.u32 4294901760, %v1072_v42  ;;  %v9155_v44 = vsub.f32 %v641_v34, %v950_v8  ;;  %v643_v54 = vmul.f32 %v6324_v57, %v632_v35  ;;  %v644_v43 = vmul.f32 %v6325_v2, %v635_v38 }
 0x114   : > { %v606_v15 = vsel %vm605_vm13, %v9043_v62, %v604_v56  ;;  %v9160_v22 = vsub.f32 %v615_v46, %v946_v58  ;;  %v609_v52 = vsel %vm605_vm13, %v604_v56, %v598_v20  ;;  %v9164_v17 = vpack.c.bf16 %v950_v8, %v946_v58 }
 0x115   : > { %13737 = vst [vmem:[#allocation170_spill] sm:$0xff] %v9155_v44  ;;  %v617_v41 = vmul.f32 %v6320_v60, %v606_v15  ;;  %v12980_v0 = vand.u32 4294901760, %v9155_v44  ;;  %v2102_v19 = vand.u32 4294901760, %v644_v43  ;;  %v2104_v42 = vand.u32 4294901760, %v643_v54 }
 0x116   : > { %13738 = vst [vmem:[#allocation171_spill] sm:$0xff] %v9160_v22  ;;  %13739 = vst [vmem:[#allocation172_spill] sm:$0xff] %v9164_v17  ;;  %v618_v34 = vmul.f32 %v6321_v10, %v609_v52  ;;  %v12981_v57 = vand.u32 4294901760, %v9160_v22  ;;  %6501 = vmatpush1.bf16.msra.mxu0 %v9164_v17  ;;  %v9169_v35 = vpack.c.bf16 %v2209_v47, %v2197_v53  ;;  %v1085_v62 = vand.u32 4294901760, %v1084_v37 }
 0x117   : > { %v2100_v2 = vand.u32 4294901760, %v617_v41  ;;  %v9174_v56 = vsub.f32 %v9155_v44, %v12980_v0  ;;  %v9176_v58 = vsub.f32 %v644_v43, %v2102_v19  ;;  %v9178_v15 = vsub.f32 %v643_v54, %v2104_v42  ;;  %6503 = vmatprep.subr.bf16.mxu0 %v8169_v63  ;;  %v13752_v0 = vld [vmem:[#allocation26_spill] sm:$0xff] }
 0x118   : > { %v2098_v46 = vand.u32 4294901760, %v618_v34  ;;  %v9184_v20 = vsub.f32 %v9160_v22, %v12981_v57  ;;  %v9190_v60 = vpack.c.bf16 %v1085_v62, %v1073_v49  ;;  %v13746_v37 = vand.u32 4294901760, %v8460_v40  ;;  %v13747_v49 = vld [vmem:[#allocation44_spill] sm:$0xff]  ;;  %v13749_v62 = vld [vmem:[#allocation65_spill] sm:$0xff]  ;;  %v13757_v44 = vld [vmem:[#allocation34_spill] sm:$0xff] }
 0x119   : > { %13740 = vst [vmem:[#allocation173_spill] sm:$0xff] %v9176_v58  ;;  %13741 = vst [vmem:[#allocation174_spill] sm:$0xff] %v9178_v15  ;;  %v9186_v53 = vsub.f32 %v617_v41, %v2100_v2  ;;  %v9188_v8 = vpack.c.bf16 %v2104_v42, %v2100_v2  ;;  %v12982_v47 = vand.u32 4294901760, %v9178_v15  ;;  %v12988_v52 = vand.u32 4294901760, %v8518_v26  ;;  %v13759_v22 = vld [vmem:[#allocation67_spill] sm:$0xff] }
 0x11a   : > { %v9193_v43 = vsub.f32 %v618_v34, %v2098_v46  ;;  %v9195_v54 = vpack.c.bf16 %v2102_v19, %v2098_v46  ;;  %v1090_v38 = vsub.f32 %v8460_v40, %v13746_v37  ;;  %6505 = vmatpush1.bf16.msra.mxu0 %v8080_v48  ;;  %v12993_v41 = vand.u32 4294901760, %v8301_v13  ;;  %v13748_v19 = vld [vmem:[#allocation46_spill] sm:$0xff]  ;;  %v13750_v37 = vld [vmem:[#allocation63_spill] sm:$0xff] }
 0x11b   : > { %13742 = vst [vmem:[#allocation175_spill] sm:$0xff] %v9186_v53  ;;  %13743 = vst [vmem:[#allocation176_spill] sm:$0xff] %v9188_v8  ;;  %v12985_v10 = vand.u32 4294901760, %v9186_v53  ;;  %v9208_v34 = vsub.f32 %v9178_v15, %v12982_v47  ;;  %6507 = vmatprep.subr.bf16.mxu0 %v13748_v19  ;;  %v1102_v47 = vsub.f32 %v8518_v26, %v12988_v52  ;;  %v13753_v5 = vand.u32 4294901760, %v13749_v62 }
 0x11c   : > { %13744 = vst [vmem:[#allocation177_spill] sm:$0xff] %v9193_v43  ;;  %13745 = vst [vmem:[#allocation178_spill] sm:$0xff] %v9195_v54  ;;  %6811 = vmatprep.subr.bf16.mxu1 %v9195_v54  ;;  %v1091_v2 = vand.u32 4294901760, %v1090_v38  ;;  %v2202_v42 = vsub.f32 %v8301_v13, %v12993_v41  ;;  %v13751_v38 = vand.u32 4294901760, %v13747_v49  ;;  %v13004_v52 = vand.u32 4294901760, %v8563_v30  ;;  %v13755_v54 = vld [vmem:[#allocation33_spill] sm:$0xff] }
 0x11d   : > { %v9217_v57 = vsub.f32 %v9186_v53, %v12985_v10  ;;  %6813 = vmatpush1.bf16.msra.mxu1 %v9188_v8  ;;  %v2220_v10 = vsub.f32 %v13749_v62, %v13753_v5  ;;  %v13754_v8 = vand.u32 4294901760, %v13750_v37  ;;  %v13007_v48 = vand.u32 4294901760, %v8565_v6 }
 0x11e   : > { %v2214_v46 = vsub.f32 %v13747_v49, %v13751_v38  ;;  %6815 = vmatprep.subr.bf16.mxu1 %v13752_v0  ;;  %6509 = vmatpush1.bf16.msra.mxu0 %v13755_v54  ;;  %v1103_v41 = vand.u32 4294901760, %v1102_v47  ;;  %v2203_v63 = vand.u32 4294901760, %v2202_v42  ;;  %v13010_v38 = vand.u32 4294901760, %v8607_v27  ;;  %v13756_v0 = vld [vmem:[#allocation71_spill] sm:$0xff] }
 0x11f   : > { %v2232_v19 = vsub.f32 %v13750_v37, %v13754_v8  ;;  %6511 = vmatprep.subr.bf16.mxu0 %v13756_v0  ;;  %v2221_v15 = vand.u32 4294901760, %v2220_v10  ;;  %v1096_v5 = vsub.f32 %v8563_v30, %v13004_v52  ;;  %v1108_v8 = vsub.f32 %v8565_v6, %v13007_v48  ;;  %v13760_v6 = vld [vmem:[#allocation56_spill] sm:$0xff] }
 0x120   : > { %v2215_v17 = vand.u32 4294901760, %v2214_v46  ;;  %v9248_v54 = vpack.c.bf16 %v1103_v41, %v1091_v2  ;;  %v1114_v42 = vsub.f32 %v8607_v27, %v13010_v38  ;;  %v13013_v10 = vand.u32 4294901760, %v8661_v50  ;;  %v13762_v38 = vld [vmem:[#allocation89_spill] sm:$0xff]  ;;  %v13763_v27 = vld [vmem:[#allocation96_spill] sm:$0xff] }
 0x121   : > { %v2233_v53 = vand.u32 4294901760, %v2232_v19  ;;  %6817 = vmatpush1.bf16.msra.mxu1 %v13757_v44  ;;  %v13758_v19 = vld [vmem:[#allocation50_spill] sm:$0xff]  ;;  %v1097_v52 = vand.u32 4294901760, %v1096_v5  ;;  %v1109_v0 = vand.u32 4294901760, %v1108_v8  ;;  %v13014_v48 = vand.u32 4294901760, %v13759_v22 }
 0x122   : > { %v9250_v47 = vpack.c.bf16 %v2215_v17, %v2203_v63  ;;  %6819 = vmatprep.subr.bf16.mxu1 %v13758_v19  ;;  %6513 = vmatpush1.bf16.msra.mxu0 %v13760_v6  ;;  %v1115_v41 = vand.u32 4294901760, %v1114_v42  ;;  %v1126_v63 = vsub.f32 %v8661_v50, %v13013_v10  ;;  %v13761_v17 = vld [vmem:[#allocation68_spill] sm:$0xff]  ;;  %v13018_v44 = vand.u32 4294901760, %v13762_v38  ;;  %v13765_v42 = vld [vmem:[#allocation57_spill] sm:$0xff] }
 0x123   : > { %v9257_v46 = vpack.c.bf16 %v2233_v53, %v2221_v15  ;;  %v13016_v2 = vand.u32 4294901760, %v13761_v17  ;;  %6515 = vmatprep.subr.bf16.mxu0 %v13763_v27  ;;  %v9267_v19 = vpack.c.bf16 %v1109_v0, %v1097_v52  ;;  %v2226_v15 = vsub.f32 %v13759_v22, %v13014_v48  ;;  %v13764_v53 = vld [vmem:[#allocation87_spill] sm:$0xff] }
 0x124   : > { %v13020_v5 = vand.u32 4294901760, %v13764_v53  ;;  %v1127_v6 = vand.u32 4294901760, %v1126_v63  ;;  %v2244_v0 = vsub.f32 %v13762_v38, %v13018_v44  ;;  %v13026_v52 = vand.u32 4294901760, %v8709_v31  ;;  %v13766_v27 = vld [vmem:[#allocation75_spill] sm:$0xff] }
 0x125   : > { %6821 = vmatpush1.bf16.msra.mxu1 %v13765_v42  ;;  %v2238_v10 = vsub.f32 %v13761_v17, %v13016_v2  ;;  %v2227_v48 = vand.u32 4294901760, %v2226_v15  ;;  %v13767_v42 = vand.u32 4294901760, %v8707_v21  ;;  %v13029_v22 = vand.u32 4294901760, %v8753_v51  ;;  %v13768_v2 = vld [vmem:[#allocation80_spill] sm:$0xff] }
 0x126   : > { %6823 = vmatprep.subr.bf16.mxu1 %v13766_v27  ;;  %v2256_v8 = vsub.f32 %v13764_v53, %v13020_v5  ;;  %6517 = vmatpush1.bf16.msra.mxu0 %v13768_v2  ;;  %v9291_v17 = vpack.c.bf16 %v1127_v6, %v1115_v41  ;;  %v2245_v38 = vand.u32 4294901760, %v2244_v0  ;;  %v1132_v15 = vsub.f32 %v8709_v31, %v13026_v52  ;;  %v13769_v53 = vld [vmem:[#allocation81_spill] sm:$0xff]  ;;  %v13770_v41 = vld [vmem:[#allocation91_spill] sm:$0xff]  ;;  %v13772_v52 = vld [vmem:[#allocation102_spill] sm:$0xff] }
 0x127   : > { %v1120_v63 = vsub.f32 %v8707_v21, %v13767_v42  ;;  %v2239_v44 = vand.u32 4294901760, %v2238_v10  ;;  %985 = vmatprep.subr.mxu0 %v8711_v23  ;;  %v1138_v42 = vsub.f32 %v8753_v51, %v13029_v22  ;;  %v13034_v21 = vand.u32 4294901760, %v8786_v39  ;;  %v13771_v2 = vld [vmem:[#allocation93_spill] sm:$0xff]  ;;  %v13773_v51 = vld [vmem:[#allocation92_spill] sm:$0xff] }
 0x128   : > { %v2257_v27 = vand.u32 4294901760, %v2256_v8  ;;  %v1133_v10 = vand.u32 4294901760, %v1132_v15  ;;  %v13032_v0 = vand.u32 4294901760, %v13770_v41  ;;  %v13033_v50 = vand.u32 4294901760, %v13771_v2 }
 0x129   : > { %v1121_v5 = vand.u32 4294901760, %v1120_v63  ;;  %6825 = vmatpush1.bf16.msra.mxu1 %v13769_v53  ;;  %v9302_v6 = vpack.c.bf16 %v2239_v44, %v2227_v48  ;;  %v1139_v8 = vand.u32 4294901760, %v1138_v42  ;;  %v1150_v63 = vsub.f32 %v8786_v39, %v13034_v21 }
 0x12a   : > { %6827 = vmatprep.subr.bf16.mxu1 %v13772_v52  ;;  %v9307_v23 = vpack.c.bf16 %v2257_v27, %v2245_v38  ;;  %v13035_v22 = vand.u32 4294901760, %v8731_v14  ;;  %987 = vmatpush1.msra.mxu0 %v13773_v51  ;;  %v2250_v44 = vsub.f32 %v13770_v41, %v13032_v0  ;;  %v2262_v27 = vsub.f32 %v13771_v2, %v13033_v50  ;;  %v13774_v0 = vld [vmem:[#allocation126_spill] sm:$0xff]  ;;  %v13775_v51 = vld [vmem:[#allocation108_spill] sm:$0xff] }
 0x12b   : > { %v9314_v48 = vpack.c.bf16 %v1133_v10, %v1121_v5  ;;  %v13036_v38 = vand.u32 4294901760, %v8719_v24  ;;  %6519 = vmatprep.subr.bf16.mxu0 %v8798_v28  ;;  %1009 = vmatmul.mubr.f32.vlgmr.msra.gmra.mrb[0].mxu0 %v8848_v55  ;;  %v1151_v15 = vand.u32 4294901760, %v1150_v63  ;;  %v1145_v42 = vand.u32 4294901760, %v8858_v29 }
 0x12c   : > { %v2268_v5 = vsub.f32 %v8731_v14, %v13035_v22  ;;  %v1157_v10 = vand.u32 4294901760, %v8853_v25  ;;  %6521 = vmatpush1.bf16.msra.mxu0 %v8915_v12  ;;  %v2251_v50 = vand.u32 4294901760, %v2250_v44  ;;  %v2263_v21 = vand.u32 4294901760, %v2262_v27 }
 0x12d   : > { %6829 = vmatpush1.bf16.msra.mxu1 %v13774_v0  ;;  %v2280_v28 = vsub.f32 %v8719_v24, %v13036_v38  ;;  %v13039_v63 = vand.u32 4294901760, %v8904_v36  ;;  %6523 = vmatprep.subr.bf16.mxu0 %v8968_v59  ;;  %v9338_v22 = vpack.c.bf16 %v1151_v15, %v1139_v8  ;;  %v13776_v0 = vld [vmem:[#allocation4_spill] sm:$0xff]  ;;  %v13779_v8 = vld [vmem:[#allocation122_spill] sm:$0xff] }
 0x12e   : > { %2139 = vmatprep.subr.mxu1 %v13775_v51  ;;  %v2269_v29 = vand.u32 4294901760, %v2268_v5  ;;  %v9340_v25 = vpack.c.bf16 %v1157_v10, %v1145_v42  ;;  %v13042_v52 = vand.u32 4294901760, %v13776_v0  ;;  %v9343_v12 = vpack.c.bf16 %v2263_v21, %v2251_v50  ;;  %v13777_v38 = vld [vmem:[#allocation116_spill] sm:$0xff]  ;;  %v13780_v5 = vld [vmem:[#allocation138_spill] sm:$0xff] }
 0x12f   : > { %v2281_v44 = vand.u32 4294901760, %v2280_v28  ;;  %v1162_v27 = vsub.f32 %v8904_v36, %v13039_v63  ;;  %v13043_v53 = vand.u32 4294901760, %v13777_v38  ;;  %v13778_v24 = vld [vmem:[#allocation100_spill] sm:$0xff]  ;;  %v13044_v15 = vand.u32 4294901760, %v13779_v8  ;;  %v13782_v21 = vld [vmem:[#allocation114_spill] sm:$0xff] }
 0x130   : > { %1350 = vmatprep.mubr.f32.mxu0 %v13778_v24  ;;  %v1174_v59 = vsub.f32 %v13776_v0, %v13042_v52  ;;  %v13046_v42 = vand.u32 4294901760, %v13780_v5  ;;  %v13781_v10 = vld [vmem:[#allocation136_spill] sm:$0xff]  ;;  %6525 = vmatpush1.bf16.msra.mxu0 %v9006_v4  ;;  %v1169_v36 = vand.u32 4294901760, %v8973_v9 }
 0x131   : > { %2141 = vmatpush1.msra.mxu1 %v13782_v21  ;;  %v9358_v28 = vpack.c.bf16 %v2281_v44, %v2269_v29  ;;  %v1163_v63 = vand.u32 4294901760, %v1162_v27  ;;  %v2274_v51 = vsub.f32 %v13777_v38, %v13043_v53  ;;  %6527 = vmatprep.subr.bf16.mxu0 %v9097_v3  ;;  %v2286_v50 = vsub.f32 %v13779_v8, %v13044_v15  ;;  %v13784_v27 = vld [vmem:[#allocation6_spill] sm:$0xff] }
 0x132   : > { %6831 = vmatprep.subr.bf16.mxu1 %v9049_v33  ;;  %v1175_v52 = vand.u32 4294901760, %v1174_v59  ;;  %v2292_v4 = vsub.f32 %v13780_v5, %v13046_v42  ;;  %v13783_v29 = vand.u32 4294901760, %v13781_v10  ;;  %2163 = vmatmul.mubr.f32.vlgmr.msra.gmra.mrb[0].mxu1 %v8848_v55  ;;  %v13047_v33 = vand.u32 4294901760, %v13784_v27  ;;  %v13785_v59 = vld [vmem:[#allocation154_spill] sm:$0xff] }
 0x133   : > { %v2275_v9 = vand.u32 4294901760, %v2274_v51  ;;  %v13050_v3 = vand.u32 4294901760, %v8966_v32  ;;  %v13053_v53 = vand.u32 4294901760, %v13785_v59  ;;  %6833 = vmatpush1.bf16.msra.mxu1 %v9119_v11  ;;  %v2287_v21 = vand.u32 4294901760, %v2286_v50  ;;  %2504 = vmatprep.mubr.f32.mxu1 %v13778_v24 }
 0x134   : > { %v2304_v44 = vsub.f32 %v13781_v10, %v13783_v29  ;;  %v9380_v15 = vpack.c.bf16 %v1175_v52, %v1163_v63  ;;  %v2293_v0 = vand.u32 4294901760, %v2292_v4  ;;  %6835 = vmatprep.subr.bf16.mxu1 %v9169_v35  ;;  %6529 = vmatpush1.bf16.msra.mxu0 %v9190_v60  ;;  %v1180_v51 = vsub.f32 %v13784_v27, %v13047_v33  ;;  %v13786_v52 = vld [vmem:[#allocation143_spill] sm:$0xff]  ;;  %v13787_v60 = vld [vmem:[#allocation142_spill] sm:$0xff] }
 0x135   : > { %v1186_v55 = vsub.f32 %v8966_v32, %v13050_v3  ;;  %v1198_v11 = vsub.f32 %v13785_v59, %v13053_v53  ;;  %v2299_v63 = vand.u32 4294901760, %v13786_v52  ;;  %6531 = vmatprep.subr.bf16.mxu0 %v9248_v54  ;;  %v9396_v50 = vpack.c.bf16 %v2287_v21, %v2275_v9  ;;  %v13788_v29 = vld [vmem:[#allocation147_spill] sm:$0xff]  ;;  %v13789_v3 = vld [vmem:[#allocation5_spill] sm:$0xff] }
 0x136   : > { %v2305_v42 = vand.u32 4294901760, %v2304_v44  ;;  %v2311_v4 = vand.u32 4294901760, %v13787_v60  ;;  %v13072_v44 = vand.u32 4294901760, %v13788_v29  ;;  %v1181_v33 = vand.u32 4294901760, %v1180_v51 }
 0x137   : > { %v1187_v24 = vand.u32 4294901760, %v1186_v55  ;;  %v1199_v27 = vand.u32 4294901760, %v1198_v11  ;;  %v13065_v32 = vand.u32 4294901760, %v13789_v3  ;;  %6837 = vmatpush1.bf16.msra.mxu1 %v9250_v47  ;;  %v13064_v51 = vand.u32 4294901760, %v9107_v18 }
 0x138   : > { %v9398_v35 = vpack.c.bf16 %v2305_v42, %v2293_v0  ;;  %v9404_v53 = vpack.c.bf16 %v2311_v4, %v2299_v63  ;;  %v2316_v54 = vsub.f32 %v13788_v29, %v13072_v44  ;;  %v1193_v0 = vand.u32 4294901760, %v9059_v45  ;;  %6839 = vmatprep.subr.bf16.mxu1 %v9257_v46  ;;  %6533 = vmatpush1.bf16.msra.mxu0 %v9267_v19  ;;  %v13790_v45 = vld [vmem:[#allocation152_spill] sm:$0xff] }
 0x139   : > { %v1205_v42 = vand.u32 4294901760, %v9054_v7  ;;  %v6544_v21 = vpack.c.bf16 %v1181_v33, %v1169_v36  ;;  %v9413_v9 = vpack.c.bf16 %v1199_v27, %v1187_v24  ;;  %v2328_v47 = vsub.f32 %v13789_v3, %v13065_v32  ;;  %6535 = vmatprep.subr.bf16.mxu0 %v9291_v17  ;;  %v13791_v36 = vld [vmem:[#allocation11_spill] sm:$0xff] }
 0x13a   : > { %v2317_v55 = vand.u32 4294901760, %v2316_v54  ;;  %v13056_v7 = vand.u32 4294901760, %v9127_v61  ;;  %v2323_v46 = vand.u32 4294901760, %v13790_v45  ;;  %v1210_v24 = vsub.f32 %v9107_v18, %v13064_v51  ;;  %v13793_v45 = vld [vmem:[#allocation27_spill] sm:$0xff]  ;;  %v13802_v51 = vld [vmem:[#allocation30_spill] sm:$0xff] }
 0x13b   : > { %v9420_v11 = vpack.c.bf16 %v1205_v42, %v1193_v0  ;;  %v2329_v52 = vand.u32 4294901760, %v2328_v47  ;;  %v13054_v19 = vand.u32 4294901760, %v13791_v36  ;;  %v13055_v27 = vand.u32 4294901760, %v9065_v1  ;;  %6841 = vmatpush1.bf16.msra.mxu1 %v9302_v6 }
 0x13c   : > { %v1222_v17 = vsub.f32 %v9127_v61, %v13056_v7  ;;  %v13057_v33 = vand.u32 4294901760, %v9061_v16  ;;  %v1217_v63 = vand.u32 4294901760, %v9184_v20  ;;  %v1229_v60 = vand.u32 4294901760, %v9174_v56  ;;  %6843 = vmatprep.subr.bf16.mxu1 %v9307_v23  ;;  %6537 = vmatpush1.bf16.msra.mxu0 %v9314_v48  ;;  %v13792_v20 = vld [vmem:[#allocation23_spill] sm:$0xff] }
 0x13d   : > { %v6854_v4 = vpack.c.bf16 %v2329_v52, %v2317_v55  ;;  %v1211_v54 = vand.u32 4294901760, %v1210_v24  ;;  %v2334_v6 = vsub.f32 %v13791_v36, %v13054_v19  ;;  %v2340_v0 = vsub.f32 %v9065_v1, %v13055_v27  ;;  %6539 = vmatprep.subr.bf16.mxu0 %v9338_v22  ;;  %v13794_v24 = vld [vmem:[#allocation166_spill] sm:$0xff]  ;;  %v13809_v36 = vld [vmem:[#allocation53_spill] sm:$0xff] }
 0x13e   : > { %v1223_v42 = vand.u32 4294901760, %v1222_v17  ;;  %v2352_v56 = vsub.f32 %v9061_v16, %v13057_v33  ;;  %v9448_v23 = vpack.c.bf16 %v1229_v60, %v1217_v63  ;;  %v13062_v48 = vand.u32 4294901760, %v13792_v20  ;;  %v13795_v17 = vld [vmem:[#allocation165_spill] sm:$0xff] }
 0x13f   : > { %v2335_v47 = vand.u32 4294901760, %v2334_v6  ;;  %v2341_v55 = vand.u32 4294901760, %v2340_v0  ;;  %v13060_v52 = vand.u32 4294901760, %v13793_v45  ;;  %v2347_v19 = vand.u32 4294901760, %v13794_v24  ;;  %6845 = vmatpush1.bf16.msra.mxu1 %v9343_v12 }
 0x140   : > { %v6550_v27 = vpack.c.bf16 %v1223_v42, %v1211_v54  ;;  %v2353_v7 = vand.u32 4294901760, %v2352_v56  ;;  %v1234_v22 = vsub.f32 %v13792_v20, %v13062_v48  ;;  %v2359_v33 = vand.u32 4294901760, %v13795_v17  ;;  %6847 = vmatprep.subr.bf16.mxu1 %v9358_v28  ;;  %6541 = vmatpush1.bf16.msra.mxu0 %v9340_v25  ;;  %v13796_v56 = vld [vmem:[#allocation24_spill] sm:$0xff] }
 0x141   : > { %v6856_v63 = vpack.c.bf16 %v2335_v47, %v2323_v46  ;;  %v1246_v60 = vsub.f32 %v13793_v45, %v13060_v52  ;;  %v13058_v6 = vand.u32 4294901760, %v9193_v43  ;;  %v13059_v12 = vand.u32 4294901760, %v9176_v58  ;;  %6543 = vmatprep.subr.bf16.mxu0 %v9380_v15  ;;  %v13797_v47 = vld [vmem:[#allocation25_spill] sm:$0xff] }
 0x142   : > { %v6858_v54 = vpack.c.bf16 %v2353_v7, %v2341_v55  ;;  %v1235_v0 = vand.u32 4294901760, %v1234_v22  ;;  %v9466_v42 = vpack.c.bf16 %v2359_v33, %v2347_v19  ;;  %v13061_v24 = vand.u32 4294901760, %v13796_v56  ;;  %v13798_v7 = vld [vmem:[#allocation47_spill] sm:$0xff] }
 0x143   : > { %v1247_v28 = vand.u32 4294901760, %v1246_v60  ;;  %v2364_v25 = vsub.f32 %v9193_v43, %v13058_v6  ;;  %v2376_v46 = vsub.f32 %v9176_v58, %v13059_v12  ;;  %v13063_v17 = vand.u32 4294901760, %v13797_v47  ;;  %6849 = vmatpush1.bf16.msra.mxu1 %v9396_v50  ;;  %v13799_v33 = vld [vmem:[#allocation51_spill] sm:$0xff] }
 0x144   : > { %v1240_v15 = vsub.f32 %v13796_v56, %v13061_v24  ;;  %v13066_v19 = vand.u32 4294901760, %v13798_v7  ;;  %v13069_v55 = vand.u32 4294901760, %v13799_v33  ;;  %v2371_v22 = vand.u32 4294901760, %v9217_v57  ;;  %6851 = vmatprep.subr.bf16.mxu1 %v9398_v35  ;;  %6545 = vmatpush1.bf16.msra.mxu0 %v6544_v21 }
 0x145   : > { %v6554_v60 = vpack.c.bf16 %v1247_v28, %v1235_v0  ;;  %v2365_v6 = vand.u32 4294901760, %v2364_v25  ;;  %v2377_v12 = vand.u32 4294901760, %v2376_v46  ;;  %v1252_v50 = vsub.f32 %v13797_v47, %v13063_v17  ;;  %6547 = vmatprep.subr.bf16.mxu0 %v9413_v9  ;;  %v13800_v28 = vld [vmem:[#allocation28_spill] sm:$0xff]  ;;  %v13801_v46 = vld [vmem:[#allocation29_spill] sm:$0xff] }
 0x146   : > { %v1241_v52 = vand.u32 4294901760, %v1240_v15  ;;  %v1258_v24 = vsub.f32 %v13798_v7, %v13066_v19  ;;  %v1270_v57 = vsub.f32 %v13799_v33, %v13069_v55  ;;  %v2383_v35 = vand.u32 4294901760, %v9208_v34 }
 0x147   : > { %v6862_v21 = vpack.c.bf16 %v2377_v12, %v2365_v6  ;;  %v1253_v0 = vand.u32 4294901760, %v1252_v50  ;;  %v13067_v25 = vand.u32 4294901760, %v13800_v28  ;;  %v13068_v48 = vand.u32 4294901760, %v13801_v46  ;;  %6853 = vmatpush1.bf16.msra.mxu1 %v9404_v53  ;;  %v13803_v12 = vld [vmem:[#allocation35_spill] sm:$0xff] }
 0x148   : > { %v1259_v9 = vand.u32 4294901760, %v1258_v24  ;;  %v1271_v15 = vand.u32 4294901760, %v1270_v57  ;;  %v6864_v17 = vpack.c.bf16 %v2383_v35, %v2371_v22  ;;  %v13070_v32 = vand.u32 4294901760, %v13802_v51  ;;  %6855 = vmatprep.subr.bf16.mxu1 %v6854_v4  ;;  %6549 = vmatpush1.bf16.msra.mxu0 %v9420_v11  ;;  %v13804_v4 = vld [vmem:[#allocation69_spill] sm:$0xff]  ;;  %v13805_v11 = vld [vmem:[#allocation72_spill] sm:$0xff] }
 0x149   : > { %v6556_v19 = vpack.c.bf16 %v1253_v0, %v1241_v52  ;;  %v2388_v34 = vsub.f32 %v13800_v28, %v13067_v25  ;;  %v2400_v6 = vsub.f32 %v13801_v46, %v13068_v48  ;;  %v13071_v50 = vand.u32 4294901760, %v13803_v12  ;;  %6551 = vmatprep.subr.bf16.mxu0 %v6550_v27  ;;  %v13806_v25 = vld [vmem:[#allocation48_spill] sm:$0xff] }
 0x14a   : > { %v6558_v53 = vpack.c.bf16 %v1271_v15, %v1259_v9  ;;  %v1264_v24 = vsub.f32 %v13802_v51, %v13070_v32  ;;  %v13073_v22 = vand.u32 4294901760, %v13804_v4  ;;  %v13074_v52 = vand.u32 4294901760, %v13805_v11  ;;  %v13807_v15 = vld [vmem:[#allocation49_spill] sm:$0xff] }
 0x14b   : > { %v2389_v57 = vand.u32 4294901760, %v2388_v34  ;;  %v2401_v35 = vand.u32 4294901760, %v2400_v6  ;;  %v1276_v0 = vsub.f32 %v13803_v12, %v13071_v50  ;;  %v13081_v48 = vand.u32 4294901760, %v13806_v25  ;;  %6857 = vmatpush1.bf16.msra.mxu1 %v6856_v63 }
 0x14c   : > { %v1265_v55 = vand.u32 4294901760, %v1264_v24  ;;  %v1282_v27 = vsub.f32 %v13804_v4, %v13073_v22  ;;  %v1294_v9 = vsub.f32 %v13805_v11, %v13074_v52  ;;  %v13079_v32 = vand.u32 4294901760, %v13807_v15  ;;  %6859 = vmatprep.subr.bf16.mxu1 %v6858_v54  ;;  %6553 = vmatpush1.bf16.msra.mxu0 %v9448_v23  ;;  %v13808_v24 = vld [vmem:[#allocation52_spill] sm:$0xff] }
 0x14d   : > { %v6866_v34 = vpack.c.bf16 %v2401_v35, %v2389_v57  ;;  %v1277_v6 = vand.u32 4294901760, %v1276_v0  ;;  %v2394_v63 = vsub.f32 %v13806_v25, %v13081_v48  ;;  %v13080_v50 = vand.u32 4294901760, %v13808_v24  ;;  %6555 = vmatprep.subr.bf16.mxu0 %v6554_v60  ;;  %v13810_v57 = vld [vmem:[#allocation58_spill] sm:$0xff]  ;;  %v13813_v48 = vld [vmem:[#allocation101_spill] sm:$0xff] }
 0x14e   : > { %v1283_v44 = vand.u32 4294901760, %v1282_v27  ;;  %v1295_v22 = vand.u32 4294901760, %v1294_v9  ;;  %v2406_v52 = vsub.f32 %v13807_v15, %v13079_v32  ;;  %v13084_v59 = vand.u32 4294901760, %v13809_v36  ;;  %v13811_v9 = vld [vmem:[#allocation59_spill] sm:$0xff] }
 0x14f   : > { %v6560_v54 = vpack.c.bf16 %v1277_v6, %v1265_v55  ;;  %v2395_v58 = vand.u32 4294901760, %v2394_v63  ;;  %v2412_v23 = vsub.f32 %v13808_v24, %v13080_v50  ;;  %v13085_v35 = vand.u32 4294901760, %v13810_v57  ;;  %6861 = vmatpush1.bf16.msra.mxu1 %v9466_v42  ;;  %v13812_v63 = vld [vmem:[#allocation94_spill] sm:$0xff] }
 0x150   : > { %v6562_v0 = vpack.c.bf16 %v1295_v22, %v1283_v44  ;;  %v2407_v60 = vand.u32 4294901760, %v2406_v52  ;;  %v2424_v27 = vsub.f32 %v13809_v36, %v13084_v59  ;;  %v13088_v32 = vand.u32 4294901760, %v13811_v9  ;;  %6863 = vmatprep.subr.bf16.mxu1 %v6862_v21  ;;  %6557 = vmatpush1.bf16.msra.mxu0 %v6556_v19  ;;  %v13814_v52 = vld [vmem:[#allocation73_spill] sm:$0xff] }
 0x151   : > { %v2413_v55 = vand.u32 4294901760, %v2412_v23  ;;  %v1288_v6 = vsub.f32 %v13810_v57, %v13085_v35  ;;  %v13091_v50 = vand.u32 4294901760, %v13812_v63  ;;  %v13092_v43 = vand.u32 4294901760, %v13813_v48  ;;  %6559 = vmatprep.subr.bf16.mxu0 %v6558_v53  ;;  %v13815_v35 = vld [vmem:[#allocation74_spill] sm:$0xff] }
 0x152   : > { %v6868_v44 = vpack.c.bf16 %v2407_v60, %v2395_v58  ;;  %v2425_v42 = vand.u32 4294901760, %v2424_v27  ;;  %v1300_v22 = vsub.f32 %v13811_v9, %v13088_v32  ;;  %v13095_v59 = vand.u32 4294901760, %v13814_v52  ;;  %v13816_v27 = vld [vmem:[#allocation76_spill] sm:$0xff] }
 0x153   : > { %v1289_v21 = vand.u32 4294901760, %v1288_v6  ;;  %v1306_v19 = vsub.f32 %v13812_v63, %v13091_v50  ;;  %v1318_v23 = vsub.f32 %v13813_v48, %v13092_v43  ;;  %v13098_v16 = vand.u32 4294901760, %v13815_v35  ;;  %6865 = vmatpush1.bf16.msra.mxu1 %v6864_v17  ;;  %v13817_v43 = vld [vmem:[#allocation77_spill] sm:$0xff] }
 0x154   : > { %v6870_v58 = vpack.c.bf16 %v2425_v42, %v2413_v55  ;;  %v1301_v53 = vand.u32 4294901760, %v1300_v22  ;;  %v2418_v60 = vsub.f32 %v13814_v52, %v13095_v59  ;;  %v13099_v32 = vand.u32 4294901760, %v13816_v27  ;;  %6867 = vmatprep.subr.bf16.mxu1 %v6866_v34  ;;  %6561 = vmatpush1.bf16.msra.mxu0 %v6560_v54  ;;  %v13818_v22 = vld [vmem:[#allocation82_spill] sm:$0xff] }
 0x155   : > { %v1307_v6 = vand.u32 4294901760, %v1306_v19  ;;  %v1319_v1 = vand.u32 4294901760, %v1318_v23  ;;  %v2430_v50 = vsub.f32 %v13815_v35, %v13098_v16  ;;  %v13100_v61 = vand.u32 4294901760, %v13817_v43  ;;  %6563 = vmatprep.subr.bf16.mxu0 %v6562_v0  ;;  %v13819_v19 = vld [vmem:[#allocation83_spill] sm:$0xff] }
 0x156   : > { %v6564_v17 = vpack.c.bf16 %v1301_v53, %v1289_v21  ;;  %v2419_v55 = vand.u32 4294901760, %v2418_v60  ;;  %v2436_v42 = vsub.f32 %v13816_v27, %v13099_v32  ;;  %v13102_v59 = vand.u32 4294901760, %v13818_v22  ;;  %v13820_v21 = vld [vmem:[#allocation117_spill] sm:$0xff]  ;;  %v13839_v27 = vld [vmem:[#allocation15_spill] sm:$0xff] }
 0x157   : > { %v6566_v18 = vpack.c.bf16 %v1319_v1, %v1307_v6  ;;  %v2431_v34 = vand.u32 4294901760, %v2430_v50  ;;  %v2448_v54 = vsub.f32 %v13817_v43, %v13100_v61  ;;  %v13103_v23 = vand.u32 4294901760, %v13819_v19  ;;  %6869 = vmatpush1.bf16.msra.mxu1 %v6868_v44  ;;  %v13821_v60 = vld [vmem:[#allocation97_spill] sm:$0xff]  ;;  %v13822_v61 = vld [vmem:[#allocation98_spill] sm:$0xff] }
 0x158   : > { %v2437_v16 = vand.u32 4294901760, %v2436_v42  ;;  %v1312_v0 = vsub.f32 %v13818_v22, %v13102_v59  ;;  %v13105_v53 = vand.u32 4294901760, %v13820_v21  ;;  %v13108_v32 = vand.u32 4294901760, %v13821_v60  ;;  %6871 = vmatprep.subr.bf16.mxu1 %v6870_v58  ;;  %6565 = vmatpush1.bf16.msra.mxu0 %v6564_v17  ;;  %v13823_v58 = vld [vmem:[#allocation105_spill] sm:$0xff] }
 0x159   : > { %v6872_v1 = vpack.c.bf16 %v2431_v34, %v2419_v55  ;;  %v2449_v50 = vand.u32 4294901760, %v2448_v54  ;;  %v1324_v6 = vsub.f32 %v13819_v19, %v13103_v23  ;;  %v13110_v3 = vand.u32 4294901760, %v13822_v61  ;;  %6567 = vmatprep.subr.bf16.mxu0 %v6566_v18  ;;  %v13824_v23 = vld [vmem:[#allocation106_spill] sm:$0xff]  ;;  %v13832_v43 = vld [vmem:[#allocation109_spill] sm:$0xff] }
 0x15a   : > { %v1313_v44 = vand.u32 4294901760, %v1312_v0  ;;  %v1330_v42 = vsub.f32 %v13820_v21, %v13105_v53  ;;  %v2442_v59 = vsub.f32 %v13821_v60, %v13108_v32  ;;  %v13112_v17 = vand.u32 4294901760, %v13823_v58  ;;  %v13825_v21 = vld [vmem:[#allocation99_spill] sm:$0xff] }
 0x15b   : > { %v6874_v55 = vpack.c.bf16 %v2449_v50, %v2437_v16  ;;  %v1325_v34 = vand.u32 4294901760, %v1324_v6  ;;  %v2454_v54 = vsub.f32 %v13822_v61, %v13110_v3  ;;  %v13116_v29 = vand.u32 4294901760, %v13824_v23  ;;  %6873 = vmatpush1.bf16.msra.mxu1 %v6872_v1  ;;  %v13826_v50 = vld [vmem:[#allocation8_spill] sm:$0xff]  ;;  %v13827_v6 = vld [vmem:[#allocation9_spill] sm:$0xff]  ;;  %v13828_v1 = vld [vmem:[#allocation127_spill] sm:$0xff] }
 0x15c   : > { %v1331_v18 = vand.u32 4294901760, %v1330_v42  ;;  %v2443_v0 = vand.u32 4294901760, %v2442_v59  ;;  %v2460_v53 = vsub.f32 %v13823_v58, %v13112_v17  ;;  %v13118_v19 = vand.u32 4294901760, %v13825_v21  ;;  %v13829_v17 = vld [vmem:[#allocation128_spill] sm:$0xff] }
 0x15d   : > { %6875 = vmatprep.subr.bf16.mxu1 %v6874_v55  ;;  %v6568_v32 = vpack.c.bf16 %v1325_v34, %v1313_v44  ;;  %v2455_v60 = vand.u32 4294901760, %v2454_v54  ;;  %v2472_v16 = vsub.f32 %v13824_v23, %v13116_v29  ;;  %v6570_v3 = vpack.c.bf16 %v13827_v6, %v13826_v50  ;;  %v13830_v34 = vld [vmem:[#allocation13_spill] sm:$0xff]  ;;  %v13831_v54 = vld [vmem:[#allocation14_spill] sm:$0xff]  ;;  %v13834_v50 = vld [vmem:[#allocation32_spill] sm:$0xff] }
 0x15e   : > { %v2461_v61 = vand.u32 4294901760, %v2460_v53  ;;  %v1336_v59 = vsub.f32 %v13825_v21, %v13118_v19  ;;  %v13120_v42 = vand.u32 4294901760, %v13828_v1  ;;  %v13124_v58 = vand.u32 4294901760, %v13829_v17  ;;  %v13833_v6 = vld [vmem:[#allocation21_spill] sm:$0xff] }
 0x15f   : > { %6569 = vmatpush1.bf16.msra.mxu0 %v6568_v32  ;;  %v6876_v55 = vpack.c.bf16 %v2455_v60, %v2443_v0  ;;  %v2473_v44 = vand.u32 4294901760, %v2472_v16  ;;  %v6572_v22 = vpack.c.bf16 %v13831_v54, %v13830_v34  ;;  %v13127_v29 = vand.u32 4294901760, %v13832_v43  ;;  %v13835_v16 = vld [vmem:[#allocation118_spill] sm:$0xff] }
 0x160   : > { %1332 = vmatprep.subr.mxu0 %v1331_v18  ;;  %v1337_v23 = vand.u32 4294901760, %v1336_v59  ;;  %v2466_v53 = vsub.f32 %v13828_v1, %v13120_v42  ;;  %v2478_v19 = vsub.f32 %v13829_v17, %v13124_v58  ;;  %v6574_v32 = vpack.c.bf16 %v13834_v50, %v13833_v6  ;;  %v13836_v59 = vld [vmem:[#allocation37_spill] sm:$0xff]  ;;  %v13837_v54 = vld [vmem:[#allocation38_spill] sm:$0xff]  ;;  %v13841_v17 = vld [vmem:[#allocation55_spill] sm:$0xff] }
 0x161   : > { %6877 = vmatpush1.bf16.msra.mxu1 %v6876_v55  ;;  %v6878_v60 = vpack.c.bf16 %v2473_v44, %v2461_v61  ;;  %v2484_v0 = vsub.f32 %v13832_v43, %v13127_v29  ;;  %v13128_v18 = vand.u32 4294901760, %v13835_v16  ;;  %v6576_v34 = vpack.c.bf16 %v13837_v54, %v13836_v59  ;;  %v13838_v1 = vld [vmem:[#allocation17_spill] sm:$0xff]  ;;  %v13842_v55 = vld [vmem:[#allocation19_spill] sm:$0xff]  ;;  %v13843_v44 = vld [vmem:[#allocation20_spill] sm:$0xff] }
 0x162   : > { %v2467_v21 = vand.u32 4294901760, %v2466_v53  ;;  %v2479_v42 = vand.u32 4294901760, %v2478_v19  ;;  %v6882_v35 = vpack.c.bf16 %v13839_v27, %v13838_v1  ;;  %v13840_v58 = vld [vmem:[#allocation45_spill] sm:$0xff]  ;;  %v6884_v29 = vpack.c.bf16 %v13843_v44, %v13842_v55  ;;  %v13845_v6 = vld [vmem:[#allocation39_spill] sm:$0xff]  ;;  %v13848_v1 = vld [vmem:[#allocation62_spill] sm:$0xff] }
 0x163   : > { %v6578_v52 = vpack.c.bf16 %v13841_v17, %v13840_v58  ;;  %6879 = vmatprep.subr.bf16.mxu1 %v6878_v60  ;;  %1338 = vmatpush1.msra.mxu0 %v1337_v23  ;;  %v2490_v61 = vsub.f32 %v13835_v16, %v13128_v18  ;;  %v13844_v50 = vld [vmem:[#allocation41_spill] sm:$0xff]  ;;  %v6582_v23 = vpack.c.bf16 %v8518_v26, %v8460_v40  ;;  %v2485_v60 = vand.u32 4294901760, %v2484_v0  ;;  %v13854_v26 = vld [vmem:[#allocation68_spill] sm:$0xff]  ;;  %v13856_v40 = vld [vmem:[#allocation87_spill] sm:$0xff] }
 0x164   : > { %v6886_v54 = vpack.c.bf16 %v13845_v6, %v13844_v50  ;;  %6571 = vmatprep.subr.bf16.mxu0 %v6570_v3  ;;  %v6880_v19 = vpack.c.bf16 %v2479_v42, %v2467_v21  ;;  %v13846_v53 = vld [vmem:[#allocation125_spill] sm:$0xff]  ;;  %v6888_v18 = vpack.c.bf16 %v13747_v49, %v8301_v13  ;;  %v6890_v44 = vpack.c.bf16 %v13750_v37, %v13749_v62  ;;  %v13849_v6 = vld [vmem:[#allocation86_spill] sm:$0xff]  ;;  %v13850_v21 = vld [vmem:[#allocation107_spill] sm:$0xff] }
 0x165   : > { %1352 = vmatmul.mubr.f32.vlgmr.msra.gmra.mrb[0].mxu0 %v13846_v53  ;;  %v13847_v27 = vld [vmem:[#allocation61_spill] sm:$0xff]  ;;  %v6584_v3 = vpack.c.bf16 %v13849_v6, %v8563_v30  ;;  %v13851_v42 = vld [vmem:[#allocation95_spill] sm:$0xff]  ;;  %v13858_v62 = vld [vmem:[#allocation124_spill] sm:$0xff] }
 0x166   : > { %v6580_v59 = vpack.c.bf16 %v13848_v1, %v13847_v27  ;;  %6573 = vmatpush1.bf16.msra.mxu0 %v6572_v22  ;;  %1532 = vmatprep.mubr.f32.mxu0 %v13850_v21  ;;  %v13852_v1 = vld [vmem:[#allocation104_spill] sm:$0xff]  ;;  %v13853_v50 = vld [vmem:[#allocation67_spill] sm:$0xff]  ;;  %v13855_v0 = vld [vmem:[#allocation89_spill] sm:$0xff]  ;;  %v6590_v6 = vpack.c.bf16 %v8786_v39, %v13858_v62  ;;  %v13903_v62 = vand.u32 4294901760, %v13796_v56 }
 0x167   : > { %6881 = vmatpush1.bf16.msra.mxu1 %v6880_v19  ;;  %6575 = vmatprep.subr.bf16.mxu0 %v6574_v32  ;;  %v6586_v27 = vpack.c.bf16 %v13852_v1, %v13851_v42  ;;  %v6892_v22 = vpack.c.bf16 %v13854_v26, %v13853_v50  ;;  %v6894_v55 = vpack.c.bf16 %v13856_v40, %v13855_v0  ;;  %v13857_v49 = vld [vmem:[#allocation111_spill] sm:$0xff]  ;;  %v2491_v1 = vand.u32 4294901760, %v2490_v61  ;;  %v13860_v42 = vld [vmem:[#allocation134_spill] sm:$0xff]  ;;  %v13861_v13 = vld [vmem:[#allocation133_spill] sm:$0xff] }
 0x168   : > { %2486 = vmatprep.subr.mxu1 %v2485_v60  ;;  %v6588_v37 = vpack.c.bf16 %v8709_v31, %v13857_v49  ;;  %v6896_v19 = vpack.c.bf16 %v13771_v2, %v13770_v41  ;;  %v13859_v32 = vld [vmem:[#allocation115_spill] sm:$0xff]  ;;  %v6592_v26 = vpack.c.bf16 %v13861_v13, %v13860_v42  ;;  %v6900_v40 = vpack.c.bf16 %v13779_v8, %v13777_v38  ;;  %v13863_v49 = vld [vmem:[#allocation137_spill] sm:$0xff]  ;;  %v13865_v8 = vld [vmem:[#allocation74_spill] sm:$0xff] }
 0x169   : > { %v6898_v30 = vpack.c.bf16 %v13859_v32, %v8731_v14  ;;  %v6902_v60 = vpack.c.bf16 %v13781_v10, %v13780_v5  ;;  %v13862_v31 = vld [vmem:[#allocation139_spill] sm:$0xff]  ;;  %v13868_v39 = vld [vmem:[#allocation82_spill] sm:$0xff]  ;;  %v13872_v5 = vld [vmem:[#allocation105_spill] sm:$0xff] }
 0x16a   : > { %6577 = vmatpush1.bf16.msra.mxu0 %v6576_v34  ;;  %v13864_v34 = vld [vmem:[#allocation73_spill] sm:$0xff]  ;;  %v13874_v42 = vld [vmem:[#allocation127_spill] sm:$0xff]  ;;  %v13885_v32 = vld [vmem:[#allocation168_spill] sm:$0xff] }
 0x16b   : > { %2492 = vmatpush1.msra.mxu1 %v2491_v1  ;;  %6579 = vmatprep.subr.bf16.mxu0 %v6578_v52  ;;  %v13869_v52 = vld [vmem:[#allocation83_spill] sm:$0xff]  ;;  %v13871_v1 = vld [vmem:[#allocation98_spill] sm:$0xff]  ;;  %v13880_v10 = vld [vmem:[#allocation5_spill] sm:$0xff] }
 0x16c   : > { %6883 = vmatprep.subr.bf16.mxu1 %v6882_v35  ;;  %2506 = vmatmul.mubr.f32.vlgmr.msra.gmra.mrb[0].mxu1 %v13846_v53  ;;  %v13866_v35 = vld [vmem:[#allocation76_spill] sm:$0xff]  ;;  %v13878_v61 = vld [vmem:[#allocation147_spill] sm:$0xff]  ;;  %v13881_v14 = vand.u32 4294901760, %v13880_v10 }
 0x16d   : > { %6885 = vmatpush1.bf16.msra.mxu1 %v6884_v29  ;;  %2686 = vmatprep.mubr.f32.mxu1 %v13850_v21  ;;  %v13870_v29 = vld [vmem:[#allocation97_spill] sm:$0xff]  ;;  %v13876_v53 = vld [vmem:[#allocation144_spill] sm:$0xff]  ;;  %v13879_v13 = vand.u32 4294901760, %v13878_v61  ;;  %v13883_v38 = vld [vmem:[#allocation167_spill] sm:$0xff] }
 0x16e   : > { %6887 = vmatprep.subr.bf16.mxu1 %v6886_v54  ;;  %6581 = vmatpush1.bf16.msra.mxu0 %v6580_v59  ;;  %v13873_v54 = vld [vmem:[#allocation106_spill] sm:$0xff]  ;;  %v13875_v59 = vld [vmem:[#allocation128_spill] sm:$0xff]  ;;  %v13884_v41 = vand.u32 4294901760, %v13883_v38 }
 0x16f   : > { %6583 = vmatprep.subr.bf16.mxu0 %v6582_v23  ;;  %v13867_v23 = vld [vmem:[#allocation77_spill] sm:$0xff]  ;;  %v13877_v21 = vld [vmem:[#allocation4_spill] sm:$0xff]  ;;  %v9709_v2 = vpack.c.bf16 %v13881_v14, %v13879_v13 }
 0x170   : > { %v13896_v14 = vld [vmem:[#allocation149_spill] sm:$0xff] }
 0x171   : > { %6889 = vmatpush1.bf16.msra.mxu1 %v6888_v18  ;;  %v6594_v18 = vpack.c.bf16 %v13877_v21, %v13876_v53  ;;  %13882 = vst [vmem:[#allocation143_spill] sm:$0xff] %v9709_v2  ;;  %v13894_v21 = vand.u32 4294901760, %v13793_v45  ;;  %v13897_v2 = vld [vmem:[#allocation6_spill] sm:$0xff] }
 0x172   : > { %6891 = vmatprep.subr.bf16.mxu1 %v6890_v44  ;;  %6585 = vmatpush1.bf16.msra.mxu0 %v6584_v3  ;;  %v13886_v44 = vand.u32 4294901760, %v13885_v32  ;;  %v6596_v53 = vpack.c.bf16 %v13897_v2, %v13896_v14  ;;  %v13911_v14 = vand.u32 4294901760, %v13800_v28 }
 0x173   : > { %6587 = vmatprep.subr.bf16.mxu0 %v6586_v27 }
 0x174   : > { %v9715_v3 = vpack.c.bf16 %v13886_v44, %v13884_v41  ;;  %v13898_v41 = vld [vmem:[#allocation177_spill] sm:$0xff] }
 0x175   : > { %6893 = vmatpush1.bf16.msra.mxu1 %v6892_v22  ;;  %v13899_v44 = vand.u32 4294901760, %v13898_v41 }
 0x176   : > { %6895 = vmatprep.subr.bf16.mxu1 %v6894_v55  ;;  %6589 = vmatpush1.bf16.msra.mxu0 %v6588_v37  ;;  %13887 = vst [vmem:[#allocation142_spill] sm:$0xff] %v9715_v3  ;;  %v13888_v37 = vld [vmem:[#allocation161_spill] sm:$0xff] }
 0x177   : > { %6591 = vmatprep.subr.bf16.mxu0 %v6590_v6  ;;  %v13889_v27 = vand.u32 4294901760, %v13888_v37  ;;  %v13890_v6 = vld [vmem:[#allocation159_spill] sm:$0xff] }
 0x178   : > { %v13891_v55 = vand.u32 4294901760, %v13890_v6 }
 0x179   : > { %6897 = vmatpush1.bf16.msra.mxu1 %v6896_v19  ;;  %v13893_v19 = vand.u32 4294901760, %v13792_v20 }
 0x17a   : > { %6899 = vmatprep.subr.bf16.mxu1 %v6898_v30  ;;  %6593 = vmatpush1.bf16.msra.mxu0 %v6592_v26  ;;  %v9721_v22 = vpack.c.bf16 %v13891_v55, %v13889_v27  ;;  %v13900_v30 = vld [vmem:[#allocation173_spill] sm:$0xff]  ;;  %v13904_v27 = vand.u32 4294901760, %v13797_v47 }
 0x17b   : > { %v9727_v13 = vpack.c.bf16 %v13894_v21, %v13893_v19  ;;  %6595 = vmatprep.subr.bf16.mxu0 %v6594_v18  ;;  %v13901_v26 = vand.u32 4294901760, %v13900_v30  ;;  %v13907_v21 = vand.u32 4294901760, %v13799_v33  ;;  %v13909_v19 = vld [vmem:[#allocation153_spill] sm:$0xff] }
 0x17c   : > { %13892 = vst [vmem:[#allocation152_spill] sm:$0xff] %v9721_v22  ;;  %v9741_v55 = vpack.c.bf16 %v13904_v27, %v13903_v62  ;;  %v13906_v22 = vand.u32 4294901760, %v13798_v7  ;;  %v13915_v62 = vand.u32 4294901760, %v13803_v12 }
 0x17d   : > { %13895 = vst [vmem:[#allocation23_spill] sm:$0xff] %v9727_v13  ;;  %v9735_v3 = vpack.c.bf16 %v13901_v26, %v13899_v44  ;;  %v13910_v13 = vld [vmem:[#allocation154_spill] sm:$0xff]  ;;  %v13912_v44 = vand.u32 4294901760, %v13801_v46  ;;  %6901 = vmatpush1.bf16.msra.mxu1 %v6900_v40  ;;  %v13927_v40 = vand.u32 4294901760, %v13812_v63 }
 0x17e   : > { %13905 = vst [vmem:[#allocation166_spill] sm:$0xff] %v9741_v55  ;;  %v9747_v18 = vpack.c.bf16 %v13907_v21, %v13906_v22  ;;  %v6598_v2 = vpack.c.bf16 %v13910_v13, %v13909_v19  ;;  %v13917_v55 = vand.u32 4294901760, %v13804_v4  ;;  %v13918_v22 = vand.u32 4294901760, %v13805_v11  ;;  %6903 = vmatprep.subr.bf16.mxu1 %v6902_v60  ;;  %6597 = vmatpush1.bf16.msra.mxu0 %v6596_v53 }
 0x17f   : > { %13902 = vst [vmem:[#allocation27_spill] sm:$0xff] %v9735_v3  ;;  %v9755_v26 = vpack.c.bf16 %v13912_v44, %v13911_v14  ;;  %v13914_v3 = vand.u32 4294901760, %v13802_v51  ;;  %v13920_v13 = vand.u32 4294901760, %v13807_v15  ;;  %v13921_v14 = vand.u32 4294901760, %v13808_v24 }
 0x180   : > { %13908 = vst [vmem:[#allocation165_spill] sm:$0xff] %v9747_v18  ;;  %v9767_v21 = vpack.c.bf16 %v13918_v22, %v13917_v55  ;;  %v13919_v18 = vand.u32 4294901760, %v13806_v25  ;;  %v13922_v44 = vand.u32 4294901760, %v13809_v36  ;;  %v13928_v55 = vand.u32 4294901760, %v13813_v48  ;;  %6599 = vmatprep.subr.bf16.mxu0 %v6598_v2 }
 0x181   : > { %13913 = vst [vmem:[#allocation24_spill] sm:$0xff] %v9755_v26  ;;  %v9761_v27 = vpack.c.bf16 %v13915_v62, %v13914_v3  ;;  %v13924_v3 = vand.u32 4294901760, %v13810_v57  ;;  %v13925_v62 = vand.u32 4294901760, %v13811_v9  ;;  %v13938_v53 = vand.u32 4294901760, %v13870_v29 }
 0x182   : > { %v9773_v19 = vpack.c.bf16 %v13920_v13, %v13919_v18  ;;  %v9779_v26 = vpack.c.bf16 %v13922_v44, %v13921_v14  ;;  %v9791_v22 = vpack.c.bf16 %v13928_v55, %v13927_v40  ;;  %v13929_v13 = vand.u32 4294901760, %v13864_v34 }
 0x183   : > { %13916 = vst [vmem:[#allocation25_spill] sm:$0xff] %v9761_v27  ;;  %v9785_v27 = vpack.c.bf16 %v13925_v62, %v13924_v3  ;;  %v13930_v18 = vand.u32 4294901760, %v13865_v8  ;;  %v13932_v44 = vand.u32 4294901760, %v13866_v35  ;;  %v13935_v62 = vand.u32 4294901760, %v13868_v39 }
 0x184   : > { %13923 = vst [vmem:[#allocation47_spill] sm:$0xff] %v9779_v26  ;;  %v13933_v26 = vand.u32 4294901760, %v13867_v23  ;;  %v13939_v60 = vand.u32 4294901760, %v13871_v1  ;;  %v6906_v2 = vpack.c.bf16 %v13880_v10, %v13878_v61  ;;  %v13950_v10 = vld [vmem:[#allocation171_spill] sm:$0xff]  ;;  %v13951_v61 = vld [vmem:[#allocation170_spill] sm:$0xff] }
 0x185   : > { %13926 = vst [vmem:[#allocation51_spill] sm:$0xff] %v9785_v27  ;;  %v9797_v14 = vpack.c.bf16 %v13930_v18, %v13929_v13  ;;  %v13936_v27 = vand.u32 4294901760, %v13869_v52  ;;  %v13940_v13 = vand.u32 4294901760, %v13872_v5  ;;  %v13941_v18 = vand.u32 4294901760, %v13873_v54 }
 0x186   : > { %v9803_v3 = vpack.c.bf16 %v13933_v26, %v13932_v44  ;;  %v9815_v55 = vpack.c.bf16 %v13939_v60, %v13938_v53  ;;  %v13942_v26 = vand.u32 4294901760, %v13874_v42  ;;  %v13943_v44 = vand.u32 4294901760, %v13875_v59 }
 0x187   : > { %13931 = vst [vmem:[#allocation28_spill] sm:$0xff] %v9797_v14  ;;  %v9809_v40 = vpack.c.bf16 %v13936_v27, %v13935_v62  ;;  %v9821_v14 = vpack.c.bf16 %v13941_v18, %v13940_v13  ;;  %v13945_v27 = vld [vmem:[#allocation157_spill] sm:$0xff]  ;;  %v13946_v62 = vld [vmem:[#allocation156_spill] sm:$0xff]  ;;  %v13947_v53 = vpack.c.bf16 %v13863_v49, %v13862_v31  ;;  %v6602_v60 = vpack.c.bf16 %v13885_v32, %v13883_v38  ;;  %v13948_v13 = vld [vmem:[#allocation146_spill] sm:$0xff] }
 0x188   : > { %13934 = vst [vmem:[#allocation29_spill] sm:$0xff] %v9803_v3  ;;  %v9827_v3 = vpack.c.bf16 %v13943_v44, %v13942_v26  ;;  %v13949_v18 = vld [vmem:[#allocation11_spill] sm:$0xff]  ;;  %v6910_v44 = vpack.c.bf16 %v13890_v6, %v13888_v37  ;;  %v13953_v38 = vld [vmem:[#allocation162_spill] sm:$0xff]  ;;  %v13954_v32 = vld [vmem:[#allocation160_spill] sm:$0xff]  ;;  %v13955_v37 = vpack.c.bf16 %v13797_v47, %v13796_v56  ;;  %v13956_v6 = vpack.c.bf16 %v13799_v33, %v13798_v7 }
 0x189   : > { %13937 = vst [vmem:[#allocation30_spill] sm:$0xff] %v9809_v40  ;;  %v6600_v40 = vpack.c.bf16 %v13946_v62, %v13945_v27  ;;  %6905 = vmatpush1.bf16.msra.mxu1 %v13947_v53  ;;  %v6908_v26 = vpack.c.bf16 %v13949_v18, %v13948_v13  ;;  %v13952_v53 = vpack.c.bf16 %v13793_v45, %v13792_v20 }
 0x18a   : > { %13944 = vst [vmem:[#allocation35_spill] sm:$0xff] %v9827_v3  ;;  %6907 = vmatprep.subr.bf16.mxu1 %v6906_v2  ;;  %v6604_v3 = vpack.c.bf16 %v13951_v61, %v13950_v10  ;;  %v6914_v2 = vpack.c.bf16 %v13900_v30, %v13898_v41  ;;  %v13959_v45 = vpack.c.bf16 %v13801_v46, %v13800_v28  ;;  %v13969_v46 = vld [vmem:[#allocation117_spill] sm:$0xff]  ;;  %v13991_v30 = vld [vmem:[#allocation88_spill] sm:$0xff] }
 0x18b   : > { %6601 = vmatpush1.bf16.msra.mxu0 %v6600_v40  ;;  %v6912_v40 = vpack.c.bf16 %v13954_v32, %v13953_v38  ;;  %v13960_v41 = vpack.c.bf16 %v13803_v12, %v13802_v51  ;;  %v13961_v56 = vpack.c.bf16 %v13805_v11, %v13804_v4  ;;  %v13962_v47 = vpack.c.bf16 %v13807_v15, %v13806_v25  ;;  %v13973_v4 = vld [vmem:[#allocation7_spill] sm:$0xff]  ;;  %v13974_v11 = vld [vmem:[#allocation129_spill] sm:$0xff]  ;;  %v13975_v15 = vld [vmem:[#allocation12_spill] sm:$0xff] }
 0x18c   : > { %6603 = vmatprep.subr.bf16.mxu0 %v6602_v60  ;;  %v13958_v60 = vld [vmem:[#allocation174_spill] sm:$0xff]  ;;  %v13963_v7 = vpack.c.bf16 %v13809_v36, %v13808_v24  ;;  %v13964_v33 = vpack.c.bf16 %v13811_v9, %v13810_v57  ;;  %v13965_v51 = vpack.c.bf16 %v13813_v48, %v13812_v63  ;;  %v13966_v28 = vpack.c.bf16 %v13865_v8, %v13864_v34  ;;  %v13972_v8 = vld [vmem:[#allocation99_spill] sm:$0xff]  ;;  %v13981_v63 = vld [vmem:[#allocation16_spill] sm:$0xff] }
 0x18d   : > { %6909 = vmatpush1.bf16.msra.mxu1 %v6908_v26  ;;  %v13967_v25 = vpack.c.bf16 %v13867_v23, %v13866_v35  ;;  %v13968_v36 = vpack.c.bf16 %v13869_v52, %v13868_v39  ;;  %v13970_v12 = vpack.c.bf16 %v13871_v1, %v13870_v29  ;;  %v13971_v48 = vpack.c.bf16 %v13873_v54, %v13872_v5  ;;  %v13976_v39 = vld [vmem:[#allocation123_spill] sm:$0xff]  ;;  %v13979_v5 = vld [vmem:[#allocation36_spill] sm:$0xff]  ;;  %v13980_v9 = vld [vmem:[#allocation54_spill] sm:$0xff] }
 0x18e   : > { %6911 = vmatprep.subr.bf16.mxu1 %v6910_v44  ;;  %v13977_v24 = vpack.c.bf16 %v13875_v59, %v13874_v42  ;;  %v13978_v57 = vld [vmem:[#allocation31_spill] sm:$0xff]  ;;  %v13982_v34 = vld [vmem:[#allocation18_spill] sm:$0xff]  ;;  %v13983_v42 = vld [vmem:[#allocation40_spill] sm:$0xff] }
 0x18f   : > { %6605 = vmatpush1.bf16.msra.mxu0 %v6604_v3  ;;  %v13957_v3 = vld [vmem:[#allocation175_spill] sm:$0xff]  ;;  %v13984_v35 = vld [vmem:[#allocation60_spill] sm:$0xff]  ;;  %v13985_v52 = vld [vmem:[#allocation78_spill] sm:$0xff] }
 0x190   : > { %6607 = vmatprep.subr.bf16.mxu0 %v13952_v53  ;;  %v6916_v20 = vpack.c.bf16 %v13958_v60, %v13957_v3  ;;  %v13986_v29 = vld [vmem:[#allocation42_spill] sm:$0xff]  ;;  %v13987_v1 = vld [vmem:[#allocation64_spill] sm:$0xff]  ;;  %v13989_v59 = vld [vmem:[#allocation103_spill] sm:$0xff] }
 0x191   : > { %6913 = vmatpush1.bf16.msra.mxu1 %v6912_v40  ;;  %v13988_v54 = vld [vmem:[#allocation84_spill] sm:$0xff]  ;;  %v13990_v23 = vld [vmem:[#allocation66_spill] sm:$0xff]  ;;  %v13993_v44 = vld [vmem:[#allocation131_spill] sm:$0xff] }
 0x192   : > { %6915 = vmatprep.subr.bf16.mxu1 %v6914_v2  ;;  %v13992_v26 = vld [vmem:[#allocation110_spill] sm:$0xff]  ;;  %v13995_v40 = vld [vmem:[#allocation119_spill] sm:$0xff] }
 0x193   : > { %6609 = vmatpush1.bf16.msra.mxu0 %v13955_v37  ;;  %v13994_v53 = vld [vmem:[#allocation90_spill] sm:$0xff]  ;;  %v13996_v2 = vld [vmem:[#allocation135_spill] sm:$0xff]  ;;  %v13997_v37 = vld [vmem:[#allocation145_spill] sm:$0xff] }
 0x194   : > { %6611 = vmatprep.subr.bf16.mxu0 %v13956_v6  ;;  %v13998_v6 = vld [vmem:[#allocation121_spill] sm:$0xff] }
 0x195   : > { %6917 = vmatpush1.bf16.msra.mxu1 %v6916_v20  ;;  %v13999_v20 = vld [vmem:[#allocation140_spill] sm:$0xff] }
 0x196   : > { %6919 = vmatprep.subr.bf16.mxu1 %v13959_v45  ;;  %v14000_v45 = vld [vmem:[#allocation150_spill] sm:$0xff] }
 0x197   : > { %6613 = vmatpush1.bf16.msra.mxu0 %v13960_v41  ;;  %v14001_v41 = vld [vmem:[#allocation155_spill] sm:$0xff] }
 0x198   : > { %6615 = vmatprep.subr.bf16.mxu0 %v13961_v56  ;;  %v14002_v56 = vld [vmem:[#allocation141_spill] sm:$0xff] }
 0x199   : > { %6921 = vmatpush1.bf16.msra.mxu1 %v13962_v47  ;;  %v14003_v47 = vld [vmem:[#allocation148_spill] sm:$0xff] }
 0x19a   : > { %6923 = vmatprep.subr.bf16.mxu1 %v13963_v7  ;;  %v14004_v7 = vld [vmem:[#allocation158_spill] sm:$0xff] }
 0x19b   : > { %6617 = vmatpush1.bf16.msra.mxu0 %v13964_v33  ;;  %v14005_v33 = vld [vmem:[#allocation169_spill] sm:$0xff] }
 0x19c   : > { %6619 = vmatprep.subr.bf16.mxu0 %v13965_v51  ;;  %v14006_v51 = vld [vmem:[#allocation151_spill] sm:$0xff] }
 0x19d   : > { %6925 = vmatpush1.bf16.msra.mxu1 %v13966_v28  ;;  %v14007_v28 = vld [vmem:[#allocation163_spill] sm:$0xff] }
 0x19e   : > { %6927 = vmatprep.subr.bf16.mxu1 %v13967_v25  ;;  %v14008_v25 = vld [vmem:[#allocation172_spill] sm:$0xff] }
 0x19f   : > { %6621 = vmatpush1.bf16.msra.mxu0 %v13968_v36  ;;  %v14009_v36 = vld [vmem:[#allocation22_spill] sm:$0xff] }
 0x1a0   : > { %1516 = vmatprep.subr.mxu0 %v13969_v46 }
 0x1a1   : > { %6929 = vmatpush1.bf16.msra.mxu1 %v13970_v12  ;;  %v14010_v12 = vld [vmem:[#allocation164_spill] sm:$0xff] }
 0x1a2   : > { %6931 = vmatprep.subr.bf16.mxu1 %v13971_v48  ;;  %v14011_v48 = vld [vmem:[#allocation178_spill] sm:$0xff] }
 0x1a3   : > { %1519 = vmatpush1.msra.mxu0 %v13972_v8 }
 0x1a4   : > { %6623 = vmatprep.subr.bf16.mxu0 %v13973_v4  ;;  %1535 = vmatmul.mubr.f32.vlgmr.msra.gmra.mrb[0].mxu0 %v13974_v11 }
 0x1a5   : > { %6625 = vmatpush1.bf16.msra.mxu0 %v13975_v15  ;;  %1662 = vmatprep.mubr.f32.mxu0 %v13976_v39 }
 0x1a6   : > { %6933 = vmatpush1.bf16.msra.mxu1 %v13977_v24  ;;  %6627 = vmatprep.subr.bf16.mxu0 %v13978_v57  ;;  %v14014_v24 = vld [vmem:[#allocation176_spill] sm:$0xff] }
 0x1a7   : > { %2670 = vmatprep.subr.mxu1 %v13832_v43 }
 0x1a9   : > { %6629 = vmatpush1.bf16.msra.mxu0 %v13979_v5 }
 0x1aa   : > { %2673 = vmatpush1.msra.mxu1 %v13835_v16  ;;  %6631 = vmatprep.subr.bf16.mxu0 %v13980_v9 }
 0x1ab   : > { %6935 = vmatprep.subr.bf16.mxu1 %v13981_v63  ;;  %2689 = vmatmul.mubr.f32.vlgmr.msra.gmra.mrb[0].mxu1 %v13974_v11  ;;  %v14012_v11 = vld [vmem:[#allocation10_spill] sm:$0xff] }
 0x1ac   : > { %6937 = vmatpush1.bf16.msra.mxu1 %v13982_v34  ;;  %2816 = vmatprep.mubr.f32.mxu1 %v13976_v39  ;;  %v14013_v39 = vld [vmem:[#allocation46_spill] sm:$0xff] }
 0x1ad   : > { %6939 = vmatprep.subr.bf16.mxu1 %v13983_v42  ;;  %6633 = vmatpush1.bf16.msra.mxu0 %v13984_v35 }
 0x1ae   : > { %6635 = vmatprep.subr.bf16.mxu0 %v13985_v52 }
 0x1b0   : > { %6941 = vmatpush1.bf16.msra.mxu1 %v13986_v29 }
 0x1b1   : > { %6943 = vmatprep.subr.bf16.mxu1 %v13987_v1  ;;  %6637 = vmatpush1.bf16.msra.mxu0 %v13988_v54 }
 0x1b2   : > { %6639 = vmatprep.subr.bf16.mxu0 %v13989_v59 }
 0x1b4   : > { %6945 = vmatpush1.bf16.msra.mxu1 %v13990_v23 }
 0x1b5   : > { %6947 = vmatprep.subr.bf16.mxu1 %v13991_v30  ;;  %6641 = vmatpush1.bf16.msra.mxu0 %v13992_v26 }
 0x1b6   : > { %6643 = vmatprep.subr.bf16.mxu0 %v13993_v44 }
 0x1b8   : > { %6949 = vmatpush1.bf16.msra.mxu1 %v13994_v53 }
 0x1b9   : > { %6951 = vmatprep.subr.bf16.mxu1 %v13995_v40  ;;  %6645 = vmatpush1.bf16.msra.mxu0 %v13996_v2 }
 0x1ba   : > { %6647 = vmatprep.subr.bf16.mxu0 %v13997_v37 }
 0x1bc   : > { %6953 = vmatpush1.bf16.msra.mxu1 %v13998_v6 }
 0x1bd   : > { %6955 = vmatprep.subr.bf16.mxu1 %v13999_v20  ;;  %6649 = vmatpush1.bf16.msra.mxu0 %v14000_v45 }
 0x1be   : > { %6651 = vmatprep.subr.bf16.mxu0 %v14001_v41 }
 0x1c0   : > { %6957 = vmatpush1.bf16.msra.mxu1 %v14002_v56 }
 0x1c1   : > { %6959 = vmatprep.subr.bf16.mxu1 %v14003_v47  ;;  %6653 = vmatpush1.bf16.msra.mxu0 %v14004_v7  ;;  %v14015_v7 = vld [vmem:[#allocation26_spill] sm:$0xff]  ;;  %v14029_v47 = vld [vmem:[#allocation9_spill] sm:$0xff] }
 0x1c2   : > { %6655 = vmatprep.subr.bf16.mxu0 %v14005_v33  ;;  %v14016_v33 = vld [vmem:[#allocation33_spill] sm:$0xff] }
 0x1c4   : > { %6961 = vmatpush1.bf16.msra.mxu1 %v14006_v51  ;;  %v14017_v51 = vld [vmem:[#allocation71_spill] sm:$0xff] }
 0x1c5   : > { %6963 = vmatprep.subr.bf16.mxu1 %v14007_v28  ;;  %6657 = vmatpush1.bf16.msra.mxu0 %v14008_v25  ;;  %v14018_v28 = vld [vmem:[#allocation34_spill] sm:$0xff] }
 0x1c6   : > { %6659 = vmatprep.subr.bf16.mxu0 %v14009_v36  ;;  %v14019_v25 = vld [vmem:[#allocation50_spill] sm:$0xff]  ;;  %v14020_v36 = vld [vmem:[#allocation56_spill] sm:$0xff] }
 0x1c8   : > { %6965 = vmatpush1.bf16.msra.mxu1 %v14010_v12  ;;  %v14021_v12 = vld [vmem:[#allocation96_spill] sm:$0xff] }
 0x1c9   : > { %6967 = vmatprep.subr.bf16.mxu1 %v14011_v48  ;;  %6661 = vmatpush1.bf16.msra.mxu0 %v14012_v11  ;;  %v14022_v48 = vld [vmem:[#allocation57_spill] sm:$0xff]  ;;  %v14023_v11 = vld [vmem:[#allocation75_spill] sm:$0xff] }
 0x1ca   : > { %6663 = vmatprep.subr.bf16.mxu0 %v14013_v39  ;;  %v14024_v39 = vld [vmem:[#allocation80_spill] sm:$0xff] }
 0x1cc   : > { %6969 = vmatpush1.bf16.msra.mxu1 %v14014_v24  ;;  %v14025_v24 = vld [vmem:[#allocation113_spill] sm:$0xff] }
 0x1cd   : > { %6971 = vmatprep.subr.bf16.mxu1 %v14015_v7  ;;  %6665 = vmatpush1.bf16.msra.mxu0 %v14016_v33  ;;  %v14026_v7 = vld [vmem:[#allocation81_spill] sm:$0xff]  ;;  %v14027_v33 = vld [vmem:[#allocation8_spill] sm:$0xff] }
 0x1ce   : > { %6667 = vmatprep.subr.bf16.mxu0 %v14017_v51  ;;  %v14028_v51 = vand.u32 4294901760, %v14027_v33 }
 0x1d0   : > { %6973 = vmatpush1.bf16.msra.mxu1 %v14018_v28  ;;  %v14030_v28 = vand.u32 4294901760, %v14029_v47  ;;  %v14042_v47 = vld [vmem:[#allocation100_spill] sm:$0xff] }
 0x1d1   : > { %6975 = vmatprep.subr.bf16.mxu1 %v14019_v25  ;;  %6669 = vmatpush1.bf16.msra.mxu0 %v14020_v36  ;;  %v14031_v25 = vld [vmem:[#allocation102_spill] sm:$0xff]  ;;  %v14032_v36 = vld [vmem:[#allocation92_spill] sm:$0xff] }
 0x1d2   : > { %6671 = vmatprep.subr.bf16.mxu0 %v14021_v12  ;;  %v6674_v56 = vpack.c.bf16 %v14030_v28, %v14028_v51  ;;  %v14033_v12 = vld [vmem:[#allocation13_spill] sm:$0xff]  ;;  %v14043_v51 = vld [vmem:[#allocation126_spill] sm:$0xff]  ;;  %v14044_v28 = vld [vmem:[#allocation108_spill] sm:$0xff] }
 0x1d3   : > { %v14034_v41 = vand.u32 4294901760, %v14033_v12  ;;  %v14045_v12 = vld [vmem:[#allocation37_spill] sm:$0xff] }
 0x1d4   : > { %6977 = vmatpush1.bf16.msra.mxu1 %v14022_v48  ;;  %v14035_v48 = vld [vmem:[#allocation14_spill] sm:$0xff] }
 0x1d5   : > { %6979 = vmatprep.subr.bf16.mxu1 %v14023_v11  ;;  %6673 = vmatpush1.bf16.msra.mxu0 %v14024_v39  ;;  %v14036_v45 = vand.u32 4294901760, %v14035_v48  ;;  %v14037_v39 = vld [vmem:[#allocation132_spill] sm:$0xff]  ;;  %v14047_v48 = vld [vmem:[#allocation38_spill] sm:$0xff] }
 0x1d6   : > { %1646 = vmatprep.subr.mxu0 %v14025_v24  ;;  %v14038_v24 = vld [vmem:[#allocation21_spill] sm:$0xff] }
 0x1d7   : > { %v6676_v11 = vpack.c.bf16 %v14036_v45, %v14034_v41  ;;  %v14039_v20 = vand.u32 4294901760, %v14038_v24  ;;  %v14048_v45 = vand.u32 4294901760, %v14047_v48  ;;  %v14050_v24 = vand.u32 4294901760, %v13841_v17 }
 0x1d8   : > { %6981 = vmatpush1.bf16.msra.mxu1 %v14026_v7  ;;  %v14040_v7 = vld [vmem:[#allocation32_spill] sm:$0xff] }
 0x1d9   : > { %6983 = vmatprep.subr.bf16.mxu1 %v14031_v25  ;;  %1648 = vmatpush1.msra.mxu0 %v14032_v36  ;;  %v14041_v6 = vand.u32 4294901760, %v14040_v7  ;;  %v14046_v36 = vand.u32 4294901760, %v14045_v12  ;;  %v14053_v7 = vld [vmem:[#allocation15_spill] sm:$0xff]  ;;  %v14058_v12 = vld [vmem:[#allocation20_spill] sm:$0xff] }
 0x1da   : > { %6675 = vmatprep.subr.bf16.mxu0 %v6674_v56  ;;  %1666 = vmatmul.mubr.f32.vlgmr.msra.gmra.mrb[0].mxu0 %v14037_v39  ;;  %v14049_v56 = vand.u32 4294901760, %v13840_v58  ;;  %v14059_v2 = vand.u32 4294901760, %v14058_v12  ;;  %v14060_v58 = vld [vmem:[#allocation41_spill] sm:$0xff] }
 0x1db   : > { %v6678_v33 = vpack.c.bf16 %v14041_v6, %v14039_v20  ;;  %6677 = vmatpush1.bf16.msra.mxu0 %v6676_v11  ;;  %1899 = vmatprep.mubr.f32.mxu0 %v14042_v47  ;;  %v6680_v41 = vpack.c.bf16 %v14048_v45, %v14046_v36  ;;  %v14051_v6 = vld [vmem:[#allocation17_spill] sm:$0xff]  ;;  %v14054_v11 = vand.u32 4294901760, %v14053_v7  ;;  %v14061_v17 = vand.u32 4294901760, %v14060_v58  ;;  %v14062_v36 = vld [vmem:[#allocation39_spill] sm:$0xff] }
 0x1dc   : > { %6985 = vmatpush1.bf16.msra.mxu1 %v14043_v51  ;;  %v6682_v25 = vpack.c.bf16 %v14050_v24, %v14049_v56  ;;  %v14052_v20 = vand.u32 4294901760, %v14051_v6  ;;  %v14055_v51 = vld [vmem:[#allocation114_spill] sm:$0xff]  ;;  %v14063_v45 = vand.u32 4294901760, %v14062_v36  ;;  %v14064_v56 = vld [vmem:[#allocation61_spill] sm:$0xff] }
 0x1dd   : > { %6679 = vmatprep.subr.bf16.mxu0 %v6678_v33  ;;  %2800 = vmatprep.subr.mxu1 %v14044_v28  ;;  %v14056_v33 = vld [vmem:[#allocation19_spill] sm:$0xff]  ;;  %v14065_v24 = vand.u32 4294901760, %v14064_v56  ;;  %v14066_v6 = vld [vmem:[#allocation62_spill] sm:$0xff] }
 0x1de   : > { %v6986_v37 = vpack.c.bf16 %v14054_v11, %v14052_v20  ;;  %v14057_v28 = vand.u32 4294901760, %v14056_v33  ;;  %v14067_v20 = vand.u32 4294901760, %v14066_v6  ;;  %v14070_v33 = vld [vmem:[#allocation79_spill] sm:$0xff] }
 0x1df   : > { %6681 = vmatpush1.bf16.msra.mxu0 %v6680_v41  ;;  %v6990_v41 = vpack.c.bf16 %v14063_v45, %v14061_v17  ;;  %v14076_v17 = vld [vmem:[#allocation65_spill] sm:$0xff]  ;;  %v14078_v45 = vld [vmem:[#allocation63_spill] sm:$0xff] }
 0x1e0   : > { %2802 = vmatpush1.msra.mxu1 %v14055_v51  ;;  %6683 = vmatprep.subr.bf16.mxu0 %v6682_v25  ;;  %v6988_v48 = vpack.c.bf16 %v14059_v2, %v14057_v28  ;;  %v6684_v7 = vpack.c.bf16 %v14067_v20, %v14065_v24  ;;  %v14068_v25 = vld [vmem:[#allocation70_spill] sm:$0xff]  ;;  %v14071_v51 = vand.u32 4294901760, %v14070_v33  ;;  %v14072_v2 = vld [vmem:[#allocation43_spill] sm:$0xff]  ;;  %v14077_v36 = vand.u32 4294901760, %v14076_v17  ;;  %v14080_v24 = vld [vmem:[#allocation85_spill] sm:$0xff] }
 0x1e1   : > { %6987 = vmatprep.subr.bf16.mxu1 %v6986_v37  ;;  %2820 = vmatmul.mubr.f32.vlgmr.msra.gmra.mrb[0].mxu1 %v14037_v39  ;;  %v14069_v11 = vand.u32 4294901760, %v14068_v25  ;;  %v14073_v37 = vand.u32 4294901760, %v14072_v2  ;;  %v14074_v39 = vld [vmem:[#allocation44_spill] sm:$0xff]  ;;  %v14079_v56 = vand.u32 4294901760, %v14078_v45  ;;  %v14081_v6 = vand.u32 4294901760, %v14080_v24  ;;  %v14082_v20 = vld [vmem:[#allocation86_spill] sm:$0xff] }
 0x1e2   : > { %6989 = vmatpush1.bf16.msra.mxu1 %v6988_v48  ;;  %3053 = vmatprep.mubr.f32.mxu1 %v14042_v47  ;;  %v14075_v28 = vand.u32 4294901760, %v14074_v39  ;;  %v14083_v25 = vand.u32 4294901760, %v14082_v20  ;;  %v14088_v2 = vand.u32 4294901760, %v13853_v50  ;;  %v14091_v17 = vand.u32 4294901760, %v13855_v0  ;;  %v14094_v24 = vld [vmem:[#allocation111_spill] sm:$0xff]  ;;  %v14104_v0 = vld [vmem:[#allocation93_spill] sm:$0xff] }
 0x1e3   : > { %v6686_v12 = vpack.c.bf16 %v14071_v51, %v14069_v11  ;;  %6991 = vmatprep.subr.bf16.mxu1 %v6990_v41  ;;  %6685 = vmatpush1.bf16.msra.mxu0 %v6684_v7  ;;  %v6994_v48 = vpack.c.bf16 %v14079_v56, %v14077_v36  ;;  %v14084_v11 = vld [vmem:[#allocation95_spill] sm:$0xff]  ;;  %v14086_v7 = vld [vmem:[#allocation104_spill] sm:$0xff] }
 0x1e4   : > { %v6992_v58 = vpack.c.bf16 %v14075_v28, %v14073_v37  ;;  %v6688_v51 = vpack.c.bf16 %v14083_v25, %v14081_v6  ;;  %v14085_v41 = vand.u32 4294901760, %v14084_v11  ;;  %v14087_v33 = vand.u32 4294901760, %v14086_v7  ;;  %v14089_v37 = vld [vmem:[#allocation68_spill] sm:$0xff]  ;;  %v14092_v36 = vld [vmem:[#allocation87_spill] sm:$0xff] }
 0x1e5   : > { %6687 = vmatprep.subr.bf16.mxu0 %v6686_v12  ;;  %v14090_v39 = vand.u32 4294901760, %v14089_v37  ;;  %v14093_v45 = vand.u32 4294901760, %v14092_v36  ;;  %v14096_v6 = vld [vmem:[#allocation112_spill] sm:$0xff]  ;;  %v14102_v50 = vld [vmem:[#allocation91_spill] sm:$0xff] }
 0x1e6   : > { %6993 = vmatpush1.bf16.msra.mxu1 %v6992_v58  ;;  %v6690_v12 = vpack.c.bf16 %v14087_v33, %v14085_v41  ;;  %v14095_v58 = vand.u32 4294901760, %v14094_v24  ;;  %v14097_v20 = vand.u32 4294901760, %v14096_v6  ;;  %v14098_v11 = vld [vmem:[#allocation124_spill] sm:$0xff]  ;;  %v14103_v33 = vand.u32 4294901760, %v14102_v50  ;;  %v14110_v24 = vld [vmem:[#allocation134_spill] sm:$0xff] }
 0x1e7   : > { %6995 = vmatprep.subr.bf16.mxu1 %v6994_v48  ;;  %6689 = vmatpush1.bf16.msra.mxu0 %v6688_v51  ;;  %v6996_v28 = vpack.c.bf16 %v14090_v39, %v14088_v2  ;;  %v6998_v56 = vpack.c.bf16 %v14093_v45, %v14091_v17  ;;  %v14099_v48 = vand.u32 4294901760, %v14098_v11  ;;  %v14100_v51 = vld [vmem:[#allocation130_spill] sm:$0xff]  ;;  %v14106_v37 = vld [vmem:[#allocation120_spill] sm:$0xff]  ;;  %v14108_v17 = vld [vmem:[#allocation115_spill] sm:$0xff] }
 0x1e8   : > { %6691 = vmatprep.subr.bf16.mxu0 %v6690_v12  ;;  %v6692_v25 = vpack.c.bf16 %v14097_v20, %v14095_v58  ;;  %v14101_v41 = vand.u32 4294901760, %v14100_v51  ;;  %v14105_v12 = vand.u32 4294901760, %v14104_v0  ;;  %v14107_v39 = vand.u32 4294901760, %v14106_v37  ;;  %v14112_v58 = vld [vmem:[#allocation133_spill] sm:$0xff]  ;;  %v14114_v11 = vld [vmem:[#allocation144_spill] sm:$0xff]  ;;  %v14120_v50 = vld [vmem:[#allocation122_spill] sm:$0xff] }
 0x1e9   : > { %v14109_v36 = vand.u32 4294901760, %v14108_v17  ;;  %v14113_v6 = vand.u32 4294901760, %v14112_v58 }
 0x1ea   : > { %6997 = vmatpush1.bf16.msra.mxu1 %v6996_v28  ;;  %v6694_v7 = vpack.c.bf16 %v14101_v41, %v14099_v48  ;;  %v7000_v2 = vpack.c.bf16 %v14105_v12, %v14103_v33  ;;  %v14111_v28 = vand.u32 4294901760, %v14110_v24  ;;  %v14118_v41 = vld [vmem:[#allocation116_spill] sm:$0xff]  ;;  %v14121_v33 = vand.u32 4294901760, %v14120_v50  ;;  %v14122_v12 = vld [vmem:[#allocation138_spill] sm:$0xff]  ;;  %v14126_v24 = vld [vmem:[#allocation149_spill] sm:$0xff] }
 0x1eb   : > { %6999 = vmatprep.subr.bf16.mxu1 %v6998_v56  ;;  %6693 = vmatpush1.bf16.msra.mxu0 %v6692_v25  ;;  %v7002_v45 = vpack.c.bf16 %v14109_v36, %v14107_v39  ;;  %v14115_v56 = vand.u32 4294901760, %v14114_v11  ;;  %v14116_v25 = vld [vmem:[#allocation4_spill] sm:$0xff]  ;;  %v14123_v37 = vand.u32 4294901760, %v14122_v12  ;;  %v14130_v11 = vld [vmem:[#allocation153_spill] sm:$0xff]  ;;  %v14137_v50 = vand.u32 4294901760, %v13946_v62  ;;  %v14139_v12 = vld [vmem:[#allocation142_spill] sm:$0xff] }
 0x1ec   : > { %6695 = vmatprep.subr.bf16.mxu0 %v6694_v7  ;;  %v6696_v20 = vpack.c.bf16 %v14113_v6, %v14111_v28  ;;  %v14117_v48 = vand.u32 4294901760, %v14116_v25  ;;  %v14119_v7 = vand.u32 4294901760, %v14118_v41  ;;  %v14124_v39 = vld [vmem:[#allocation136_spill] sm:$0xff]  ;;  %v14128_v28 = vld [vmem:[#allocation6_spill] sm:$0xff]  ;;  %v14145_v62 = vld [vmem:[#allocation23_spill] sm:$0xff] }
 0x1ed   : > { %v14125_v17 = vand.u32 4294901760, %v14124_v39  ;;  %v14129_v58 = vand.u32 4294901760, %v14128_v28  ;;  %v14141_v39 = vand.u32 4294901760, %v13949_v18  ;;  %v14149_v18 = vld [vmem:[#allocation166_spill] sm:$0xff] }
 0x1ee   : > { %7001 = vmatpush1.bf16.msra.mxu1 %v7000_v2  ;;  %v6698_v51 = vpack.c.bf16 %v14117_v48, %v14115_v56  ;;  %v7004_v0 = vpack.c.bf16 %v14121_v33, %v14119_v7  ;;  %v14127_v2 = vand.u32 4294901760, %v14126_v24  ;;  %v14134_v48 = vand.u32 4294901760, %v13862_v31 }
 0x1ef   : > { %7003 = vmatprep.subr.bf16.mxu1 %v7002_v45  ;;  %6697 = vmatpush1.bf16.msra.mxu0 %v6696_v20  ;;  %v7006_v36 = vpack.c.bf16 %v14125_v17, %v14123_v37  ;;  %v14131_v45 = vand.u32 4294901760, %v14130_v11  ;;  %v14132_v20 = vld [vmem:[#allocation154_spill] sm:$0xff]  ;;  %v14136_v7 = vand.u32 4294901760, %v13945_v27  ;;  %v14140_v37 = vand.u32 4294901760, %v13948_v13  ;;  %v14144_v27 = vld [vmem:[#allocation152_spill] sm:$0xff]  ;;  %v14148_v13 = vld [vmem:[#allocation27_spill] sm:$0xff] }
 0x1f0   : > { %6699 = vmatprep.subr.bf16.mxu0 %v6698_v51  ;;  %v6700_v6 = vpack.c.bf16 %v14129_v58, %v14127_v2  ;;  %v14133_v56 = vand.u32 4294901760, %v14132_v20  ;;  %v14135_v51 = vand.u32 4294901760, %v13863_v49  ;;  %v14142_v31 = vand.u32 4294901760, %v13950_v10  ;;  %v14150_v10 = vld [vmem:[#allocation165_spill] sm:$0xff]  ;;  %v14153_v11 = vld [vmem:[#allocation24_spill] sm:$0xff] }
 0x1f1   : > { %v6704_v33 = vpack.c.bf16 %v14137_v50, %v14136_v7  ;;  %v7012_v17 = vpack.c.bf16 %v14141_v39, %v14140_v37  ;;  %v14143_v49 = vand.u32 4294901760, %v13951_v61  ;;  %v14146_v24 = vand.u32 4294901760, %v13953_v38  ;;  %v14155_v38 = vld [vmem:[#allocation47_spill] sm:$0xff]  ;;  %v14157_v20 = vld [vmem:[#allocation28_spill] sm:$0xff]  ;;  %v14195_v7 = vld [vmem:[#allocation113_spill] sm:$0xff] }
 0x1f2   : > { %7005 = vmatpush1.bf16.msra.mxu1 %v7004_v0  ;;  %v6702_v25 = vpack.c.bf16 %v14133_v56, %v14131_v45  ;;  %v7008_v41 = vpack.c.bf16 %v14135_v51, %v14134_v48  ;;  %v14138_v0 = vld [vmem:[#allocation143_spill] sm:$0xff]  ;;  %v14147_v2 = vand.u32 4294901760, %v13954_v32  ;;  %v14151_v61 = vand.u32 4294901760, %v13957_v3  ;;  %v14154_v45 = vld [vmem:[#allocation25_spill] sm:$0xff]  ;;  %v14200_v37 = vld [vmem:[#allocation108_spill] sm:$0xff] }
 0x1f3   : > { %7007 = vmatprep.subr.bf16.mxu1 %v7006_v36  ;;  %6701 = vmatpush1.bf16.msra.mxu0 %v6700_v6  ;;  %v6708_v36 = vpack.c.bf16 %v14143_v49, %v14142_v31  ;;  %v14152_v58 = vand.u32 4294901760, %v13958_v60  ;;  %v14156_v32 = vld [vmem:[#allocation51_spill] sm:$0xff]  ;;  %v14158_v3 = vld [vmem:[#allocation29_spill] sm:$0xff]  ;;  %v14159_v60 = vld [vmem:[#allocation30_spill] sm:$0xff]  ;;  %v14160_v56 = vand.u32 4294901760, %v13969_v46  ;;  %v14164_v46 = vand.u32 4294901760, %v13832_v43 }
 0x1f4   : > { %6703 = vmatprep.subr.bf16.mxu0 %v6702_v25  ;;  %v7016_v28 = vpack.c.bf16 %v14147_v2, %v14146_v24  ;;  %v14166_v43 = vld [vmem:[#allocation135_spill] sm:$0xff]  ;;  %v14191_v25 = vld [vmem:[#allocation96_spill] sm:$0xff]  ;;  %v14192_v48 = vld [vmem:[#allocation57_spill] sm:$0xff] }
 0x1f5   : > { %v7020_v6 = vpack.c.bf16 %v14152_v58, %v14151_v61  ;;  %v14193_v51 = vld [vmem:[#allocation75_spill] sm:$0xff]  ;;  %v14196_v50 = vld [vmem:[#allocation81_spill] sm:$0xff]  ;;  %v14201_v39 = vld [vmem:[#allocation114_spill] sm:$0xff] }
 0x1f6   : > { %7009 = vmatpush1.bf16.msra.mxu1 %v7008_v41  ;;  %v14194_v41 = vld [vmem:[#allocation80_spill] sm:$0xff] }
 0x1f7   : > { %7011 = vmatprep.subr.bf16.mxu1 %v14138_v0  ;;  %6705 = vmatpush1.bf16.msra.mxu0 %v6704_v33  ;;  %v14197_v33 = vld [vmem:[#allocation102_spill] sm:$0xff]  ;;  %v14198_v0 = vld [vmem:[#allocation92_spill] sm:$0xff] }
 0x1f8   : > { %6707 = vmatprep.subr.bf16.mxu0 %v14139_v12  ;;  %v14199_v12 = vld [vmem:[#allocation126_spill] sm:$0xff] }
 0x1fa   : > { %7013 = vmatpush1.bf16.msra.mxu1 %v7012_v17 }
 0x1fb   : > { %7015 = vmatprep.subr.bf16.mxu1 %v14144_v27  ;;  %6709 = vmatpush1.bf16.msra.mxu0 %v6708_v36 }
 0x1fc   : > { %6711 = vmatprep.subr.bf16.mxu0 %v14145_v62 }
 0x1fe   : > { %7017 = vmatpush1.bf16.msra.mxu1 %v7016_v28 }
 0x1ff   : > { %7019 = vmatprep.subr.bf16.mxu1 %v14148_v13  ;;  %6713 = vmatpush1.bf16.msra.mxu0 %v14149_v18 }
 0x200   : > { %6715 = vmatprep.subr.bf16.mxu0 %v14150_v10 }
 0x202   : > { %7021 = vmatpush1.bf16.msra.mxu1 %v7020_v6 }
 0x203   : > { %7023 = vmatprep.subr.bf16.mxu1 %v14153_v11  ;;  %6717 = vmatpush1.bf16.msra.mxu0 %v14154_v45 }
 0x204   : > { %6719 = vmatprep.subr.bf16.mxu0 %v9767_v21  ;;  %v14162_v21 = vld [vmem:[#allocation125_spill] sm:$0xff] }
 0x206   : > { %7025 = vmatpush1.bf16.msra.mxu1 %v9773_v19  ;;  %v14161_v19 = vand.u32 4294901760, %v13972_v8  ;;  %v14169_v8 = vld [vmem:[#allocation140_spill] sm:$0xff] }
 0x207   : > { %7027 = vmatprep.subr.bf16.mxu1 %v14155_v38  ;;  %6721 = vmatpush1.bf16.msra.mxu0 %v14156_v32 }
 0x208   : > { %6723 = vmatprep.subr.bf16.mxu0 %v9791_v22  ;;  %v14163_v22 = vld [vmem:[#allocation35_spill] sm:$0xff] }
 0x20a   : > { %7029 = vmatpush1.bf16.msra.mxu1 %v14157_v20 }
 0x20b   : > { %7031 = vmatprep.subr.bf16.mxu1 %v14158_v3  ;;  %6725 = vmatpush1.bf16.msra.mxu0 %v14159_v60 }
 0x20c   : > { %1883 = vmatprep.subr.mxu0 %v14160_v56 }
 0x20e   : > { %7033 = vmatpush1.bf16.msra.mxu1 %v9815_v55  ;;  %v14168_v55 = vld [vmem:[#allocation121_spill] sm:$0xff] }
 0x20f   : > { %7035 = vmatprep.subr.bf16.mxu1 %v9821_v14  ;;  %1887 = vmatpush1.msra.mxu0 %v14161_v19  ;;  %v14165_v14 = vand.u32 4294901760, %v13835_v16  ;;  %v14167_v16 = vld [vmem:[#allocation145_spill] sm:$0xff] }
 0x210   : > { %6727 = vmatprep.subr.bf16.mxu0 %v13973_v4  ;;  %1901 = vmatmul.mubr.f32.vlgmr.msra.gmra.mrb[0].mxu0 %v14162_v21  ;;  %v14170_v4 = vld [vmem:[#allocation150_spill] sm:$0xff] }
 0x211   : > { %6729 = vmatpush1.bf16.msra.mxu0 %v13975_v15  ;;  %2026 = vmatprep.mubr.f32.mxu0 %v14042_v47  ;;  %v14171_v15 = vld [vmem:[#allocation155_spill] sm:$0xff] }
 0x212   : > { %7037 = vmatpush1.bf16.msra.mxu1 %v14163_v22  ;;  %6731 = vmatprep.subr.bf16.mxu0 %v13978_v57  ;;  %v14172_v57 = vld [vmem:[#allocation141_spill] sm:$0xff] }
 0x213   : > { %3037 = vmatprep.subr.mxu1 %v14164_v46 }
 0x215   : > { %6733 = vmatpush1.bf16.msra.mxu0 %v13979_v5  ;;  %v14173_v5 = vld [vmem:[#allocation148_spill] sm:$0xff] }
 0x216   : > { %3041 = vmatpush1.msra.mxu1 %v14165_v14  ;;  %6735 = vmatprep.subr.bf16.mxu0 %v13980_v9  ;;  %v14174_v9 = vld [vmem:[#allocation158_spill] sm:$0xff] }
 0x217   : > { %7039 = vmatprep.subr.bf16.mxu1 %v13981_v63  ;;  %3055 = vmatmul.mubr.f32.vlgmr.msra.gmra.mrb[0].mxu1 %v14162_v21  ;;  %v14175_v63 = vld [vmem:[#allocation169_spill] sm:$0xff] }
 0x218   : > { %7041 = vmatpush1.bf16.msra.mxu1 %v13982_v34  ;;  %3180 = vmatprep.mubr.f32.mxu1 %v14042_v47  ;;  %v14176_v34 = vld [vmem:[#allocation151_spill] sm:$0xff]  ;;  %v14190_v47 = vld [vmem:[#allocation56_spill] sm:$0xff] }
 0x219   : > { %7043 = vmatprep.subr.bf16.mxu1 %v13983_v42  ;;  %6737 = vmatpush1.bf16.msra.mxu0 %v13984_v35  ;;  %v14177_v42 = vld [vmem:[#allocation163_spill] sm:$0xff]  ;;  %v14178_v35 = vld [vmem:[#allocation172_spill] sm:$0xff] }
 0x21a   : > { %6739 = vmatprep.subr.bf16.mxu0 %v13985_v52  ;;  %v14179_v52 = vld [vmem:[#allocation22_spill] sm:$0xff] }
 0x21c   : > { %7045 = vmatpush1.bf16.msra.mxu1 %v13986_v29  ;;  %v14180_v29 = vld [vmem:[#allocation164_spill] sm:$0xff] }
 0x21d   : > { %7047 = vmatprep.subr.bf16.mxu1 %v13987_v1  ;;  %6741 = vmatpush1.bf16.msra.mxu0 %v13988_v54  ;;  %v14181_v1 = vld [vmem:[#allocation178_spill] sm:$0xff] }
 0x21e   : > { %6743 = vmatprep.subr.bf16.mxu0 %v13989_v59  ;;  %v14182_v54 = vld [vmem:[#allocation10_spill] sm:$0xff] }
 0x21f   : > { %v14183_v59 = vld [vmem:[#allocation46_spill] sm:$0xff] }
 0x220   : > { %7049 = vmatpush1.bf16.msra.mxu1 %v13990_v23  ;;  %v14184_v23 = vld [vmem:[#allocation176_spill] sm:$0xff] }
 0x221   : > { %7051 = vmatprep.subr.bf16.mxu1 %v13991_v30  ;;  %6745 = vmatpush1.bf16.msra.mxu0 %v13992_v26  ;;  %v14185_v30 = vld [vmem:[#allocation26_spill] sm:$0xff]  ;;  %v14186_v26 = vld [vmem:[#allocation33_spill] sm:$0xff] }
 0x222   : > { %6747 = vmatprep.subr.bf16.mxu0 %v13993_v44  ;;  %v14187_v44 = vld [vmem:[#allocation71_spill] sm:$0xff] }
 0x224   : > { %7053 = vmatpush1.bf16.msra.mxu1 %v13994_v53  ;;  %v14188_v53 = vld [vmem:[#allocation34_spill] sm:$0xff] }
 0x225   : > { %7055 = vmatprep.subr.bf16.mxu1 %v13995_v40  ;;  %6749 = vmatpush1.bf16.msra.mxu0 %v14166_v43  ;;  %v14189_v40 = vld [vmem:[#allocation50_spill] sm:$0xff] }
 0x226   : > { %6751 = vmatprep.subr.bf16.mxu0 %v14167_v16 }
 0x228   : > { %7057 = vmatpush1.bf16.msra.mxu1 %v14168_v55 }
 0x229   : > { %7059 = vmatprep.subr.bf16.mxu1 %v14169_v8  ;;  %6753 = vmatpush1.bf16.msra.mxu0 %v14170_v4 }
 0x22a   : > { %6755 = vmatprep.subr.bf16.mxu0 %v14171_v15 }
 0x22c   : > { %7061 = vmatpush1.bf16.msra.mxu1 %v14172_v57 }
 0x22d   : > { %7063 = vmatprep.subr.bf16.mxu1 %v14173_v5  ;;  %6757 = vmatpush1.bf16.msra.mxu0 %v14174_v9 }
 0x22e   : > { %6759 = vmatprep.subr.bf16.mxu0 %v14175_v63 }
 0x230   : > { %7065 = vmatpush1.bf16.msra.mxu1 %v14176_v34  ;;  %v3232_v34 = vld [vmem:[%s12742_s3 + $0x8] sm:$0xff] }
 0x231   : > { %7067 = vmatprep.subr.bf16.mxu1 %v14177_v42  ;;  %6761 = vmatpush1.bf16.msra.mxu0 %v14178_v35  ;;  %v6426_v42 = vld [vmem:[%s12742_s3 + $0x240] sm:$0xff]  ;;  %v3740_v35 = vld [vmem:[%s12741_s2 + $0x8] sm:$0xff] }
 0x232   : > { %6763 = vmatprep.subr.bf16.mxu0 %v14179_v52 }
 0x234   : > { %7069 = vmatpush1.bf16.msra.mxu1 %v14180_v29 }
 0x235   : > { %7071 = vmatprep.subr.bf16.mxu1 %v14181_v1  ;;  %6765 = vmatpush1.bf16.msra.mxu0 %v14182_v54 }
 0x236   : > { %6767 = vmatprep.subr.bf16.mxu0 %v14183_v59  ;;  %v14206_v59 = vld [vmem:[#allocation3_spill] sm:$0xff] }
 0x238   : > { %7073 = vmatpush1.bf16.msra.mxu1 %v14184_v23 }
 0x239   : > { %7075 = vmatprep.subr.bf16.mxu1 %v14185_v30  ;;  %6769 = vmatpush1.bf16.msra.mxu0 %v14186_v26 }
 0x23a   : > { %6771 = vmatprep.subr.bf16.mxu0 %v14187_v44 }
 0x23c   : > { %7077 = vmatpush1.bf16.msra.mxu1 %v14188_v53 }
 0x23d   : > { %7079 = vmatprep.subr.bf16.mxu1 %v14189_v40  ;;  %6773 = vmatpush1.bf16.msra.mxu0 %v14190_v47  ;;  %v10353_v40 = vsel %vm876_vm10, %v3740_v35, 0  ;;  %v6363_v47 = vld [vmem:[%s12742_s3 + $0x28] sm:$0xff] }
 0x23e   : > { %6775 = vmatprep.subr.bf16.mxu0 %v14191_v25  ;;  %v6430_v25 = vld [vmem:[%s12742_s3 + $0x260] sm:$0xff] }
 0x240   : > { %7081 = vmatpush1.bf16.msra.mxu1 %v14192_v48 }
 0x241   : > { %7083 = vmatprep.subr.bf16.mxu1 %v14193_v51  ;;  %6777 = vmatpush1.bf16.msra.mxu0 %v14194_v41 }
 0x242   : > { %2012 = vmatprep.subr.mxu0 %v14195_v7 }
 0x244   : > { %7085 = vmatpush1.bf16.msra.mxu1 %v14196_v50 }
 0x245   : > { %7087 = vmatprep.subr.bf16.mxu1 %v14197_v33  ;;  %2014 = vmatpush1.msra.mxu0 %v14198_v0 }
 0x246   : > { %2028 = vmatmul.mubr.f32.vlgmr.msra.gmra.mrb[0].mxu0 %v14162_v21 }
 0x248   : > { %7089 = vmatpush1.bf16.msra.mxu1 %v14199_v12 }
 0x249   : > { %3166 = vmatprep.subr.mxu1 %v14200_v37 }
 0x24c   : > { %3168 = vmatpush1.msra.mxu1 %v14201_v39 }
 0x24d   : > { %3182 = vmatmul.mubr.f32.vlgmr.msra.gmra.mrb[0].mxu1 %v14162_v21 }
 0x319   : > { %v2029_v17 = vpop.f32.mrb[0].mxu0 }
 0x31a   : > { %v2031_v31 = vpop.f32.mrb[1].mxu0 }
 0x31b   : > { %v3188_v49 = vadd.f32 %v2031_v31, %v2029_v17 }
 0x320   : > { %v3183_v36 = vpop.f32.mrb[0].mxu1 }
 0x321   : > { %v3189_v27 = vadd.f32 %v3188_v49, %v3183_v36  ;;  %v3185_v62 = vpop.f32.mrb[1].mxu1 }
 0x323   : > { %v3190_v24 = vadd.f32 %v3189_v27, %v3185_v62  ;;  %v6362_v27 = vld [vmem:[%s12742_s3 + $0x20] sm:$0xff] }
 0x325   : > { %3191 = vadd.xlane.f32.xlu0 %v3190_v24 }
 0x3b2   : > { %v3192_v2 = vpop.xlane.xlu0 %3191 }
 0x3b3   : > { %v3194_v28 = vmul.f32 0.001953125, %v3192_v2  ;;  %v6433_v2 = vld [vmem:[%s12742_s3 + $0x278] sm:$0xff] }
 0x3b5   : > { %v3195_v13 = vsub.f32 %v2029_v17, %v3194_v28  ;;  %v3196_v18 = vsub.f32 %v2031_v31, %v3194_v28  ;;  %v3197_v10 = vsub.f32 %v3183_v36, %v3194_v28  ;;  %v3198_v61 = vsub.f32 %v3185_v62, %v3194_v28 }
 0x3b6   : > { %v10382_v36 = vand.u32 4294901760, %v10353_v40 }
 0x3b7   : > { %v3199_v58 = vmul.f32 %v3195_v13, %v3195_v13  ;;  %v3200_v6 = vmul.f32 %v3196_v18, %v3196_v18  ;;  %v3201_v11 = vmul.f32 %v3197_v10, %v3197_v10  ;;  %v3202_v38 = vmul.f32 %v3198_v61, %v3198_v61 }
 0x3b8   : > { %14212 = vst [vmem:[#allocation94_spill] sm:$0xff] %v10382_v36 }
 0x3b9   : > { %v3203_v45 = vadd.f32 %v3200_v6, %v3199_v58 }
 0x3bb   : > { %v3204_v32 = vadd.f32 %v3203_v45, %v3201_v11 }
 0x3bd   : > { %v3205_v20 = vadd.f32 %v3204_v32, %v3202_v38 }
 0x3bf   : > { %3206 = vadd.xlane.f32.xlu1 %v3205_v20 }
 0x44c   : > { %v3207_v3 = vpop.xlane.xlu1 %3206 }
 0x44d   : > { %v3208_v60 = vmul.f32 0.001953125, %v3207_v3 }
 0x44f   : > { %v3209_v56 = vadd.f32 1e-05, %v3208_v60 }
 0x451   : > { %7779 = vrsqrt.f32 %v3209_v56 }
 0x45b   : > { %v7780_v19 = vpop.eup %7779 }
 0x45c   : > { %v3211_v21 = vmul.f32 %v7780_v19, %v3195_v13  ;;  %v3212_v22 = vmul.f32 %v7780_v19, %v3196_v18  ;;  %v3214_v43 = vmul.f32 %v7780_v19, %v3198_v61  ;;  %v3213_v16 = vmul.f32 %v7780_v19, %v3197_v10  ;;  %v3231_v13 = vld [vmem:[%s12742_s3] sm:$0xff]  ;;  %v6429_v18 = vld [vmem:[%s12742_s3 + $0x258] sm:$0xff] }
 0x45e   : > { %v10184_v46 = vmax.f32 %v3211_v21, 0.0  ;;  %v10186_v14 = vmax.f32 %v3212_v22, 0.0  ;;  %v10196_v55 = vmax.f32 %v3214_v43, 0.0  ;;  %v10202_v8 = vmax.f32 %v3213_v16, 0.0 }
 0x460   : > { %3221 = vrot.lane.b32.xlu1 %v10186_v14, %s7796_s22  ;;  %3219 = vrot.lane.b32.xlu0 %v10184_v46, %s7796_s22  ;;  %v13157_v4 = vand.u32 4294901760, %v10184_v46  ;;  %v13160_v15 = vand.u32 4294901760, %v10186_v14  ;;  %v13159_v57 = vand.u32 4294901760, %v10202_v8  ;;  %v13158_v5 = vand.u32 4294901760, %v10196_v55 }
 0x462   : > { %v10311_v9 = vsub.f32 %v10184_v46, %v13157_v4  ;;  %v10316_v63 = vsub.f32 %v10186_v14, %v13160_v15  ;;  %v10336_v1 = vsub.f32 %v10202_v8, %v13159_v57  ;;  %v10341_v54 = vsub.f32 %v10196_v55, %v13158_v5 }
 0x464   : > { %3245 = vrot.lane.b32.xlu1 %v10186_v14, %s7795_s21  ;;  %3243 = vrot.lane.b32.xlu0 %v10184_v46, %s7795_s21  ;;  %14202 = vst [vmem:[#allocation69_spill] sm:$0xff] %v10311_v9  ;;  %14203 = vst [vmem:[#allocation72_spill] sm:$0xff] %v10316_v63  ;;  %v13151_v30 = vand.u32 4294901760, %v10316_v63  ;;  %v13150_v26 = vand.u32 4294901760, %v10311_v9  ;;  %v13149_v50 = vand.u32 4294901760, %v10341_v54  ;;  %v13148_v33 = vand.u32 4294901760, %v10336_v1 }
 0x465   : > { %14204 = vst [vmem:[#allocation48_spill] sm:$0xff] %v10336_v1  ;;  %14205 = vst [vmem:[#allocation49_spill] sm:$0xff] %v10341_v54 }
 0x466   : > { %v10368_v12 = vsub.f32 %v10316_v63, %v13151_v30  ;;  %v10373_v37 = vsub.f32 %v10311_v9, %v13150_v26  ;;  %v10401_v61 = vsub.f32 %v10341_v54, %v13149_v50  ;;  %v10406_v58 = vsub.f32 %v10336_v1, %v13148_v33 }
 0x468   : > { %3249 = vrot.lane.b32.xlu1 %v10196_v55, %s7795_s21  ;;  %3225 = vrot.lane.b32.xlu0 %v10196_v55, %s7796_s22  ;;  %14207 = vst [vmem:[#allocation52_spill] sm:$0xff] %v10368_v12  ;;  %14208 = vst [vmem:[#allocation53_spill] sm:$0xff] %v10373_v37 }
 0x469   : > { %14213 = vst [vmem:[#allocation101_spill] sm:$0xff] %v10401_v61  ;;  %14214 = vst [vmem:[#allocation109_spill] sm:$0xff] %v10406_v58 }
 0x46c   : > { %3247 = vrot.lane.b32.xlu1 %v10202_v8, %s7795_s21  ;;  %3223 = vrot.lane.b32.xlu0 %v10202_v8, %s7796_s22 }
 0x470   : > { %3269 = vrot.lane.b32.xlu1 %v10186_v14, %s7797_s23  ;;  %3267 = vrot.lane.b32.xlu0 %v10184_v46, %s7797_s23 }
 0x474   : > { %3293 = vrot.lane.b32.xlu1 %v10186_v14, %s7798_s24  ;;  %3291 = vrot.lane.b32.xlu0 %v10184_v46, %s7798_s24 }
 0x478   : > { %3297 = vrot.lane.b32.xlu1 %v10196_v55, %s7798_s24  ;;  %3273 = vrot.lane.b32.xlu0 %v10196_v55, %s7797_s23 }
 0x47c   : > { %3295 = vrot.lane.b32.xlu1 %v10202_v8, %s7798_s24  ;;  %3271 = vrot.lane.b32.xlu0 %v10202_v8, %s7797_s23 }
 0x480   : > { %3317 = vrot.lane.b32.xlu1 %v10186_v14, %s7799_s25  ;;  %3315 = vrot.lane.b32.xlu0 %v10184_v46, %s7799_s25 }
 0x484   : > { %3341 = vrot.lane.b32.xlu1 %v10186_v14, %s7800_s26  ;;  %3339 = vrot.lane.b32.xlu0 %v10184_v46, %s7800_s26 }
 0x488   : > { %3345 = vrot.lane.b32.xlu1 %v10196_v55, %s7800_s26  ;;  %3321 = vrot.lane.b32.xlu0 %v10196_v55, %s7799_s25 }
 0x48c   : > { %3343 = vrot.lane.b32.xlu1 %v10202_v8, %s7800_s26  ;;  %3319 = vrot.lane.b32.xlu0 %v10202_v8, %s7799_s25 }
 0x490   : > { %3365 = vrot.lane.b32.xlu1 %v10186_v14, %s7801_s27  ;;  %3363 = vrot.lane.b32.xlu0 %v10184_v46, %s7801_s27 }
 0x494   : > { %3389 = vrot.lane.b32.xlu1 %v10186_v14, %s7802_s28  ;;  %3387 = vrot.lane.b32.xlu0 %v10184_v46, %s7802_s28 }
 0x498   : > { %3393 = vrot.lane.b32.xlu1 %v10196_v55, %s7802_s28  ;;  %3369 = vrot.lane.b32.xlu0 %v10196_v55, %s7801_s27 }
 0x49c   : > { %3391 = vrot.lane.b32.xlu1 %v10202_v8, %s7802_s28  ;;  %3367 = vrot.lane.b32.xlu0 %v10202_v8, %s7801_s27  ;;  %s14953_s28 = sshll.u32 %s14955_s16, 5 }
 0x4a0   : > { %3413 = vrot.lane.b32.xlu1 %v10186_v14, %s7803_s29  ;;  %3411 = vrot.lane.b32.xlu0 %v10184_v46, %s7803_s29 }
 0x4a4   : > { %3437 = vrot.lane.b32.xlu1 %v10186_v14, %s7804_s30  ;;  %3435 = vrot.lane.b32.xlu0 %v10184_v46, %s7804_s30 }
 0x4a8   : > { %3441 = vrot.lane.b32.xlu1 %v10196_v55, %s7804_s30  ;;  %3417 = vrot.lane.b32.xlu0 %v10196_v55, %s7803_s29 }
 0x4ac   : > { %3439 = vrot.lane.b32.xlu1 %v10202_v8, %s7804_s30  ;;  %3415 = vrot.lane.b32.xlu0 %v10202_v8, %s7803_s29 }
 0x4b0   : > { %3461 = vrot.lane.b32.xlu1 %v10186_v14, %s7805_s5  ;;  %3459 = vrot.lane.b32.xlu0 %v10184_v46, %s7805_s5 }
 0x4b4   : > { %3485 = vrot.lane.b32.xlu1 %v10186_v14, %s7806_s6  ;;  %3483 = vrot.lane.b32.xlu0 %v10184_v46, %s7806_s6 }
 0x4b8   : > { %3489 = vrot.lane.b32.xlu1 %v10196_v55, %s7806_s6  ;;  %3465 = vrot.lane.b32.xlu0 %v10196_v55, %s7805_s5 }
 0x4bc   : > { %3487 = vrot.lane.b32.xlu1 %v10202_v8, %s7806_s6  ;;  %3463 = vrot.lane.b32.xlu0 %v10202_v8, %s7805_s5  ;;  %s14211_s5 = smov 120   ;;  %s197_s6 = scalar_lea.vmem %s12743_s4, %s14953_s28 }
 0x4c0   : > { %3509 = vrot.lane.b32.xlu1 %v10186_v14, %s7807_s7  ;;  %3507 = vrot.lane.b32.xlu0 %v10184_v46, %s7807_s7 }
 0x4c4   : > { %3511 = vrot.lane.b32.xlu1 %v10202_v8, %s7807_s7  ;;  %3513 = vrot.lane.b32.xlu0 %v10196_v55, %s7807_s7 }
 0x4c8   : > { %3539 = vrot.lane.b32.xlu1 %v10202_v8, %s7808_s8  ;;  %3537 = vrot.lane.b32.xlu0 %v10186_v14, %s7808_s8 }
 0x4cc   : > { %3563 = vrot.lane.b32.xlu1 %v10202_v8, %s7809_s9  ;;  %3561 = vrot.lane.b32.xlu0 %v10186_v14, %s7809_s9 }
 0x4d0   : > { %3559 = vrot.lane.b32.xlu1 %v10184_v46, %s7809_s9  ;;  %3535 = vrot.lane.b32.xlu0 %v10184_v46, %s7808_s8 }
 0x4d2   : > { %v10331_v52 = vpop.permute.xlu1 %3221  ;;  %v3220_v29 = vpop.permute.xlu0 %3219 }
 0x4d3   : > { %v3229_v23 = vsel %vm212_vm1, %v3220_v29, %v10331_v52 }
 0x4d4   : > { %v3236_v44 = vmul.f32 %v3232_v34, %v3229_v23  ;;  %v3635_v53 = vmul.f32 %v6426_v42, %v3229_v23  ;;  %3565 = vrot.lane.b32.xlu1 %v10196_v55, %s7809_s9  ;;  %3541 = vrot.lane.b32.xlu0 %v10196_v55, %s7808_s8 }
 0x4d6   : > { %v3852_v48 = vand.u32 4294901760, %v3236_v44  ;;  %v3926_v51 = vand.u32 4294901760, %v3635_v53  ;;  %v3246_v41 = vpop.permute.xlu1 %3245  ;;  %v3244_v7 = vpop.permute.xlu0 %3243 }
 0x4d7   : > { %v3253_v0 = vsel %vm237_vm0, %v3244_v7, %v3246_v41 }
 0x4d8   : > { %v10375_v39 = vsub.f32 %v3236_v44, %v3852_v48  ;;  %v10377_v17 = vsub.f32 %v3635_v53, %v3926_v51  ;;  %v3260_v31 = vmul.f32 %v6363_v47, %v3253_v0  ;;  %v3647_v49 = vmul.f32 %v6430_v25, %v3253_v0  ;;  %3587 = vrot.lane.b32.xlu1 %v10202_v8, %s14211_s5  ;;  %v6364_v25 = vld [vmem:[%s12742_s3 + $0x30] sm:$0xff] }
 0x4d9   : > { %3585 = vrot.lane.b32.xlu0 %v10186_v14, %s14211_s5 }
 0x4da   : > { %14209 = vst [vmem:[#allocation58_spill] sm:$0xff] %v10375_v39  ;;  %14210 = vst [vmem:[#allocation59_spill] sm:$0xff] %v10377_v17  ;;  %v3856_v62 = vand.u32 4294901760, %v3260_v31  ;;  %v3930_v24 = vand.u32 4294901760, %v3647_v49  ;;  %v3250_v28 = vpop.permute.xlu1 %3249  ;;  %v3226_v10 = vpop.permute.xlu0 %3225  ;;  %v13147_v6 = vand.u32 4294901760, %v10377_v17 }
 0x4db   : > { %v3254_v11 = vsel %vm237_vm0, %v3250_v28, %v3244_v7  ;;  %v3230_v45 = vsel %vm212_vm1, %v3226_v10, %v3220_v29 }
 0x4dc   : > { %v10414_v32 = vpack.c.bf16 %v3930_v24, %v3926_v51  ;;  %v10416_v20 = vsub.f32 %v3260_v31, %v3856_v62  ;;  %v10418_v3 = vsub.f32 %v3647_v49, %v3930_v24  ;;  %3611 = vrot.lane.b32.xlu1 %v10202_v8, %s14218_s14  ;;  %v3259_v56 = vmul.f32 %v6362_v27, %v3254_v11  ;;  %v6431_v51 = vld [vmem:[%s12742_s3 + $0x268] sm:$0xff]  ;;  %v6432_v31 = vld [vmem:[%s12742_s3 + $0x270] sm:$0xff] }
 0x4dd   : > { %v10423_v19 = vmul.f32 %v6433_v2, %v3254_v11  ;;  %v3235_v21 = vmul.f32 %v3231_v13, %v3230_v45  ;;  %v10425_v22 = vmul.f32 %v6429_v18, %v3230_v45  ;;  %3609 = vrot.lane.b32.xlu0 %v10186_v14, %s14218_s14  ;;  %v10430_v34 = vpack.c.bf16 %v3856_v62, %v3852_v48  ;;  %v6365_v48 = vld [vmem:[%s12742_s3 + $0x38] sm:$0xff]  ;;  %v3233_v13 = vld [vmem:[%s12742_s3 + $0x10] sm:$0xff] }
 0x4de   : > { %14215 = vst [vmem:[#allocation118_spill] sm:$0xff] %v10414_v32  ;;  %14216 = vst [vmem:[#allocation45_spill] sm:$0xff] %v10416_v20  ;;  %v13146_v43 = vand.u32 4294901760, %v10418_v3  ;;  %v3248_v16 = vpop.permute.xlu1 %3247  ;;  %v3224_v42 = vpop.permute.xlu0 %3223  ;;  %v10437_v23 = vsub.f32 %v10377_v17, %v13147_v6  ;;  %v3858_v44 = vand.u32 4294901760, %v3259_v56  ;;  %v6428_v6 = vld [vmem:[%s12742_s3 + $0x250] sm:$0xff] }
 0x4df   : > { %14217 = vst [vmem:[#allocation55_spill] sm:$0xff] %v10418_v3  ;;  %14219 = vst [vmem:[#allocation107_spill] sm:$0xff] %v10430_v34  ;;  %v13154_v53 = vand.u32 4294901760, %v10423_v19  ;;  %v3854_v47 = vand.u32 4294901760, %v3235_v21  ;;  %v13155_v0 = vand.u32 4294901760, %v10425_v22  ;;  %v3251_v49 = vsel %vm237_vm0, %v3248_v16, %v3250_v28  ;;  %7091 = vmatprep.subr.bf16.mxu0 %v10430_v34 }
 0x4e0   : > { %14220 = vst [vmem:[#allocation67_spill] sm:$0xff] %v10437_v23  ;;  %v10452_v7 = vsub.f32 %v10418_v3, %v13146_v43  ;;  %v3252_v27 = vsel %vm237_vm0, %v3246_v41, %v3248_v16  ;;  %v10463_v62 = vsub.f32 %v3259_v56, %v3858_v44  ;;  %v3227_v18 = vsel %vm212_vm1, %v3224_v42, %v3226_v10  ;;  %v3234_v56 = vld [vmem:[%s12742_s3 + $0x18] sm:$0xff] }
 0x4e1   : > { %v10465_v24 = vpack.c.bf16 %v3858_v44, %v3854_v47  ;;  %v10467_v2 = vsub.f32 %v3235_v21, %v3854_v47  ;;  %3607 = vrot.lane.b32.xlu1 %v10184_v46, %s14218_s14  ;;  %v10479_v41 = vsub.f32 %v10423_v19, %v13154_v53  ;;  %v3261_v28 = vmul.f32 %v6364_v25, %v3252_v27  ;;  %v6427_v25 = vld [vmem:[%s12742_s3 + $0x248] sm:$0xff] }
 0x4e2   : > { %14221 = vst [vmem:[#allocation89_spill] sm:$0xff] %v10452_v7  ;;  %14222 = vst [vmem:[#allocation139_spill] sm:$0xff] %v10463_v62  ;;  %v3262_v11 = vmul.f32 %v6365_v48, %v3251_v49  ;;  %v10481_v45 = vmul.f32 %v6431_v51, %v3252_v27  ;;  %3583 = vrot.lane.b32.xlu0 %v10184_v46, %s14211_s5  ;;  %v10488_v10 = vpop.permute.xlu1 %3269  ;;  %v10490_v21 = vpop.permute.xlu0 %3267  ;;  %v13152_v16 = vand.u32 4294901760, %v10463_v62  ;;  %vm14388_vm0 = vcmp.lt.s32.totalorder %v14206_v59, 7 }
 0x4e3   : > { %14223 = vst [vmem:[#allocation137_spill] sm:$0xff] %v10465_v24  ;;  %14224 = vst [vmem:[#allocation73_spill] sm:$0xff] %v10467_v2  ;;  %v13153_v44 = vand.u32 4294901760, %v10467_v2  ;;  %v3649_v47 = vmul.f32 %v6432_v31, %v3251_v49  ;;  %v3228_v48 = vsel %vm212_vm1, %v10331_v52, %v3224_v42  ;;  %7093 = vmatpush1.bf16.msra.mxu0 %v10465_v24  ;;  %v5012_v43 = vand.u32 4294901760, %v3261_v28 }
 0x4e4   : > { %14225 = vst [vmem:[#allocation74_spill] sm:$0xff] %v10479_v41  ;;  %v13156_v51 = vand.u32 4294901760, %v10481_v45  ;;  %v5010_v27 = vand.u32 4294901760, %v3262_v11  ;;  %v3237_v33 = vmul.f32 %v3233_v13, %v3228_v48  ;;  %v10508_v31 = vsub.f32 %v10463_v62, %v13152_v16  ;;  %vm14389_vm1 = vmmov %vm14388_vm0 }
 0x4e5   : > { %v10513_v52 = vsub.f32 %v10425_v22, %v13155_v0  ;;  %v5084_v42 = vand.u32 4294901760, %v3649_v47  ;;  %v3238_v49 = vmul.f32 %v3234_v56, %v3227_v18  ;;  %3613 = vrot.lane.b32.xlu1 %v10196_v55, %s14218_s14  ;;  %v10520_v50 = vsub.f32 %v10467_v2, %v13153_v44  ;;  %v6371_v0 = vld [vmem:[%s12742_s3 + $0x68] sm:$0xff] }
 0x4e6   : > { %v10522_v13 = vsub.f32 %v3262_v11, %v5010_v27  ;;  %v10524_v26 = vsub.f32 %v3261_v28, %v5012_v43  ;;  %v10526_v30 = vmul.f32 %v6427_v25, %v3228_v48  ;;  %3589 = vrot.lane.b32.xlu0 %v10196_v55, %s14211_s5  ;;  %v10530_v16 = vpop.permute.xlu1 %3293  ;;  %v3292_v56 = vpop.permute.xlu0 %3291  ;;  %v3637_v29 = vmul.f32 %v6428_v6, %v3227_v18  ;;  %v6367_v11 = vld [vmem:[%s12742_s3 + $0x48] sm:$0xff] }
 0x4e7   : > { %14226 = vst [vmem:[#allocation76_spill] sm:$0xff] %v10513_v52  ;;  %v10532_v35 = vsub.f32 %v3649_v47, %v5084_v42  ;;  %v5006_v38 = vand.u32 4294901760, %v3238_v49  ;;  %v5008_v60 = vand.u32 4294901760, %v3237_v33  ;;  %v10540_v28 = vsub.f32 %v10481_v45, %v13156_v51  ;;  %v6434_v47 = vld [vmem:[%s12742_s3 + $0x280] sm:$0xff] }
 0x4e8   : > { %14227 = vst [vmem:[#allocation77_spill] sm:$0xff] %v10522_v13  ;;  %14228 = vst [vmem:[#allocation82_spill] sm:$0xff] %v10524_v26  ;;  %v13165_v25 = vand.u32 4294901760, %v10524_v26  ;;  %v3277_v6 = vsel %vm263_vm2, %v10490_v21, %v10488_v10  ;;  %v5080_v44 = vand.u32 4294901760, %v3637_v29  ;;  %v3301_v51 = vsel %vm289_vm3, %v3292_v56, %v10530_v16 }
 0x4e9   : > { %14229 = vst [vmem:[#allocation83_spill] sm:$0xff] %v10532_v35  ;;  %14230 = vst [vmem:[#allocation97_spill] sm:$0xff] %v10540_v28  ;;  %v10552_v53 = vsub.f32 %v3238_v49, %v5006_v38  ;;  %v10565_v5 = vpack.c.bf16 %v5012_v43, %v5008_v60  ;;  %v10567_v57 = vsub.f32 %v3237_v33, %v5008_v60  ;;  %v6438_v49 = vld [vmem:[%s12742_s3 + $0x2a0] sm:$0xff]  ;;  %v14235_v24 = vand.u32 4294901760, %v10526_v30 }
 0x4ea   : > { %v10563_v4 = vsub.f32 %v10524_v26, %v13165_v25  ;;  %v10569_v15 = vmul.f32 %v6367_v11, %v3277_v6  ;;  %v3298_v18 = vpop.permute.xlu1 %3297  ;;  %v10574_v48 = vpop.permute.xlu0 %3273  ;;  %v10581_v25 = vpack.c.bf16 %v5084_v42, %v5080_v44  ;;  %v10583_v43 = vsub.f32 %v3637_v29, %v5080_v44  ;;  %v6370_v60 = vld [vmem:[%s12742_s3 + $0x60] sm:$0xff]  ;;  %v6373_v26 = vld [vmem:[%s12742_s3 + $0x78] sm:$0xff] }
 0x4eb   : > { %14231 = vst [vmem:[#allocation98_spill] sm:$0xff] %v10552_v53  ;;  %14233 = vst [vmem:[#allocation106_spill] sm:$0xff] %v10565_v5  ;;  %v10579_v34 = vsub.f32 %v10526_v30, %v14235_v24  ;;  %v3659_v33 = vmul.f32 %v6434_v47, %v3277_v6  ;;  %v10590_v9 = vpack.c.bf16 %v5010_v27, %v5006_v38  ;;  %v6441_v24 = vld [vmem:[%s12742_s3 + $0x2b8] sm:$0xff]  ;;  %v14240_v29 = vand.u32 4294901760, %v10532_v35 }
 0x4ec   : > { %14232 = vst [vmem:[#allocation105_spill] sm:$0xff] %v10563_v4  ;;  %14234 = vst [vmem:[#allocation127_spill] sm:$0xff] %v10567_v57  ;;  %v13176_v1 = vand.u32 4294901760, %v10569_v15  ;;  %v10592_v63 = vmul.f32 %v6371_v0, %v3301_v51  ;;  %v3671_v47 = vmul.f32 %v6438_v49, %v3301_v51  ;;  %v3302_v6 = vsel %vm289_vm3, %v3298_v18, %v3292_v56 }
 0x4ed   : > { %14236 = vst [vmem:[#allocation128_spill] sm:$0xff] %v10579_v34  ;;  %14237 = vst [vmem:[#allocation147_spill] sm:$0xff] %v10581_v25  ;;  %v10600_v44 = vsub.f32 %v10532_v35, %v14240_v29  ;;  %v3934_v42 = vand.u32 4294901760, %v3659_v33  ;;  %7403 = vmatprep.subr.bf16.mxu1 %v10590_v9  ;;  %v3307_v27 = vmul.f32 %v6370_v60, %v3302_v6  ;;  %v14243_v35 = vand.u32 4294901760, %v10567_v57  ;;  %v6437_v60 = vld [vmem:[%s12742_s3 + $0x298] sm:$0xff] }
 0x4ee   : > { %14238 = vst [vmem:[#allocation5_spill] sm:$0xff] %v10583_v43  ;;  %14239 = vst [vmem:[#allocation167_spill] sm:$0xff] %v10590_v9  ;;  %v10608_v38 = vsub.f32 %v10569_v15, %v13176_v1  ;;  %v3864_v0 = vand.u32 4294901760, %v10592_v63  ;;  %v3296_v3 = vpop.permute.xlu1 %3295  ;;  %v3272_v29 = vpop.permute.xlu0 %3271  ;;  %v3938_v49 = vand.u32 4294901760, %v3671_v47  ;;  %7405 = vmatpush1.bf16.msra.mxu1 %v10565_v5  ;;  %v10620_v11 = vmul.f32 %v6441_v24, %v3302_v6  ;;  %v6366_v1 = vld [vmem:[%s12742_s3 + $0x40] sm:$0xff]  ;;  %v6372_v24 = vld [vmem:[%s12742_s3 + $0x70] sm:$0xff] }
 0x4ef   : > { %14241 = vst [vmem:[#allocation168_spill] sm:$0xff] %v10600_v44  ;;  %v10615_v51 = vsub.f32 %v10567_v57, %v14243_v35  ;;  %v10617_v56 = vsub.f32 %v3659_v33, %v3934_v42  ;;  %v3866_v35 = vand.u32 4294901760, %v3307_v27  ;;  %v3278_v33 = vsel %vm263_vm2, %v10574_v48, %v10490_v21 }
 0x4f0   : > { %14242 = vst [vmem:[#allocation161_spill] sm:$0xff] %v10608_v38  ;;  %v10629_v9 = vsub.f32 %v10592_v63, %v3864_v0  ;;  %v3299_v6 = vsel %vm289_vm3, %v3296_v3, %v3298_v18  ;;  %v10641_v17 = vpack.c.bf16 %v3938_v49, %v3934_v42  ;;  %v10643_v54 = vsub.f32 %v3671_v47, %v3938_v49  ;;  %v6439_v18 = vld [vmem:[%s12742_s3 + $0x2a8] sm:$0xff]  ;;  %v6440_v42 = vld [vmem:[%s12742_s3 + $0x2b0] sm:$0xff] }
 0x4f1   : > { %14244 = vst [vmem:[#allocation159_spill] sm:$0xff] %v10615_v51  ;;  %14245 = vst [vmem:[#allocation177_spill] sm:$0xff] %v10617_v56  ;;  %v13197_v5 = vand.u32 4294901760, %v10617_v56  ;;  %v10649_v21 = vsub.f32 %v3307_v27, %v3866_v35  ;;  %v3283_v57 = vmul.f32 %v6366_v1, %v3278_v33  ;;  %v10651_v62 = vmul.f32 %v6437_v60, %v3278_v33 }
 0x4f2   : > { %14246 = vst [vmem:[#allocation173_spill] sm:$0xff] %v10629_v9  ;;  %14247 = vst [vmem:[#allocation157_spill] sm:$0xff] %v10641_v17  ;;  %v3300_v47 = vsel %vm289_vm3, %v10530_v16, %v3296_v3  ;;  %v10662_v49 = vpop.permute.xlu1 %3317  ;;  %v10664_v63 = vpop.permute.xlu0 %3315  ;;  %v14250_v1 = vand.u32 4294901760, %v10583_v43  ;;  %v13201_v33 = vand.u32 4294901760, %v10643_v54  ;;  %v14253_v3 = vand.u32 4294901760, %v10620_v11 }
 0x4f3   : > { %14248 = vst [vmem:[#allocation156_spill] sm:$0xff] %v10643_v54  ;;  %14249 = vst [vmem:[#allocation146_spill] sm:$0xff] %v10649_v21  ;;  %v10674_v60 = vsub.f32 %v10617_v56, %v13197_v5  ;;  %v3309_v2 = vmul.f32 %v6372_v24, %v3300_v47  ;;  %v13202_v44 = vand.u32 4294901760, %v10649_v21  ;;  %v3862_v41 = vand.u32 4294901760, %v3283_v57 }
 0x4f4   : > { %v10669_v27 = vsub.f32 %v10583_v43, %v14250_v1  ;;  %v10681_v16 = vsub.f32 %v10620_v11, %v14253_v3  ;;  %v10683_v52 = vmul.f32 %v6373_v26, %v3299_v6  ;;  %v10686_v43 = vmul.f32 %v6439_v18, %v3300_v47  ;;  %vm14394_vm3 = vmmov %vm14388_vm0 }
 0x4f5   : > { %14252 = vst [vmem:[#allocation171_spill] sm:$0xff] %v10674_v60  ;;  %v5020_v5 = vand.u32 4294901760, %v3309_v2  ;;  %v10691_v24 = vsub.f32 %v10643_v54, %v13201_v33  ;;  %v10696_v56 = vsub.f32 %v10649_v21, %v13202_v44  ;;  %v10698_v3 = vpack.c.bf16 %v3866_v35, %v3862_v41  ;;  %v6368_v33 = vld [vmem:[%s12742_s3 + $0x50] sm:$0xff]  ;;  %v6369_v35 = vld [vmem:[%s12742_s3 + $0x58] sm:$0xff] }
 0x4f6   : > { %14251 = vst [vmem:[#allocation11_spill] sm:$0xff] %v10669_v27  ;;  %14254 = vst [vmem:[#allocation170_spill] sm:$0xff] %v10681_v16  ;;  %v3673_v27 = vmul.f32 %v6440_v42, %v3299_v6  ;;  %v10700_v26 = vsub.f32 %v3283_v57, %v3862_v41  ;;  %v10702_v16 = vpop.permute.xlu1 %3341  ;;  %v3340_v18 = vpop.permute.xlu0 %3339  ;;  %v5018_v42 = vand.u32 4294901760, %v10683_v52  ;;  %v6435_v57 = vld [vmem:[%s12742_s3 + $0x288] sm:$0xff]  ;;  %v14260_v44 = vand.u32 4294901760, %v10569_v15 }
 0x4f7   : > { %14255 = vst [vmem:[#allocation162_spill] sm:$0xff] %v10691_v24  ;;  %14256 = vst [vmem:[#allocation160_spill] sm:$0xff] %v10696_v56  ;;  %v10706_v1 = vsub.f32 %v3309_v2, %v5020_v5  ;;  %v6436_v2 = vld [vmem:[%s12742_s3 + $0x290] sm:$0xff]  ;;  %v3275_v54 = vsel %vm263_vm2, %v3272_v29, %v10574_v48  ;;  %v3276_v21 = vsel %vm263_vm2, %v10488_v10, %v3272_v29  ;;  %v14262_v24 = vand.u32 4294901760, %v10651_v62  ;;  %v6375_v48 = vld [vmem:[%s12742_s3 + $0x88] sm:$0xff] }
 0x4f8   : > { %14257 = vst [vmem:[#allocation175_spill] sm:$0xff] %v10698_v3  ;;  %14258 = vst [vmem:[#allocation174_spill] sm:$0xff] %v10700_v26  ;;  %v5092_v47 = vand.u32 4294901760, %v3673_v27  ;;  %v10720_v6 = vpack.c.bf16 %v3864_v0, %v14260_v44  ;;  %v10737_v15 = vsub.f32 %v10683_v52, %v5018_v42  ;;  %v14266_v60 = vand.u32 4294901760, %v10686_v43  ;;  %v6442_v52 = vld [vmem:[%s12742_s3 + $0x2c0] sm:$0xff] }
 0x4f9   : > { %14259 = vst [vmem:[#allocation117_spill] sm:$0xff] %v10706_v1  ;;  %v10734_v41 = vsub.f32 %v10651_v62, %v14262_v24  ;;  %v3285_v29 = vmul.f32 %v6368_v33, %v3276_v21  ;;  %v3286_v24 = vmul.f32 %v6369_v35, %v3275_v54  ;;  %v14268_v7 = vand.u32 4294901760, %v10700_v26  ;;  %vm14393_vm2 = vmmov %vm14388_vm0 }
 0x4fa   : > { %14261 = vst [vmem:[#allocation99_spill] sm:$0xff] %v10720_v6  ;;  %14264 = vst [vmem:[#allocation129_spill] sm:$0xff] %v10737_v15  ;;  %v10740_v0 = vsub.f32 %v3673_v27, %v5092_v47  ;;  %v10748_v10 = vsub.f32 %v10686_v43, %v14266_v60  ;;  %7095 = vmatprep.subr.bf16.mxu0 %v10720_v6  ;;  %v10756_v27 = vpop.permute.xlu1 %3345  ;;  %v10758_v44 = vpop.permute.xlu0 %3321  ;;  %v3661_v6 = vmul.f32 %v6436_v2, %v3275_v54  ;;  %v6379_v2 = vld [vmem:[%s12742_s3 + $0xa8] sm:$0xff] }
 0x4fb   : > { %14263 = vst [vmem:[#allocation7_spill] sm:$0xff] %v10734_v41  ;;  %v10751_v41 = vmul.f32 %v6435_v57, %v3276_v21  ;;  %v10763_v23 = vsub.f32 %v10700_v26, %v14268_v7  ;;  %7097 = vmatpush1.bf16.msra.mxu0 %v10698_v3  ;;  %v3325_v21 = vsel %vm315_vm4, %v10664_v63, %v10662_v49  ;;  %v14270_v33 = vand.u32 4294901760, %v10706_v1  ;;  %v6446_v3 = vld [vmem:[%s12742_s3 + $0x2e0] sm:$0xff] }
 0x4fc   : > { %14265 = vst [vmem:[#allocation12_spill] sm:$0xff] %v10740_v0  ;;  %14267 = vst [vmem:[#allocation123_spill] sm:$0xff] %v10748_v10  ;;  %v5014_v57 = vand.u32 4294901760, %v3286_v24  ;;  %v5016_v10 = vand.u32 4294901760, %v3285_v29  ;;  %v10776_v28 = vmul.f32 %v6375_v48, %v3325_v21  ;;  %v5088_v60 = vand.u32 4294901760, %v3661_v6 }
 0x4fd   : > { %14269 = vst [vmem:[#allocation31_spill] sm:$0xff] %v10763_v23  ;;  %v10774_v35 = vsub.f32 %v10706_v1, %v14270_v33  ;;  %v3683_v54 = vmul.f32 %v6442_v52, %v3325_v21  ;;  %v3349_v33 = vsel %vm341_vm5, %v3340_v18, %v10702_v16  ;;  %v14272_v1 = vand.u32 4294901760, %v10740_v0 }
 0x4fe   : > { %v10793_v7 = vpack.c.bf16 %v5020_v5, %v5016_v10  ;;  %v10795_v52 = vsub.f32 %v3286_v24, %v5014_v57  ;;  %v10797_v21 = vsub.f32 %v3285_v29, %v5016_v10  ;;  %v3344_v26 = vpop.permute.xlu1 %3343  ;;  %v10799_v34 = vpop.permute.xlu0 %3319  ;;  %v10801_v61 = vpack.c.bf16 %v5092_v47, %v5088_v60  ;;  %v6449_v47 = vld [vmem:[%s12742_s3 + $0x2f8] sm:$0xff] }
 0x4ff   : > { %14271 = vst [vmem:[#allocation36_spill] sm:$0xff] %v10774_v35  ;;  %v10791_v48 = vsub.f32 %v10740_v0, %v14272_v1  ;;  %v10803_v58 = vsub.f32 %v3661_v6, %v5088_v60  ;;  %v13225_v12 = vand.u32 4294901760, %v10776_v28  ;;  %v3942_v37 = vand.u32 4294901760, %v3683_v54  ;;  %v6378_v1 = vld [vmem:[%s12742_s3 + $0xa0] sm:$0xff] }
 0x500   : > { %14274 = vst [vmem:[#allocation16_spill] sm:$0xff] %v10793_v7  ;;  %14275 = vst [vmem:[#allocation18_spill] sm:$0xff] %v10795_v52  ;;  %v10810_v24 = vpack.c.bf16 %v5018_v42, %v5014_v57  ;;  %v3356_v10 = vmul.f32 %v6379_v2, %v3349_v33  ;;  %v3695_v29 = vmul.f32 %v6446_v3, %v3349_v33  ;;  %v14282_v57 = vand.u32 4294901760, %v10751_v41 }
 0x501   : > { %14273 = vst [vmem:[#allocation54_spill] sm:$0xff] %v10791_v48  ;;  %14276 = vst [vmem:[#allocation40_spill] sm:$0xff] %v10797_v21  ;;  %v10819_v60 = vsub.f32 %v10776_v28, %v13225_v12  ;;  %v10821_v0 = vsub.f32 %v3683_v54, %v3942_v37  ;;  %v3350_v42 = vsel %vm341_vm5, %v10756_v27, %v3340_v18  ;;  %v6374_v12 = vld [vmem:[%s12742_s3 + $0x80] sm:$0xff]  ;;  %v6445_v54 = vld [vmem:[%s12742_s3 + $0x2d8] sm:$0xff] }
 0x502   : > { %14277 = vst [vmem:[#allocation60_spill] sm:$0xff] %v10801_v61  ;;  %14278 = vst [vmem:[#allocation78_spill] sm:$0xff] %v10803_v58  ;;  %v10829_v3 = vsub.f32 %v10751_v41, %v14282_v57  ;;  %7407 = vmatprep.subr.bf16.mxu1 %v10810_v24  ;;  %v3872_v2 = vand.u32 4294901760, %v3356_v10  ;;  %v3946_v33 = vand.u32 4294901760, %v3695_v29  ;;  %v3355_v6 = vmul.f32 %v6378_v1, %v3350_v42  ;;  %v10838_v5 = vpop.permute.xlu1 %3365  ;;  %v10840_v18 = vpop.permute.xlu0 %3363 }
 0x503   : > { %14279 = vst [vmem:[#allocation42_spill] sm:$0xff] %v10810_v24  ;;  %14280 = vst [vmem:[#allocation64_spill] sm:$0xff] %v10819_v60  ;;  %v14284_v57 = vand.u32 4294901760, %v10797_v21  ;;  %7409 = vmatpush1.bf16.msra.mxu1 %v10793_v7  ;;  %v10849_v1 = vmul.f32 %v6449_v47, %v3350_v42  ;;  %v14289_v24 = vand.u32 4294901760, %v10803_v58 }
 0x504   : > { %14281 = vst [vmem:[#allocation84_spill] sm:$0xff] %v10821_v0  ;;  %14283 = vst [vmem:[#allocation103_spill] sm:$0xff] %v10829_v3  ;;  %v3326_v3 = vsel %vm315_vm4, %v10758_v44, %v10664_v63  ;;  %v10855_v35 = vpack.c.bf16 %v3946_v33, %v3942_v37  ;;  %v10857_v61 = vsub.f32 %v3356_v10, %v3872_v2  ;;  %v3874_v52 = vand.u32 4294901760, %v3355_v6  ;;  %v6381_v37 = vld [vmem:[%s12742_s3 + $0xb8] sm:$0xff]  ;;  %v6447_v10 = vld [vmem:[%s12742_s3 + $0x2e8] sm:$0xff] }
 0x505   : > { %v10845_v48 = vsub.f32 %v10797_v21, %v14284_v57  ;;  %v10859_v15 = vsub.f32 %v3695_v29, %v3946_v33  ;;  %v6380_v57 = vld [vmem:[%s12742_s3 + $0xb0] sm:$0xff]  ;;  %v10867_v47 = vsub.f32 %v10803_v58, %v14289_v24  ;;  %v3331_v7 = vmul.f32 %v6374_v12, %v3326_v3 }
 0x506   : > { %14286 = vst [vmem:[#allocation88_spill] sm:$0xff] %v10855_v35  ;;  %14287 = vst [vmem:[#allocation110_spill] sm:$0xff] %v10857_v61  ;;  %v10870_v63 = vmul.f32 %v6445_v54, %v3326_v3  ;;  %v10879_v33 = vsub.f32 %v3355_v6, %v3874_v52  ;;  %v6448_v24 = vld [vmem:[%s12742_s3 + $0x2f0] sm:$0xff]  ;;  %v3347_v12 = vsel %vm341_vm5, %v3344_v26, %v10756_v27  ;;  %v10890_v54 = vpop.permute.xlu1 %3389  ;;  %v10892_v42 = vpop.permute.xlu0 %3387  ;;  %v14292_v29 = vand.u32 4294901760, %v10821_v0 }
 0x507   : > { %14285 = vst [vmem:[#allocation66_spill] sm:$0xff] %v10845_v48  ;;  %14288 = vst [vmem:[#allocation131_spill] sm:$0xff] %v10859_v15  ;;  %v3348_v3 = vsel %vm341_vm5, %v10702_v16, %v3344_v26  ;;  %v3870_v58 = vand.u32 4294901760, %v3331_v7  ;;  %v14294_v27 = vand.u32 4294901760, %v10849_v1  ;;  %v3358_v16 = vmul.f32 %v6381_v37, %v3347_v12 }
 0x508   : > { %14290 = vst [vmem:[#allocation90_spill] sm:$0xff] %v10867_v47  ;;  %14291 = vst [vmem:[#allocation119_spill] sm:$0xff] %v10879_v33  ;;  %v10897_v6 = vsub.f32 %v10821_v0, %v14292_v29  ;;  %v13241_v21 = vand.u32 4294901760, %v10870_v63  ;;  %v3357_v47 = vmul.f32 %v6380_v57, %v3348_v3  ;;  %v10906_v26 = vmul.f32 %v6447_v10, %v3348_v3  ;;  %v6376_v3 = vld [vmem:[%s12742_s3 + $0x90] sm:$0xff] }
 0x509   : > { %v10904_v35 = vsub.f32 %v10849_v1, %v14294_v27  ;;  %v14296_v4 = vand.u32 4294901760, %v10859_v15  ;;  %v10913_v29 = vpack.c.bf16 %v3874_v52, %v3870_v58  ;;  %v10915_v0 = vsub.f32 %v3331_v7, %v3870_v58 }
 0x50a   : > { %14293 = vst [vmem:[#allocation8_spill] sm:$0xff] %v10897_v6  ;;  %v3697_v57 = vmul.f32 %v6448_v24, %v3347_v12  ;;  %v10920_v48 = vsub.f32 %v10870_v63, %v13241_v21  ;;  %v5026_v37 = vand.u32 4294901760, %v3358_v16  ;;  %v5028_v10 = vand.u32 4294901760, %v3357_v47  ;;  %v10929_v58 = vpop.permute.xlu1 %3393  ;;  %v10931_v7 = vpop.permute.xlu0 %3369 }
 0x50b   : > { %14295 = vst [vmem:[#allocation9_spill] sm:$0xff] %v10904_v35  ;;  %v10911_v51 = vsub.f32 %v10859_v15, %v14296_v4  ;;  %14298 = vst [vmem:[#allocation14_spill] sm:$0xff] %v10913_v29  ;;  %v6377_v4 = vld [vmem:[%s12742_s3 + $0x98] sm:$0xff]  ;;  %v14301_v52 = vand.u32 4294901760, %v10879_v33  ;;  %v14303_v21 = vand.u32 4294901760, %v10776_v28  ;;  %v6443_v15 = vld [vmem:[%s12742_s3 + $0x2c8] sm:$0xff] }
 0x50c   : > { %14299 = vst [vmem:[#allocation132_spill] sm:$0xff] %v10915_v0  ;;  %14300 = vst [vmem:[#allocation21_spill] sm:$0xff] %v10920_v48  ;;  %v5100_v12 = vand.u32 4294901760, %v3697_v57  ;;  %v6444_v35 = vld [vmem:[%s12742_s3 + $0x2d0] sm:$0xff]  ;;  %v3323_v48 = vsel %vm315_vm4, %v10799_v34, %v10758_v44  ;;  %v10955_v28 = vsub.f32 %v3357_v47, %v5028_v10 }
 0x50d   : > { %14297 = vst [vmem:[#allocation13_spill] sm:$0xff] %v10911_v51  ;;  %v10936_v24 = vsub.f32 %v10879_v33, %v14301_v52  ;;  %v10940_v27 = vpack.c.bf16 %v3872_v2, %v14303_v21  ;;  %v10953_v33 = vsub.f32 %v3358_v16, %v5026_v37  ;;  %v3324_v21 = vsel %vm315_vm4, %v10662_v49, %v10799_v34  ;;  %v6383_v2 = vld [vmem:[%s12742_s3 + $0xc8] sm:$0xff]  ;;  %v6450_v52 = vld [vmem:[%s12742_s3 + $0x300] sm:$0xff] }
 0x50e   : > { %14306 = vst [vmem:[#allocation38_spill] sm:$0xff] %v10955_v28  ;;  %v14307_v51 = vand.u32 4294901760, %v10906_v26  ;;  %v10969_v44 = vsub.f32 %v3697_v57, %v5100_v12  ;;  %v3333_v47 = vmul.f32 %v6376_v3, %v3324_v21  ;;  %v3334_v16 = vmul.f32 %v6377_v4, %v3323_v48  ;;  %v10983_v57 = vpop.permute.xlu1 %3391  ;;  %v10985_v3 = vpop.permute.xlu0 %3367 }
 0x50f   : > { %14302 = vst [vmem:[#allocation32_spill] sm:$0xff] %v10936_v24  ;;  %14304 = vst [vmem:[#allocation100_spill] sm:$0xff] %v10940_v27  ;;  %7099 = vmatprep.subr.bf16.mxu0 %v10940_v27  ;;  %v10976_v49 = vmul.f32 %v6443_v15, %v3324_v21  ;;  %v14310_v15 = vand.u32 4294901760, %v10915_v0  ;;  %vm14401_vm4 = vcmp.lt.s32.totalorder %v14206_v59, 1 }
 0x510   : > { %14305 = vst [vmem:[#allocation37_spill] sm:$0xff] %v10953_v33  ;;  %v10967_v6 = vsub.f32 %v10906_v26, %v14307_v51  ;;  %14309 = vst [vmem:[#allocation15_spill] sm:$0xff] %v10969_v44  ;;  %v3685_v33 = vmul.f32 %v6444_v35, %v3323_v48  ;;  %7101 = vmatpush1.bf16.msra.mxu0 %v10913_v29  ;;  %v3373_v51 = vsel %vm367_vm6, %v10840_v18, %v10838_v5 }
 0x511   : > { %v13257_v4 = vand.u32 4294901760, %v10969_v44  ;;  %v5022_v27 = vand.u32 4294901760, %v3334_v16  ;;  %v10988_v24 = vmul.f32 %v6383_v2, %v3373_v51  ;;  %v10993_v35 = vsub.f32 %v10915_v0, %v14310_v15  ;;  %v6387_v15 = vld [vmem:[%s12742_s3 + $0xe8] sm:$0xff]  ;;  %vm14404_vm5 = vmmov %vm14401_vm4 }
 0x512   : > { %14308 = vst [vmem:[#allocation17_spill] sm:$0xff] %v10967_v6  ;;  %v5024_v6 = vand.u32 4294901760, %v3333_v47  ;;  %v5096_v21 = vand.u32 4294901760, %v3685_v33  ;;  %v3707_v34 = vmul.f32 %v6450_v52, %v3373_v51  ;;  %v14312_v29 = vand.u32 4294901760, %v10955_v28  ;;  %v6454_v52 = vld [vmem:[%s12742_s3 + $0x320] sm:$0xff] }
 0x513   : > { %14311 = vst [vmem:[#allocation19_spill] sm:$0xff] %v10993_v35  ;;  %v11004_v61 = vsub.f32 %v10969_v44, %v13257_v4  ;;  %v11006_v2 = vsub.f32 %v3334_v16, %v5022_v27  ;;  %v3876_v4 = vand.u32 4294901760, %v10988_v24  ;;  %v11023_v16 = vpop.permute.xlu1 %3413  ;;  %v11028_v0 = vpack.c.bf16 %v5026_v37, %v5022_v27  ;;  %v6457_v37 = vld [vmem:[%s12742_s3 + $0x338] sm:$0xff] }
 0x514   : > { %v10999_v25 = vsub.f32 %v10955_v28, %v14312_v29  ;;  %v11008_v60 = vsub.f32 %v3333_v47, %v5024_v6  ;;  %v11016_v51 = vpack.c.bf16 %v5028_v10, %v5024_v6  ;;  %v11018_v29 = vpack.c.bf16 %v5100_v12, %v5096_v21  ;;  %v11025_v47 = vpop.permute.xlu0 %3411 }
 0x515   : > { %14314 = vst [vmem:[#allocation41_spill] sm:$0xff] %v11004_v61  ;;  %14315 = vst [vmem:[#allocation39_spill] sm:$0xff] %v11006_v2  ;;  %v11020_v48 = vsub.f32 %v3685_v33, %v5096_v21  ;;  %v3950_v28 = vand.u32 4294901760, %v3707_v34  ;;  %v3397_v6 = vsel %vm393_vm7, %v10892_v42, %v10890_v54  ;;  %v6386_v33 = vld [vmem:[%s12742_s3 + $0xe0] sm:$0xff]  ;;  %v14321_v10 = vand.u32 4294901760, %v10976_v49  ;;  %7411 = vmatprep.subr.bf16.mxu1 %v11028_v0 }
 0x516   : > { %14313 = vst [vmem:[#allocation20_spill] sm:$0xff] %v10999_v25  ;;  %14316 = vst [vmem:[#allocation61_spill] sm:$0xff] %v11008_v60  ;;  %v11043_v21 = vsub.f32 %v10988_v24, %v3876_v4  ;;  %v3404_v44 = vmul.f32 %v6387_v15, %v3397_v6  ;;  %v3719_v27 = vmul.f32 %v6454_v52, %v3397_v6  ;;  %v6382_v61 = vld [vmem:[%s12742_s3 + $0xc0] sm:$0xff]  ;;  %v6453_v25 = vld [vmem:[%s12742_s3 + $0x318] sm:$0xff]  ;;  %v14325_v52 = vand.u32 4294901760, %v11008_v60 }
 0x517   : > { %14317 = vst [vmem:[#allocation62_spill] sm:$0xff] %v11016_v51  ;;  %14318 = vst [vmem:[#allocation70_spill] sm:$0xff] %v11018_v29  ;;  %v11040_v12 = vsub.f32 %v10976_v49, %v14321_v10  ;;  %v3398_v24 = vsel %vm393_vm7, %v10929_v58, %v10892_v42  ;;  %v3374_v15 = vsel %vm367_vm6, %v10931_v7, %v10840_v18  ;;  %7413 = vmatpush1.bf16.msra.mxu1 %v11016_v51  ;;  %v11072_v29 = vpop.permute.xlu1 %3437 }
 0x518   : > { %14319 = vst [vmem:[#allocation79_spill] sm:$0xff] %v11020_v48  ;;  %14320 = vst [vmem:[#allocation43_spill] sm:$0xff] %v11028_v0  ;;  %v11069_v6 = vsub.f32 %v11008_v60, %v14325_v52  ;;  %v3880_v10 = vand.u32 4294901760, %v3404_v44  ;;  %v3403_v0 = vmul.f32 %v6386_v33, %v3398_v24  ;;  %v11074_v2 = vpop.permute.xlu0 %3435  ;;  %v3379_v35 = vmul.f32 %v6382_v61, %v3374_v15  ;;  %v6388_v61 = vld [vmem:[%s12742_s3 + $0xf0] sm:$0xff] }
 0x519   : > { %14322 = vst [vmem:[#allocation44_spill] sm:$0xff] %v11040_v12  ;;  %14323 = vst [vmem:[#allocation65_spill] sm:$0xff] %v11043_v21  ;;  %v11055_v12 = vsub.f32 %v3707_v34, %v3950_v28  ;;  %v3954_v34 = vand.u32 4294901760, %v3719_v27  ;;  %v11077_v21 = vmul.f32 %v6457_v37, %v3398_v24  ;;  %v11079_v18 = vmul.f32 %v6453_v25, %v3374_v15  ;;  %v6389_v25 = vld [vmem:[%s12742_s3 + $0xf8] sm:$0xff]  ;;  %v6456_v24 = vld [vmem:[%s12742_s3 + $0x330] sm:$0xff] }
 0x51a   : > { %14326 = vst [vmem:[#allocation85_spill] sm:$0xff] %v11069_v6  ;;  %v11083_v52 = vsub.f32 %v3404_v44, %v3880_v10  ;;  %v3882_v6 = vand.u32 4294901760, %v3403_v0  ;;  %v14330_v33 = vand.u32 4294901760, %v11020_v48  ;;  %v3878_v42 = vand.u32 4294901760, %v3379_v35 }
 0x51b   : > { %14324 = vst [vmem:[#allocation63_spill] sm:$0xff] %v11055_v12  ;;  %v11081_v13 = vpack.c.bf16 %v3954_v34, %v3950_v28  ;;  %v11085_v60 = vsub.f32 %v3719_v27, %v3954_v34  ;;  %v13283_v53 = vand.u32 4294901760, %v11077_v21  ;;  %v6455_v27 = vld [vmem:[%s12742_s3 + $0x328] sm:$0xff]  ;;  %v3395_v15 = vsel %vm393_vm7, %v10983_v57, %v10929_v58 }
 0x51c   : > { %14328 = vst [vmem:[#allocation95_spill] sm:$0xff] %v11083_v52  ;;  %v11090_v51 = vsub.f32 %v11020_v48, %v14330_v33  ;;  %v11101_v44 = vsub.f32 %v3403_v0, %v3882_v6  ;;  %v3396_v34 = vsel %vm393_vm7, %v10890_v54, %v10983_v57  ;;  %v11117_v0 = vpop.permute.xlu1 %3441  ;;  %v11119_v33 = vpop.permute.xlu0 %3417  ;;  %v14333_v28 = vand.u32 4294901760, %v11055_v12  ;;  %vm14410_vm7 = vmmov %vm14401_vm4 }
 0x51d   : > { %14327 = vst [vmem:[#allocation86_spill] sm:$0xff] %v11081_v13  ;;  %14329 = vst [vmem:[#allocation104_spill] sm:$0xff] %v11085_v60  ;;  %v11129_v48 = vsub.f32 %v11077_v21, %v13283_v53  ;;  %v11131_v58 = vpack.c.bf16 %v3882_v6, %v3878_v42  ;;  %v14338_v57 = vand.u32 4294901760, %v11079_v18  ;;  %v3405_v52 = vmul.f32 %v6388_v61, %v3396_v34  ;;  %v6385_v6 = vld [vmem:[%s12742_s3 + $0xd8] sm:$0xff] }
 0x51e   : > { %14331 = vst [vmem:[#allocation68_spill] sm:$0xff] %v11090_v51  ;;  %14332 = vst [vmem:[#allocation87_spill] sm:$0xff] %v11101_v44  ;;  %v11124_v37 = vsub.f32 %v11055_v12, %v14333_v28  ;;  %v11133_v51 = vsub.f32 %v3379_v35, %v3878_v42  ;;  %v13288_v54 = vand.u32 4294901760, %v11101_v44  ;;  %v3406_v17 = vmul.f32 %v6389_v25, %v3395_v15  ;;  %v6384_v35 = vld [vmem:[%s12742_s3 + $0xd0] sm:$0xff] }
 0x51f   : > { %14335 = vst [vmem:[#allocation112_spill] sm:$0xff] %v11129_v48  ;;  %14336 = vst [vmem:[#allocation124_spill] sm:$0xff] %v11131_v58  ;;  %v11139_v13 = vsub.f32 %v11079_v18, %v14338_v57  ;;  %v11142_v12 = vmul.f32 %v6455_v27, %v3396_v34  ;;  %v11144_v53 = vpack.c.bf16 %v3880_v10, %v3876_v4  ;;  %v14341_v42 = vand.u32 4294901760, %v11085_v60  ;;  %v6451_v4 = vld [vmem:[%s12742_s3 + $0x308] sm:$0xff]  ;;  %v6452_v10 = vld [vmem:[%s12742_s3 + $0x310] sm:$0xff] }
 0x520   : > { %14334 = vst [vmem:[#allocation111_spill] sm:$0xff] %v11124_v37  ;;  %14337 = vst [vmem:[#allocation130_spill] sm:$0xff] %v11133_v51  ;;  %v3721_v37 = vmul.f32 %v6456_v24, %v3395_v15  ;;  %v5034_v25 = vand.u32 4294901760, %v3406_v17  ;;  %v5036_v57 = vand.u32 4294901760, %v3405_v52  ;;  %v3371_v27 = vsel %vm367_vm6, %v10985_v3, %v10931_v7  ;;  %v11167_v24 = vpop.permute.xlu1 %3439  ;;  %v11169_v15 = vpop.permute.xlu0 %3415 }
 0x521   : > { %14339 = vst [vmem:[#allocation91_spill] sm:$0xff] %v11139_v13  ;;  %14340 = vst [vmem:[#allocation93_spill] sm:$0xff] %v11144_v53  ;;  %v11155_v61 = vsub.f32 %v11085_v60, %v14341_v42  ;;  %v11174_v34 = vsub.f32 %v11101_v44, %v13288_v54  ;;  %7103 = vmatprep.subr.bf16.mxu0 %v11144_v53  ;;  %v3372_v60 = vsel %vm367_vm6, %v10838_v5, %v10985_v3  ;;  %v6391_v54 = vld [vmem:[%s12742_s3 + $0x108] sm:$0xff] }
 0x522   : > { %v5108_v28 = vand.u32 4294901760, %v3721_v37  ;;  %v11182_v7 = vsub.f32 %v3406_v17, %v5034_v25  ;;  %v11184_v48 = vsub.f32 %v3405_v52, %v5036_v57  ;;  %v3381_v13 = vmul.f32 %v6384_v35, %v3372_v60  ;;  %7105 = vmatpush1.bf16.msra.mxu0 %v11131_v58  ;;  %vm14405_vm6 = vmmov %vm14401_vm4 }
 0x523   : > { %14342 = vst [vmem:[#allocation120_spill] sm:$0xff] %v11155_v61  ;;  %14343 = vst [vmem:[#allocation115_spill] sm:$0xff] %v11174_v34  ;;  %v3382_v61 = vmul.f32 %v6385_v6, %v3371_v27  ;;  %v14346_v42 = vand.u32 4294901760, %v11133_v51  ;;  %v11197_v5 = vmul.f32 %v6451_v4, %v3372_v60  ;;  %v3709_v17 = vmul.f32 %v6452_v10, %v3371_v27  ;;  %v6458_v10 = vld [vmem:[%s12742_s3 + $0x340] sm:$0xff] }
 0x524   : > { %14344 = vst [vmem:[#allocation134_spill] sm:$0xff] %v11182_v7  ;;  %14345 = vst [vmem:[#allocation133_spill] sm:$0xff] %v11184_v48  ;;  %v11195_v44 = vsub.f32 %v3721_v37, %v5108_v28  ;;  %v13299_v3 = vand.u32 4294901760, %v11184_v48  ;;  %v5032_v35 = vand.u32 4294901760, %v3381_v13  ;;  %v3421_v6 = vsel %vm419_vm8, %v11025_v47, %v11023_v16  ;;  %v11204_v58 = vpop.permute.xlu1 %3461  ;;  %v11206_v7 = vpop.permute.xlu0 %3459 }
 0x525   : > { %v11193_v53 = vsub.f32 %v11133_v51, %v14346_v42  ;;  %v5030_v52 = vand.u32 4294901760, %v3382_v61  ;;  %v14349_v42 = vand.u32 4294901760, %v11142_v12  ;;  %v5104_v4 = vand.u32 4294901760, %v3709_v17 }
 0x526   : > { %14348 = vst [vmem:[#allocation4_spill] sm:$0xff] %v11195_v44  ;;  %v13302_v60 = vand.u32 4294901760, %v11195_v44  ;;  %v3428_v27 = vmul.f32 %v6391_v54, %v3421_v6  ;;  %v11220_v51 = vsub.f32 %v11184_v48, %v13299_v3  ;;  %v11225_v56 = vsub.f32 %v3381_v13, %v5032_v35  ;;  %v6395_v3 = vld [vmem:[%s12742_s3 + $0x128] sm:$0xff] }
 0x527   : > { %14347 = vst [vmem:[#allocation144_spill] sm:$0xff] %v11193_v53  ;;  %v11211_v37 = vsub.f32 %v11142_v12, %v14349_v42  ;;  %v11223_v53 = vsub.f32 %v3382_v61, %v5030_v52  ;;  %v11234_v23 = vpack.c.bf16 %v5108_v28, %v5104_v4  ;;  %v11236_v54 = vsub.f32 %v3709_v17, %v5104_v4  ;;  %v6390_v28 = vld [vmem:[%s12742_s3 + $0x100] sm:$0xff] }
 0x528   : > { %14351 = vst [vmem:[#allocation122_spill] sm:$0xff] %v11220_v51  ;;  %14353 = vst [vmem:[#allocation136_spill] sm:$0xff] %v11225_v56  ;;  %v11230_v42 = vsub.f32 %v11195_v44, %v13302_v60  ;;  %v3731_v34 = vmul.f32 %v6458_v10, %v3421_v6  ;;  %v3884_v13 = vand.u32 4294901760, %v3428_v27  ;;  %v11242_v48 = vpack.c.bf16 %v5034_v25, %v5030_v52  ;;  %v6394_v60 = vld [vmem:[%s12742_s3 + $0x120] sm:$0xff]  ;;  %v11253_v17 = vpop.permute.xlu1 %3485 }
 0x529   : > { %14350 = vst [vmem:[#allocation116_spill] sm:$0xff] %v11211_v37  ;;  %14352 = vst [vmem:[#allocation138_spill] sm:$0xff] %v11223_v53  ;;  %v11232_v37 = vpack.c.bf16 %v5036_v57, %v5032_v35  ;;  %v6461_v57 = vld [vmem:[%s12742_s3 + $0x358] sm:$0xff]  ;;  %v11255_v35 = vpop.permute.xlu0 %3483  ;;  %v3445_v25 = vsel %vm445_vm9, %v11074_v2, %v11072_v29  ;;  %v3446_v52 = vsel %vm445_vm9, %v11117_v0, %v11074_v2  ;;  %v14359_v10 = vand.u32 4294901760, %v11197_v5  ;;  %v6396_v2 = vld [vmem:[%s12742_s3 + $0x130] sm:$0xff] }
 0x52a   : > { %14354 = vst [vmem:[#allocation149_spill] sm:$0xff] %v11230_v42  ;;  %14356 = vst [vmem:[#allocation153_spill] sm:$0xff] %v11234_v23  ;;  %v3422_v4 = vsel %vm419_vm8, %v11119_v33, %v11025_v47  ;;  %v11275_v6 = vand.u32 4294901760, %v3731_v34  ;;  %v11277_v44 = vsub.f32 %v3428_v27, %v3884_v13  ;;  %7415 = vmatprep.subr.bf16.mxu1 %v11242_v48  ;;  %v14363_v51 = vand.u32 4294901760, %v11225_v56  ;;  %v6397_v27 = vld [vmem:[%s12742_s3 + $0x138] sm:$0xff] }
 0x52b   : > { %14355 = vst [vmem:[#allocation6_spill] sm:$0xff] %v11232_v37  ;;  %14357 = vst [vmem:[#allocation154_spill] sm:$0xff] %v11236_v54  ;;  %v11273_v61 = vsub.f32 %v11197_v5, %v14359_v10  ;;  %v3452_v42 = vmul.f32 %v6395_v3, %v3445_v25  ;;  %7417 = vmatpush1.bf16.msra.mxu1 %v11232_v37  ;;  %v3451_v10 = vmul.f32 %v6394_v60, %v3446_v52 }
 0x52c   : > { %14358 = vst [vmem:[#allocation143_spill] sm:$0xff] %v11242_v48  ;;  %14361 = vst [vmem:[#allocation152_spill] sm:$0xff] %v11275_v6  ;;  %v11286_v47 = vsub.f32 %v11225_v56, %v14363_v51  ;;  %v3734_v53 = vmul.f32 %v6461_v57, %v3422_v4  ;;  %v11293_v3 = vsub.f32 %v3731_v34, %v11275_v6  ;;  %v11303_v60 = vpop.permute.xlu1 %3489  ;;  %v14366_v57 = vand.u32 4294901760, %v11236_v54 }
 0x52d   : > { %14360 = vst [vmem:[#allocation142_spill] sm:$0xff] %v11273_v61  ;;  %14362 = vst [vmem:[#allocation23_spill] sm:$0xff] %v11277_v44  ;;  %v3427_v61 = vmul.f32 %v6390_v28, %v3422_v4  ;;  %v3888_v25 = vand.u32 4294901760, %v3452_v42  ;;  %v3443_v48 = vsel %vm445_vm9, %v11167_v24, %v11117_v0  ;;  %v3444_v51 = vsel %vm445_vm9, %v11072_v29, %v11167_v24  ;;  %v11305_v28 = vpop.permute.xlu0 %3465  ;;  %v6392_v29 = vld [vmem:[%s12742_s3 + $0x110] sm:$0xff]  ;;  %v6393_v24 = vld [vmem:[%s12742_s3 + $0x118] sm:$0xff] }
 0x52e   : > { %14364 = vst [vmem:[#allocation27_spill] sm:$0xff] %v11286_v47  ;;  %14365 = vst [vmem:[#allocation166_spill] sm:$0xff] %v11293_v3  ;;  %v11310_v34 = vsub.f32 %v11236_v54, %v14366_v57  ;;  %v3890_v52 = vand.u32 4294901760, %v3451_v10  ;;  %v3453_v37 = vmul.f32 %v6396_v2, %v3444_v51  ;;  %v11314_v0 = vand.u32 4294901760, %v3734_v53 }
 0x52f   : > { %v3886_v4 = vand.u32 4294901760, %v3427_v61  ;;  %v11312_v56 = vsub.f32 %v3452_v42, %v3888_v25  ;;  %v3454_v47 = vmul.f32 %v6397_v27, %v3443_v48  ;;  %v11316_v23 = vpack.c.bf16 %v3888_v25, %v3884_v13  ;;  %v6459_v48 = vld [vmem:[%s12742_s3 + $0x348] sm:$0xff]  ;;  %v6460_v13 = vld [vmem:[%s12742_s3 + $0x350] sm:$0xff] }
 0x530   : > { %14367 = vst [vmem:[#allocation165_spill] sm:$0xff] %v11310_v34  ;;  %14369 = vst [vmem:[#allocation25_spill] sm:$0xff] %v11314_v0  ;;  %v11325_v54 = vsub.f32 %v3451_v10, %v3890_v52  ;;  %v5044_v25 = vand.u32 4294901760, %v3453_v37  ;;  %v3419_v10 = vsel %vm419_vm8, %v11169_v15, %v11119_v33  ;;  %v3488_v51 = vpop.permute.xlu1 %3487 }
 0x531   : > { %14368 = vst [vmem:[#allocation24_spill] sm:$0xff] %v11312_v56  ;;  %14370 = vst [vmem:[#allocation47_spill] sm:$0xff] %v11316_v23  ;;  %v11327_v2 = vpack.c.bf16 %v3890_v52, %v3886_v4  ;;  %v11329_v42 = vsub.f32 %v3427_v61, %v3886_v4  ;;  %v5042_v27 = vand.u32 4294901760, %v3454_v47  ;;  %7107 = vmatprep.subr.bf16.mxu0 %v11316_v23  ;;  %v3464_v52 = vpop.permute.xlu0 %3463 }
 0x532   : > { %14371 = vst [vmem:[#allocation51_spill] sm:$0xff] %v11325_v54  ;;  %v3420_v61 = vsel %vm419_vm8, %v11023_v16, %v11169_v15  ;;  %v13322_v4 = vand.u32 4294901760, %v11325_v54  ;;  %v3430_v3 = vmul.f32 %v6393_v24, %v3419_v10  ;;  %v11351_v56 = vsub.f32 %v3453_v37, %v5044_v25  ;;  %v6399_v16 = vld [vmem:[%s12742_s3 + $0x148] sm:$0xff] }
 0x533   : > { %14372 = vst [vmem:[#allocation28_spill] sm:$0xff] %v11327_v2  ;;  %14373 = vst [vmem:[#allocation29_spill] sm:$0xff] %v11329_v42  ;;  %v3429_v34 = vmul.f32 %v6392_v29, %v3420_v61  ;;  %7109 = vmatpush1.bf16.msra.mxu0 %v11327_v2  ;;  %v11349_v23 = vsub.f32 %v3454_v47, %v5042_v27  ;;  %v3732_v33 = vmul.f32 %v6459_v48, %v3420_v61 }
 0x534   : > { %14375 = vst [vmem:[#allocation125_spill] sm:$0xff] %v11351_v56  ;;  %v3733_v44 = vmul.f32 %v6460_v13, %v3419_v10  ;;  %v11359_v15 = vsub.f32 %v11325_v54, %v13322_v4  ;;  %v11362_v29 = vsub.f32 %v3734_v53, %v11314_v0  ;;  %v5038_v24 = vand.u32 4294901760, %v3430_v3  ;;  %v11373_v10 = vpop.permute.xlu1 %3509  ;;  %v6403_v54 = vld [vmem:[%s12742_s3 + $0x168] sm:$0xff] }
 0x535   : > { %14374 = vst [vmem:[#allocation30_spill] sm:$0xff] %v11349_v23  ;;  %v5040_v57 = vand.u32 4294901760, %v3429_v34  ;;  %v11365_v37 = vand.u32 4294901760, %v3732_v33  ;;  %v3469_v13 = vsel %vm471_vm11, %v11206_v7, %v11204_v58  ;;  %v11375_v61 = vpop.permute.xlu0 %3507  ;;  %v14383_v23 = vand.u32 4294901760, %v11329_v42 }
 0x536   : > { %14376 = vst [vmem:[#allocation35_spill] sm:$0xff] %v11359_v15  ;;  %14377 = vst [vmem:[#allocation135_spill] sm:$0xff] %v11362_v29  ;;  %v11367_v48 = vand.u32 4294901760, %v3733_v44  ;;  %v11379_v53 = vsub.f32 %v3430_v3, %v5038_v24  ;;  %v3476_v47 = vmul.f32 %v6399_v16, %v3469_v13  ;;  %v6402_v29 = vld [vmem:[%s12742_s3 + $0x160] sm:$0xff] }
 0x537   : > { %14378 = vst [vmem:[#allocation145_spill] sm:$0xff] %v11365_v37  ;;  %v11377_v4 = vpack.c.bf16 %v5044_v25, %v5040_v57  ;;  %v11381_v2 = vsub.f32 %v3429_v34, %v5040_v57  ;;  %v11392_v15 = vsub.f32 %v11329_v42, %v14383_v23  ;;  %v14384_v25 = vand.u32 4294901760, %v11351_v56  ;;  %v6398_v16 = vld [vmem:[%s12742_s3 + $0x140] sm:$0xff] }
 0x538   : > { %14379 = vst [vmem:[#allocation121_spill] sm:$0xff] %v11367_v48  ;;  %14381 = vst [vmem:[#allocation150_spill] sm:$0xff] %v11379_v53  ;;  %v11400_v34 = vsub.f32 %v3732_v33, %v11365_v37  ;;  %v11402_v57 = vpack.c.bf16 %v5042_v27, %v5038_v24  ;;  %v3892_v53 = vand.u32 4294901760, %v3476_v47  ;;  %v3493_v23 = vsel %vm14388_vm0, %v11255_v35, %v11253_v17  ;;  %v6405_v27 = vld [vmem:[%s12742_s3 + $0x178] sm:$0xff]  ;;  %v3512_v42 = vpop.permute.xlu1 %3511 }
 0x539   : > { %14380 = vst [vmem:[#allocation140_spill] sm:$0xff] %v11377_v4  ;;  %14382 = vst [vmem:[#allocation155_spill] sm:$0xff] %v11381_v2  ;;  %v11397_v3 = vsub.f32 %v11351_v56, %v14384_v25  ;;  %v3494_v33 = vsel %vm14389_vm1, %v11303_v60, %v11255_v35  ;;  %v11420_v24 = vsub.f32 %v3733_v44, %v11367_v48  ;;  %v6404_v35 = vld [vmem:[%s12742_s3 + $0x170] sm:$0xff] }
 0x53a   : > { %14386 = vst [vmem:[#allocation148_spill] sm:$0xff] %v11400_v34  ;;  %14387 = vst [vmem:[#allocation158_spill] sm:$0xff] %v11402_v57  ;;  %7419 = vmatprep.subr.bf16.mxu1 %v11402_v57  ;;  %v3500_v25 = vmul.f32 %v6403_v54, %v3493_v23  ;;  %v3499_v13 = vmul.f32 %v6402_v29, %v3494_v33  ;;  %v3470_v56 = vsel %vm471_vm11, %v11305_v28, %v11206_v7  ;;  %v3514_v34 = vpop.permute.xlu0 %3513 }
 0x53b   : > { %14385 = vst [vmem:[#allocation141_spill] sm:$0xff] %v11397_v3  ;;  %14390 = vst [vmem:[#allocation169_spill] sm:$0xff] %v11420_v24  ;;  %v14391_v3 = vand.u32 4294901760, %v11381_v2  ;;  %v11435_v24 = vsub.f32 %v3476_v47, %v3892_v53  ;;  %7421 = vmatpush1.bf16.msra.mxu1 %v11377_v4  ;;  %v3475_v54 = vmul.f32 %v6398_v16, %v3470_v56  ;;  %v6401_v56 = vld [vmem:[%s12742_s3 + $0x158] sm:$0xff] }
 0x53c   : > { %v3491_v7 = vsel %vm14393_vm2, %v3488_v51, %v11303_v60  ;;  %v3896_v29 = vand.u32 4294901760, %v3500_v25  ;;  %v3898_v23 = vand.u32 4294901760, %v3499_v13  ;;  %v3492_v33 = vsel %vm14394_vm3, %v11253_v17, %v3488_v51 }
 0x53d   : > { %v11433_v44 = vsub.f32 %v11381_v2, %v14391_v3  ;;  %v3502_v57 = vmul.f32 %v6405_v27, %v3491_v7  ;;  %v6400_v3 = vld [vmem:[%s12742_s3 + $0x150] sm:$0xff]  ;;  %v3894_v47 = vand.u32 4294901760, %v3475_v54  ;;  %v3501_v2 = vmul.f32 %v6404_v35, %v3492_v33  ;;  %v6407_v35 = vld [vmem:[%s12742_s3 + $0x188] sm:$0xff]  ;;  %v11465_v33 = vpop.permute.xlu1 %3539 }
 0x53e   : > { %v3467_v60 = vsel %vm471_vm11, %v3464_v52, %v11305_v28  ;;  %v3468_v16 = vsel %vm471_vm11, %v11204_v58, %v3464_v52  ;;  %v11456_v17 = vsub.f32 %v3500_v25, %v3896_v29  ;;  %v11458_v51 = vsub.f32 %v3499_v13, %v3898_v23  ;;  %v11467_v4 = vpop.permute.xlu0 %3537 }
 0x53f   : > { %14392 = vst [vmem:[#allocation151_spill] sm:$0xff] %v11433_v44  ;;  %v5050_v27 = vand.u32 4294901760, %v3502_v57  ;;  %v11460_v7 = vpack.c.bf16 %v3896_v29, %v3892_v53  ;;  %v11469_v28 = vpack.c.bf16 %v3898_v23, %v3894_v47  ;;  %v11471_v44 = vsub.f32 %v3475_v54, %v3894_v47 }
 0x540   : > { %14395 = vst [vmem:[#allocation163_spill] sm:$0xff] %v11456_v17  ;;  %14396 = vst [vmem:[#allocation172_spill] sm:$0xff] %v11458_v51  ;;  %v5052_v58 = vand.u32 4294901760, %v3501_v2  ;;  %v3477_v52 = vmul.f32 %v6400_v3, %v3468_v16  ;;  %v13346_v13 = vand.u32 4294901760, %v11458_v51  ;;  %v3478_v53 = vmul.f32 %v6401_v56, %v3467_v60 }
 0x541   : > { %14397 = vst [vmem:[#allocation22_spill] sm:$0xff] %v11460_v7  ;;  %14398 = vst [vmem:[#allocation164_spill] sm:$0xff] %v11469_v28  ;;  %v11474_v25 = vsub.f32 %v3502_v57, %v5050_v27  ;;  %7111 = vmatprep.subr.bf16.mxu0 %v11460_v7  ;;  %v3517_v29 = vsel %vm14401_vm4, %v11375_v61, %v11373_v10  ;;  %v13353_v48 = vand.u32 4294901760, %v11471_v44  ;;  %v6408_v57 = vld [vmem:[%s12742_s3 + $0x190] sm:$0xff] }
 0x542   : > { %14399 = vst [vmem:[#allocation178_spill] sm:$0xff] %v11471_v44  ;;  %v11482_v23 = vsub.f32 %v3501_v2, %v5052_v58  ;;  %v5048_v54 = vand.u32 4294901760, %v3477_v52  ;;  %7113 = vmatpush1.bf16.msra.mxu0 %v11469_v28  ;;  %v3524_v3 = vmul.f32 %v6407_v35, %v3517_v29  ;;  %v11491_v47 = vsub.f32 %v11458_v51, %v13346_v13  ;;  %v6409_v2 = vld [vmem:[%s12742_s3 + $0x198] sm:$0xff]  ;;  %v3564_v35 = vpop.permute.xlu1 %3563  ;;  %v3562_v29 = vpop.permute.xlu0 %3561 }
 0x543   : > { %14400 = vst [vmem:[#allocation10_spill] sm:$0xff] %v11474_v25  ;;  %v5046_v56 = vand.u32 4294901760, %v3478_v53  ;;  %v3516_v60 = vsel %vm14404_vm5, %v11373_v10, %v3512_v42  ;;  %v3515_v16 = vsel %vm14405_vm6, %v3512_v42, %v3514_v34  ;;  %v11504_v28 = vsub.f32 %v11471_v44, %v13353_v48  ;;  %v6406_v10 = vld [vmem:[%s12742_s3 + $0x180] sm:$0xff] }
 0x544   : > { %14402 = vst [vmem:[#allocation46_spill] sm:$0xff] %v11482_v23  ;;  %14403 = vst [vmem:[#allocation176_spill] sm:$0xff] %v11491_v47  ;;  %v13356_v13 = vand.u32 4294901760, %v11482_v23  ;;  %v11507_v7 = vpack.c.bf16 %v5052_v58, %v5048_v54  ;;  %v11509_v51 = vsub.f32 %v3477_v52, %v5048_v54  ;;  %v3900_v42 = vand.u32 4294901760, %v3524_v3 }
 0x545   : > { %v11514_v25 = vsub.f32 %v3478_v53, %v5046_v56  ;;  %v3525_v47 = vmul.f32 %v6408_v57, %v3516_v60  ;;  %v11516_v17 = vpack.c.bf16 %v5050_v27, %v5046_v56  ;;  %v3518_v52 = vsel %vm14410_vm7, %v3514_v34, %v11375_v61  ;;  %v6411_v53 = vld [vmem:[%s12742_s3 + $0x1c8] sm:$0xff] }
 0x546   : > { %14406 = vst [vmem:[#allocation26_spill] sm:$0xff] %v11507_v7  ;;  %14407 = vst [vmem:[#allocation33_spill] sm:$0xff] %v11509_v51  ;;  %v11521_v48 = vsub.f32 %v11482_v23, %v13356_v13  ;;  %v13357_v58 = vand.u32 4294901760, %v11509_v51  ;;  %v3526_v54 = vmul.f32 %v6409_v2, %v3515_v16  ;;  %v11530_v44 = vsub.f32 %v3524_v3, %v3900_v42  ;;  %v6415_v13 = vld [vmem:[%s12742_s3 + $0x1e8] sm:$0xff]  ;;  %v3560_v61 = vpop.permute.xlu1 %3559  ;;  %v3536_v34 = vpop.permute.xlu0 %3535 }
 0x547   : > { %14408 = vst [vmem:[#allocation71_spill] sm:$0xff] %v11516_v17  ;;  %v5056_v27 = vand.u32 4294901760, %v3525_v47  ;;  %7423 = vmatprep.subr.bf16.mxu1 %v11516_v17  ;;  %v3523_v57 = vmul.f32 %v6406_v10, %v3518_v52  ;;  %v14412_v56 = vand.u32 4294901760, %v10186_v14  ;;  %v3544_v14 = vsel %vm553_vm14, %v11467_v4, %v11465_v33 }
 0x548   : > { %14409 = vst [vmem:[#allocation34_spill] sm:$0xff] %v11521_v48  ;;  %14411 = vst [vmem:[#allocation50_spill] sm:$0xff] %v11530_v44  ;;  %v11543_v2 = vsub.f32 %v11509_v51, %v13357_v58  ;;  %v5054_v3 = vand.u32 4294901760, %v3526_v54  ;;  %7425 = vmatpush1.bf16.msra.mxu1 %v11507_v7  ;;  %v3568_v16 = vsel %vm579_vm15, %v3562_v29, %v3564_v35  ;;  %v14415_v10 = vand.u32 4294901760, %v10202_v8  ;;  %v6414_v7 = vld [vmem:[%s12742_s3 + $0x1e0] sm:$0xff] }
 0x549   : > { %v11535_v60 = vpack.c.bf16 %v14412_v56, %v3900_v42  ;;  %v11556_v52 = vsub.f32 %v3525_v47, %v5056_v27  ;;  %v3902_v56 = vand.u32 4294901760, %v3523_v57  ;;  %v3552_v58 = vmul.f32 %v6411_v53, %v3544_v14  ;;  %v6410_v47 = vld [vmem:[%s12742_s3 + $0x1c0] sm:$0xff] }
 0x54a   : > { %14414 = vst [vmem:[#allocation96_spill] sm:$0xff] %v11543_v2  ;;  %v11554_v42 = vpack.c.bf16 %v14415_v10, %v5056_v27  ;;  %v11562_v17 = vsub.f32 %v3526_v54, %v5054_v3  ;;  %v14419_v23 = vand.u32 4294901760, %v10196_v55  ;;  %v3576_v48 = vmul.f32 %v6415_v13, %v3568_v16  ;;  %v6416_v55 = vld [vmem:[%s12742_s3 + $0x1f0] sm:$0xff]  ;;  %v3566_v13 = vpop.permute.xlu1 %3565 }
 0x54b   : > { %14413 = vst [vmem:[#allocation56_spill] sm:$0xff] %v11535_v60  ;;  %14417 = vst [vmem:[#allocation75_spill] sm:$0xff] %v11556_v52  ;;  %7115 = vmatprep.subr.bf16.mxu0 %v11535_v60  ;;  %v3569_v8 = vsel %vm579_vm15, %v3560_v61, %v3562_v29  ;;  %v13368_v53 = vand.u32 4294901760, %v11556_v52  ;;  %v14421_v27 = vand.u32 4294901760, %v10184_v46  ;;  %v11578_v54 = vsub.f32 %v3523_v57, %v3902_v56  ;;  %v6417_v46 = vld [vmem:[%s12742_s3 + $0x1f8] sm:$0xff] }
 0x54c   : > { %14416 = vst [vmem:[#allocation57_spill] sm:$0xff] %v11554_v42  ;;  %14418 = vst [vmem:[#allocation80_spill] sm:$0xff] %v11562_v17  ;;  %v11566_v51 = vpack.c.bf16 %v14419_v23, %v5054_v3  ;;  %v3908_v10 = vand.u32 4294901760, %v3552_v58  ;;  %v3542_v23 = vpop.permute.xlu0 %3541  ;;  %v3912_v29 = vand.u32 4294901760, %v3576_v48  ;;  %v3575_v3 = vmul.f32 %v6414_v7, %v3569_v8  ;;  %v6412_v7 = vld [vmem:[%s12742_s3 + $0x1d0] sm:$0xff] }
 0x54d   : > { %v11576_v14 = vpack.c.bf16 %v14421_v27, %v3902_v56  ;;  %14423 = vst [vmem:[#allocation102_spill] sm:$0xff] %v11578_v54  ;;  %v3545_v16 = vsel %vm553_vm14, %v3536_v34, %v11467_v4  ;;  %v3567_v57 = vsel %vm579_vm15, %v3564_v35, %v3566_v13  ;;  %v11595_v56 = vsub.f32 %v11556_v52, %v13368_v53 }
 0x54e   : > { %14420 = vst [vmem:[#allocation113_spill] sm:$0xff] %v11566_v51  ;;  %7427 = vmatprep.subr.bf16.mxu1 %v11566_v51  ;;  %v13377_v27 = vand.u32 4294901760, %v11578_v54  ;;  %v11598_v51 = vsub.f32 %v3552_v58, %v3908_v10  ;;  %v3551_v4 = vmul.f32 %v6410_v47, %v3545_v16  ;;  %v11605_v8 = vsub.f32 %v3576_v48, %v3912_v29  ;;  %v6413_v58 = vld [vmem:[%s12742_s3 + $0x1d8] sm:$0xff] }
 0x54f   : > { %14422 = vst [vmem:[#allocation81_spill] sm:$0xff] %v11576_v14  ;;  %14424 = vst [vmem:[#allocation92_spill] sm:$0xff] %v11595_v56  ;;  %7117 = vmatpush1.bf16.msra.mxu0 %v11576_v14  ;;  %7429 = vmatpush1.bf16.msra.mxu1 %v11554_v42  ;;  %v3914_v35 = vand.u32 4294901760, %v3575_v3  ;;  %v3570_v53 = vsel %vm579_vm15, %v3566_v13, %v3560_v61  ;;  %v3577_v60 = vmul.f32 %v6416_v55, %v3567_v57  ;;  %v11620_v14 = vpop.permute.xlu1 %3587 }
 0x550   : > { %v11615_v42 = vsub.f32 %v11578_v54, %v13377_v27  ;;  %v3910_v47 = vand.u32 4294901760, %v3551_v4  ;;  %v3578_v16 = vmul.f32 %v6417_v46, %v3570_v53  ;;  %v3543_v48 = vsel %vm553_vm14, %v11465_v33, %v3542_v23  ;;  %v3586_v57 = vpop.permute.xlu0 %3585 }
 0x551   : > { %v11622_v52 = vsub.f32 %v3575_v3, %v3914_v35  ;;  %v5068_v61 = vand.u32 4294901760, %v3577_v60  ;;  %v3546_v55 = vsel %vm553_vm14, %v3542_v23, %v3536_v34  ;;  %v3553_v13 = vmul.f32 %v6412_v7, %v3543_v48  ;;  %v6419_v3 = vld [vmem:[%s12742_s3 + $0x208] sm:$0xff] }
 0x552   : > { %v11626_v56 = vpack.c.bf16 %v3914_v35, %v3910_v47  ;;  %v11628_v27 = vsub.f32 %v3551_v4, %v3910_v47  ;;  %v5066_v54 = vand.u32 4294901760, %v3578_v16  ;;  %v3554_v53 = vmul.f32 %v6413_v58, %v3546_v55  ;;  %v6423_v47 = vld [vmem:[%s12742_s3 + $0x228] sm:$0xff] }
 0x553   : > { %14425 = vst [vmem:[#allocation126_spill] sm:$0xff] %v11622_v52  ;;  %v13381_v46 = vand.u32 4294901760, %v11622_v52  ;;  %v11631_v17 = vsub.f32 %v3577_v60, %v5068_v61  ;;  %v5064_v33 = vand.u32 4294901760, %v3553_v13  ;;  %v11633_v2 = vpack.c.bf16 %v3912_v29, %v3908_v10  ;;  %v3612_v35 = vpop.permute.xlu1 %3611 }
 0x554   : > { %14426 = vst [vmem:[#allocation108_spill] sm:$0xff] %v11626_v56  ;;  %14427 = vst [vmem:[#allocation114_spill] sm:$0xff] %v11628_v27  ;;  %v13384_v34 = vand.u32 4294901760, %v11628_v27  ;;  %v11639_v23 = vsub.f32 %v3578_v16, %v5066_v54  ;;  %v5062_v7 = vand.u32 4294901760, %v3554_v53  ;;  %v3592_v4 = vsel %vm605_vm13, %v3586_v57, %v11620_v14  ;;  %v3610_v16 = vpop.permute.xlu0 %3609 }
 0x555   : > { %14428 = vst [vmem:[#allocation3_spill] sm:$0xff] %v11631_v17  ;;  %14429 = vst [vmem:[#allocation179_spill] sm:$0xff] %v11633_v2  ;;  %v11647_v60 = vsub.f32 %v11622_v52, %v13381_v46  ;;  %v13387_v10 = vand.u32 4294901760, %v11631_v17  ;;  %v11650_v29 = vpack.c.bf16 %v5068_v61, %v5064_v33  ;;  %v11652_v58 = vsub.f32 %v3553_v13, %v5064_v33 }
 0x556   : > { %14430 = vst [vmem:[#allocation180_spill] sm:$0xff] %v11639_v23  ;;  %7119 = vmatprep.subr.bf16.mxu0 %v11633_v2  ;;  %v11661_v48 = vsub.f32 %v11628_v27, %v13384_v34  ;;  %v11663_v55 = vsub.f32 %v3554_v53, %v5062_v7  ;;  %v3600_v46 = vmul.f32 %v6419_v3, %v3592_v4  ;;  %v14436_v34 = vand.u32 4294901760, %v10526_v30 }
 0x557   : > { %14431 = vst [vmem:[#allocation181_spill] sm:$0xff] %v11650_v29  ;;  %14432 = vst [vmem:[#allocation182_spill] sm:$0xff] %v11652_v58  ;;  %7121 = vmatpush1.bf16.msra.mxu0 %v11626_v56  ;;  %v11666_v61 = vpack.c.bf16 %v5066_v54, %v5062_v7  ;;  %v11671_v13 = vsub.f32 %v11631_v17, %v13387_v10  ;;  %v3616_v2 = vsel %vm631_vm12, %v3610_v16, %v3612_v35  ;;  %v6422_v7 = vld [vmem:[%s12742_s3 + $0x220] sm:$0xff] }
 0x558   : > { %14433 = vst [vmem:[#allocation183_spill] sm:$0xff] %v11663_v55  ;;  %v14437_v53 = vand.u32 4294901760, %v10481_v45  ;;  %v3916_v3 = vand.u32 4294901760, %v3600_v46  ;;  %v3624_v54 = vmul.f32 %v6423_v47, %v3616_v2  ;;  %v14439_v4 = vand.u32 4294901760, %v10751_v41  ;;  %v3608_v47 = vpop.permute.xlu1 %3607 }
 0x559   : > { %14434 = vst [vmem:[#allocation184_spill] sm:$0xff] %v11666_v61  ;;  %14435 = vst [vmem:[#allocation185_spill] sm:$0xff] %v11671_v13  ;;  %7431 = vmatprep.subr.bf16.mxu1 %v11666_v61  ;;  %v14440_v10 = vand.u32 4294901760, %v10686_v43  ;;  %v14442_v30 = vand.u32 4294901760, %v10425_v22  ;;  %v14443_v45 = vand.u32 4294901760, %v10423_v19  ;;  %v6418_v43 = vld [vmem:[%s12742_s3 + $0x200] sm:$0xff] }
 0x55a   : > { %v11680_v52 = vpack.c.bf16 %v14437_v53, %v14436_v34  ;;  %v14445_v53 = vand.u32 4294901760, %v11652_v58  ;;  %7433 = vmatpush1.bf16.msra.mxu1 %v11650_v29  ;;  %v14446_v41 = vand.u32 4294901760, %v10976_v49  ;;  %v14447_v22 = vand.u32 4294901760, %v10906_v26  ;;  %v3584_v49 = vpop.permute.xlu0 %3583 }
 0x55b   : > { %v11690_v33 = vpack.c.bf16 %v14440_v10, %v14439_v4  ;;  %v11696_v34 = vpack.c.bf16 %v14443_v45, %v14442_v30  ;;  %v14449_v19 = vand.u32 4294901760, %v10651_v62  ;;  %v14450_v4 = vand.u32 4294901760, %v10620_v11 }
 0x55c   : > { %14438 = vst [vmem:[#allocation186_spill] sm:$0xff] %v11680_v52  ;;  %v11701_v2 = vsub.f32 %v11652_v58, %v14445_v53  ;;  %v11711_v10 = vpack.c.bf16 %v14447_v22, %v14446_v41  ;;  %v14452_v45 = vand.u32 4294901760, %v11197_v5  ;;  %v14453_v53 = vand.u32 4294901760, %v11142_v12  ;;  %v3739_v5 = vld [vmem:[%s12741_s2] sm:$0xff] }
 0x55d   : > { %14441 = vst [vmem:[#allocation187_spill] sm:$0xff] %v11690_v33  ;;  %14444 = vst [vmem:[#allocation188_spill] sm:$0xff] %v11696_v34  ;;  %v11717_v30 = vpack.c.bf16 %v14450_v4, %v14449_v19  ;;  %v11725_v61 = vsub.f32 %v3600_v46, %v3916_v3  ;;  %v3920_v56 = vand.u32 4294901760, %v3624_v54  ;;  %v3617_v26 = vsel %vm631_vm12, %v3608_v47, %v3610_v16 }
 0x55e   : > { %14448 = vst [vmem:[#allocation189_spill] sm:$0xff] %v11711_v10  ;;  %v11723_v29 = vpack.c.bf16 %v14453_v53, %v14452_v45  ;;  %v14455_v41 = vand.u32 4294901760, %v10870_v63  ;;  %v14456_v62 = vand.u32 4294901760, %v10849_v1  ;;  %v3623_v12 = vmul.f32 %v6422_v7, %v3617_v26  ;;  %v6424_v7 = vld [vmem:[%s12742_s3 + $0x230] sm:$0xff]  ;;  %v3614_v53 = vpop.permute.xlu1 %3613 }
 0x55f   : > { %14451 = vst [vmem:[#allocation190_spill] sm:$0xff] %v11717_v30  ;;  %v3593_v46 = vsel %vm605_vm13, %v3584_v49, %v3586_v57  ;;  %v14458_v22 = vand.u32 4294901760, %v11079_v18  ;;  %v14459_v19 = vand.u32 4294901760, %v11077_v21  ;;  %v11748_v63 = vsub.f32 %v10353_v40, %v10382_v36  ;;  %v6425_v57 = vld [vmem:[%s12742_s3 + $0x238] sm:$0xff]  ;;  %v6420_v40 = vld [vmem:[%s12742_s3 + $0x210] sm:$0xff] }
 0x560   : > { %14454 = vst [vmem:[#allocation191_spill] sm:$0xff] %v11723_v29  ;;  %v11733_v11 = vpack.c.bf16 %v14456_v62, %v14455_v41  ;;  %v11750_v1 = vsub.f32 %v3624_v54, %v3920_v56  ;;  %v3599_v4 = vmul.f32 %v6418_v43, %v3593_v46  ;;  %v11758_v18 = vpack.c.bf16 %v3920_v56, %v3916_v3  ;;  %v6421_v62 = vld [vmem:[%s12742_s3 + $0x218] sm:$0xff]  ;;  %v3590_v46 = vpop.permute.xlu0 %3589 }
 0x561   : > { %v11744_v16 = vpack.c.bf16 %v14459_v19, %v14458_v22  ;;  %14461 = vst [vmem:[#allocation194_spill] sm:$0xff] %v11748_v63  ;;  %v13402_v21 = vand.u32 4294901760, %v10375_v39  ;;  %v3922_v45 = vand.u32 4294901760, %v3623_v12  ;;  %v11765_v54 = vand.u32 4294901760, %v11748_v63 }
 0x562   : > { %14457 = vst [vmem:[#allocation192_spill] sm:$0xff] %v11733_v11  ;;  %14462 = vst [vmem:[#allocation195_spill] sm:$0xff] %v11758_v18  ;;  %v11768_v26 = vand.u32 4294901760, %v3739_v5  ;;  %v3918_v41 = vand.u32 4294901760, %v3599_v4  ;;  %v3615_v56 = vsel %vm631_vm12, %v3612_v35, %v3614_v53  ;;  %v3618_v3 = vsel %vm631_vm12, %v3614_v53, %v3608_v47  ;;  %7123 = vmatprep.subr.bf16.mxu0 %v11758_v18 }
 0x563   : > { %14460 = vst [vmem:[#allocation193_spill] sm:$0xff] %v11744_v16  ;;  %14463 = vst [vmem:[#allocation196_spill] sm:$0xff] %v11765_v54  ;;  %v3990_v22 = vsub.f32 %v10375_v39, %v13402_v21  ;;  %v11781_v19 = vsub.f32 %v3623_v12, %v3922_v45  ;;  %v3625_v43 = vmul.f32 %v6424_v7, %v3615_v56 }
 0x564   : > { %14464 = vst [vmem:[#allocation197_spill] sm:$0xff] %v11768_v26  ;;  %v3626_v17 = vmul.f32 %v6425_v57, %v3618_v3  ;;  %v3591_v35 = vsel %vm605_vm13, %v11620_v14, %v3590_v46  ;;  %v11786_v47 = vpack.c.bf16 %v3922_v45, %v3918_v41  ;;  %v11788_v53 = vsub.f32 %v3599_v4, %v3918_v41 }
 0x565   : > { %14465 = vst [vmem:[#allocation198_spill] sm:$0xff] %v11781_v19  ;;  %v3594_v58 = vsel %vm605_vm13, %v3590_v46, %v3584_v49  ;;  %v3601_v18 = vmul.f32 %v6420_v40, %v3591_v35  ;;  %v13404_v27 = vand.u32 4294901760, %v11781_v19  ;;  %v5076_v21 = vand.u32 4294901760, %v3625_v43 }
 0x566   : > { %14466 = vst [vmem:[#allocation199_spill] sm:$0xff] %v11786_v47  ;;  %14467 = vst [vmem:[#allocation200_spill] sm:$0xff] %v11788_v53  ;;  %v5074_v13 = vand.u32 4294901760, %v3626_v17  ;;  %v3602_v12 = vmul.f32 %v6421_v62, %v3594_v58  ;;  %v13406_v7 = vand.u32 4294901760, %v11788_v53  ;;  %7125 = vmatpush1.bf16.msra.mxu0 %v11786_v47  ;;  %v3973_v14 = vsub.f32 %v11748_v63, %v11765_v54 }
 0x567   : > { %v5072_v57 = vand.u32 4294901760, %v3601_v18  ;;  %v3991_v45 = vand.u32 4294901760, %v3990_v22  ;;  %v11800_v59 = vsub.f32 %v11781_v19, %v13404_v27  ;;  %v11804_v4 = vsub.f32 %v3625_v43, %v5076_v21  ;;  %7127 = vmatprep.subr.bf16.mxu0 %v11680_v52  ;;  %v14491_v19 = vld [vmem:[#allocation19_spill] sm:$0xff] }
 0x568   : > { %v11802_v49 = vsub.f32 %v3626_v17, %v5074_v13  ;;  %v5070_v40 = vand.u32 4294901760, %v3602_v12  ;;  %v11810_v58 = vsub.f32 %v11788_v53, %v13406_v7  ;;  %v3974_v3 = vand.u32 4294901760, %v3973_v14  ;;  %v14478_v7 = vld [vmem:[#allocation160_spill] sm:$0xff] }
 0x569   : > { %14469 = vst [vmem:[#allocation202_spill] sm:$0xff] %v11804_v4  ;;  %v11812_v41 = vpack.c.bf16 %v5076_v21, %v5072_v57  ;;  %v11814_v56 = vsub.f32 %v3601_v18, %v5072_v57  ;;  %v13403_v62 = vand.u32 4294901760, %v11804_v4  ;;  %v14474_v43 = vand.u32 4294901760, %v10416_v20  ;;  %v14492_v53 = vld [vmem:[#allocation60_spill] sm:$0xff] }
 0x56a   : > { %14468 = vst [vmem:[#allocation201_spill] sm:$0xff] %v11802_v49  ;;  %v11817_v46 = vsub.f32 %v3602_v12, %v5070_v40  ;;  %v11819_v17 = vpack.c.bf16 %v5074_v13, %v5070_v40  ;;  %7129 = vmatpush1.bf16.msra.mxu0 %v10414_v32  ;;  %3975 = vmatprep.mubr.f32.mxu0 %v3974_v3  ;;  %v3997_v18 = vand.u32 4294901760, %v10520_v50  ;;  %v4009_v57 = vand.u32 4294901760, %v10508_v31 }
 0x56b   : > { %14470 = vst [vmem:[#allocation203_spill] sm:$0xff] %v11812_v41  ;;  %14471 = vst [vmem:[#allocation204_spill] sm:$0xff] %v11814_v56  ;;  %v4002_v22 = vsub.f32 %v10416_v20, %v14474_v43  ;;  %v13405_v35 = vand.u32 4294901760, %v11814_v56  ;;  %v11827_v21 = vsub.f32 %v3739_v5, %v11768_v26  ;;  %v11834_v13 = vsub.f32 %v11804_v4, %v13403_v62  ;;  %v14477_v43 = vld [vmem:[#allocation31_spill] sm:$0xff]  ;;  %v14489_v4 = vld [vmem:[#allocation18_spill] sm:$0xff] }
 0x56c   : > { %14472 = vst [vmem:[#allocation205_spill] sm:$0xff] %v11817_v46  ;;  %14473 = vst [vmem:[#allocation206_spill] sm:$0xff] %v11819_v17  ;;  %7435 = vmatprep.subr.bf16.mxu1 %v11819_v17  ;;  %7131 = vmatprep.subr.bf16.mxu0 %v11690_v33  ;;  %v13413_v14 = vand.u32 4294901760, %v10608_v38  ;;  %v13418_v40 = vand.u32 4294901760, %v10629_v9  ;;  %v11849_v5 = vpack.c.bf16 %v4009_v57, %v3997_v18  ;;  %v4021_v62 = vand.u32 4294901760, %v14477_v43  ;;  %v14479_v33 = vld [vmem:[#allocation157_spill] sm:$0xff] }
 0x56d   : > { %14475 = vst [vmem:[#allocation207_spill] sm:$0xff] %v11827_v21  ;;  %v4003_v12 = vand.u32 4294901760, %v4002_v22  ;;  %v11843_v50 = vsub.f32 %v11814_v56, %v13405_v35  ;;  %7437 = vmatpush1.bf16.msra.mxu1 %v11812_v41  ;;  %v11847_v31 = vand.u32 4294901760, %v11827_v21  ;;  %5129 = vmatprep.mubr.f32.mxu1 %v3974_v3  ;;  %v4033_v41 = vand.u32 4294901760, %v14478_v7  ;;  %v14480_v3 = vld [vmem:[#allocation98_spill] sm:$0xff]  ;;  %v14481_v43 = vld [vmem:[#allocation77_spill] sm:$0xff] }
 0x56e   : > { %7439 = vmatprep.subr.bf16.mxu1 %v11696_v34  ;;  %v4014_v27 = vsub.f32 %v10608_v38, %v13413_v14  ;;  %v4026_v35 = vsub.f32 %v10629_v9, %v13418_v40  ;;  %7133 = vmatpush1.bf16.msra.mxu0 %v14479_v33  ;;  %v13427_v57 = vand.u32 4294901760, %v14480_v3  ;;  %v14483_v40 = vld [vmem:[#allocation110_spill] sm:$0xff]  ;;  %v14484_v7 = vld [vmem:[#allocation147_spill] sm:$0xff]  ;;  %v13448_v56 = vand.u32 4294901760, %v14489_v4  ;;  %v14500_v26 = vld [vmem:[#allocation37_spill] sm:$0xff] }
 0x56f   : > { %14476 = vst [vmem:[#allocation208_spill] sm:$0xff] %v11847_v31  ;;  %v11853_v22 = vpack.c.bf16 %v4003_v12, %v3991_v45  ;;  %v3979_v18 = vsub.f32 %v11827_v21, %v11847_v31  ;;  %v13432_v45 = vand.u32 4294901760, %v14481_v43  ;;  %v14482_v12 = vld [vmem:[#allocation64_spill] sm:$0xff]  ;;  %7135 = vmatprep.subr.bf16.mxu0 %v11711_v10  ;;  %v11869_v17 = vpack.c.bf16 %v4033_v41, %v4021_v62 }
 0x570   : > { %v4015_v14 = vand.u32 4294901760, %v4014_v27  ;;  %v4027_v32 = vand.u32 4294901760, %v4026_v35  ;;  %v13441_v52 = vand.u32 4294901760, %v14483_v40  ;;  %v5144_v31 = vsub.f32 %v14480_v3, %v13427_v57  ;;  %v14486_v35 = vld [vmem:[#allocation159_spill] sm:$0xff]  ;;  %v14488_v57 = vld [vmem:[#allocation88_spill] sm:$0xff] }
 0x571   : > { %7441 = vmatpush1.bf16.msra.mxu1 %v14484_v7  ;;  %v11873_v33 = vand.u32 4294901760, %v3979_v18  ;;  %v5156_v34 = vsub.f32 %v14481_v43, %v13432_v45  ;;  %v14485_v10 = vand.u32 4294901760, %v14482_v12  ;;  %v5151_v18 = vand.u32 4294901760, %v14486_v35  ;;  %v14487_v7 = vld [vmem:[#allocation105_spill] sm:$0xff] }
 0x572   : > { %7443 = vmatprep.subr.bf16.mxu1 %v11717_v30  ;;  %v7146_v41 = vpack.c.bf16 %v4027_v32, %v4015_v14  ;;  %v4050_v62 = vsub.f32 %v14483_v40, %v13441_v52  ;;  %v5163_v47 = vand.u32 4294901760, %v14487_v7  ;;  %7137 = vmatpush1.bf16.msra.mxu0 %v14488_v57  ;;  %v5145_v54 = vand.u32 4294901760, %v5144_v31  ;;  %v14490_v32 = vld [vmem:[#allocation129_spill] sm:$0xff]  ;;  %v14493_v31 = vld [vmem:[#allocation32_spill] sm:$0xff] }
 0x573   : > { %v4038_v27 = vsub.f32 %v14482_v12, %v14485_v10  ;;  %v5157_v21 = vand.u32 4294901760, %v5156_v34  ;;  %7139 = vmatprep.subr.bf16.mxu0 %v11723_v29  ;;  %v13451_v14 = vand.u32 4294901760, %v14490_v32  ;;  %v4045_v52 = vand.u32 4294901760, %v14491_v19  ;;  %v14495_v19 = vld [vmem:[#allocation95_spill] sm:$0xff] }
 0x574   : > { %v4051_v10 = vand.u32 4294901760, %v4050_v62  ;;  %v11893_v30 = vpack.c.bf16 %v5163_v47, %v5151_v18  ;;  %v5168_v34 = vsub.f32 %v14489_v4, %v13448_v56  ;;  %v4057_v7 = vand.u32 4294901760, %v14493_v31  ;;  %v14498_v56 = vld [vmem:[#allocation36_spill] sm:$0xff] }
 0x575   : > { %v4039_v45 = vand.u32 4294901760, %v4038_v27  ;;  %7445 = vmatpush1.bf16.msra.mxu1 %v14492_v53  ;;  %v11898_v35 = vpack.c.bf16 %v5157_v21, %v5145_v54  ;;  %v14494_v27 = vld [vmem:[#allocation65_spill] sm:$0xff]  ;;  %v5180_v62 = vsub.f32 %v14490_v32, %v13451_v14  ;;  %v13459_v18 = vand.u32 4294901760, %v14495_v19  ;;  %v14496_v53 = vld [vmem:[#allocation66_spill] sm:$0xff]  ;;  %v14499_v14 = vld [vmem:[#allocation39_spill] sm:$0xff] }
 0x576   : > { %v13455_v57 = vand.u32 4294901760, %v14494_v27  ;;  %7447 = vmatprep.subr.bf16.mxu1 %v11733_v11  ;;  %v5175_v54 = vand.u32 4294901760, %v14496_v53  ;;  %v14497_v21 = vld [vmem:[#allocation86_spill] sm:$0xff]  ;;  %v5169_v29 = vand.u32 4294901760, %v5168_v34  ;;  %v11912_v63 = vpack.c.bf16 %v4057_v7, %v4045_v52  ;;  %v14502_v32 = vld [vmem:[#allocation144_spill] sm:$0xff] }
 0x577   : > { %v7150_v47 = vpack.c.bf16 %v4051_v10, %v4039_v45  ;;  %7141 = vmatpush1.bf16.msra.mxu0 %v14497_v21  ;;  %v5187_v11 = vand.u32 4294901760, %v14498_v56  ;;  %v5181_v45 = vand.u32 4294901760, %v5180_v62  ;;  %v4074_v10 = vsub.f32 %v14495_v19, %v13459_v18  ;;  %v14501_v34 = vld [vmem:[#allocation70_spill] sm:$0xff] }
 0x578   : > { %v4062_v31 = vsub.f32 %v14494_v27, %v13455_v57  ;;  %3957 = vmatprep.subr.mxu0 %v11365_v37  ;;  %v13463_v53 = vand.u32 4294901760, %v14499_v14  ;;  %v13465_v21 = vand.u32 4294901760, %v14500_v26  ;;  %v4069_v57 = vand.u32 4294901760, %v14502_v32  ;;  %v14503_v27 = vld [vmem:[#allocation115_spill] sm:$0xff] }
 0x579   : > { %7449 = vmatpush1.bf16.msra.mxu1 %v14501_v34  ;;  %v11925_v7 = vpack.c.bf16 %v5187_v11, %v5175_v54  ;;  %v4081_v56 = vand.u32 4294901760, %v14503_v27  ;;  %v7458_v62 = vpack.c.bf16 %v5181_v45, %v5169_v29  ;;  %v4075_v37 = vand.u32 4294901760, %v4074_v10  ;;  %v14504_v54 = vld [vmem:[#allocation23_spill] sm:$0xff]  ;;  %v14506_v34 = vld [vmem:[#allocation85_spill] sm:$0xff] }
 0x57a   : > { %v4063_v52 = vand.u32 4294901760, %v4062_v31  ;;  %7451 = vmatprep.subr.bf16.mxu1 %v11744_v16  ;;  %v5192_v18 = vsub.f32 %v14499_v14, %v13463_v53  ;;  %v5204_v19 = vsub.f32 %v14500_v26, %v13465_v21  ;;  %v13468_v32 = vand.u32 4294901760, %v14504_v54  ;;  %v14505_v31 = vld [vmem:[#allocation24_spill] sm:$0xff]  ;;  %v14508_v21 = vld [vmem:[#allocation153_spill] sm:$0xff] }
 0x57b   : > { %3959 = vmatpush1.msra.mxu0 %v11275_v6  ;;  %v11937_v11 = vpack.c.bf16 %v4081_v56, %v4069_v57  ;;  %v13469_v27 = vand.u32 4294901760, %v14505_v31  ;;  %v5199_v16 = vand.u32 4294901760, %v14506_v34  ;;  %v14507_v53 = vld [vmem:[#allocation20_spill] sm:$0xff]  ;;  %v14510_v6 = vld [vmem:[#allocation134_spill] sm:$0xff] }
 0x57c   : > { %7143 = vmatprep.subr.bf16.mxu0 %v11853_v22  ;;  %3981 = vmatmul.mubr.f32.vlgmr.msra.gmra.mrb[2].mxu0 %v11873_v33  ;;  %v7154_v29 = vpack.c.bf16 %v4075_v37, %v4063_v52  ;;  %v5193_v45 = vand.u32 4294901760, %v5192_v18  ;;  %v5205_v10 = vand.u32 4294901760, %v5204_v19  ;;  %v5211_v14 = vand.u32 4294901760, %v14507_v53  ;;  %v14509_v22 = vld [vmem:[#allocation138_spill] sm:$0xff]  ;;  %v14511_v53 = vld [vmem:[#allocation35_spill] sm:$0xff] }
 0x57d   : > { %7453 = vmatpush1.bf16.msra.mxu1 %v14508_v21  ;;  %7145 = vmatpush1.bf16.msra.mxu0 %v11849_v5  ;;  %v4086_v57 = vsub.f32 %v14504_v54, %v13468_v32  ;;  %v4098_v34 = vsub.f32 %v14505_v31, %v13469_v27  ;;  %v13471_v56 = vand.u32 4294901760, %v14509_v22  ;;  %v13475_v37 = vand.u32 4294901760, %v14510_v6 }
 0x57e   : > { %5111 = vmatprep.subr.mxu1 %v11314_v0  ;;  %7147 = vmatprep.subr.bf16.mxu0 %v7146_v41  ;;  %v7462_v19 = vpack.c.bf16 %v5205_v10, %v5193_v45  ;;  %v11956_v18 = vpack.c.bf16 %v5211_v14, %v5199_v16  ;;  %v4093_v5 = vand.u32 4294901760, %v11392_v15  ;;  %v4105_v52 = vand.u32 4294901760, %v14511_v53  ;;  %v14512_v14 = vld [vmem:[#allocation163_spill] sm:$0xff]  ;;  %v14515_v0 = vld [vmem:[#allocation122_spill] sm:$0xff] }
 0x57f   : > { %v4087_v21 = vand.u32 4294901760, %v4086_v57  ;;  %v4099_v32 = vand.u32 4294901760, %v4098_v34  ;;  %v5216_v27 = vsub.f32 %v14509_v22, %v13471_v56  ;;  %v5228_v31 = vsub.f32 %v14510_v6, %v13475_v37  ;;  %4322 = vmatprep.mubr.f32.mxu0 %v10382_v36  ;;  %v14513_v45 = vld [vmem:[#allocation27_spill] sm:$0xff]  ;;  %v14514_v57 = vld [vmem:[#allocation121_spill] sm:$0xff] }
 0x580   : > { %v11967_v41 = vpack.c.bf16 %v4105_v52, %v4093_v5  ;;  %v13477_v16 = vand.u32 4294901760, %v11435_v24  ;;  %v13476_v15 = vand.u32 4294901760, %v14512_v14  ;;  %v5223_v10 = vand.u32 4294901760, %v14513_v45  ;;  %v14516_v45 = vld [vmem:[#allocation150_spill] sm:$0xff] }
 0x581   : > { %5113 = vmatpush1.msra.mxu1 %v14514_v57  ;;  %7149 = vmatpush1.bf16.msra.mxu0 %v11869_v17  ;;  %v7158_v34 = vpack.c.bf16 %v4099_v32, %v4087_v21  ;;  %v5217_v53 = vand.u32 4294901760, %v5216_v27  ;;  %v5229_v56 = vand.u32 4294901760, %v5228_v31  ;;  %v5235_v22 = vand.u32 4294901760, %v14515_v0  ;;  %v14517_v57 = vld [vmem:[#allocation30_spill] sm:$0xff] }
 0x582   : > { %7455 = vmatprep.subr.bf16.mxu1 %v11898_v35  ;;  %7151 = vmatprep.subr.bf16.mxu0 %v7150_v47  ;;  %v4110_v5 = vsub.f32 %v11435_v24, %v13477_v16  ;;  %v4122_v52 = vsub.f32 %v14512_v14, %v13476_v15  ;;  %v13479_v37 = vand.u32 4294901760, %v14516_v45  ;;  %v13478_v17 = vand.u32 4294901760, %v14517_v57  ;;  %v14518_v35 = vld [vmem:[#allocation176_spill] sm:$0xff] }
 0x583   : > { %5135 = vmatmul.mubr.f32.vlgmr.msra.gmra.mrb[2].mxu1 %v11873_v33  ;;  %v7466_v21 = vpack.c.bf16 %v5229_v56, %v5217_v53  ;;  %v11985_v32 = vpack.c.bf16 %v5235_v22, %v5223_v10  ;;  %v4117_v0 = vand.u32 4294901760, %v11504_v28  ;;  %v4129_v47 = vand.u32 4294901760, %v14518_v35  ;;  %v14519_v22 = vld [vmem:[#allocation151_spill] sm:$0xff]  ;;  %v14520_v56 = vld [vmem:[#allocation141_spill] sm:$0xff] }
 0x584   : > { %7457 = vmatpush1.bf16.msra.mxu1 %v11893_v30  ;;  %v4111_v31 = vand.u32 4294901760, %v4110_v5  ;;  %v4123_v27 = vand.u32 4294901760, %v4122_v52  ;;  %v5240_v15 = vsub.f32 %v14516_v45, %v13479_v37  ;;  %v5252_v16 = vsub.f32 %v14517_v57, %v13478_v17  ;;  %5476 = vmatprep.mubr.f32.mxu1 %v10382_v36  ;;  %v14521_v37 = vld [vmem:[#allocation10_spill] sm:$0xff] }
 0x585   : > { %7459 = vmatprep.subr.bf16.mxu1 %v7458_v62  ;;  %7153 = vmatpush1.bf16.msra.mxu0 %v11912_v63  ;;  %v7164_v28 = vpack.c.bf16 %v4129_v47, %v4117_v0  ;;  %v13480_v33 = vand.u32 4294901760, %v11530_v44  ;;  %v5247_v30 = vand.u32 4294901760, %v14519_v22  ;;  %v5259_v10 = vand.u32 4294901760, %v14520_v56  ;;  %v14556_v36 = vld [vmem:[#allocation54_spill] sm:$0xff] }
 0x586   : > { %7155 = vmatprep.subr.bf16.mxu0 %v7154_v29  ;;  %v7162_v53 = vpack.c.bf16 %v4123_v27, %v4111_v31  ;;  %v5241_v5 = vand.u32 4294901760, %v5240_v15  ;;  %v5253_v52 = vand.u32 4294901760, %v5252_v16  ;;  %v13482_v35 = vand.u32 4294901760, %v11514_v25 }
 0x587   : > { %v4134_v17 = vsub.f32 %v11530_v44, %v13480_v33  ;;  %v7472_v62 = vpack.c.bf16 %v5259_v10, %v5247_v30  ;;  %v13481_v63 = vand.u32 4294901760, %v14521_v37  ;;  %v4141_v0 = vand.u32 4294901760, %v11615_v42  ;;  %v14522_v42 = vld [vmem:[#allocation53_spill] sm:$0xff]  ;;  %v14524_v30 = vld [vmem:[#allocation96_spill] sm:$0xff] }
 0x588   : > { %7461 = vmatpush1.bf16.msra.mxu1 %v11925_v7  ;;  %v7470_v47 = vpack.c.bf16 %v5253_v52, %v5241_v5  ;;  %v5264_v29 = vsub.f32 %v11514_v25, %v13482_v35  ;;  %v13483_v16 = vand.u32 4294901760, %v11598_v51  ;;  %v13484_v15 = vand.u32 4294901760, %v11605_v8  ;;  %v14526_v52 = vld [vmem:[#allocation52_spill] sm:$0xff] }
 0x589   : > { %7463 = vmatprep.subr.bf16.mxu1 %v7462_v19  ;;  %7157 = vmatpush1.bf16.msra.mxu0 %v11937_v11  ;;  %v4135_v31 = vand.u32 4294901760, %v4134_v17  ;;  %v5276_v27 = vsub.f32 %v14521_v37, %v13481_v63  ;;  %v14523_v22 = vand.u32 4294901760, %v14522_v42  ;;  %v5271_v56 = vand.u32 4294901760, %v14524_v30  ;;  %v14525_v19 = vld [vmem:[#allocation34_spill] sm:$0xff]  ;;  %v14528_v42 = vld [vmem:[#allocation80_spill] sm:$0xff] }
 0x58a   : > { %7159 = vmatprep.subr.bf16.mxu0 %v7158_v34  ;;  %v5265_v10 = vand.u32 4294901760, %v5264_v29  ;;  %v4158_v5 = vsub.f32 %v11598_v51, %v13483_v16  ;;  %v4170_v11 = vsub.f32 %v11605_v8, %v13484_v15  ;;  %v5283_v17 = vand.u32 4294901760, %v14525_v19 }
 0x58b   : > { %v7168_v7 = vpack.c.bf16 %v14523_v22, %v4141_v0  ;;  %v14527_v33 = vand.u32 4294901760, %v14526_v52  ;;  %v5277_v35 = vand.u32 4294901760, %v5276_v27  ;;  %v13485_v0 = vand.u32 4294901760, %v14528_v42 }
 0x58c   : > { %v4165_v22 = vand.u32 4294901760, %v11661_v48  ;;  %7465 = vmatpush1.bf16.msra.mxu1 %v11956_v18  ;;  %v4159_v34 = vand.u32 4294901760, %v4158_v5  ;;  %v4171_v29 = vand.u32 4294901760, %v4170_v11  ;;  %v7476_v30 = vpack.c.bf16 %v5283_v17, %v5271_v56  ;;  %v14529_v5 = vld [vmem:[#allocation92_spill] sm:$0xff] }
 0x58d   : > { %v7166_v63 = vpack.c.bf16 %v14527_v33, %v4135_v31  ;;  %v4177_v16 = vand.u32 4294901760, %v11647_v60  ;;  %7467 = vmatprep.subr.bf16.mxu1 %v7466_v21  ;;  %7161 = vmatpush1.bf16.msra.mxu0 %v11967_v41  ;;  %v7474_v15 = vpack.c.bf16 %v5277_v35, %v5265_v10  ;;  %v5288_v33 = vsub.f32 %v14528_v42, %v13485_v0 }
 0x58e   : > { %v13499_v31 = vand.u32 4294901760, %v11725_v61  ;;  %v13487_v27 = vand.u32 4294901760, %v11750_v1  ;;  %7163 = vmatprep.subr.bf16.mxu0 %v7162_v53  ;;  %v7170_v48 = vpack.c.bf16 %v4171_v29, %v4159_v34  ;;  %v5295_v11 = vand.u32 4294901760, %v14529_v5  ;;  %v14530_v53 = vld [vmem:[#allocation109_spill] sm:$0xff] }
 0x58f   : > { %v7172_v18 = vpack.c.bf16 %v4177_v16, %v4165_v22  ;;  %v13486_v56 = vand.u32 4294901760, %v11663_v55  ;;  %v5289_v60 = vand.u32 4294901760, %v5288_v33  ;;  %v13494_v35 = vand.u32 4294901760, %v11639_v23  ;;  %v14532_v22 = vld [vmem:[#allocation101_spill] sm:$0xff] }
 0x590   : > { %v4182_v41 = vsub.f32 %v11725_v61, %v13499_v31  ;;  %v4194_v21 = vsub.f32 %v11750_v1, %v13487_v27  ;;  %7469 = vmatpush1.bf16.msra.mxu1 %v11985_v32  ;;  %v14531_v10 = vand.u32 4294901760, %v14530_v53  ;;  %v4189_v17 = vand.u32 4294901760, %v11810_v58 }
 0x591   : > { %v5312_v19 = vsub.f32 %v11663_v55, %v13486_v56  ;;  %v4201_v52 = vand.u32 4294901760, %v11800_v59  ;;  %7471 = vmatprep.subr.bf16.mxu1 %v7470_v47  ;;  %7165 = vmatpush1.bf16.msra.mxu0 %v7164_v28  ;;  %v14533_v34 = vand.u32 4294901760, %v14532_v22  ;;  %v5324_v32 = vsub.f32 %v11639_v23, %v13494_v35  ;;  %v14535_v56 = vld [vmem:[#allocation97_spill] sm:$0xff] }
 0x592   : > { %v7480_v16 = vpack.c.bf16 %v14531_v10, %v5295_v11  ;;  %v4183_v33 = vand.u32 4294901760, %v4182_v41  ;;  %v4195_v5 = vand.u32 4294901760, %v4194_v21  ;;  %7167 = vmatprep.subr.bf16.mxu0 %v7166_v63  ;;  %v14534_v10 = vld [vmem:[#allocation128_spill] sm:$0xff]  ;;  %v13488_v58 = vand.u32 4294901760, %v14535_v56  ;;  %v14536_v47 = vld [vmem:[#allocation185_spill] sm:$0xff] }
 0x593   : > { %v7478_v29 = vpack.c.bf16 %v14533_v34, %v5289_v60  ;;  %v5313_v11 = vand.u32 4294901760, %v5312_v19  ;;  %v7176_v53 = vpack.c.bf16 %v4201_v52, %v4189_v17  ;;  %v13493_v0 = vand.u32 4294901760, %v14534_v10  ;;  %v14538_v34 = vld [vmem:[#allocation89_spill] sm:$0xff] }
 0x594   : > { %v7174_v27 = vpack.c.bf16 %v4195_v5, %v4183_v33  ;;  %v5325_v59 = vand.u32 4294901760, %v5324_v32  ;;  %v5319_v28 = vand.u32 4294901760, %v11701_v2  ;;  %v5331_v22 = vand.u32 4294901760, %v14536_v47  ;;  %7473 = vmatpush1.bf16.msra.mxu1 %v7472_v62  ;;  %v14537_v2 = vld [vmem:[#allocation67_spill] sm:$0xff] }
 0x595   : > { %v4206_v60 = vsub.f32 %v14534_v10, %v13493_v0  ;;  %v4218_v63 = vsub.f32 %v14535_v56, %v13488_v58  ;;  %v13492_v41 = vand.u32 4294901760, %v11817_v46  ;;  %v13489_v21 = vand.u32 4294901760, %v11802_v49  ;;  %7475 = vmatprep.subr.bf16.mxu1 %v7474_v15  ;;  %7169 = vmatpush1.bf16.msra.mxu0 %v7168_v7  ;;  %v14539_v15 = vld [vmem:[#allocation103_spill] sm:$0xff]  ;;  %v14545_v0 = vld [vmem:[#allocation44_spill] sm:$0xff] }
 0x596   : > { %v7482_v19 = vpack.c.bf16 %v5325_v59, %v5313_v11  ;;  %v7484_v17 = vpack.c.bf16 %v5331_v22, %v5319_v28  ;;  %v4213_v52 = vand.u32 4294901760, %v14537_v2  ;;  %v4225_v62 = vand.u32 4294901760, %v14538_v34  ;;  %7171 = vmatprep.subr.bf16.mxu0 %v7170_v48  ;;  %v14540_v11 = vld [vmem:[#allocation123_spill] sm:$0xff]  ;;  %v14541_v34 = vld [vmem:[#allocation76_spill] sm:$0xff] }
 0x597   : > { %v4207_v33 = vand.u32 4294901760, %v4206_v60  ;;  %v4219_v5 = vand.u32 4294901760, %v4218_v63  ;;  %v5336_v32 = vsub.f32 %v11817_v46, %v13492_v41  ;;  %v5348_v47 = vsub.f32 %v11802_v49, %v13489_v21  ;;  %v14542_v21 = vld [vmem:[#allocation74_spill] sm:$0xff] }
 0x598   : > { %v7180_v58 = vpack.c.bf16 %v4225_v62, %v4213_v52  ;;  %v13490_v7 = vand.u32 4294901760, %v14539_v15  ;;  %v13491_v59 = vand.u32 4294901760, %v14540_v11  ;;  %v5343_v28 = vand.u32 4294901760, %v11843_v50  ;;  %7477 = vmatpush1.bf16.msra.mxu1 %v7476_v30 }
 0x599   : > { %v7178_v22 = vpack.c.bf16 %v4219_v5, %v4207_v33  ;;  %v5337_v48 = vand.u32 4294901760, %v5336_v32  ;;  %v5349_v60 = vand.u32 4294901760, %v5348_v47  ;;  %v5355_v63 = vand.u32 4294901760, %v11834_v13  ;;  %7479 = vmatprep.subr.bf16.mxu1 %v7478_v29  ;;  %7173 = vmatpush1.bf16.msra.mxu0 %v7172_v18  ;;  %v14543_v5 = vld [vmem:[#allocation171_spill] sm:$0xff]  ;;  %v14544_v13 = vld [vmem:[#allocation162_spill] sm:$0xff] }
 0x59a   : > { %v4230_v2 = vsub.f32 %v14539_v15, %v13490_v7  ;;  %v4242_v52 = vsub.f32 %v14540_v11, %v13491_v59  ;;  %v13496_v62 = vand.u32 4294901760, %v14541_v34  ;;  %v13495_v50 = vand.u32 4294901760, %v14542_v21  ;;  %7175 = vmatprep.subr.bf16.mxu0 %v7174_v27 }
 0x59b   : > { %v7486_v30 = vpack.c.bf16 %v5349_v60, %v5337_v48  ;;  %v7488_v33 = vpack.c.bf16 %v5355_v63, %v5343_v28  ;;  %v4237_v32 = vand.u32 4294901760, %v14543_v5  ;;  %v4249_v29 = vand.u32 4294901760, %v14544_v13  ;;  %v14546_v48 = vld [vmem:[#allocation17_spill] sm:$0xff]  ;;  %v14547_v60 = vld [vmem:[#allocation11_spill] sm:$0xff]  ;;  %v14548_v13 = vld [vmem:[#allocation168_spill] sm:$0xff] }
 0x59c   : > { %v4231_v18 = vand.u32 4294901760, %v4230_v2  ;;  %v4243_v47 = vand.u32 4294901760, %v4242_v52  ;;  %v5360_v7 = vsub.f32 %v14541_v34, %v13496_v62  ;;  %v5372_v59 = vsub.f32 %v14542_v21, %v13495_v50  ;;  %7481 = vmatpush1.bf16.msra.mxu1 %v7480_v16  ;;  %v14550_v62 = vld [vmem:[#allocation170_spill] sm:$0xff] }
 0x59d   : > { %v7184_v41 = vpack.c.bf16 %v4249_v29, %v4237_v32  ;;  %v13497_v27 = vand.u32 4294901760, %v14545_v0  ;;  %v13498_v28 = vand.u32 4294901760, %v14546_v48  ;;  %v5367_v63 = vand.u32 4294901760, %v14547_v60  ;;  %7483 = vmatprep.subr.bf16.mxu1 %v7482_v19  ;;  %7177 = vmatpush1.bf16.msra.mxu0 %v7176_v53  ;;  %v14549_v32 = vld [vmem:[#allocation7_spill] sm:$0xff] }
 0x59e   : > { %v7182_v2 = vpack.c.bf16 %v4243_v47, %v4231_v18  ;;  %v5361_v52 = vand.u32 4294901760, %v5360_v7  ;;  %v5373_v5 = vand.u32 4294901760, %v5372_v59  ;;  %v5379_v35 = vand.u32 4294901760, %v14548_v13  ;;  %7179 = vmatprep.subr.bf16.mxu0 %v7178_v22  ;;  %v14551_v18 = vld [vmem:[#allocation8_spill] sm:$0xff]  ;;  %v14552_v59 = vld [vmem:[#allocation13_spill] sm:$0xff] }
 0x59f   : > { %v4254_v50 = vsub.f32 %v14545_v0, %v13497_v27  ;;  %v4266_v16 = vsub.f32 %v14546_v48, %v13498_v28  ;;  %v13504_v29 = vand.u32 4294901760, %v14549_v32  ;;  %v13505_v60 = vand.u32 4294901760, %v14550_v62 }
 0x5a0   : > { %v7490_v19 = vpack.c.bf16 %v5373_v5, %v5361_v52  ;;  %v7492_v53 = vpack.c.bf16 %v5379_v35, %v5367_v63  ;;  %v4261_v7 = vand.u32 4294901760, %v14551_v18  ;;  %v4273_v47 = vand.u32 4294901760, %v14552_v59  ;;  %7485 = vmatpush1.bf16.msra.mxu1 %v7484_v17  ;;  %v14553_v52 = vld [vmem:[#allocation142_spill] sm:$0xff]  ;;  %v14554_v63 = vld [vmem:[#allocation116_spill] sm:$0xff] }
 0x5a1   : > { %v4255_v22 = vand.u32 4294901760, %v4254_v50  ;;  %v4267_v13 = vand.u32 4294901760, %v4266_v16  ;;  %v5384_v27 = vsub.f32 %v14549_v32, %v13504_v29  ;;  %v5396_v28 = vsub.f32 %v14550_v62, %v13505_v60  ;;  %7487 = vmatprep.subr.bf16.mxu1 %v7486_v30  ;;  %7181 = vmatpush1.bf16.msra.mxu0 %v7180_v58  ;;  %v14555_v18 = vld [vmem:[#allocation90_spill] sm:$0xff]  ;;  %v14557_v30 = vld [vmem:[#allocation21_spill] sm:$0xff] }
 0x5a2   : > { %v7188_v31 = vpack.c.bf16 %v4273_v47, %v4261_v7  ;;  %v13508_v35 = vand.u32 4294901760, %v14553_v52  ;;  %v13509_v5 = vand.u32 4294901760, %v14554_v63  ;;  %v5391_v59 = vand.u32 4294901760, %v14555_v18  ;;  %7183 = vmatprep.subr.bf16.mxu0 %v7182_v2  ;;  %v14558_v47 = vld [vmem:[#allocation9_spill] sm:$0xff] }
 0x5a3   : > { %v7186_v17 = vpack.c.bf16 %v4267_v13, %v4255_v22  ;;  %v5385_v50 = vand.u32 4294901760, %v5384_v27  ;;  %v5397_v16 = vand.u32 4294901760, %v5396_v28  ;;  %v5403_v44 = vand.u32 4294901760, %v14556_v36  ;;  %v14559_v22 = vld [vmem:[#allocation111_spill] sm:$0xff]  ;;  %v14560_v28 = vld [vmem:[#allocation120_spill] sm:$0xff] }
 0x5a4   : > { %v4278_v29 = vsub.f32 %v14553_v52, %v13508_v35  ;;  %v4290_v58 = vsub.f32 %v14554_v63, %v13509_v5  ;;  %v13512_v7 = vand.u32 4294901760, %v14557_v30  ;;  %v13515_v60 = vand.u32 4294901760, %v14558_v47  ;;  %7489 = vmatpush1.bf16.msra.mxu1 %v7488_v33 }
 0x5a5   : > { %v7494_v18 = vpack.c.bf16 %v5397_v16, %v5385_v50  ;;  %v7496_v2 = vpack.c.bf16 %v5403_v44, %v5391_v59  ;;  %v4285_v27 = vand.u32 4294901760, %v14559_v22  ;;  %v4297_v13 = vand.u32 4294901760, %v14560_v28  ;;  %7491 = vmatprep.subr.bf16.mxu1 %v7490_v19  ;;  %7185 = vmatpush1.bf16.msra.mxu0 %v7184_v41  ;;  %v14561_v50 = vld [vmem:[#allocation148_spill] sm:$0xff]  ;;  %v14563_v22 = vld [vmem:[#allocation41_spill] sm:$0xff] }
 0x5a6   : > { %v4279_v36 = vand.u32 4294901760, %v4278_v29  ;;  %v4291_v49 = vand.u32 4294901760, %v4290_v58  ;;  %v5408_v35 = vsub.f32 %v14557_v30, %v13512_v7  ;;  %v5420_v5 = vsub.f32 %v14558_v47, %v13515_v60  ;;  %7187 = vmatprep.subr.bf16.mxu0 %v7186_v17  ;;  %v14562_v59 = vld [vmem:[#allocation68_spill] sm:$0xff]  ;;  %v14564_v58 = vld [vmem:[#allocation91_spill] sm:$0xff] }
 0x5a7   : > { %v7192_v33 = vpack.c.bf16 %v4297_v13, %v4285_v27  ;;  %v13518_v44 = vand.u32 4294901760, %v14561_v50  ;;  %v5415_v16 = vand.u32 4294901760, %v14562_v59  ;;  %v5427_v28 = vand.u32 4294901760, %v14563_v22  ;;  %v14565_v60 = vld [vmem:[#allocation112_spill] sm:$0xff]  ;;  %v14566_v27 = vld [vmem:[#allocation166_spill] sm:$0xff] }
 0x5a8   : > { %v7190_v19 = vpack.c.bf16 %v4291_v49, %v4279_v36  ;;  %v5409_v41 = vand.u32 4294901760, %v5408_v35  ;;  %v5421_v29 = vand.u32 4294901760, %v5420_v5  ;;  %v13519_v46 = vand.u32 4294901760, %v14564_v58  ;;  %7493 = vmatpush1.bf16.msra.mxu1 %v7492_v53  ;;  %v14568_v35 = vld [vmem:[#allocation165_spill] sm:$0xff] }
 0x5a9   : > { %v4302_v7 = vsub.f32 %v14561_v50, %v13518_v44  ;;  %v7500_v23 = vpack.c.bf16 %v5427_v28, %v5415_v16  ;;  %v13524_v17 = vand.u32 4294901760, %v14565_v60  ;;  %v14567_v13 = vand.u32 4294901760, %v14566_v27  ;;  %7495 = vmatprep.subr.bf16.mxu1 %v7494_v18  ;;  %7189 = vmatpush1.bf16.msra.mxu0 %v7188_v31  ;;  %v14569_v36 = vld [vmem:[#allocation169_spill] sm:$0xff]  ;;  %v14573_v44 = vld [vmem:[#allocation135_spill] sm:$0xff] }
 0x5aa   : > { %v7498_v59 = vpack.c.bf16 %v5421_v29, %v5409_v41  ;;  %v5432_v49 = vsub.f32 %v14564_v58, %v13519_v46  ;;  %v7194_v53 = vpack.c.bf16 %v10416_v20, %v10375_v39  ;;  %v5439_v5 = vand.u32 4294901760, %v14568_v35  ;;  %7191 = vmatprep.subr.bf16.mxu0 %v7190_v19  ;;  %v14570_v28 = vld [vmem:[#allocation149_spill] sm:$0xff]  ;;  %v14572_v29 = vld [vmem:[#allocation139_spill] sm:$0xff]  ;;  %v14574_v19 = vld [vmem:[#allocation174_spill] sm:$0xff] }
 0x5ab   : > { %v4308_v55 = vsub.f32 %v14566_v27, %v14567_v13  ;;  %v5444_v22 = vsub.f32 %v14565_v60, %v13524_v17  ;;  %v5451_v18 = vand.u32 4294901760, %v14570_v28  ;;  %v14571_v41 = vld [vmem:[#allocation73_spill] sm:$0xff]  ;;  %v7198_v20 = vpack.c.bf16 %v10629_v9, %v10608_v38  ;;  %v14575_v27 = vld [vmem:[#allocation146_spill] sm:$0xff]  ;;  %v14589_v38 = vld [vmem:[#allocation87_spill] sm:$0xff] }
 0x5ac   : > { %v5433_v31 = vand.u32 4294901760, %v5432_v49  ;;  %v7196_v13 = vpack.c.bf16 %v14572_v29, %v14571_v41  ;;  %7497 = vmatpush1.bf16.msra.mxu1 %v7496_v2  ;;  %v4303_v35 = vand.u32 4294901760, %v4302_v7  ;;  %v7200_v50 = vpack.c.bf16 %v14575_v27, %v14574_v19  ;;  %v14577_v2 = vld [vmem:[#allocation127_spill] sm:$0xff]  ;;  %v14592_v41 = vld [vmem:[#allocation38_spill] sm:$0xff] }
 0x5ad   : > { %v5445_v39 = vand.u32 4294901760, %v5444_v22  ;;  %v7504_v16 = vpack.c.bf16 %v5451_v18, %v5439_v5  ;;  %7499 = vmatprep.subr.bf16.mxu1 %v7498_v59  ;;  %7193 = vmatpush1.bf16.msra.mxu0 %v7192_v33  ;;  %v4309_v17 = vand.u32 4294901760, %v4308_v55  ;;  %v7506_v49 = vpack.c.bf16 %v14481_v43, %v14480_v3  ;;  %v14578_v5 = vld [vmem:[#allocation82_spill] sm:$0xff]  ;;  %v14579_v18 = vld [vmem:[#allocation129_spill] sm:$0xff]  ;;  %v14581_v43 = vld [vmem:[#allocation132_spill] sm:$0xff] }
 0x5ae   : > { %v7202_v28 = vpack.c.bf16 %v14483_v40, %v14482_v12  ;;  %4304 = vmatprep.subr.mxu0 %v4303_v35  ;;  %v14576_v9 = vand.u32 4294901760, %v14569_v36  ;;  %v7508_v22 = vpack.c.bf16 %v14578_v5, %v14577_v2  ;;  %v7510_v59 = vpack.c.bf16 %v14579_v18, %v14489_v4  ;;  %v14582_v3 = vld [vmem:[#allocation119_spill] sm:$0xff]  ;;  %v14583_v40 = vld [vmem:[#allocation65_spill] sm:$0xff]  ;;  %v14588_v2 = vld [vmem:[#allocation130_spill] sm:$0xff] }
 0x5af   : > { %v7502_v46 = vpack.c.bf16 %v5445_v39, %v5433_v31  ;;  %v14580_v55 = vand.u32 4294901760, %v14573_v44  ;;  %v7204_v27 = vpack.c.bf16 %v14582_v3, %v14581_v43  ;;  %v14584_v35 = vld [vmem:[#allocation95_spill] sm:$0xff]  ;;  %v14585_v31 = vld [vmem:[#allocation40_spill] sm:$0xff]  ;;  %v14586_v12 = vld [vmem:[#allocation117_spill] sm:$0xff]  ;;  %v7208_v18 = vpack.c.bf16 %v14589_v38, %v14588_v2 }
 0x5b0   : > { %v5462_v7 = vsub.f32 %v14569_v36, %v14576_v9  ;;  %v7206_v39 = vpack.c.bf16 %v14584_v35, %v14583_v40  ;;  %v7512_v19 = vpack.c.bf16 %v14586_v12, %v14585_v31  ;;  %7501 = vmatpush1.bf16.msra.mxu1 %v7500_v23  ;;  %v14587_v9 = vld [vmem:[#allocation39_spill] sm:$0xff]  ;;  %v14590_v4 = vld [vmem:[#allocation24_spill] sm:$0xff]  ;;  %v14593_v3 = vld [vmem:[#allocation138_spill] sm:$0xff]  ;;  %v14623_v43 = vand.u32 4294901760, %v11435_v24 }
 0x5b1   : > { %v5456_v33 = vsub.f32 %v14573_v44, %v14580_v55  ;;  %v7514_v5 = vpack.c.bf16 %v14500_v26, %v14587_v9  ;;  %v7210_v29 = vpack.c.bf16 %v14590_v4, %v14504_v54  ;;  %v14591_v55 = vld [vmem:[#allocation61_spill] sm:$0xff]  ;;  %7503 = vmatprep.subr.bf16.mxu1 %v7502_v46  ;;  %4310 = vmatpush1.msra.mxu0 %v4309_v17  ;;  %v14595_v12 = vld [vmem:[#allocation51_spill] sm:$0xff]  ;;  %v14597_v38 = vld [vmem:[#allocation136_spill] sm:$0xff] }
 0x5b2   : > { %v7516_v36 = vpack.c.bf16 %v14592_v41, %v14591_v55  ;;  %v7518_v35 = vpack.c.bf16 %v14510_v6, %v14593_v3  ;;  %v14594_v40 = vld [vmem:[#allocation29_spill] sm:$0xff]  ;;  %v7214_v26 = vpack.c.bf16 %v14512_v14, %v11435_v24  ;;  %7195 = vmatprep.subr.bf16.mxu0 %v7194_v53  ;;  %v7522_v41 = vpack.c.bf16 %v14517_v57, %v14516_v45  ;;  %v14599_v46 = vld [vmem:[#allocation178_spill] sm:$0xff]  ;;  %v14600_v17 = vld [vmem:[#allocation172_spill] sm:$0xff] }
 0x5b3   : > { %v7212_v23 = vpack.c.bf16 %v14595_v12, %v14594_v40  ;;  %v14596_v9 = vld [vmem:[#allocation197_spill] sm:$0xff]  ;;  %v7216_v55 = vpack.c.bf16 %v14600_v17, %v14599_v46  ;;  %v5457_v6 = vand.u32 4294901760, %v5456_v33  ;;  %v14601_v3 = vld [vmem:[#allocation155_spill] sm:$0xff]  ;;  %v14604_v31 = vld [vmem:[#allocation46_spill] sm:$0xff]  ;;  %v5463_v44 = vand.u32 4294901760, %v5462_v7 }
 0x5b4   : > { %4324 = vmatmul.mubr.f32.vlgmr.msra.gmra.mrb[2].mxu0 %v14596_v9  ;;  %v14598_v2 = vld [vmem:[#allocation133_spill] sm:$0xff]  ;;  %7505 = vmatpush1.bf16.msra.mxu1 %v7504_v16  ;;  %v14606_v33 = vld [vmem:[#allocation194_spill] sm:$0xff]  ;;  %v14608_v17 = vld [vmem:[#allocation55_spill] sm:$0xff]  ;;  %v14630_v24 = vand.u32 4294901760, %v11605_v8 }
 0x5b5   : > { %v7520_v4 = vpack.c.bf16 %v14598_v2, %v14597_v38  ;;  %7197 = vmatpush1.bf16.msra.mxu0 %v7196_v13  ;;  %v14602_v54 = vld [vmem:[#allocation125_spill] sm:$0xff]  ;;  %5458 = vmatprep.subr.mxu1 %v5457_v6  ;;  %v14613_v46 = vld [vmem:[#allocation84_spill] sm:$0xff]  ;;  %v14614_v12 = vld [vmem:[#allocation131_spill] sm:$0xff]  ;;  %v14624_v13 = vand.u32 4294901760, %v14512_v14 }
 0x5b6   : > { %7199 = vmatprep.subr.bf16.mxu0 %v7198_v20  ;;  %v14603_v53 = vld [vmem:[#allocation33_spill] sm:$0xff]  ;;  %4504 = vmatprep.mubr.f32.mxu0 %v14606_v33  ;;  %v14616_v7 = vld [vmem:[#allocation12_spill] sm:$0xff]  ;;  %v14620_v40 = vld [vmem:[#allocation15_spill] sm:$0xff] }
 0x5b7   : > { %v14605_v2 = vld [vmem:[#allocation49_spill] sm:$0xff]  ;;  %v14621_v20 = vld [vmem:[#allocation154_spill] sm:$0xff]  ;;  %v12258_v6 = vpack.c.bf16 %v14624_v13, %v14623_v43  ;;  %v14631_v43 = vand.u32 4294901760, %v11725_v61  ;;  %v14635_v13 = vld [vmem:[#allocation180_spill] sm:$0xff] }
 0x5b8   : > { %5464 = vmatpush1.msra.mxu1 %v5463_v44  ;;  %v14622_v44 = vld [vmem:[#allocation4_spill] sm:$0xff] }
 0x5b9   : > { %7201 = vmatpush1.bf16.msra.mxu0 %v7200_v50  ;;  %7507 = vmatprep.subr.bf16.mxu1 %v7506_v49  ;;  %v14617_v50 = vld [vmem:[#allocation63_spill] sm:$0xff]  ;;  %v14618_v49 = vld [vmem:[#allocation104_spill] sm:$0xff] }
 0x5ba   : > { %7203 = vmatprep.subr.bf16.mxu0 %v7202_v28  ;;  %5478 = vmatmul.mubr.f32.vlgmr.msra.gmra.mrb[2].mxu1 %v14596_v9  ;;  %v14615_v28 = vld [vmem:[#allocation78_spill] sm:$0xff]  ;;  %v14619_v9 = vld [vmem:[#allocation79_spill] sm:$0xff] }
 0x5bb   : > { %7509 = vmatpush1.bf16.msra.mxu1 %v7508_v22  ;;  %5658 = vmatprep.mubr.f32.mxu1 %v14606_v33  ;;  %v14636_v33 = vand.u32 4294901760, %v14635_v13 }
 0x5bc   : > { %7511 = vmatprep.subr.bf16.mxu1 %v7510_v59  ;;  %v14626_v59 = vand.u32 4294901760, %v14517_v57  ;;  %v14632_v57 = vand.u32 4294901760, %v11750_v1 }
 0x5bd   : > { %7205 = vmatpush1.bf16.msra.mxu0 %v7204_v27  ;;  %v14625_v27 = vand.u32 4294901760, %v14516_v45 }
 0x5be   : > { %7207 = vmatprep.subr.bf16.mxu0 %v7206_v39  ;;  %v14627_v39 = vand.u32 4294901760, %v11514_v25  ;;  %v12282_v45 = vpack.c.bf16 %v14632_v57, %v14631_v43  ;;  %v14647_v43 = vand.u32 4294901760, %v14540_v11 }
 0x5bf   : > { %7513 = vmatpush1.bf16.msra.mxu1 %v7512_v19  ;;  %v12264_v16 = vpack.c.bf16 %v14626_v59, %v14625_v27  ;;  %v14628_v19 = vand.u32 4294901760, %v14521_v37  ;;  %v14638_v59 = vand.u32 4294901760, %v14534_v10 }
 0x5c0   : > { %7515 = vmatprep.subr.bf16.mxu1 %v7514_v5 }
 0x5c1   : > { %7209 = vmatpush1.bf16.msra.mxu0 %v7208_v18  ;;  %v12270_v5 = vpack.c.bf16 %v14628_v19, %v14627_v39  ;;  %v14639_v39 = vand.u32 4294901760, %v14535_v56 }
 0x5c2   : > { %7211 = vmatprep.subr.bf16.mxu0 %v7210_v29  ;;  %v14629_v29 = vand.u32 4294901760, %v11598_v51 }
 0x5c3   : > { %7517 = vmatpush1.bf16.msra.mxu1 %v7516_v36  ;;  %v14633_v36 = vld [vmem:[#allocation183_spill] sm:$0xff]  ;;  %v12294_v19 = vpack.c.bf16 %v14639_v39, %v14638_v59  ;;  %v14652_v59 = vand.u32 4294901760, %v14542_v21 }
 0x5c4   : > { %v12276_v14 = vpack.c.bf16 %v14630_v24, %v14629_v29  ;;  %7519 = vmatprep.subr.bf16.mxu1 %v7518_v35  ;;  %v14634_v18 = vand.u32 4294901760, %v14633_v36  ;;  %v14641_v35 = vld [vmem:[#allocation205_spill] sm:$0xff] }
 0x5c5   : > { %7213 = vmatpush1.bf16.msra.mxu0 %v7212_v23  ;;  %14640 = vst [vmem:[#allocation160_spill] sm:$0xff] %v12294_v19  ;;  %v14642_v23 = vand.u32 4294901760, %v14641_v35  ;;  %v14643_v29 = vld [vmem:[#allocation201_spill] sm:$0xff]  ;;  %v14654_v19 = vand.u32 4294901760, %v14545_v0 }
 0x5c6   : > { %7215 = vmatprep.subr.bf16.mxu0 %v7214_v26  ;;  %v12288_v27 = vpack.c.bf16 %v14636_v33, %v14634_v18  ;;  %v14644_v24 = vand.u32 4294901760, %v14643_v29  ;;  %v14646_v26 = vand.u32 4294901760, %v14539_v15  ;;  %v14649_v18 = vld [vmem:[#allocation50_spill] sm:$0xff]  ;;  %v14650_v33 = vld [vmem:[#allocation72_spill] sm:$0xff] }
 0x5c7   : > { %7521 = vmatpush1.bf16.msra.mxu1 %v7520_v4  ;;  %v7218_v38 = vpack.c.bf16 %v14650_v33, %v14649_v18  ;;  %v14658_v4 = vand.u32 4294901760, %v14550_v62 }
 0x5c8   : > { %14637 = vst [vmem:[#allocation31_spill] sm:$0xff] %v12288_v27  ;;  %v12300_v22 = vpack.c.bf16 %v14644_v24, %v14642_v23  ;;  %v12306_v57 = vpack.c.bf16 %v14647_v43, %v14646_v26  ;;  %v14651_v27 = vand.u32 4294901760, %v14541_v34  ;;  %v14655_v23 = vand.u32 4294901760, %v14546_v48  ;;  %7523 = vmatprep.subr.bf16.mxu1 %v7522_v41  ;;  %v14664_v41 = vld [vmem:[#allocation102_spill] sm:$0xff] }
 0x5c9   : > { %7217 = vmatpush1.bf16.msra.mxu0 %v7216_v55  ;;  %v14657_v26 = vand.u32 4294901760, %v14549_v32  ;;  %v14665_v55 = vld [vmem:[#allocation69_spill] sm:$0xff] }
 0x5ca   : > { %14645 = vst [vmem:[#allocation159_spill] sm:$0xff] %v12300_v22  ;;  %14648 = vst [vmem:[#allocation105_spill] sm:$0xff] %v12306_v57  ;;  %v12314_v39 = vpack.c.bf16 %v14652_v59, %v14651_v27  ;;  %v12320_v24 = vpack.c.bf16 %v14655_v23, %v14654_v19  ;;  %7219 = vmatprep.subr.bf16.mxu0 %v7218_v38  ;;  %v14659_v57 = vand.u32 4294901760, %v14553_v52  ;;  %v14660_v27 = vand.u32 4294901760, %v14554_v63 }
 0x5cb   : > { %v12326_v43 = vpack.c.bf16 %v14658_v4, %v14657_v26  ;;  %v14662_v19 = vand.u32 4294901760, %v14558_v47  ;;  %v14666_v22 = vand.u32 4294901760, %v14564_v58  ;;  %v14667_v26 = vand.u32 4294901760, %v14565_v60 }
 0x5cc   : > { %14653 = vst [vmem:[#allocation19_spill] sm:$0xff] %v12314_v39  ;;  %14656 = vst [vmem:[#allocation32_spill] sm:$0xff] %v12320_v24  ;;  %v12332_v59 = vpack.c.bf16 %v14660_v27, %v14659_v57  ;;  %v14661_v39 = vand.u32 4294901760, %v14557_v30  ;;  %v7220_v24 = vpack.c.bf16 %v14665_v55, %v14664_v41  ;;  %v14668_v4 = vpack.c.bf16 %v14602_v54, %v14601_v3  ;;  %v14670_v27 = vld [vmem:[#allocation114_spill] sm:$0xff] }
 0x5cd   : > { %v12346_v38 = vpack.c.bf16 %v14667_v26, %v14666_v22  ;;  %v7222_v57 = vpack.c.bf16 %v11605_v8, %v11598_v51  ;;  %v14672_v22 = vpack.c.bf16 %v14604_v31, %v14603_v53  ;;  %v7226_v26 = vpack.c.bf16 %v11750_v1, %v11725_v61  ;;  %v14674_v51 = vld [vmem:[#allocation75_spill] sm:$0xff]  ;;  %v14679_v1 = vld [vmem:[#allocation182_spill] sm:$0xff] }
 0x5ce   : > { %v12338_v23 = vpack.c.bf16 %v14662_v19, %v14661_v39  ;;  %7525 = vmatpush1.bf16.msra.mxu1 %v14668_v4  ;;  %v14669_v39 = vpack.c.bf16 %v14521_v37, %v11514_v25  ;;  %7221 = vmatpush1.bf16.msra.mxu0 %v7220_v24  ;;  %v14671_v19 = vld [vmem:[#allocation126_spill] sm:$0xff]  ;;  %v14673_v4 = vpack.c.bf16 %v14605_v2, %v14528_v42  ;;  %v14675_v25 = vld [vmem:[#allocation48_spill] sm:$0xff] }
 0x5cf   : > { %7223 = vmatprep.subr.bf16.mxu0 %v7222_v57  ;;  %v7532_v8 = vpack.c.bf16 %v14675_v25, %v14674_v51  ;;  %v7534_v37 = vpack.c.bf16 %v14635_v13, %v14633_v36  ;;  %v14676_v24 = vld [vmem:[#allocation200_spill] sm:$0xff]  ;;  %v14677_v57 = vld [vmem:[#allocation198_spill] sm:$0xff]  ;;  %v14678_v61 = vpack.c.bf16 %v14535_v56, %v14534_v10  ;;  %v14681_v36 = vld [vmem:[#allocation59_spill] sm:$0xff]  ;;  %v14686_v10 = vpack.c.bf16 %v14542_v21, %v14541_v34 }
 0x5d0   : > { %14663 = vst [vmem:[#allocation66_spill] sm:$0xff] %v12338_v23  ;;  %7527 = vmatprep.subr.bf16.mxu1 %v14669_v39  ;;  %v7224_v23 = vpack.c.bf16 %v14671_v19, %v14670_v27  ;;  %v7228_v39 = vpack.c.bf16 %v14677_v57, %v14676_v24  ;;  %v14682_v13 = vpack.c.bf16 %v14608_v17, %v14681_v36 }
 0x5d1   : > { %v14695_v21 = vpack.c.bf16 %v14614_v12, %v14613_v46  ;;  %v14696_v34 = vpack.c.bf16 %v14554_v63, %v14553_v52  ;;  %v14702_v52 = vpack.c.bf16 %v14565_v60, %v14564_v58  ;;  %v14703_v63 = vld [vmem:[#allocation166_spill] sm:$0xff]  ;;  %v14711_v60 = vld [vmem:[#allocation175_spill] sm:$0xff]  ;;  %v14712_v58 = vld [vmem:[#allocation169_spill] sm:$0xff] }
 0x5d2   : > { %7529 = vmatpush1.bf16.msra.mxu1 %v14672_v22  ;;  %7225 = vmatpush1.bf16.msra.mxu0 %v7224_v23  ;;  %v14680_v22 = vld [vmem:[#allocation3_spill] sm:$0xff] }
 0x5d3   : > { %7531 = vmatprep.subr.bf16.mxu1 %v14673_v4  ;;  %7227 = vmatprep.subr.bf16.mxu0 %v7226_v26  ;;  %v7536_v23 = vpack.c.bf16 %v14680_v22, %v14679_v1  ;;  %v7538_v26 = vpack.c.bf16 %v14643_v29, %v14641_v35  ;;  %v14683_v4 = vpack.c.bf16 %v14540_v11, %v14539_v15  ;;  %v14688_v35 = vld [vmem:[#allocation177_spill] sm:$0xff] }
 0x5d4   : > { %v14694_v11 = vpack.c.bf16 %v14550_v62, %v14549_v32  ;;  %v14699_v62 = vpack.c.bf16 %v14618_v49, %v14617_v50  ;;  %v14700_v32 = vld [vmem:[#allocation148_spill] sm:$0xff] }
 0x5d6   : > { %7533 = vmatpush1.bf16.msra.mxu1 %v7532_v8  ;;  %7229 = vmatpush1.bf16.msra.mxu0 %v7228_v39  ;;  %v14684_v8 = vld [vmem:[#allocation204_spill] sm:$0xff] }
 0x5d7   : > { %7535 = vmatprep.subr.bf16.mxu1 %v7534_v37  ;;  %7231 = vmatprep.subr.bf16.mxu0 %v14678_v61  ;;  %v14685_v37 = vld [vmem:[#allocation202_spill] sm:$0xff]  ;;  %v14687_v39 = vld [vmem:[#allocation156_spill] sm:$0xff]  ;;  %v14690_v61 = vpack.c.bf16 %v14546_v48, %v14545_v0  ;;  %v14697_v0 = vpack.c.bf16 %v14616_v7, %v14615_v28  ;;  %v14698_v48 = vpack.c.bf16 %v14558_v47, %v14557_v30  ;;  %v14705_v30 = vld [vmem:[#allocation207_spill] sm:$0xff] }
 0x5d8   : > { %v7540_v56 = vpack.c.bf16 %v14685_v37, %v14684_v8  ;;  %v14689_v29 = vpack.c.bf16 %v14687_v39, %v14688_v35  ;;  %v14706_v47 = vld [vmem:[#allocation137_spill] sm:$0xff] }
 0x5da   : > { %7537 = vmatpush1.bf16.msra.mxu1 %v7536_v23  ;;  %7233 = vmatpush1.bf16.msra.mxu0 %v14682_v13  ;;  %v14691_v23 = vld [vmem:[#allocation83_spill] sm:$0xff]  ;;  %v14701_v13 = vpack.c.bf16 %v14620_v40, %v14619_v9 }
 0x5db   : > { %7539 = vmatprep.subr.bf16.mxu1 %v7538_v26  ;;  %7235 = vmatprep.subr.bf16.mxu0 %v14683_v4  ;;  %v14692_v26 = vld [vmem:[#allocation5_spill] sm:$0xff]  ;;  %v14704_v4 = vld [vmem:[#allocation107_spill] sm:$0xff] }
 0x5dc   : > { %v14693_v15 = vpack.c.bf16 %v14691_v23, %v14692_v26 }
 0x5de   : > { %7541 = vmatpush1.bf16.msra.mxu1 %v7540_v56  ;;  %7237 = vmatpush1.bf16.msra.mxu0 %v14689_v29  ;;  %v14707_v56 = vld [vmem:[#allocation196_spill] sm:$0xff]  ;;  %v14709_v29 = vld [vmem:[#allocation99_spill] sm:$0xff] }
 0x5df   : > { %7543 = vmatprep.subr.bf16.mxu1 %v14686_v10  ;;  %7239 = vmatprep.subr.bf16.mxu0 %v14690_v61  ;;  %v14708_v10 = vpack.c.bf16 %v14622_v44, %v14621_v20  ;;  %v14710_v61 = vld [vmem:[#allocation135_spill] sm:$0xff]  ;;  %v14784_v44 = vld [vmem:[#allocation110_spill] sm:$0xff] }
 0x5e2   : > { %7545 = vmatpush1.bf16.msra.mxu1 %v14693_v15  ;;  %7241 = vmatpush1.bf16.msra.mxu0 %v14695_v21  ;;  %v14713_v15 = vld [vmem:[#allocation100_spill] sm:$0xff]  ;;  %v14715_v21 = vld [vmem:[#allocation106_spill] sm:$0xff] }
 0x5e3   : > { %7547 = vmatprep.subr.bf16.mxu1 %v14694_v11  ;;  %7243 = vmatprep.subr.bf16.mxu0 %v14696_v34  ;;  %v14714_v11 = vld [vmem:[#allocation167_spill] sm:$0xff]  ;;  %v14716_v34 = vld [vmem:[#allocation42_spill] sm:$0xff] }
 0x5e6   : > { %7549 = vmatpush1.bf16.msra.mxu1 %v14697_v0  ;;  %7245 = vmatpush1.bf16.msra.mxu0 %v14699_v62  ;;  %v14717_v0 = vld [vmem:[#allocation14_spill] sm:$0xff]  ;;  %v14719_v62 = vld [vmem:[#allocation16_spill] sm:$0xff] }
 0x5e7   : > { %7551 = vmatprep.subr.bf16.mxu1 %v14698_v48  ;;  %4488 = vmatprep.subr.mxu0 %v14700_v32  ;;  %v14718_v48 = vld [vmem:[#allocation93_spill] sm:$0xff] }
 0x5ea   : > { %7553 = vmatpush1.bf16.msra.mxu1 %v14701_v13  ;;  %4491 = vmatpush1.msra.mxu0 %v14703_v63  ;;  %v14720_v13 = vld [vmem:[#allocation43_spill] sm:$0xff] }
 0x5eb   : > { %7555 = vmatprep.subr.bf16.mxu1 %v14702_v52  ;;  %7247 = vmatprep.subr.bf16.mxu0 %v14704_v4  ;;  %v14721_v52 = vld [vmem:[#allocation124_spill] sm:$0xff] }
 0x5ec   : > { %4507 = vmatmul.mubr.f32.vlgmr.msra.gmra.mrb[2].mxu0 %v14705_v30 }
 0x5ed   : > { %7249 = vmatpush1.bf16.msra.mxu0 %v14706_v47  ;;  %4634 = vmatprep.mubr.f32.mxu0 %v14707_v56 }
 0x5ee   : > { %7557 = vmatpush1.bf16.msra.mxu1 %v14708_v10  ;;  %7251 = vmatprep.subr.bf16.mxu0 %v14709_v29  ;;  %v14722_v10 = vld [vmem:[#allocation47_spill] sm:$0xff] }
 0x5ef   : > { %5642 = vmatprep.subr.mxu1 %v14710_v61 }
 0x5f1   : > { %7253 = vmatpush1.bf16.msra.mxu0 %v14711_v60 }
 0x5f2   : > { %5645 = vmatpush1.msra.mxu1 %v14712_v58  ;;  %7255 = vmatprep.subr.bf16.mxu0 %v14713_v15  ;;  %v14762_v15 = vld [vmem:[#allocation45_spill] sm:$0xff] }
 0x5f3   : > { %7559 = vmatprep.subr.bf16.mxu1 %v14714_v11  ;;  %5661 = vmatmul.mubr.f32.vlgmr.msra.gmra.mrb[2].mxu1 %v14705_v30  ;;  %v14723_v11 = vld [vmem:[#allocation62_spill] sm:$0xff]  ;;  %v14724_v30 = vld [vmem:[#allocation143_spill] sm:$0xff] }
 0x5f4   : > { %7561 = vmatpush1.bf16.msra.mxu1 %v14715_v21  ;;  %5788 = vmatprep.mubr.f32.mxu1 %v14707_v56  ;;  %v14725_v21 = vld [vmem:[#allocation28_spill] sm:$0xff]  ;;  %v14726_v56 = vld [vmem:[#allocation22_spill] sm:$0xff] }
 0x5f5   : > { %7563 = vmatprep.subr.bf16.mxu1 %v14716_v34  ;;  %7257 = vmatpush1.bf16.msra.mxu0 %v14717_v0  ;;  %v14727_v34 = vld [vmem:[#allocation6_spill] sm:$0xff] }
 0x5f6   : > { %7259 = vmatprep.subr.bf16.mxu0 %v14718_v48  ;;  %v14728_v0 = vld [vmem:[#allocation158_spill] sm:$0xff]  ;;  %v14729_v48 = vld [vmem:[#allocation164_spill] sm:$0xff] }
 0x5f8   : > { %7565 = vmatpush1.bf16.msra.mxu1 %v14719_v62  ;;  %v14730_v62 = vld [vmem:[#allocation56_spill] sm:$0xff] }
 0x5f9   : > { %7567 = vmatprep.subr.bf16.mxu1 %v14720_v13  ;;  %7261 = vmatpush1.bf16.msra.mxu0 %v14721_v52  ;;  %v14731_v13 = vld [vmem:[#allocation140_spill] sm:$0xff]  ;;  %v14732_v52 = vld [vmem:[#allocation71_spill] sm:$0xff] }
 0x5fa   : > { %7263 = vmatprep.subr.bf16.mxu0 %v14722_v10  ;;  %v14733_v10 = vld [vmem:[#allocation81_spill] sm:$0xff] }
 0x5fc   : > { %7569 = vmatpush1.bf16.msra.mxu1 %v14723_v11  ;;  %v14734_v11 = vld [vmem:[#allocation179_spill] sm:$0xff] }
 0x5fd   : > { %7571 = vmatprep.subr.bf16.mxu1 %v14724_v30  ;;  %7265 = vmatpush1.bf16.msra.mxu0 %v14725_v21  ;;  %v14735_v30 = vld [vmem:[#allocation26_spill] sm:$0xff]  ;;  %v14736_v21 = vld [vmem:[#allocation113_spill] sm:$0xff] }
 0x5fe   : > { %7267 = vmatprep.subr.bf16.mxu0 %v14726_v56  ;;  %v14737_v56 = vld [vmem:[#allocation108_spill] sm:$0xff] }
 0x600   : > { %7573 = vmatpush1.bf16.msra.mxu1 %v14727_v34  ;;  %v14738_v34 = vld [vmem:[#allocation195_spill] sm:$0xff] }
 0x601   : > { %7575 = vmatprep.subr.bf16.mxu1 %v14728_v0  ;;  %7269 = vmatpush1.bf16.msra.mxu0 %v14729_v48  ;;  %v14739_v0 = vld [vmem:[#allocation57_spill] sm:$0xff]  ;;  %v14740_v48 = vld [vmem:[#allocation184_spill] sm:$0xff] }
 0x602   : > { %7271 = vmatprep.subr.bf16.mxu0 %v14730_v62  ;;  %v14741_v62 = vld [vmem:[#allocation199_spill] sm:$0xff] }
 0x604   : > { %7577 = vmatpush1.bf16.msra.mxu1 %v14731_v13  ;;  %v14742_v13 = vld [vmem:[#allocation186_spill] sm:$0xff] }
 0x605   : > { %7579 = vmatprep.subr.bf16.mxu1 %v14732_v52  ;;  %7273 = vmatpush1.bf16.msra.mxu0 %v14733_v10  ;;  %v14743_v52 = vld [vmem:[#allocation181_spill] sm:$0xff]  ;;  %v14744_v10 = vld [vmem:[#allocation206_spill] sm:$0xff] }
 0x606   : > { %7275 = vmatprep.subr.bf16.mxu0 %v14734_v11  ;;  %v14745_v11 = vld [vmem:[#allocation118_spill] sm:$0xff] }
 0x608   : > { %7581 = vmatpush1.bf16.msra.mxu1 %v14735_v30  ;;  %v14746_v30 = vld [vmem:[#allocation187_spill] sm:$0xff] }
 0x609   : > { %7583 = vmatprep.subr.bf16.mxu1 %v14736_v21  ;;  %7277 = vmatpush1.bf16.msra.mxu0 %v14737_v56  ;;  %v14747_v21 = vld [vmem:[#allocation203_spill] sm:$0xff]  ;;  %v14748_v56 = vld [vmem:[#allocation188_spill] sm:$0xff] }
 0x60a   : > { %7279 = vmatprep.subr.bf16.mxu0 %v14738_v34  ;;  %v14749_v34 = vld [vmem:[#allocation157_spill] sm:$0xff] }
 0x60c   : > { %7585 = vmatpush1.bf16.msra.mxu1 %v14739_v0  ;;  %v14750_v0 = vld [vmem:[#allocation189_spill] sm:$0xff] }
 0x60d   : > { %7587 = vmatprep.subr.bf16.mxu1 %v14740_v48  ;;  %7281 = vmatpush1.bf16.msra.mxu0 %v14741_v62  ;;  %v14751_v48 = vld [vmem:[#allocation147_spill] sm:$0xff]  ;;  %v14752_v62 = vld [vmem:[#allocation190_spill] sm:$0xff] }
 0x60e   : > { %7283 = vmatprep.subr.bf16.mxu0 %v14742_v13  ;;  %v14753_v13 = vld [vmem:[#allocation88_spill] sm:$0xff] }
 0x610   : > { %7589 = vmatpush1.bf16.msra.mxu1 %v14743_v52  ;;  %v14754_v52 = vld [vmem:[#allocation191_spill] sm:$0xff] }
 0x611   : > { %7591 = vmatprep.subr.bf16.mxu1 %v14744_v10  ;;  %7285 = vmatpush1.bf16.msra.mxu0 %v14745_v11  ;;  %v14755_v10 = vld [vmem:[#allocation60_spill] sm:$0xff] }
 0x612   : > { %7287 = vmatprep.subr.bf16.mxu0 %v14746_v30  ;;  %v14756_v11 = vld [vmem:[#allocation192_spill] sm:$0xff]  ;;  %v14757_v30 = vld [vmem:[#allocation86_spill] sm:$0xff] }
 0x614   : > { %7593 = vmatpush1.bf16.msra.mxu1 %v14747_v21  ;;  %v14758_v21 = vld [vmem:[#allocation145_spill] sm:$0xff] }
 0x615   : > { %7595 = vmatprep.subr.bf16.mxu1 %v14748_v56  ;;  %7289 = vmatpush1.bf16.msra.mxu0 %v14749_v34  ;;  %v14759_v56 = vld [vmem:[#allocation70_spill] sm:$0xff] }
 0x616   : > { %7291 = vmatprep.subr.bf16.mxu0 %v14750_v0  ;;  %v14760_v34 = vld [vmem:[#allocation58_spill] sm:$0xff] }
 0x617   : > { %v14761_v0 = vand.u32 4294901760, %v14760_v34 }
 0x618   : > { %7597 = vmatpush1.bf16.msra.mxu1 %v14751_v48  ;;  %v14763_v48 = vand.u32 4294901760, %v14762_v15  ;;  %v14775_v15 = vld [vmem:[#allocation94_spill] sm:$0xff] }
 0x619   : > { %7599 = vmatprep.subr.bf16.mxu1 %v14752_v62  ;;  %7293 = vmatpush1.bf16.msra.mxu0 %v14753_v13  ;;  %v14764_v62 = vld [vmem:[#allocation193_spill] sm:$0xff]  ;;  %v14765_v13 = vld [vmem:[#allocation152_spill] sm:$0xff] }
 0x61a   : > { %7295 = vmatprep.subr.bf16.mxu0 %v14754_v52  ;;  %v7298_v58 = vpack.c.bf16 %v14763_v48, %v14761_v0  ;;  %v14766_v52 = vld [vmem:[#allocation73_spill] sm:$0xff] }
 0x61b   : > { %v14767_v60 = vand.u32 4294901760, %v14766_v52  ;;  %v14776_v0 = vld [vmem:[#allocation153_spill] sm:$0xff]  ;;  %v14778_v52 = vld [vmem:[#allocation174_spill] sm:$0xff] }
 0x61c   : > { %7601 = vmatpush1.bf16.msra.mxu1 %v14755_v10  ;;  %v14768_v10 = vld [vmem:[#allocation139_spill] sm:$0xff]  ;;  %v14777_v48 = vld [vmem:[#allocation25_spill] sm:$0xff] }
 0x61d   : > { %7603 = vmatprep.subr.bf16.mxu1 %v14756_v11  ;;  %7297 = vmatpush1.bf16.msra.mxu0 %v14757_v30  ;;  %v14769_v61 = vand.u32 4294901760, %v14768_v10  ;;  %v14770_v30 = vld [vmem:[#allocation208_spill] sm:$0xff]  ;;  %v14780_v10 = vld [vmem:[#allocation146_spill] sm:$0xff] }
 0x61e   : > { %4618 = vmatprep.subr.mxu0 %v14758_v21  ;;  %v14771_v21 = vld [vmem:[#allocation161_spill] sm:$0xff] }
 0x61f   : > { %v7300_v11 = vpack.c.bf16 %v14769_v61, %v14767_v60  ;;  %v14772_v29 = vand.u32 4294901760, %v14771_v21  ;;  %v14781_v61 = vand.u32 4294901760, %v14780_v10  ;;  %v14785_v21 = vand.u32 4294901760, %v14784_v44 }
 0x620   : > { %7605 = vmatpush1.bf16.msra.mxu1 %v14759_v56  ;;  %v14773_v56 = vld [vmem:[#allocation173_spill] sm:$0xff] }
 0x621   : > { %7607 = vmatprep.subr.bf16.mxu1 %v14764_v62  ;;  %4620 = vmatpush1.msra.mxu0 %v14765_v13  ;;  %v14774_v47 = vand.u32 4294901760, %v14773_v56  ;;  %v14779_v13 = vand.u32 4294901760, %v14778_v52  ;;  %v14793_v52 = vld [vmem:[#allocation82_spill] sm:$0xff] }
 0x622   : > { %7299 = vmatprep.subr.bf16.mxu0 %v7298_v58  ;;  %4638 = vmatmul.mubr.f32.vlgmr.msra.gmra.mrb[2].mxu0 %v14770_v30  ;;  %v14782_v58 = vld [vmem:[#allocation64_spill] sm:$0xff]  ;;  %v14794_v63 = vand.u32 4294901760, %v14793_v52 }
 0x623   : > { %v7302_v34 = vpack.c.bf16 %v14774_v47, %v14772_v29  ;;  %7301 = vmatpush1.bf16.msra.mxu0 %v7300_v11  ;;  %4871 = vmatprep.mubr.f32.mxu0 %v14775_v15  ;;  %v7304_v60 = vpack.c.bf16 %v14781_v61, %v14779_v13  ;;  %v14783_v62 = vand.u32 4294901760, %v14782_v58  ;;  %v14786_v47 = vld [vmem:[#allocation98_spill] sm:$0xff]  ;;  %v14788_v11 = vld [vmem:[#allocation77_spill] sm:$0xff]  ;;  %v14799_v58 = vld [vmem:[#allocation132_spill] sm:$0xff] }
 0x624   : > { %7609 = vmatpush1.bf16.msra.mxu1 %v14776_v0  ;;  %v14787_v29 = vand.u32 4294901760, %v14786_v47  ;;  %v14789_v56 = vand.u32 4294901760, %v14788_v11  ;;  %v14790_v0 = vld [vmem:[#allocation121_spill] sm:$0xff]  ;;  %v14795_v13 = vld [vmem:[#allocation18_spill] sm:$0xff]  ;;  %v14801_v47 = vld [vmem:[#allocation119_spill] sm:$0xff] }
 0x625   : > { %7303 = vmatprep.subr.bf16.mxu0 %v7302_v34  ;;  %5772 = vmatprep.subr.mxu1 %v14777_v48  ;;  %v7306_v20 = vpack.c.bf16 %v14785_v21, %v14783_v62  ;;  %v14791_v34 = vld [vmem:[#allocation127_spill] sm:$0xff]  ;;  %v14796_v44 = vand.u32 4294901760, %v14795_v13  ;;  %v14797_v62 = vld [vmem:[#allocation129_spill] sm:$0xff]  ;;  %v14800_v21 = vand.u32 4294901760, %v14799_v58 }
 0x626   : > { %v7610_v4 = vpack.c.bf16 %v14789_v56, %v14787_v29  ;;  %v14792_v48 = vand.u32 4294901760, %v14791_v34  ;;  %v14798_v61 = vand.u32 4294901760, %v14797_v62  ;;  %v14802_v29 = vand.u32 4294901760, %v14801_v47  ;;  %v14805_v34 = vld [vmem:[#allocation95_spill] sm:$0xff] }
 0x627   : > { %7305 = vmatpush1.bf16.msra.mxu0 %v7304_v60 }
 0x628   : > { %5774 = vmatpush1.msra.mxu1 %v14790_v0  ;;  %7307 = vmatprep.subr.bf16.mxu0 %v7306_v20  ;;  %v7612_v10 = vpack.c.bf16 %v14794_v63, %v14792_v48  ;;  %v7614_v60 = vpack.c.bf16 %v14798_v61, %v14796_v44  ;;  %v7308_v11 = vpack.c.bf16 %v14802_v29, %v14800_v21  ;;  %v14803_v20 = vld [vmem:[#allocation65_spill] sm:$0xff]  ;;  %v14806_v0 = vand.u32 4294901760, %v14805_v34  ;;  %v14807_v63 = vld [vmem:[#allocation40_spill] sm:$0xff]  ;;  %v14811_v44 = vld [vmem:[#allocation39_spill] sm:$0xff] }
 0x629   : > { %7611 = vmatprep.subr.bf16.mxu1 %v7610_v4  ;;  %5792 = vmatmul.mubr.f32.vlgmr.msra.gmra.mrb[2].mxu1 %v14770_v30  ;;  %v14804_v56 = vand.u32 4294901760, %v14803_v20  ;;  %v14808_v4 = vand.u32 4294901760, %v14807_v63  ;;  %v14809_v30 = vld [vmem:[#allocation117_spill] sm:$0xff]  ;;  %v14812_v62 = vand.u32 4294901760, %v14811_v44  ;;  %v14815_v21 = vld [vmem:[#allocation130_spill] sm:$0xff]  ;;  %v14817_v29 = vld [vmem:[#allocation87_spill] sm:$0xff] }
 0x62a   : > { %7613 = vmatpush1.bf16.msra.mxu1 %v7612_v10  ;;  %6025 = vmatprep.mubr.f32.mxu1 %v14775_v15  ;;  %v14810_v48 = vand.u32 4294901760, %v14809_v30  ;;  %v14813_v61 = vld [vmem:[#allocation37_spill] sm:$0xff]  ;;  %v14816_v47 = vand.u32 4294901760, %v14815_v21  ;;  %v14818_v20 = vand.u32 4294901760, %v14817_v29  ;;  %v14825_v30 = vld [vmem:[#allocation38_spill] sm:$0xff] }
 0x62b   : > { %v7310_v52 = vpack.c.bf16 %v14806_v0, %v14804_v56  ;;  %7615 = vmatprep.subr.bf16.mxu1 %v7614_v60  ;;  %7309 = vmatpush1.bf16.msra.mxu0 %v7308_v11  ;;  %v14814_v58 = vand.u32 4294901760, %v14813_v61  ;;  %v14819_v56 = vld [vmem:[#allocation23_spill] sm:$0xff]  ;;  %v14821_v11 = vld [vmem:[#allocation24_spill] sm:$0xff]  ;;  %v14823_v63 = vld [vmem:[#allocation61_spill] sm:$0xff] }
 0x62c   : > { %v7616_v13 = vpack.c.bf16 %v14810_v48, %v14808_v4  ;;  %v7312_v0 = vpack.c.bf16 %v14818_v20, %v14816_v47  ;;  %v14820_v60 = vand.u32 4294901760, %v14819_v56  ;;  %v14822_v34 = vand.u32 4294901760, %v14821_v11  ;;  %v14831_v47 = vld [vmem:[#allocation29_spill] sm:$0xff]  ;;  %v14833_v20 = vld [vmem:[#allocation51_spill] sm:$0xff] }
 0x62d   : > { %7311 = vmatprep.subr.bf16.mxu0 %v7310_v52  ;;  %v7618_v10 = vpack.c.bf16 %v14814_v58, %v14812_v62  ;;  %v14824_v4 = vand.u32 4294901760, %v14823_v63  ;;  %v14826_v48 = vand.u32 4294901760, %v14825_v30  ;;  %v14827_v62 = vld [vmem:[#allocation138_spill] sm:$0xff]  ;;  %v14834_v56 = vand.u32 4294901760, %v14833_v20 }
 0x62e   : > { %7617 = vmatpush1.bf16.msra.mxu1 %v7616_v13  ;;  %v7314_v52 = vpack.c.bf16 %v14822_v34, %v14820_v60  ;;  %v14828_v61 = vand.u32 4294901760, %v14827_v62  ;;  %v14829_v58 = vld [vmem:[#allocation134_spill] sm:$0xff]  ;;  %v14832_v13 = vand.u32 4294901760, %v14831_v47  ;;  %v14837_v60 = vld [vmem:[#allocation133_spill] sm:$0xff]  ;;  %v14843_v62 = vand.u32 4294901760, %v14649_v18 }
 0x62f   : > { %7619 = vmatprep.subr.bf16.mxu1 %v7618_v10  ;;  %7313 = vmatpush1.bf16.msra.mxu0 %v7312_v0  ;;  %v7620_v44 = vpack.c.bf16 %v14826_v48, %v14824_v4  ;;  %v14830_v21 = vand.u32 4294901760, %v14829_v58  ;;  %v14835_v10 = vld [vmem:[#allocation136_spill] sm:$0xff]  ;;  %v14838_v11 = vand.u32 4294901760, %v14837_v60  ;;  %v14850_v18 = vand.u32 4294901760, %v14604_v31 }
 0x630   : > { %7315 = vmatprep.subr.bf16.mxu0 %v7314_v52  ;;  %v7316_v15 = vpack.c.bf16 %v14834_v56, %v14832_v13  ;;  %v14836_v0 = vand.u32 4294901760, %v14835_v10  ;;  %v14839_v52 = vld [vmem:[#allocation178_spill] sm:$0xff]  ;;  %v14841_v4 = vld [vmem:[#allocation172_spill] sm:$0xff]  ;;  %v14856_v31 = vand.u32 4294901760, %v14675_v25  ;;  %v14861_v56 = vand.u32 4294901760, %v14679_v1 }
 0x631   : > { %v7622_v29 = vpack.c.bf16 %v14830_v21, %v14828_v61  ;;  %v14840_v63 = vand.u32 4294901760, %v14839_v52  ;;  %v14842_v30 = vand.u32 4294901760, %v14841_v4  ;;  %v14844_v61 = vand.u32 4294901760, %v14650_v33 }
 0x632   : > { %7621 = vmatpush1.bf16.msra.mxu1 %v7620_v44  ;;  %v7624_v34 = vpack.c.bf16 %v14838_v11, %v14836_v0  ;;  %v14847_v21 = vand.u32 4294901760, %v14664_v41  ;;  %v14853_v41 = vand.u32 4294901760, %v14670_v27  ;;  %v14859_v27 = vld [vmem:[#allocation31_spill] sm:$0xff]  ;;  %v14864_v25 = vand.u32 4294901760, %v14608_v17  ;;  %v14872_v17 = vld [vmem:[#allocation32_spill] sm:$0xff] }
 0x633   : > { %7623 = vmatprep.subr.bf16.mxu1 %v7622_v29  ;;  %7317 = vmatpush1.bf16.msra.mxu0 %v7316_v15  ;;  %v7320_v48 = vpack.c.bf16 %v14842_v30, %v14840_v63  ;;  %v7322_v44 = vpack.c.bf16 %v14844_v61, %v14843_v62  ;;  %v14846_v15 = vand.u32 4294901760, %v14602_v54  ;;  %v14848_v29 = vand.u32 4294901760, %v14665_v55 }
 0x634   : > { %7319 = vmatprep.subr.bf16.mxu0 %v12258_v6  ;;  %v14845_v6 = vand.u32 4294901760, %v14601_v3  ;;  %v14851_v3 = vand.u32 4294901760, %v14528_v42  ;;  %v14852_v54 = vand.u32 4294901760, %v14605_v2  ;;  %v14854_v55 = vand.u32 4294901760, %v14671_v19  ;;  %v14860_v19 = vld [vmem:[#allocation160_spill] sm:$0xff] }
 0x635   : > { %v7324_v47 = vpack.c.bf16 %v14848_v29, %v14847_v21  ;;  %v14857_v42 = vand.u32 4294901760, %v14676_v24  ;;  %v14858_v2 = vand.u32 4294901760, %v14677_v57  ;;  %v14865_v24 = vld [vmem:[#allocation159_spill] sm:$0xff]  ;;  %v14866_v57 = vld [vmem:[#allocation105_spill] sm:$0xff]  ;;  %v14867_v60 = vand.u32 4294901760, %v14684_v8 }
 0x636   : > { %7625 = vmatpush1.bf16.msra.mxu1 %v7624_v34  ;;  %v7628_v58 = vpack.c.bf16 %v14846_v15, %v14845_v6  ;;  %v7634_v13 = vpack.c.bf16 %v14852_v54, %v14851_v3  ;;  %v7328_v20 = vpack.c.bf16 %v14854_v55, %v14853_v41  ;;  %v14868_v11 = vand.u32 4294901760, %v14685_v37  ;;  %v14890_v15 = vld [vmem:[#allocation4_spill] sm:$0xff]  ;;  %v14893_v29 = vld [vmem:[#allocation137_spill] sm:$0xff]  ;;  %v14902_v54 = vld [vmem:[#allocation167_spill] sm:$0xff] }
 0x637   : > { %7627 = vmatprep.subr.bf16.mxu1 %v12264_v16  ;;  %7321 = vmatpush1.bf16.msra.mxu0 %v7320_v48  ;;  %v14849_v16 = vand.u32 4294901760, %v14603_v53  ;;  %v14855_v53 = vand.u32 4294901760, %v14674_v51  ;;  %v14863_v51 = vand.u32 4294901760, %v14681_v36  ;;  %v14869_v1 = vand.u32 4294901760, %v14688_v35  ;;  %v14871_v36 = vld [vmem:[#allocation19_spill] sm:$0xff]  ;;  %v14901_v3 = vld [vmem:[#allocation100_spill] sm:$0xff] }
 0x638   : > { %7323 = vmatprep.subr.bf16.mxu0 %v7322_v44  ;;  %v7644_v34 = vpack.c.bf16 %v14868_v11, %v14867_v60  ;;  %v14873_v63 = vand.u32 4294901760, %v14692_v26  ;;  %v14874_v4 = vand.u32 4294901760, %v14691_v23  ;;  %v14875_v8 = vand.u32 4294901760, %v14613_v46  ;;  %v14881_v46 = vld [vmem:[#allocation66_spill] sm:$0xff]  ;;  %v14924_v11 = vld [vmem:[#allocation113_spill] sm:$0xff] }
 0x639   : > { %v7632_v33 = vpack.c.bf16 %v14850_v18, %v14849_v16  ;;  %v7336_v0 = vpack.c.bf16 %v14864_v25, %v14863_v51  ;;  %v14876_v37 = vand.u32 4294901760, %v14614_v12  ;;  %v14878_v35 = vand.u32 4294901760, %v14616_v7  ;;  %v14885_v7 = vld [vmem:[#allocation166_spill] sm:$0xff]  ;;  %v14898_v16 = vld [vmem:[#allocation175_spill] sm:$0xff]  ;;  %v14899_v18 = vld [vmem:[#allocation169_spill] sm:$0xff] }
 0x63a   : > { %7629 = vmatpush1.bf16.msra.mxu1 %v7628_v58  ;;  %v7648_v30 = vpack.c.bf16 %v14874_v4, %v14873_v63  ;;  %v14879_v26 = vand.u32 4294901760, %v14617_v50  ;;  %v14880_v23 = vand.u32 4294901760, %v14618_v49  ;;  %v14882_v12 = vand.u32 4294901760, %v14700_v32  ;;  %v14887_v49 = vld [vmem:[#allocation107_spill] sm:$0xff]  ;;  %v14888_v44 = vld [vmem:[#allocation154_spill] sm:$0xff]  ;;  %v14892_v32 = vld [vmem:[#allocation197_spill] sm:$0xff] }
 0x63b   : > { %7631 = vmatprep.subr.bf16.mxu1 %v12270_v5  ;;  %7325 = vmatpush1.bf16.msra.mxu0 %v7324_v47  ;;  %v7636_v5 = vpack.c.bf16 %v14856_v31, %v14855_v53  ;;  %v7344_v48 = vpack.c.bf16 %v14876_v37, %v14875_v8  ;;  %v14886_v50 = vand.u32 4294901760, %v14885_v7  ;;  %v14889_v6 = vand.u32 4294901760, %v14888_v44  ;;  %v14904_v41 = vld [vmem:[#allocation42_spill] sm:$0xff]  ;;  %v14907_v53 = vld [vmem:[#allocation16_spill] sm:$0xff]  ;;  %v14908_v31 = vld [vmem:[#allocation43_spill] sm:$0xff] }
 0x63c   : > { %7327 = vmatprep.subr.bf16.mxu0 %v12276_v14  ;;  %v7332_v14 = vpack.c.bf16 %v14858_v2, %v14857_v42  ;;  %v7348_v61 = vpack.c.bf16 %v14880_v23, %v14879_v26  ;;  %v14891_v58 = vand.u32 4294901760, %v14890_v15  ;;  %v14905_v55 = vld [vmem:[#allocation14_spill] sm:$0xff]  ;;  %v14910_v42 = vld [vmem:[#allocation47_spill] sm:$0xff]  ;;  %v14918_v51 = vld [vmem:[#allocation56_spill] sm:$0xff] }
 0x63d   : > { %v14911_v2 = vld [vmem:[#allocation62_spill] sm:$0xff]  ;;  %v14919_v25 = vld [vmem:[#allocation140_spill] sm:$0xff]  ;;  %v14931_v63 = vld [vmem:[#allocation181_spill] sm:$0xff] }
 0x63e   : > { %7633 = vmatpush1.bf16.msra.mxu1 %v7632_v33  ;;  %v7660_v21 = vpack.c.bf16 %v14891_v58, %v14889_v6  ;;  %v14900_v33 = vand.u32 4294901760, %v14899_v18  ;;  %v14923_v60 = vld [vmem:[#allocation26_spill] sm:$0xff]  ;;  %v14934_v8 = vld [vmem:[#allocation187_spill] sm:$0xff]  ;;  %v14941_v23 = vld [vmem:[#allocation88_spill] sm:$0xff] }
 0x63f   : > { %7635 = vmatprep.subr.bf16.mxu1 %v7634_v13  ;;  %7329 = vmatpush1.bf16.msra.mxu0 %v7328_v20  ;;  %v14903_v13 = vld [vmem:[#allocation106_spill] sm:$0xff]  ;;  %v14906_v20 = vld [vmem:[#allocation93_spill] sm:$0xff]  ;;  %v14935_v37 = vld [vmem:[#allocation203_spill] sm:$0xff] }
 0x640   : > { %7331 = vmatprep.subr.bf16.mxu0 %v12282_v45  ;;  %v14862_v45 = vand.u32 4294901760, %v14680_v22  ;;  %v14870_v22 = vand.u32 4294901760, %v14687_v39  ;;  %v14877_v39 = vand.u32 4294901760, %v14615_v28  ;;  %v14932_v4 = vld [vmem:[#allocation206_spill] sm:$0xff]  ;;  %v14948_v7 = vld [vmem:[#allocation193_spill] sm:$0xff] }
 0x641   : > { %v14940_v26 = vld [vmem:[#allocation190_spill] sm:$0xff]  ;;  %v14951_v44 = vld [vmem:[#allocation25_spill] sm:$0xff] }
 0x642   : > { %7637 = vmatpush1.bf16.msra.mxu1 %v7636_v5  ;;  %v7640_v10 = vpack.c.bf16 %v14862_v45, %v14861_v56  ;;  %v7340_v52 = vpack.c.bf16 %v14870_v22, %v14869_v1  ;;  %v7652_v62 = vpack.c.bf16 %v14878_v35, %v14877_v39  ;;  %v14909_v5 = vld [vmem:[#allocation124_spill] sm:$0xff]  ;;  %v14915_v56 = vld [vmem:[#allocation6_spill] sm:$0xff]  ;;  %v14926_v1 = vld [vmem:[#allocation195_spill] sm:$0xff] }
 0x643   : > { %7639 = vmatprep.subr.bf16.mxu1 %v14859_v27  ;;  %7333 = vmatpush1.bf16.msra.mxu0 %v7332_v14  ;;  %v14912_v14 = vld [vmem:[#allocation143_spill] sm:$0xff]  ;;  %v14913_v27 = vld [vmem:[#allocation28_spill] sm:$0xff]  ;;  %v14916_v45 = vld [vmem:[#allocation158_spill] sm:$0xff] }
 0x644   : > { %7335 = vmatprep.subr.bf16.mxu0 %v14860_v19  ;;  %v14914_v19 = vld [vmem:[#allocation22_spill] sm:$0xff]  ;;  %v14927_v22 = vld [vmem:[#allocation57_spill] sm:$0xff] }
 0x645   : > { %v14937_v39 = vld [vmem:[#allocation157_spill] sm:$0xff] }
 0x646   : > { %7641 = vmatpush1.bf16.msra.mxu1 %v7640_v10  ;;  %v14917_v10 = vld [vmem:[#allocation164_spill] sm:$0xff]  ;;  %v14938_v35 = vld [vmem:[#allocation189_spill] sm:$0xff] }
 0x647   : > { %7643 = vmatprep.subr.bf16.mxu1 %v14865_v24  ;;  %7337 = vmatpush1.bf16.msra.mxu0 %v7336_v0  ;;  %v14920_v0 = vld [vmem:[#allocation71_spill] sm:$0xff]  ;;  %v14921_v24 = vld [vmem:[#allocation81_spill] sm:$0xff] }
 0x648   : > { %7339 = vmatprep.subr.bf16.mxu0 %v14866_v57  ;;  %v14922_v57 = vld [vmem:[#allocation179_spill] sm:$0xff]  ;;  %v14952_v6 = vld [vmem:[#allocation121_spill] sm:$0xff] }
 0x64a   : > { %7645 = vmatpush1.bf16.msra.mxu1 %v7644_v34  ;;  %v14925_v34 = vld [vmem:[#allocation108_spill] sm:$0xff] }
 0x64b   : > { %7647 = vmatprep.subr.bf16.mxu1 %v14871_v36  ;;  %7341 = vmatpush1.bf16.msra.mxu0 %v7340_v52  ;;  %v14928_v52 = vld [vmem:[#allocation184_spill] sm:$0xff]  ;;  %v14929_v36 = vld [vmem:[#allocation199_spill] sm:$0xff] }
 0x64c   : > { %7343 = vmatprep.subr.bf16.mxu0 %v14872_v17  ;;  %v14930_v17 = vld [vmem:[#allocation186_spill] sm:$0xff] }
 0x64e   : > { %7649 = vmatpush1.bf16.msra.mxu1 %v7648_v30  ;;  %v14933_v30 = vld [vmem:[#allocation118_spill] sm:$0xff] }
 0x64f   : > { %7651 = vmatprep.subr.bf16.mxu1 %v12326_v43  ;;  %7345 = vmatpush1.bf16.msra.mxu0 %v7344_v48  ;;  %v14883_v43 = vand.u32 4294901760, %v14619_v9  ;;  %v14894_v9 = vld [vmem:[#allocation94_spill] sm:$0xff]  ;;  %v14936_v48 = vld [vmem:[#allocation188_spill] sm:$0xff] }
 0x650   : > { %7347 = vmatprep.subr.bf16.mxu0 %v12332_v59  ;;  %v14884_v59 = vand.u32 4294901760, %v14620_v40  ;;  %v14895_v40 = vld [vmem:[#allocation99_spill] sm:$0xff] }
 0x652   : > { %7653 = vmatpush1.bf16.msra.mxu1 %v7652_v62  ;;  %v7656_v28 = vpack.c.bf16 %v14884_v59, %v14883_v43  ;;  %v14939_v62 = vld [vmem:[#allocation147_spill] sm:$0xff]  ;;  %v14945_v43 = vld [vmem:[#allocation86_spill] sm:$0xff]  ;;  %v14946_v59 = vld [vmem:[#allocation145_spill] sm:$0xff] }
 0x653   : > { %7655 = vmatprep.subr.bf16.mxu1 %v14881_v46  ;;  %7349 = vmatpush1.bf16.msra.mxu0 %v7348_v61  ;;  %v14942_v61 = vld [vmem:[#allocation191_spill] sm:$0xff]  ;;  %v14943_v46 = vld [vmem:[#allocation60_spill] sm:$0xff] }
 0x654   : > { %4855 = vmatprep.subr.mxu0 %v14882_v12  ;;  %v14944_v12 = vld [vmem:[#allocation192_spill] sm:$0xff] }
 0x656   : > { %7657 = vmatpush1.bf16.msra.mxu1 %v7656_v28  ;;  %v14947_v28 = vld [vmem:[#allocation70_spill] sm:$0xff] }
 0x657   : > { %7659 = vmatprep.subr.bf16.mxu1 %v12346_v38  ;;  %4859 = vmatpush1.msra.mxu0 %v14886_v50  ;;  %v14896_v38 = vld [vmem:[#allocation135_spill] sm:$0xff]  ;;  %v14949_v50 = vld [vmem:[#allocation152_spill] sm:$0xff] }
 0x658   : > { %7351 = vmatprep.subr.bf16.mxu0 %v14887_v49  ;;  %4873 = vmatmul.mubr.f32.vlgmr.msra.gmra.mrb[2].mxu0 %v14892_v32  ;;  %v14897_v47 = vand.u32 4294901760, %v14896_v38  ;;  %v14950_v49 = vld [vmem:[#allocation153_spill] sm:$0xff] }
 0x659   : > { %7353 = vmatpush1.bf16.msra.mxu0 %v14893_v29  ;;  %4998 = vmatprep.mubr.f32.mxu0 %v14894_v9 }
 0x65a   : > { %7661 = vmatpush1.bf16.msra.mxu1 %v7660_v21  ;;  %7355 = vmatprep.subr.bf16.mxu0 %v14895_v40 }
 0x65b   : > { %6009 = vmatprep.subr.mxu1 %v14897_v47 }
 0x65d   : > { %7357 = vmatpush1.bf16.msra.mxu0 %v14898_v16 }
 0x65e   : > { %6013 = vmatpush1.msra.mxu1 %v14900_v33  ;;  %7359 = vmatprep.subr.bf16.mxu0 %v14901_v3 }
 0x65f   : > { %7663 = vmatprep.subr.bf16.mxu1 %v14902_v54  ;;  %6027 = vmatmul.mubr.f32.vlgmr.msra.gmra.mrb[2].mxu1 %v14892_v32 }
 0x660   : > { %7665 = vmatpush1.bf16.msra.mxu1 %v14903_v13  ;;  %6152 = vmatprep.mubr.f32.mxu1 %v14894_v9 }
 0x661   : > { %7667 = vmatprep.subr.bf16.mxu1 %v14904_v41  ;;  %7361 = vmatpush1.bf16.msra.mxu0 %v14905_v55 }
 0x662   : > { %7363 = vmatprep.subr.bf16.mxu0 %v14906_v20 }
 0x664   : > { %7669 = vmatpush1.bf16.msra.mxu1 %v14907_v53 }
 0x665   : > { %7671 = vmatprep.subr.bf16.mxu1 %v14908_v31  ;;  %7365 = vmatpush1.bf16.msra.mxu0 %v14909_v5 }
 0x666   : > { %7367 = vmatprep.subr.bf16.mxu0 %v14910_v42 }
 0x668   : > { %7673 = vmatpush1.bf16.msra.mxu1 %v14911_v2 }
 0x669   : > { %7675 = vmatprep.subr.bf16.mxu1 %v14912_v14  ;;  %7369 = vmatpush1.bf16.msra.mxu0 %v14913_v27 }
 0x66a   : > { %7371 = vmatprep.subr.bf16.mxu0 %v14914_v19 }
 0x66c   : > { %7677 = vmatpush1.bf16.msra.mxu1 %v14915_v56 }
 0x66d   : > { %7679 = vmatprep.subr.bf16.mxu1 %v14916_v45  ;;  %7373 = vmatpush1.bf16.msra.mxu0 %v14917_v10  ;;  %v7783_v10 = vld [vmem:[%s7853_s20] sm:$0xff] }
 0x66e   : > { %7375 = vmatprep.subr.bf16.mxu0 %v14918_v51 }
 0x670   : > { %7681 = vmatpush1.bf16.msra.mxu1 %v14919_v25  ;;  %v7784_v25 = vld [vmem:[%s7853_s20 + $0x8] sm:$0xff] }
 0x671   : > { %7683 = vmatprep.subr.bf16.mxu1 %v14920_v0  ;;  %7377 = vmatpush1.bf16.msra.mxu0 %v14921_v24  ;;  %v7785_v24 = vld [vmem:[%s7853_s20 + $0x10] sm:$0xff] }
 0x672   : > { %7379 = vmatprep.subr.bf16.mxu0 %v14922_v57 }
 0x674   : > { %7685 = vmatpush1.bf16.msra.mxu1 %v14923_v60  ;;  %v7786_v60 = vld [vmem:[%s7853_s20 + $0x18] sm:$0xff] }
 0x675   : > { %7687 = vmatprep.subr.bf16.mxu1 %v14924_v11  ;;  %7381 = vmatpush1.bf16.msra.mxu0 %v14925_v34 }
 0x676   : > { %7383 = vmatprep.subr.bf16.mxu0 %v14926_v1 }
 0x678   : > { %7689 = vmatpush1.bf16.msra.mxu1 %v14927_v22 }
 0x679   : > { %7691 = vmatprep.subr.bf16.mxu1 %v14928_v52  ;;  %7385 = vmatpush1.bf16.msra.mxu0 %v14929_v36 }
 0x67a   : > { %7387 = vmatprep.subr.bf16.mxu0 %v14930_v17 }
 0x67c   : > { %7693 = vmatpush1.bf16.msra.mxu1 %v14931_v63 }
 0x67d   : > { %7695 = vmatprep.subr.bf16.mxu1 %v14932_v4  ;;  %7389 = vmatpush1.bf16.msra.mxu0 %v14933_v30 }
 0x67e   : > { %7391 = vmatprep.subr.bf16.mxu0 %v14934_v8 }
 0x680   : > { %7697 = vmatpush1.bf16.msra.mxu1 %v14935_v37 }
 0x681   : > { %7699 = vmatprep.subr.bf16.mxu1 %v14936_v48  ;;  %7393 = vmatpush1.bf16.msra.mxu0 %v14937_v39 }
 0x682   : > { %7395 = vmatprep.subr.bf16.mxu0 %v14938_v35 }
 0x684   : > { %7701 = vmatpush1.bf16.msra.mxu1 %v14939_v62 }
 0x685   : > { %7703 = vmatprep.subr.bf16.mxu1 %v14940_v26  ;;  %7397 = vmatpush1.bf16.msra.mxu0 %v14941_v23 }
 0x686   : > { %7399 = vmatprep.subr.bf16.mxu0 %v14942_v61 }
 0x688   : > { %7705 = vmatpush1.bf16.msra.mxu1 %v14943_v46 }
 0x689   : > { %7707 = vmatprep.subr.bf16.mxu1 %v14944_v12  ;;  %7401 = vmatpush1.bf16.msra.mxu0 %v14945_v43 }
 0x68a   : > { %4984 = vmatprep.subr.mxu0 %v14946_v59 }
 0x68c   : > { %7709 = vmatpush1.bf16.msra.mxu1 %v14947_v28 }
 0x68d   : > { %7711 = vmatprep.subr.bf16.mxu1 %v14948_v7  ;;  %4986 = vmatpush1.msra.mxu0 %v14949_v50 }
 0x68e   : > { %5000 = vmatmul.mubr.f32.vlgmr.msra.gmra.mrb[2].mxu0 %v14892_v32 }
 0x690   : > { %7713 = vmatpush1.bf16.msra.mxu1 %v14950_v49 }
 0x691   : > { %6138 = vmatprep.subr.mxu1 %v14951_v44 }
 0x694   : > { %6140 = vmatpush1.msra.mxu1 %v14952_v6 }
 0x695   : > { %6154 = vmatmul.mubr.f32.vlgmr.msra.gmra.mrb[2].mxu1 %v14892_v32 }
 0x761   : > { %v5001_v15 = vpop.f32.mrb[2].mxu0 }
 0x762   : > { %v5003_v58 = vpop.f32.mrb[3].mxu0 }
 0x763   : > { %v6160_v21 = vadd.f32 %v5003_v58, %v5001_v15 }
 0x768   : > { %v6155_v29 = vpop.f32.mrb[2].mxu1 }
 0x769   : > { %v6161_v9 = vadd.f32 %v6160_v21, %v6155_v29  ;;  %v6157_v40 = vpop.f32.mrb[3].mxu1 }
 0x76b   : > { %v6162_v38 = vadd.f32 %v6161_v9, %v6157_v40 }
 0x76d   : > { %6163 = vadd.xlane.f32.xlu0 %v6162_v38 }
 0x7fa   : > { %v6164_v47 = vpop.xlane.xlu0 %6163 }
 0x7fb   : > { %v6165_v16 = vmul.f32 0.001953125, %v6164_v47 }
 0x7fd   : > { %v6166_v18 = vsub.f32 %v5001_v15, %v6165_v16  ;;  %v6167_v33 = vsub.f32 %v5003_v58, %v6165_v16  ;;  %v6168_v3 = vsub.f32 %v6155_v29, %v6165_v16  ;;  %v6169_v54 = vsub.f32 %v6157_v40, %v6165_v16 }
 0x7ff   : > { %v6170_v13 = vmul.f32 %v6166_v18, %v6166_v18  ;;  %v6171_v41 = vmul.f32 %v6167_v33, %v6167_v33  ;;  %v6172_v55 = vmul.f32 %v6168_v3, %v6168_v3  ;;  %v6173_v32 = vmul.f32 %v6169_v54, %v6169_v54 }
 0x801   : > { %v6174_v20 = vadd.f32 %v6171_v41, %v6170_v13 }
 0x803   : > { %v6175_v53 = vadd.f32 %v6174_v20, %v6172_v55 }
 0x805   : > { %v6176_v31 = vadd.f32 %v6175_v53, %v6173_v32 }
 0x807   : > { %6177 = vadd.xlane.f32.xlu1 %v6176_v31 }
 0x894   : > { %v6178_v5 = vpop.xlane.xlu1 %6177 }
 0x895   : > { %v6179_v42 = vmul.f32 0.001953125, %v6178_v5 }
 0x897   : > { %v6180_v2 = vadd.f32 1e-05, %v6179_v42 }
 0x899   : > { %7781 = vrsqrt.f32 %v6180_v2 }
 0x8a3   : > { %v7782_v14 = vpop.eup %7781 }
 0x8a4   : > { %v6182_v27 = vmul.f32 %v7782_v14, %v6166_v18  ;;  %v6183_v19 = vmul.f32 %v7782_v14, %v6167_v33  ;;  %v6184_v56 = vmul.f32 %v7782_v14, %v6168_v3  ;;  %v6185_v45 = vmul.f32 %v7782_v14, %v6169_v54 }
 0x8a6   : > { %v6186_v51 = vadd.f32 %v7783_v10, %v6182_v27  ;;  %v6187_v0 = vadd.f32 %v7784_v25, %v6183_v19  ;;  %v6188_v57 = vadd.f32 %v7785_v24, %v6184_v56  ;;  %v6189_v11 = vadd.f32 %v7786_v60, %v6185_v45 }
 0x8a8   : > { %v6190_v34 = vmax.f32 %v6186_v51, 0.0  ;;  %v6191_v1 = vmax.f32 %v6187_v0, 0.0  ;;  %v6192_v22 = vmax.f32 %v6188_v57, 0.0  ;;  %v6193_v52 = vmax.f32 %v6189_v11, 0.0 }
 0x8aa   : > { %6194 = vst [vmem:[%s197_s6] sm:$0xff] %v6190_v34  ;;  %6195 = vst [vmem:[%s197_s6 + $0x8] sm:$0xff] %v6191_v1 }
 0x8ab   : > { %6196 = vst [vmem:[%s197_s6 + $0x10] sm:$0xff] %v6192_v22  ;;  %6197 = vst [vmem:[%s197_s6 + $0x18] sm:$0xff] %v6193_v52 }
 0x8ac PF: > { %s14_s15 = sadd.s32 1, %s7793_s15  }
 0x8ad   : > { %p11_p4 = scmp.ge.s32.totalorder %s14_s15, 4  }
 0x8af   :  { %13 = sbr.rel (!%p11_p4) target bundleno = 1 (0x1), region = 91 }

</bundles_post_ra>
